<compile_context>
chip_gen: v5e
topology: v5e:2x2
jax: 0.10.0
libtpu: 0.0.40
codegen_flags: <defaults>
</compile_context>

<pallas_src>
import jax
import jax.numpy as jnp
from jax.experimental import pallas as pl
from jax.experimental.pallas import tpu as pltpu

C_OUT = 32
H_IN = W_IN = 60
H_POOL = W_POOL = 29
SPAT = H_POOL * W_POOL          # 841 valid spatial positions per channel
LANE = 896                      # 841 rounded up to a multiple of 128 (lane-dense)
FEAT = C_OUT * SPAT             # 26912 (PyTorch flatten size)
K_PAD = C_OUT * LANE            # 28672 = 4 * 7168 (padded K for the big Linear)
HID = 256
NC_TILE = 8                     # conv output channels per grid step
TK = 7168                       # K-tile for the big Linear (K_PAD // TK = 4)
HEAD_LANE = 128                 # lane-dense width of the fused-head partial output


# ----------------------------------------------------------------------------
# One-time parameter repack (hoisted out of the per-call forward).
# W1 rows c*841+s (PyTorch NCHW flatten) -> c*896+s, padded rows zeroed so the
# padded conv lanes contribute 0; stored bf16 to halve the dominant HBM stream.
# ----------------------------------------------------------------------------
def prepare_params(conv_w, conv_b, w1):
    conv_w9 = conv_w.reshape(C_OUT, 9)            # (32, 9)  taps t = 3*dy + dx
    conv_b2 = conv_b.reshape(C_OUT, 1)            # (32, 1)
    w1_re = jnp.pad(w1.reshape(C_OUT, SPAT, HID),
                    ((0, 0), (0, LANE - SPAT), (0, 0))).reshape(K_PAD, HID)
    return conv_w9, conv_b2, w1_re.astype(jnp.bfloat16)


# ----------------------------------------------------------------------------
# Per-call layout glue: im2col at the pooled 29x29 resolution.
# patches[b, 2*a+bb, 3*dy+dx, 29*i+j] = x[b, 2*i+a+dy, 2*j+bb+dx]
# 9 sliced windows + reshape/transpose (fewer XLA ops than 36 strided slices).
# ----------------------------------------------------------------------------
def build_patches(xs):
    B = xs.shape[0]
    taps = []
    for dy in range(3):
        for dx in range(3):
            win = xs[:, dy:dy + 58, dx:dx + 58]          # (B, 58, 58)
            win = win.reshape(B, 29, 2, 29, 2)           # [b, i, a, j, bb]
            win = win.transpose(0, 2, 4, 1, 3)           # [b, a, bb, i, j]
            taps.append(win.reshape(B, 4, SPAT))         # pool offset = 2a+bb
    pats = jnp.stack(taps, axis=2)                       # (B, 4, 9, 841)
    return jnp.pad(pats, ((0, 0), (0, 0), (0, 0), (0, LANE - SPAT)))


# ----------------------------------------------------------------------------
# Kernel 1: fused Conv2d(1->32, 3x3) + ReLU + MaxPool2d(2,2).
# Grid (B, 32 // NC_TILE); lane-dense (NC_TILE, 896) f32 output per step.
# ----------------------------------------------------------------------------
def conv_relu_pool_kernel(p_ref, w_ref, b_ref, o_ref):
    # p_ref: (4, 9, LANE)  w_ref: (NC_TILE, 9)  b_ref: (NC_TILE, 1)
    w = w_ref[...]
    pooled = None
    for ab in range(4):                     # pool offsets (a, bb)
        z = w[:, 0:1] * p_ref[ab, 0:1, :]
        for t in range(1, 9):               # conv taps (dy, dx)
            z = z + w[:, t:t + 1] * p_ref[ab, t:t + 1, :]
        pooled = z if pooled is None else jnp.maximum(pooled, z)
    # relu(maxpool(conv + b)) == relu(max_ab(z_ab) + b)
    o_ref[...] = jnp.maximum(pooled + b_ref[...], 0.0)


def conv_relu_pool(patches, conv_w9, conv_b2):
    B = patches.shape[0]
    return pl.pallas_call(
        conv_relu_pool_kernel,
        out_shape=jax.ShapeDtypeStruct((B, C_OUT, LANE), jnp.float32),
        grid=(B, C_OUT // NC_TILE),
        in_specs=[
            pl.BlockSpec((None, 4, 9, LANE), lambda b, g: (b, 0, 0, 0)),
            pl.BlockSpec((NC_TILE, 9), lambda b, g: (g, 0)),
            pl.BlockSpec((NC_TILE, 1), lambda b, g: (g, 0)),
        ],
        out_specs=pl.BlockSpec((None, NC_TILE, LANE), lambda b, g: (b, g, 0)),
        compiler_params=pltpu.CompilerParams(
            dimension_semantics=("parallel", "parallel")),
    )(patches, conv_w9, conv_b2)


# ----------------------------------------------------------------------------
# Kernel 2: Linear(28672 -> 256) + ReLU + fused Linear(256 -> 1) partial.
# Grid (nsplit hidden splits [parallel], 4 K-steps [arbitrary]).
#   nsplit = 2 only on 2-TensorCore chips (v4 / v7x): each core streams half
#   of W1.  On single-TC v5e / v6e: nsplit = 1, grid (1, 4).
# bf16 x bf16 MXU dot, f32 accumulator; bias/ReLU/head math in f32.
# The (B, 1) head partial is stored broadcast across a lane-dense 128 block.
# ----------------------------------------------------------------------------
def mlp_head_kernel(f_ref, w1_ref, b1_ref, w2_ref, part_ref, acc_ref):
    k = pl.program_id(1)

    @pl.when(k == 0)
    def _():
        acc_ref[...] = jnp.zeros_like(acc_ref)

    acc_ref[...] += jnp.dot(f_ref[...].astype(jnp.bfloat16), w1_ref[...],
                            preferred_element_type=jnp.float32)

    @pl.when(k == pl.num_programs(1) - 1)
    def _():
        h = jnp.maximum(acc_ref[...] + b1_ref[...], 0.0)          # (B, n_tile) f32
        z = jnp.sum(h * w2_ref[...], axis=1, keepdims=True)       # (B, 1) head partial
        part_ref[...] = jnp.broadcast_to(z, part_ref.shape)


def mlp_hidden_head(feats, w1_re, b1, w2, nsplit):
    B = feats.shape[0]
    n_tile = HID // nsplit
    return pl.pallas_call(
        mlp_head_kernel,
        out_shape=jax.ShapeDtypeStruct((B, nsplit * HEAD_LANE), jnp.float32),
        grid=(nsplit, K_PAD // TK),
        in_specs=[
            pl.BlockSpec((B, TK), lambda j, k: (0, k)),
            pl.BlockSpec((TK, n_tile), lambda j, k: (k, j)),
            pl.BlockSpec((1, n_tile), lambda j, k: (0, j)),
            pl.BlockSpec((1, n_tile), lambda j, k: (0, j)),
        ],
        out_specs=pl.BlockSpec((B, HEAD_LANE), lambda j, k: (0, j)),
        scratch_shapes=[pltpu.VMEM((B, n_tile), jnp.float32)],
        compiler_params=pltpu.CompilerParams(
            dimension_semantics=("parallel", "arbitrary"),
            vmem_limit_bytes=32 * 1024 * 1024),
    )(feats, w1_re, b1, w2)


def default_hidden_split():
    """Use the 2-way hidden split only on chips with 2 TensorCores per device."""
    try:
        kind = jax.devices()[0].device_kind.lower()
    except Exception:
        return 1
    return 2 if any(tag in kind for tag in ("v4", "v7", "7x")) else 1


# ----------------------------------------------------------------------------
# Full forward: im2col layout glue + 2 Pallas kernels + trivial head combine.
# NOTE: if batch ever grows past a few hundred, add a B grid axis to kernel 2
# (full-extent B blocks grow VMEM linearly with batch).
# ----------------------------------------------------------------------------
def propositional_primitive_forward(x, conv_w9, conv_b2, w1_re, b1, w2, b2,
                                    *, nsplit=1):
    B = x.shape[0]
    patches = build_patches(x[:, 0])                        # (B, 4, 9, 896)
    conv_out = conv_relu_pool(patches, conv_w9, conv_b2)    # (B, 32, 896) f32
    feats = conv_out.reshape(B, K_PAD)                      # free reshape
    parts = mlp_hidden_head(feats, w1_re, b1, w2, nsplit)   # (B, nsplit*128)
    z = parts.reshape(B, nsplit, HEAD_LANE)[:, :, 0].sum(axis=1, keepdims=True) + b2
    return jax.nn.sigmoid(z)                                # (B, 1)


# ----------------------------------------------------------------------------
# Pure-JAX reference (verification only).
# ----------------------------------------------------------------------------
def reference_forward(x, conv_w, conv_b, w1, b1, w2, b2):
    B = x.shape[0]
    xs = x[:, 0]
    conv = jnp.zeros((B, C_OUT, 58, 58), jnp.float32)
    for dy in range(3):
        for dx in range(3):
            conv = conv + (xs[:, None, dy:dy + 58, dx:dx + 58]
                           * conv_w[None, :, dy:dy + 1, dx:dx + 1])
    conv = jnp.maximum(conv + conv_b[None], 0.0)
    pooled = conv.reshape(B, C_OUT, 29, 2, 29, 2).max(axis=(3, 5))
    feats = pooled.reshape(B, FEAT)
    h = jnp.maximum(
        jnp.dot(feats, w1, precision=jax.lax.Precision.HIGHEST) + b1, 0.0)
    z = jnp.sum(h * w2, axis=1, keepdims=True) + b2
    return 1.0 / (1.0 + jnp.exp(-z)), pooled


if __name__ == "__main__":
    key = jax.random.PRNGKey(0)
    kx, k1, k2, k3, k4, k5, k6 = jax.random.split(key, 7)

    # deterministic synthetic parameters (shapes from the module's __init__)
    conv_w = jax.random.normal(k1, (C_OUT, 3, 3), jnp.float32) * 0.2
    conv_b = jax.random.normal(k2, (C_OUT, 1, 1), jnp.float32) * 0.05
    w1 = jax.random.normal(k3, (FEAT, HID), jnp.float32) / jnp.sqrt(FEAT)
    b1 = jax.random.normal(k4, (1, HID), jnp.float32) * 0.05
    w2 = jax.random.normal(k5, (1, HID), jnp.float32) / jnp.sqrt(HID)
    b2 = jax.random.normal(k6, (1, 1), jnp.float32) * 0.05

    # 60x60 grayscale images, NCHW, batch=2
    x = jax.random.uniform(kx, (2, 1, H_IN, W_IN), jnp.float32)

    # one-time parameter repack (kept out of the per-call forward)
    conv_w9, conv_b2, w1_re = jax.block_until_ready(
        prepare_params(conv_w, conv_b, w1))

    nsplit = default_hidden_split()
    fwd = jax.jit(propositional_primitive_forward, static_argnames=("nsplit",))
    out = jax.block_until_ready(
        fwd(x, conv_w9, conv_b2, w1_re, b1, w2, b2, nsplit=nsplit))
    assert out.shape == (2, 1) and out.dtype == jnp.float32

    # verification against a pure-JAX f32 reference
    ref_out, ref_pooled = reference_forward(x, conv_w, conv_b, w1, b1, w2, b2)
    patches = build_patches(x[:, 0])
    conv_out = jax.block_until_ready(conv_relu_pool(patches, conv_w9, conv_b2))
    pooled = conv_out[:, :, :SPAT].reshape(2, C_OUT, H_POOL, W_POOL)
    assert jnp.allclose(pooled, ref_pooled, atol=1e-5), "conv/pool mismatch"
    # bf16 W1 / feats with f32 accumulation: allow a slightly looser tolerance
    assert jnp.allclose(out, ref_out, atol=5e-3), "forward mismatch"

    print("KERNEL_OK")
</pallas_src>

<mosaic_0001>
module attributes {stable_mosaic.version = 11 : i64} {
  func.func @conv_relu_pool_kernel(%arg0: i32, %arg1: i32, %arg2: memref<1x4x9x896xf32, #tpu.memory_space<vmem>>, %arg3: memref<8x9xf32, #tpu.memory_space<vmem>>, %arg4: memref<8x1xf32, #tpu.memory_space<vmem>>, %arg5: memref<1x8x896xf32, #tpu.memory_space<vmem>>) attributes {dimension_semantics = [#tpu.dimension_semantics<parallel>, #tpu.dimension_semantics<parallel>], iteration_bounds = array<i64: 2, 4>, scalar_prefetch = 0 : i64, scratch_operands = 0 : i64, tpu.core_type = #tpu.core_type<tc>, window_params = [{transform_indices = @transform_0, window_bounds = array<i64: 1, 4, 9, 896>}, {transform_indices = @transform_1, window_bounds = array<i64: 8, 9>}, {transform_indices = @transform_2, window_bounds = array<i64: 8, 1>}, {transform_indices = @transform_3, window_bounds = array<i64: 1, 8, 896>}]} {
    %c0 = arith.constant 0 : index
    %c0_0 = arith.constant 0 : index
    %0 = vector.load %arg3[%c0, %c0_0] : memref<8x9xf32, #tpu.memory_space<vmem>>, vector<8x9xf32>
    %1 = vector.extract_strided_slice %0 {offsets = [0, 0], sizes = [8, 1], strides = [1, 1]} : vector<8x9xf32> to vector<8x1xf32>
    %c0_1 = arith.constant 0 : index
    %c0_2 = arith.constant 0 : index
    %c0_3 = arith.constant 0 : index
    %c0_4 = arith.constant 0 : index
    %2 = vector.load %arg2[%c0_1, %c0_2, %c0_3, %c0_4] : memref<1x4x9x896xf32, #tpu.memory_space<vmem>>, vector<1x1x1x896xf32>
    %3 = vector.shape_cast %2 : vector<1x1x1x896xf32> to vector<1x896xf32>
    %4 = vector.broadcast %1 : vector<8x1xf32> to vector<8x896xf32>
    %5 = vector.broadcast %3 : vector<1x896xf32> to vector<8x896xf32>
    %6 = arith.mulf %4, %5 : vector<8x896xf32>
    %7 = vector.extract_strided_slice %0 {offsets = [0, 1], sizes = [8, 1], strides = [1, 1]} : vector<8x9xf32> to vector<8x1xf32>
    %c0_5 = arith.constant 0 : index
    %c0_6 = arith.constant 0 : index
    %c1 = arith.constant 1 : index
    %c0_7 = arith.constant 0 : index
    %8 = vector.load %arg2[%c0_5, %c0_6, %c1, %c0_7] : memref<1x4x9x896xf32, #tpu.memory_space<vmem>>, vector<1x1x1x896xf32>
    %9 = vector.shape_cast %8 : vector<1x1x1x896xf32> to vector<1x896xf32>
    %10 = vector.broadcast %7 : vector<8x1xf32> to vector<8x896xf32>
    %11 = vector.broadcast %9 : vector<1x896xf32> to vector<8x896xf32>
    %12 = arith.mulf %10, %11 : vector<8x896xf32>
    %13 = arith.addf %6, %12 : vector<8x896xf32>
    %14 = vector.extract_strided_slice %0 {offsets = [0, 2], sizes = [8, 1], strides = [1, 1]} : vector<8x9xf32> to vector<8x1xf32>
    %c0_8 = arith.constant 0 : index
    %c0_9 = arith.constant 0 : index
    %c2 = arith.constant 2 : index
    %c0_10 = arith.constant 0 : index
    %15 = vector.load %arg2[%c0_8, %c0_9, %c2, %c0_10] : memref<1x4x9x896xf32, #tpu.memory_space<vmem>>, vector<1x1x1x896xf32>
    %16 = vector.shape_cast %15 : vector<1x1x1x896xf32> to vector<1x896xf32>
    %17 = vector.broadcast %14 : vector<8x1xf32> to vector<8x896xf32>
    %18 = vector.broadcast %16 : vector<1x896xf32> to vector<8x896xf32>
    %19 = arith.mulf %17, %18 : vector<8x896xf32>
    %20 = arith.addf %13, %19 : vector<8x896xf32>
    %21 = vector.extract_strided_slice %0 {offsets = [0, 3], sizes = [8, 1], strides = [1, 1]} : vector<8x9xf32> to vector<8x1xf32>
    %c0_11 = arith.constant 0 : index
    %c0_12 = arith.constant 0 : index
    %c3 = arith.constant 3 : index
    %c0_13 = arith.constant 0 : index
    %22 = vector.load %arg2[%c0_11, %c0_12, %c3, %c0_13] : memref<1x4x9x896xf32, #tpu.memory_space<vmem>>, vector<1x1x1x896xf32>
    %23 = vector.shape_cast %22 : vector<1x1x1x896xf32> to vector<1x896xf32>
    %24 = vector.broadcast %21 : vector<8x1xf32> to vector<8x896xf32>
    %25 = vector.broadcast %23 : vector<1x896xf32> to vector<8x896xf32>
    %26 = arith.mulf %24, %25 : vector<8x896xf32>
    %27 = arith.addf %20, %26 : vector<8x896xf32>
    %28 = vector.extract_strided_slice %0 {offsets = [0, 4], sizes = [8, 1], strides = [1, 1]} : vector<8x9xf32> to vector<8x1xf32>
    %c0_14 = arith.constant 0 : index
    %c0_15 = arith.constant 0 : index
    %c4 = arith.constant 4 : index
    %c0_16 = arith.constant 0 : index
    %29 = vector.load %arg2[%c0_14, %c0_15, %c4, %c0_16] : memref<1x4x9x896xf32, #tpu.memory_space<vmem>>, vector<1x1x1x896xf32>
    %30 = vector.shape_cast %29 : vector<1x1x1x896xf32> to vector<1x896xf32>
    %31 = vector.broadcast %28 : vector<8x1xf32> to vector<8x896xf32>
    %32 = vector.broadcast %30 : vector<1x896xf32> to vector<8x896xf32>
    %33 = arith.mulf %31, %32 : vector<8x896xf32>
    %34 = arith.addf %27, %33 : vector<8x896xf32>
    %35 = vector.extract_strided_slice %0 {offsets = [0, 5], sizes = [8, 1], strides = [1, 1]} : vector<8x9xf32> to vector<8x1xf32>
    %c0_17 = arith.constant 0 : index
    %c0_18 = arith.constant 0 : index
    %c5 = arith.constant 5 : index
    %c0_19 = arith.constant 0 : index
    %36 = vector.load %arg2[%c0_17, %c0_18, %c5, %c0_19] : memref<1x4x9x896xf32, #tpu.memory_space<vmem>>, vector<1x1x1x896xf32>
    %37 = vector.shape_cast %36 : vector<1x1x1x896xf32> to vector<1x896xf32>
    %38 = vector.broadcast %35 : vector<8x1xf32> to vector<8x896xf32>
    %39 = vector.broadcast %37 : vector<1x896xf32> to vector<8x896xf32>
    %40 = arith.mulf %38, %39 : vector<8x896xf32>
    %41 = arith.addf %34, %40 : vector<8x896xf32>
    %42 = vector.extract_strided_slice %0 {offsets = [0, 6], sizes = [8, 1], strides = [1, 1]} : vector<8x9xf32> to vector<8x1xf32>
    %c0_20 = arith.constant 0 : index
    %c0_21 = arith.constant 0 : index
    %c6 = arith.constant 6 : index
    %c0_22 = arith.constant 0 : index
    %43 = vector.load %arg2[%c0_20, %c0_21, %c6, %c0_22] : memref<1x4x9x896xf32, #tpu.memory_space<vmem>>, vector<1x1x1x896xf32>
    %44 = vector.shape_cast %43 : vector<1x1x1x896xf32> to vector<1x896xf32>
    %45 = vector.broadcast %42 : vector<8x1xf32> to vector<8x896xf32>
    %46 = vector.broadcast %44 : vector<1x896xf32> to vector<8x896xf32>
    %47 = arith.mulf %45, %46 : vector<8x896xf32>
    %48 = arith.addf %41, %47 : vector<8x896xf32>
    %49 = vector.extract_strided_slice %0 {offsets = [0, 7], sizes = [8, 1], strides = [1, 1]} : vector<8x9xf32> to vector<8x1xf32>
    %c0_23 = arith.constant 0 : index
    %c0_24 = arith.constant 0 : index
    %c7 = arith.constant 7 : index
    %c0_25 = arith.constant 0 : index
    %50 = vector.load %arg2[%c0_23, %c0_24, %c7, %c0_25] : memref<1x4x9x896xf32, #tpu.memory_space<vmem>>, vector<1x1x1x896xf32>
    %51 = vector.shape_cast %50 : vector<1x1x1x896xf32> to vector<1x896xf32>
    %52 = vector.broadcast %49 : vector<8x1xf32> to vector<8x896xf32>
    %53 = vector.broadcast %51 : vector<1x896xf32> to vector<8x896xf32>
    %54 = arith.mulf %52, %53 : vector<8x896xf32>
    %55 = arith.addf %48, %54 : vector<8x896xf32>
    %56 = vector.extract_strided_slice %0 {offsets = [0, 8], sizes = [8, 1], strides = [1, 1]} : vector<8x9xf32> to vector<8x1xf32>
    %c0_26 = arith.constant 0 : index
    %c0_27 = arith.constant 0 : index
    %c8 = arith.constant 8 : index
    %c0_28 = arith.constant 0 : index
    %57 = vector.load %arg2[%c0_26, %c0_27, %c8, %c0_28] : memref<1x4x9x896xf32, #tpu.memory_space<vmem>>, vector<1x1x1x896xf32>
    %58 = vector.shape_cast %57 : vector<1x1x1x896xf32> to vector<1x896xf32>
    %59 = vector.broadcast %56 : vector<8x1xf32> to vector<8x896xf32>
    %60 = vector.broadcast %58 : vector<1x896xf32> to vector<8x896xf32>
    %61 = arith.mulf %59, %60 : vector<8x896xf32>
    %62 = arith.addf %55, %61 : vector<8x896xf32>
    %63 = vector.extract_strided_slice %0 {offsets = [0, 0], sizes = [8, 1], strides = [1, 1]} : vector<8x9xf32> to vector<8x1xf32>
    %c0_29 = arith.constant 0 : index
    %c1_30 = arith.constant 1 : index
    %c0_31 = arith.constant 0 : index
    %c0_32 = arith.constant 0 : index
    %64 = vector.load %arg2[%c0_29, %c1_30, %c0_31, %c0_32] : memref<1x4x9x896xf32, #tpu.memory_space<vmem>>, vector<1x1x1x896xf32>
    %65 = vector.shape_cast %64 : vector<1x1x1x896xf32> to vector<1x896xf32>
    %66 = vector.broadcast %63 : vector<8x1xf32> to vector<8x896xf32>
    %67 = vector.broadcast %65 : vector<1x896xf32> to vector<8x896xf32>
    %68 = arith.mulf %66, %67 : vector<8x896xf32>
    %69 = vector.extract_strided_slice %0 {offsets = [0, 1], sizes = [8, 1], strides = [1, 1]} : vector<8x9xf32> to vector<8x1xf32>
    %c0_33 = arith.constant 0 : index
    %c1_34 = arith.constant 1 : index
    %c1_35 = arith.constant 1 : index
    %c0_36 = arith.constant 0 : index
    %70 = vector.load %arg2[%c0_33, %c1_34, %c1_35, %c0_36] : memref<1x4x9x896xf32, #tpu.memory_space<vmem>>, vector<1x1x1x896xf32>
    %71 = vector.shape_cast %70 : vector<1x1x1x896xf32> to vector<1x896xf32>
    %72 = vector.broadcast %69 : vector<8x1xf32> to vector<8x896xf32>
    %73 = vector.broadcast %71 : vector<1x896xf32> to vector<8x896xf32>
    %74 = arith.mulf %72, %73 : vector<8x896xf32>
    %75 = arith.addf %68, %74 : vector<8x896xf32>
    %76 = vector.extract_strided_slice %0 {offsets = [0, 2], sizes = [8, 1], strides = [1, 1]} : vector<8x9xf32> to vector<8x1xf32>
    %c0_37 = arith.constant 0 : index
    %c1_38 = arith.constant 1 : index
    %c2_39 = arith.constant 2 : index
    %c0_40 = arith.constant 0 : index
    %77 = vector.load %arg2[%c0_37, %c1_38, %c2_39, %c0_40] : memref<1x4x9x896xf32, #tpu.memory_space<vmem>>, vector<1x1x1x896xf32>
    %78 = vector.shape_cast %77 : vector<1x1x1x896xf32> to vector<1x896xf32>
    %79 = vector.broadcast %76 : vector<8x1xf32> to vector<8x896xf32>
    %80 = vector.broadcast %78 : vector<1x896xf32> to vector<8x896xf32>
    %81 = arith.mulf %79, %80 : vector<8x896xf32>
    %82 = arith.addf %75, %81 : vector<8x896xf32>
    %83 = vector.extract_strided_slice %0 {offsets = [0, 3], sizes = [8, 1], strides = [1, 1]} : vector<8x9xf32> to vector<8x1xf32>
    %c0_41 = arith.constant 0 : index
    %c1_42 = arith.constant 1 : index
    %c3_43 = arith.constant 3 : index
    %c0_44 = arith.constant 0 : index
    %84 = vector.load %arg2[%c0_41, %c1_42, %c3_43, %c0_44] : memref<1x4x9x896xf32, #tpu.memory_space<vmem>>, vector<1x1x1x896xf32>
    %85 = vector.shape_cast %84 : vector<1x1x1x896xf32> to vector<1x896xf32>
    %86 = vector.broadcast %83 : vector<8x1xf32> to vector<8x896xf32>
    %87 = vector.broadcast %85 : vector<1x896xf32> to vector<8x896xf32>
    %88 = arith.mulf %86, %87 : vector<8x896xf32>
    %89 = arith.addf %82, %88 : vector<8x896xf32>
    %90 = vector.extract_strided_slice %0 {offsets = [0, 4], sizes = [8, 1], strides = [1, 1]} : vector<8x9xf32> to vector<8x1xf32>
    %c0_45 = arith.constant 0 : index
    %c1_46 = arith.constant 1 : index
    %c4_47 = arith.constant 4 : index
    %c0_48 = arith.constant 0 : index
    %91 = vector.load %arg2[%c0_45, %c1_46, %c4_47, %c0_48] : memref<1x4x9x896xf32, #tpu.memory_space<vmem>>, vector<1x1x1x896xf32>
    %92 = vector.shape_cast %91 : vector<1x1x1x896xf32> to vector<1x896xf32>
    %93 = vector.broadcast %90 : vector<8x1xf32> to vector<8x896xf32>
    %94 = vector.broadcast %92 : vector<1x896xf32> to vector<8x896xf32>
    %95 = arith.mulf %93, %94 : vector<8x896xf32>
    %96 = arith.addf %89, %95 : vector<8x896xf32>
    %97 = vector.extract_strided_slice %0 {offsets = [0, 5], sizes = [8, 1], strides = [1, 1]} : vector<8x9xf32> to vector<8x1xf32>
    %c0_49 = arith.constant 0 : index
    %c1_50 = arith.constant 1 : index
    %c5_51 = arith.constant 5 : index
    %c0_52 = arith.constant 0 : index
    %98 = vector.load %arg2[%c0_49, %c1_50, %c5_51, %c0_52] : memref<1x4x9x896xf32, #tpu.memory_space<vmem>>, vector<1x1x1x896xf32>
    %99 = vector.shape_cast %98 : vector<1x1x1x896xf32> to vector<1x896xf32>
    %100 = vector.broadcast %97 : vector<8x1xf32> to vector<8x896xf32>
    %101 = vector.broadcast %99 : vector<1x896xf32> to vector<8x896xf32>
    %102 = arith.mulf %100, %101 : vector<8x896xf32>
    %103 = arith.addf %96, %102 : vector<8x896xf32>
    %104 = vector.extract_strided_slice %0 {offsets = [0, 6], sizes = [8, 1], strides = [1, 1]} : vector<8x9xf32> to vector<8x1xf32>
    %c0_53 = arith.constant 0 : index
    %c1_54 = arith.constant 1 : index
    %c6_55 = arith.constant 6 : index
    %c0_56 = arith.constant 0 : index
    %105 = vector.load %arg2[%c0_53, %c1_54, %c6_55, %c0_56] : memref<1x4x9x896xf32, #tpu.memory_space<vmem>>, vector<1x1x1x896xf32>
    %106 = vector.shape_cast %105 : vector<1x1x1x896xf32> to vector<1x896xf32>
    %107 = vector.broadcast %104 : vector<8x1xf32> to vector<8x896xf32>
    %108 = vector.broadcast %106 : vector<1x896xf32> to vector<8x896xf32>
    %109 = arith.mulf %107, %108 : vector<8x896xf32>
    %110 = arith.addf %103, %109 : vector<8x896xf32>
    %111 = vector.extract_strided_slice %0 {offsets = [0, 7], sizes = [8, 1], strides = [1, 1]} : vector<8x9xf32> to vector<8x1xf32>
    %c0_57 = arith.constant 0 : index
    %c1_58 = arith.constant 1 : index
    %c7_59 = arith.constant 7 : index
    %c0_60 = arith.constant 0 : index
    %112 = vector.load %arg2[%c0_57, %c1_58, %c7_59, %c0_60] : memref<1x4x9x896xf32, #tpu.memory_space<vmem>>, vector<1x1x1x896xf32>
    %113 = vector.shape_cast %112 : vector<1x1x1x896xf32> to vector<1x896xf32>
    %114 = vector.broadcast %111 : vector<8x1xf32> to vector<8x896xf32>
    %115 = vector.broadcast %113 : vector<1x896xf32> to vector<8x896xf32>
    %116 = arith.mulf %114, %115 : vector<8x896xf32>
    %117 = arith.addf %110, %116 : vector<8x896xf32>
    %118 = vector.extract_strided_slice %0 {offsets = [0, 8], sizes = [8, 1], strides = [1, 1]} : vector<8x9xf32> to vector<8x1xf32>
    %c0_61 = arith.constant 0 : index
    %c1_62 = arith.constant 1 : index
    %c8_63 = arith.constant 8 : index
    %c0_64 = arith.constant 0 : index
    %119 = vector.load %arg2[%c0_61, %c1_62, %c8_63, %c0_64] : memref<1x4x9x896xf32, #tpu.memory_space<vmem>>, vector<1x1x1x896xf32>
    %120 = vector.shape_cast %119 : vector<1x1x1x896xf32> to vector<1x896xf32>
    %121 = vector.broadcast %118 : vector<8x1xf32> to vector<8x896xf32>
    %122 = vector.broadcast %120 : vector<1x896xf32> to vector<8x896xf32>
    %123 = arith.mulf %121, %122 : vector<8x896xf32>
    %124 = arith.addf %117, %123 : vector<8x896xf32>
    %125 = arith.maximumf %62, %124 : vector<8x896xf32>
    %126 = vector.extract_strided_slice %0 {offsets = [0, 0], sizes = [8, 1], strides = [1, 1]} : vector<8x9xf32> to vector<8x1xf32>
    %c0_65 = arith.constant 0 : index
    %c2_66 = arith.constant 2 : index
    %c0_67 = arith.constant 0 : index
    %c0_68 = arith.constant 0 : index
    %127 = vector.load %arg2[%c0_65, %c2_66, %c0_67, %c0_68] : memref<1x4x9x896xf32, #tpu.memory_space<vmem>>, vector<1x1x1x896xf32>
    %128 = vector.shape_cast %127 : vector<1x1x1x896xf32> to vector<1x896xf32>
    %129 = vector.broadcast %126 : vector<8x1xf32> to vector<8x896xf32>
    %130 = vector.broadcast %128 : vector<1x896xf32> to vector<8x896xf32>
    %131 = arith.mulf %129, %130 : vector<8x896xf32>
    %132 = vector.extract_strided_slice %0 {offsets = [0, 1], sizes = [8, 1], strides = [1, 1]} : vector<8x9xf32> to vector<8x1xf32>
    %c0_69 = arith.constant 0 : index
    %c2_70 = arith.constant 2 : index
    %c1_71 = arith.constant 1 : index
    %c0_72 = arith.constant 0 : index
    %133 = vector.load %arg2[%c0_69, %c2_70, %c1_71, %c0_72] : memref<1x4x9x896xf32, #tpu.memory_space<vmem>>, vector<1x1x1x896xf32>
    %134 = vector.shape_cast %133 : vector<1x1x1x896xf32> to vector<1x896xf32>
    %135 = vector.broadcast %132 : vector<8x1xf32> to vector<8x896xf32>
    %136 = vector.broadcast %134 : vector<1x896xf32> to vector<8x896xf32>
    %137 = arith.mulf %135, %136 : vector<8x896xf32>
    %138 = arith.addf %131, %137 : vector<8x896xf32>
    %139 = vector.extract_strided_slice %0 {offsets = [0, 2], sizes = [8, 1], strides = [1, 1]} : vector<8x9xf32> to vector<8x1xf32>
    %c0_73 = arith.constant 0 : index
    %c2_74 = arith.constant 2 : index
    %c2_75 = arith.constant 2 : index
    %c0_76 = arith.constant 0 : index
    %140 = vector.load %arg2[%c0_73, %c2_74, %c2_75, %c0_76] : memref<1x4x9x896xf32, #tpu.memory_space<vmem>>, vector<1x1x1x896xf32>
    %141 = vector.shape_cast %140 : vector<1x1x1x896xf32> to vector<1x896xf32>
    %142 = vector.broadcast %139 : vector<8x1xf32> to vector<8x896xf32>
    %143 = vector.broadcast %141 : vector<1x896xf32> to vector<8x896xf32>
    %144 = arith.mulf %142, %143 : vector<8x896xf32>
    %145 = arith.addf %138, %144 : vector<8x896xf32>
    %146 = vector.extract_strided_slice %0 {offsets = [0, 3], sizes = [8, 1], strides = [1, 1]} : vector<8x9xf32> to vector<8x1xf32>
    %c0_77 = arith.constant 0 : index
    %c2_78 = arith.constant 2 : index
    %c3_79 = arith.constant 3 : index
    %c0_80 = arith.constant 0 : index
    %147 = vector.load %arg2[%c0_77, %c2_78, %c3_79, %c0_80] : memref<1x4x9x896xf32, #tpu.memory_space<vmem>>, vector<1x1x1x896xf32>
    %148 = vector.shape_cast %147 : vector<1x1x1x896xf32> to vector<1x896xf32>
    %149 = vector.broadcast %146 : vector<8x1xf32> to vector<8x896xf32>
    %150 = vector.broadcast %148 : vector<1x896xf32> to vector<8x896xf32>
    %151 = arith.mulf %149, %150 : vector<8x896xf32>
    %152 = arith.addf %145, %151 : vector<8x896xf32>
    %153 = vector.extract_strided_slice %0 {offsets = [0, 4], sizes = [8, 1], strides = [1, 1]} : vector<8x9xf32> to vector<8x1xf32>
    %c0_81 = arith.constant 0 : index
    %c2_82 = arith.constant 2 : index
    %c4_83 = arith.constant 4 : index
    %c0_84 = arith.constant 0 : index
    %154 = vector.load %arg2[%c0_81, %c2_82, %c4_83, %c0_84] : memref<1x4x9x896xf32, #tpu.memory_space<vmem>>, vector<1x1x1x896xf32>
    %155 = vector.shape_cast %154 : vector<1x1x1x896xf32> to vector<1x896xf32>
    %156 = vector.broadcast %153 : vector<8x1xf32> to vector<8x896xf32>
    %157 = vector.broadcast %155 : vector<1x896xf32> to vector<8x896xf32>
    %158 = arith.mulf %156, %157 : vector<8x896xf32>
    %159 = arith.addf %152, %158 : vector<8x896xf32>
    %160 = vector.extract_strided_slice %0 {offsets = [0, 5], sizes = [8, 1], strides = [1, 1]} : vector<8x9xf32> to vector<8x1xf32>
    %c0_85 = arith.constant 0 : index
    %c2_86 = arith.constant 2 : index
    %c5_87 = arith.constant 5 : index
    %c0_88 = arith.constant 0 : index
    %161 = vector.load %arg2[%c0_85, %c2_86, %c5_87, %c0_88] : memref<1x4x9x896xf32, #tpu.memory_space<vmem>>, vector<1x1x1x896xf32>
    %162 = vector.shape_cast %161 : vector<1x1x1x896xf32> to vector<1x896xf32>
    %163 = vector.broadcast %160 : vector<8x1xf32> to vector<8x896xf32>
    %164 = vector.broadcast %162 : vector<1x896xf32> to vector<8x896xf32>
    %165 = arith.mulf %163, %164 : vector<8x896xf32>
    %166 = arith.addf %159, %165 : vector<8x896xf32>
    %167 = vector.extract_strided_slice %0 {offsets = [0, 6], sizes = [8, 1], strides = [1, 1]} : vector<8x9xf32> to vector<8x1xf32>
    %c0_89 = arith.constant 0 : index
    %c2_90 = arith.constant 2 : index
    %c6_91 = arith.constant 6 : index
    %c0_92 = arith.constant 0 : index
    %168 = vector.load %arg2[%c0_89, %c2_90, %c6_91, %c0_92] : memref<1x4x9x896xf32, #tpu.memory_space<vmem>>, vector<1x1x1x896xf32>
    %169 = vector.shape_cast %168 : vector<1x1x1x896xf32> to vector<1x896xf32>
    %170 = vector.broadcast %167 : vector<8x1xf32> to vector<8x896xf32>
    %171 = vector.broadcast %169 : vector<1x896xf32> to vector<8x896xf32>
    %172 = arith.mulf %170, %171 : vector<8x896xf32>
    %173 = arith.addf %166, %172 : vector<8x896xf32>
    %174 = vector.extract_strided_slice %0 {offsets = [0, 7], sizes = [8, 1], strides = [1, 1]} : vector<8x9xf32> to vector<8x1xf32>
    %c0_93 = arith.constant 0 : index
    %c2_94 = arith.constant 2 : index
    %c7_95 = arith.constant 7 : index
    %c0_96 = arith.constant 0 : index
    %175 = vector.load %arg2[%c0_93, %c2_94, %c7_95, %c0_96] : memref<1x4x9x896xf32, #tpu.memory_space<vmem>>, vector<1x1x1x896xf32>
    %176 = vector.shape_cast %175 : vector<1x1x1x896xf32> to vector<1x896xf32>
    %177 = vector.broadcast %174 : vector<8x1xf32> to vector<8x896xf32>
    %178 = vector.broadcast %176 : vector<1x896xf32> to vector<8x896xf32>
    %179 = arith.mulf %177, %178 : vector<8x896xf32>
    %180 = arith.addf %173, %179 : vector<8x896xf32>
    %181 = vector.extract_strided_slice %0 {offsets = [0, 8], sizes = [8, 1], strides = [1, 1]} : vector<8x9xf32> to vector<8x1xf32>
    %c0_97 = arith.constant 0 : index
    %c2_98 = arith.constant 2 : index
    %c8_99 = arith.constant 8 : index
    %c0_100 = arith.constant 0 : index
    %182 = vector.load %arg2[%c0_97, %c2_98, %c8_99, %c0_100] : memref<1x4x9x896xf32, #tpu.memory_space<vmem>>, vector<1x1x1x896xf32>
    %183 = vector.shape_cast %182 : vector<1x1x1x896xf32> to vector<1x896xf32>
    %184 = vector.broadcast %181 : vector<8x1xf32> to vector<8x896xf32>
    %185 = vector.broadcast %183 : vector<1x896xf32> to vector<8x896xf32>
    %186 = arith.mulf %184, %185 : vector<8x896xf32>
    %187 = arith.addf %180, %186 : vector<8x896xf32>
    %188 = arith.maximumf %125, %187 : vector<8x896xf32>
    %189 = vector.extract_strided_slice %0 {offsets = [0, 0], sizes = [8, 1], strides = [1, 1]} : vector<8x9xf32> to vector<8x1xf32>
    %c0_101 = arith.constant 0 : index
    %c3_102 = arith.constant 3 : index
    %c0_103 = arith.constant 0 : index
    %c0_104 = arith.constant 0 : index
    %190 = vector.load %arg2[%c0_101, %c3_102, %c0_103, %c0_104] : memref<1x4x9x896xf32, #tpu.memory_space<vmem>>, vector<1x1x1x896xf32>
    %191 = vector.shape_cast %190 : vector<1x1x1x896xf32> to vector<1x896xf32>
    %192 = vector.broadcast %189 : vector<8x1xf32> to vector<8x896xf32>
    %193 = vector.broadcast %191 : vector<1x896xf32> to vector<8x896xf32>
    %194 = arith.mulf %192, %193 : vector<8x896xf32>
    %195 = vector.extract_strided_slice %0 {offsets = [0, 1], sizes = [8, 1], strides = [1, 1]} : vector<8x9xf32> to vector<8x1xf32>
    %c0_105 = arith.constant 0 : index
    %c3_106 = arith.constant 3 : index
    %c1_107 = arith.constant 1 : index
    %c0_108 = arith.constant 0 : index
    %196 = vector.load %arg2[%c0_105, %c3_106, %c1_107, %c0_108] : memref<1x4x9x896xf32, #tpu.memory_space<vmem>>, vector<1x1x1x896xf32>
    %197 = vector.shape_cast %196 : vector<1x1x1x896xf32> to vector<1x896xf32>
    %198 = vector.broadcast %195 : vector<8x1xf32> to vector<8x896xf32>
    %199 = vector.broadcast %197 : vector<1x896xf32> to vector<8x896xf32>
    %200 = arith.mulf %198, %199 : vector<8x896xf32>
    %201 = arith.addf %194, %200 : vector<8x896xf32>
    %202 = vector.extract_strided_slice %0 {offsets = [0, 2], sizes = [8, 1], strides = [1, 1]} : vector<8x9xf32> to vector<8x1xf32>
    %c0_109 = arith.constant 0 : index
    %c3_110 = arith.constant 3 : index
    %c2_111 = arith.constant 2 : index
    %c0_112 = arith.constant 0 : index
    %203 = vector.load %arg2[%c0_109, %c3_110, %c2_111, %c0_112] : memref<1x4x9x896xf32, #tpu.memory_space<vmem>>, vector<1x1x1x896xf32>
    %204 = vector.shape_cast %203 : vector<1x1x1x896xf32> to vector<1x896xf32>
    %205 = vector.broadcast %202 : vector<8x1xf32> to vector<8x896xf32>
    %206 = vector.broadcast %204 : vector<1x896xf32> to vector<8x896xf32>
    %207 = arith.mulf %205, %206 : vector<8x896xf32>
    %208 = arith.addf %201, %207 : vector<8x896xf32>
    %209 = vector.extract_strided_slice %0 {offsets = [0, 3], sizes = [8, 1], strides = [1, 1]} : vector<8x9xf32> to vector<8x1xf32>
    %c0_113 = arith.constant 0 : index
    %c3_114 = arith.constant 3 : index
    %c3_115 = arith.constant 3 : index
    %c0_116 = arith.constant 0 : index
    %210 = vector.load %arg2[%c0_113, %c3_114, %c3_115, %c0_116] : memref<1x4x9x896xf32, #tpu.memory_space<vmem>>, vector<1x1x1x896xf32>
    %211 = vector.shape_cast %210 : vector<1x1x1x896xf32> to vector<1x896xf32>
    %212 = vector.broadcast %209 : vector<8x1xf32> to vector<8x896xf32>
    %213 = vector.broadcast %211 : vector<1x896xf32> to vector<8x896xf32>
    %214 = arith.mulf %212, %213 : vector<8x896xf32>
    %215 = arith.addf %208, %214 : vector<8x896xf32>
    %216 = vector.extract_strided_slice %0 {offsets = [0, 4], sizes = [8, 1], strides = [1, 1]} : vector<8x9xf32> to vector<8x1xf32>
    %c0_117 = arith.constant 0 : index
    %c3_118 = arith.constant 3 : index
    %c4_119 = arith.constant 4 : index
    %c0_120 = arith.constant 0 : index
    %217 = vector.load %arg2[%c0_117, %c3_118, %c4_119, %c0_120] : memref<1x4x9x896xf32, #tpu.memory_space<vmem>>, vector<1x1x1x896xf32>
    %218 = vector.shape_cast %217 : vector<1x1x1x896xf32> to vector<1x896xf32>
    %219 = vector.broadcast %216 : vector<8x1xf32> to vector<8x896xf32>
    %220 = vector.broadcast %218 : vector<1x896xf32> to vector<8x896xf32>
    %221 = arith.mulf %219, %220 : vector<8x896xf32>
    %222 = arith.addf %215, %221 : vector<8x896xf32>
    %223 = vector.extract_strided_slice %0 {offsets = [0, 5], sizes = [8, 1], strides = [1, 1]} : vector<8x9xf32> to vector<8x1xf32>
    %c0_121 = arith.constant 0 : index
    %c3_122 = arith.constant 3 : index
    %c5_123 = arith.constant 5 : index
    %c0_124 = arith.constant 0 : index
    %224 = vector.load %arg2[%c0_121, %c3_122, %c5_123, %c0_124] : memref<1x4x9x896xf32, #tpu.memory_space<vmem>>, vector<1x1x1x896xf32>
    %225 = vector.shape_cast %224 : vector<1x1x1x896xf32> to vector<1x896xf32>
    %226 = vector.broadcast %223 : vector<8x1xf32> to vector<8x896xf32>
    %227 = vector.broadcast %225 : vector<1x896xf32> to vector<8x896xf32>
    %228 = arith.mulf %226, %227 : vector<8x896xf32>
    %229 = arith.addf %222, %228 : vector<8x896xf32>
    %230 = vector.extract_strided_slice %0 {offsets = [0, 6], sizes = [8, 1], strides = [1, 1]} : vector<8x9xf32> to vector<8x1xf32>
    %c0_125 = arith.constant 0 : index
    %c3_126 = arith.constant 3 : index
    %c6_127 = arith.constant 6 : index
    %c0_128 = arith.constant 0 : index
    %231 = vector.load %arg2[%c0_125, %c3_126, %c6_127, %c0_128] : memref<1x4x9x896xf32, #tpu.memory_space<vmem>>, vector<1x1x1x896xf32>
    %232 = vector.shape_cast %231 : vector<1x1x1x896xf32> to vector<1x896xf32>
    %233 = vector.broadcast %230 : vector<8x1xf32> to vector<8x896xf32>
    %234 = vector.broadcast %232 : vector<1x896xf32> to vector<8x896xf32>
    %235 = arith.mulf %233, %234 : vector<8x896xf32>
    %236 = arith.addf %229, %235 : vector<8x896xf32>
    %237 = vector.extract_strided_slice %0 {offsets = [0, 7], sizes = [8, 1], strides = [1, 1]} : vector<8x9xf32> to vector<8x1xf32>
    %c0_129 = arith.constant 0 : index
    %c3_130 = arith.constant 3 : index
    %c7_131 = arith.constant 7 : index
    %c0_132 = arith.constant 0 : index
    %238 = vector.load %arg2[%c0_129, %c3_130, %c7_131, %c0_132] : memref<1x4x9x896xf32, #tpu.memory_space<vmem>>, vector<1x1x1x896xf32>
    %239 = vector.shape_cast %238 : vector<1x1x1x896xf32> to vector<1x896xf32>
    %240 = vector.broadcast %237 : vector<8x1xf32> to vector<8x896xf32>
    %241 = vector.broadcast %239 : vector<1x896xf32> to vector<8x896xf32>
    %242 = arith.mulf %240, %241 : vector<8x896xf32>
    %243 = arith.addf %236, %242 : vector<8x896xf32>
    %244 = vector.extract_strided_slice %0 {offsets = [0, 8], sizes = [8, 1], strides = [1, 1]} : vector<8x9xf32> to vector<8x1xf32>
    %c0_133 = arith.constant 0 : index
    %c3_134 = arith.constant 3 : index
    %c8_135 = arith.constant 8 : index
    %c0_136 = arith.constant 0 : index
    %245 = vector.load %arg2[%c0_133, %c3_134, %c8_135, %c0_136] : memref<1x4x9x896xf32, #tpu.memory_space<vmem>>, vector<1x1x1x896xf32>
    %246 = vector.shape_cast %245 : vector<1x1x1x896xf32> to vector<1x896xf32>
    %247 = vector.broadcast %244 : vector<8x1xf32> to vector<8x896xf32>
    %248 = vector.broadcast %246 : vector<1x896xf32> to vector<8x896xf32>
    %249 = arith.mulf %247, %248 : vector<8x896xf32>
    %250 = arith.addf %243, %249 : vector<8x896xf32>
    %251 = arith.maximumf %188, %250 : vector<8x896xf32>
    %c0_137 = arith.constant 0 : index
    %c0_138 = arith.constant 0 : index
    %252 = vector.load %arg4[%c0_137, %c0_138] : memref<8x1xf32, #tpu.memory_space<vmem>>, vector<8x1xf32>
    %253 = vector.broadcast %252 : vector<8x1xf32> to vector<8x896xf32>
    %254 = arith.addf %251, %253 : vector<8x896xf32>
    %cst = arith.constant 0.000000e+00 : f32
    %255 = vector.broadcast %cst : f32 to vector<8x896xf32>
    %256 = arith.maximumf %254, %255 : vector<8x896xf32>
    %c0_139 = arith.constant 0 : index
    %c0_140 = arith.constant 0 : index
    %c0_141 = arith.constant 0 : index
    %257 = vector.load %arg5[%c0_139, %c0_140, %c0_141] : memref<1x8x896xf32, #tpu.memory_space<vmem>>, vector<1x8x896xf32>
    %258 = vector.shape_cast %257 : vector<1x8x896xf32> to vector<8x896xf32>
    %259 = vector.shape_cast %256 : vector<8x896xf32> to vector<1x8x896xf32>
    tpu.vector_store %arg5[%c0_139, %c0_140, %c0_141], %259 {strides = array<i32>} : memref<1x8x896xf32, #tpu.memory_space<vmem>>, vector<1x8x896xf32>,
    return
  }
  func.func @transform_0(%arg0: i32, %arg1: i32) -> (i32, i32, i32, i32) {
    %c0_i32 = arith.constant 0 : i32
    %c0_i32_0 = arith.constant 0 : i32
    %c0_i32_1 = arith.constant 0 : i32
    %c0_i32_2 = arith.constant 0 : i32
    return %arg0, %c0_i32, %c0_i32_0, %c0_i32_1 : i32, i32, i32, i32
  }
  func.func @transform_1(%arg0: i32, %arg1: i32) -> (i32, i32) {
    %c0_i32 = arith.constant 0 : i32
    %c0_i32_0 = arith.constant 0 : i32
    return %arg1, %c0_i32 : i32, i32
  }
  func.func @transform_2(%arg0: i32, %arg1: i32) -> (i32, i32) {
    %c0_i32 = arith.constant 0 : i32
    %c0_i32_0 = arith.constant 0 : i32
    return %arg1, %c0_i32 : i32, i32
  }
  func.func @transform_3(%arg0: i32, %arg1: i32) -> (i32, i32, i32) {
    %c0_i32 = arith.constant 0 : i32
    %c0_i32_0 = arith.constant 0 : i32
    return %arg0, %arg1, %c0_i32 : i32, i32, i32
  }
}

module attributes {stable_mosaic.version = 11 : i64} {
  func.func @mlp_head_kernel(%arg0: i32, %arg1: i32, %arg2: memref<2x7168xf32, #tpu.memory_space<vmem>>, %arg3: memref<7168x256xbf16, #tpu.memory_space<vmem>>, %arg4: memref<1x256xf32, #tpu.memory_space<vmem>>, %arg5: memref<1x256xf32, #tpu.memory_space<vmem>>, %arg6: memref<2x128xf32, #tpu.memory_space<vmem>>, %arg7: memref<2x256xf32, #tpu.memory_space<vmem>>) attributes {dimension_semantics = [#tpu.dimension_semantics<parallel>, #tpu.dimension_semantics<arbitrary>], iteration_bounds = array<i64: 1, 4>, scalar_prefetch = 0 : i64, scratch_operands = 1 : i64, tpu.core_type = #tpu.core_type<tc>, window_params = [{transform_indices = @transform_0, window_bounds = array<i64: 2, 7168>}, {transform_indices = @transform_1, window_bounds = array<i64: 7168, 256>}, {transform_indices = @transform_2, window_bounds = array<i64: 1, 256>}, {transform_indices = @transform_3, window_bounds = array<i64: 1, 256>}, {transform_indices = @transform_4, window_bounds = array<i64: 2, 128>}]} {
    %c0_i32 = arith.constant 0 : i32
    %0 = arith.cmpi eq, %arg1, %c0_i32 : i32
    %1 = arith.extui %0 : i1 to i32
    %c0_i32_0 = arith.constant 0 : i32
    %2 = arith.cmpi ne, %1, %c0_i32_0 : i32
    scf.if %2 {
      %cst_9 = arith.constant 0.000000e+00 : f32
      %13 = vector.broadcast %cst_9 : f32 to vector<2x256xf32>
      %c0_10 = arith.constant 0 : index
      %c0_11 = arith.constant 0 : index
      %14 = vector.load %arg7[%c0_10, %c0_11] : memref<2x256xf32, #tpu.memory_space<vmem>>, vector<2x256xf32>
      tpu.vector_store %arg7[%c0_10, %c0_11], %13 {strides = array<i32>} : memref<2x256xf32, #tpu.memory_space<vmem>>, vector<2x256xf32>,
    } else {
    }
    %c0 = arith.constant 0 : index
    %c0_1 = arith.constant 0 : index
    %3 = vector.load %arg7[%c0, %c0_1] : memref<2x256xf32, #tpu.memory_space<vmem>>, vector<2x256xf32>
    %c0_2 = arith.constant 0 : index
    %c0_3 = arith.constant 0 : index
    %4 = vector.load %arg2[%c0_2, %c0_3] : memref<2x7168xf32, #tpu.memory_space<vmem>>, vector<2x7168xf32>
    %5 = arith.truncf %4 : vector<2x7168xf32> to vector<2x7168xbf16>
    %c0_4 = arith.constant 0 : index
    %c0_5 = arith.constant 0 : index
    %6 = vector.load %arg3[%c0_4, %c0_5] : memref<7168x256xbf16, #tpu.memory_space<vmem>>, vector<7168x256xbf16>
    %cst = arith.constant dense<0.000000e+00> : vector<2x256xf32>
    %7 = tpu.matmul %5, %6, %cst {dimension_numbers = #tpu.dot_dimension_numbers<[1], [0], [0], [1], [0, 0, 1, 1], [], []>} : vector<2x7168xbf16>, vector<7168x256xbf16>, vector<2x256xf32> -> vector<2x256xf32>
    %8 = arith.addf %3, %7 : vector<2x256xf32>
    %c0_6 = arith.constant 0 : index
    %c0_7 = arith.constant 0 : index
    %9 = vector.load %arg7[%c0_6, %c0_7] : memref<2x256xf32, #tpu.memory_space<vmem>>, vector<2x256xf32>
    tpu.vector_store %arg7[%c0_6, %c0_7], %8 {strides = array<i32>} : memref<2x256xf32, #tpu.memory_space<vmem>>, vector<2x256xf32>,
    %c3_i32 = arith.constant 3 : i32
    %10 = arith.cmpi eq, %arg1, %c3_i32 : i32
    %11 = arith.extui %10 : i1 to i32
    %c0_i32_8 = arith.constant 0 : i32
    %12 = arith.cmpi ne, %11, %c0_i32_8 : i32
    scf.if %12 {
      %c0_9 = arith.constant 0 : index
      %c0_10 = arith.constant 0 : index
      %13 = vector.load %arg7[%c0_9, %c0_10] : memref<2x256xf32, #tpu.memory_space<vmem>>, vector<2x256xf32>
      %c0_11 = arith.constant 0 : index
      %c0_12 = arith.constant 0 : index
      %14 = vector.load %arg4[%c0_11, %c0_12] : memref<1x256xf32, #tpu.memory_space<vmem>>, vector<1x256xf32>
      %15 = vector.broadcast %14 : vector<1x256xf32> to vector<2x256xf32>
      %16 = arith.addf %13, %15 : vector<2x256xf32>
      %cst_13 = arith.constant 0.000000e+00 : f32
      %17 = vector.broadcast %cst_13 : f32 to vector<2x256xf32>
      %18 = arith.maximumf %16, %17 : vector<2x256xf32>
      %c0_14 = arith.constant 0 : index
      %c0_15 = arith.constant 0 : index
      %19 = vector.load %arg5[%c0_14, %c0_15] : memref<1x256xf32, #tpu.memory_space<vmem>>, vector<1x256xf32>
      %20 = vector.broadcast %19 : vector<1x256xf32> to vector<2x256xf32>
      %21 = arith.mulf %18, %20 : vector<2x256xf32>
      %cst_16 = arith.constant dense<0.000000e+00> : vector<2xf32>
      %22 = vector.multi_reduction <add>, %21, %cst_16 [1] : vector<2x256xf32> to vector<2xf32>
      %23 = vector.shape_cast %22 : vector<2xf32> to vector<2x1xf32>
      %24 = vector.shape_cast %23 : vector<2x1xf32> to vector<2x1xf32>
      %25 = vector.broadcast %24 : vector<2x1xf32> to vector<2x128xf32>
      %c0_17 = arith.constant 0 : index
      %c0_18 = arith.constant 0 : index
      %26 = vector.load %arg6[%c0_17, %c0_18] : memref<2x128xf32, #tpu.memory_space<vmem>>, vector<2x128xf32>
      tpu.vector_store %arg6[%c0_17, %c0_18], %25 {strides = array<i32>} : memref<2x128xf32, #tpu.memory_space<vmem>>, vector<2x128xf32>,
    } else {
    }
    return
  }
  func.func @transform_0(%arg0: i32, %arg1: i32) -> (i32, i32) {
    %c0_i32 = arith.constant 0 : i32
    %c0_i32_0 = arith.constant 0 : i32
    return %c0_i32, %arg1 : i32, i32
  }
  func.func @transform_1(%arg0: i32, %arg1: i32) -> (i32, i32) {
    %c0_i32 = arith.constant 0 : i32
    return %arg1, %arg0 : i32, i32
  }
  func.func @transform_2(%arg0: i32, %arg1: i32) -> (i32, i32) {
    %c0_i32 = arith.constant 0 : i32
    %c0_i32_0 = arith.constant 0 : i32
    return %c0_i32, %arg0 : i32, i32
  }
  func.func @transform_3(%arg0: i32, %arg1: i32) -> (i32, i32) {
    %c0_i32 = arith.constant 0 : i32
    %c0_i32_0 = arith.constant 0 : i32
    return %c0_i32, %arg0 : i32, i32
  }
  func.func @transform_4(%arg0: i32, %arg1: i32) -> (i32, i32) {
    %c0_i32 = arith.constant 0 : i32
    %c0_i32_0 = arith.constant 0 : i32
    return %c0_i32, %arg0 : i32, i32
  }
}

</mosaic_0001>

<bundles_post_ra>
// kernel: propositional_primitive_forward.2
= control target key start
LH: loop header
LB: loop body
LE: loop exit
PB: predicated region body
PF: predicated region fallthrough
CT: control target
= control target key end

     0   :  { %s1819_s12 = smov 0   ;;  %s1821_s13 = smov 0   ;;  %s2665_s0 = inlined_call_operand.vmem [shape: f32[2,4,9,896], index: 0, kind: input, shape index: {}]   ;;  %s2666_s1 = inlined_call_operand.vmem [shape: f32[32,9], index: 1, kind: input, shape index: {}]   ;;  %s2667_s2 = inlined_call_operand.vmem [shape: f32[32,1], index: 2, kind: input, shape index: {}]   ;;  %s2668_s3 = inlined_call_operand.vmem [shape: f32[2,32,896], index: 3, kind: output, shape index: {}]  }
   0x1   :  { %s1823_s14 = smov 0   ;;  %s1825_s15 = smov 0  }
   0x2   :  { %s1827_s16 = smov 0  }
   0x3 LB: > { %s22_s17 = sadd.s32 1, %s1780_s14  ;;  %s25_s18 = sadd.s32 1, %s1784_s15  ;;  %s1788_s16 = sphi %s1827_s16, %s13_s16   ;;  %s1784_s15 = sphi %s1825_s15, %s2777_s15   ;;  %s1780_s14 = sphi %s1823_s14, %s2776_s14   ;;  %s1776_s13 = sphi %s1821_s13, %s2775_s13   ;;  %s1772_s12 = sphi %s1819_s12, %s2774_s12  }
   0x4   : > { %p23_p0 = scmp.ge.s32.totalorder %s22_s17, 4  ;;  %p1610_p1 = scmp.ge.s32.totalorder %s1788_s16, 1 }
   0x5   : > { %p169_p2 = scmp.lt.s32.totalorder %s1788_s16, 9 }
   0x6   : > { %s2779_s17 = smov (%p23_p0, %s22_s17), 0  ;;  %s2781_s18 = smov (!%p23_p0, %s25_s18), %s1784_s15 }
   0x7   : > { %p170_p3 = pnand %p1610_p1, %p169_p2  ;;  %p27_p4 = scmp.ge.s32.totalorder %s2781_s18, 2 }
   0x9   : > { %s2783_s18 = smov (%p27_p4, %s2781_s18), 0  ;;  %173 = sbr.rel (%p170_p3) target bundleno = 326 (0x146), region = 32 }
   0xe   : > { %p210_p5 = scmp.lt.s32.totalorder %s1772_s12, 3  ;;  %v1790_v0 = vmov 0   ;;  %v1791_v1 = vmov 2   ;;  %v1792_v2 = vmov 4   ;;  %v1793_v4 = vmov 1   ;;  %p205_p6 = scmp.lt.s32.totalorder %s1776_s13, 1 }
   0xf   : > { %1739 = vset.pattern.permute.xlu0 %v1790_v0  ;;  %1741 = vset.pattern.permute.xlu1 %v1791_v1  ;;  %v1794_v5 = vmov 3   ;;  %v1795_v6 = vmov 5   ;;  %v1796_v7 = vmov 6   ;;  %v1797_v8 = vmov 8  }
  0x10   : > { %s2785_s12 = smov (!%p210_p5, %s1772_s12), 3  ;;  %1743 = vset.pattern.permute.xlu2 %v1792_v2  ;;  %v1798_v9 = vmov 7   ;;  %s2787_s13 = smov (!%p205_p6, %s1776_s13), 1 }
  0x11   : > { %s1612_s19 = sshll.u32 %s2785_s12, 3  ;;  %s1687_s26 = smul.u32 448, %s2787_s13 }
  0x12   : > { %s213_s22 = scalar_lea.vmem %s2666_s1, %s1612_s19  ;;  %s217_s25 = scalar_lea.vmem %s2667_s2, %s1612_s19 }
  0x13   : > { %v227_v3 = vld [vmem:[%s213_s22] sm:$0xff]  ;;  %s1868_s29 = scalar_lea.vmem %s2665_s0, %s1687_s26  ;;  %s1688_s30 = smul.u32 7, %s2785_s12 }
  0x14   : > { %233 = vperm.xlu0 %1739, %v227_v3   ;;  %300 = vperm.xlu1 %1741, %v227_v3   ;;  %v1445_v10 = vld [vmem:[%s217_s25] sm:$0xff]  ;;  %s1689_s4 = smul.u32 28, %s2787_s13 }
  0x15   : > { %374 = vperm.xlu2 %1743, %v227_v3   ;;  %v228_v11 = vld [vmem:[%s1868_s29] ss:$8 sm:$0xf]  ;;  %v1617_v14 = vld [vmem:[%s1868_s29 + $0x2] ss:$8 sm:$0xf] }
  0x16   : > { %v229_v12 = vld [vmem:[%s1868_s29] ss:$8 sm:$0xf0]  ;;  %v1618_v15 = vld [vmem:[%s1868_s29 + $0x2] ss:$8 sm:$0xf0]  ;;  %s224_s5 = sadd.s32 %s1689_s4, %s1688_s30 }
  0x17   : > { %v1872_v13 = vor.u32 %v229_v12, %v228_v11  ;;  %v1882_v22 = vor.u32 %v1618_v15, %v1617_v14  ;;  %v1631_v23 = vld [vmem:[%s1868_s29 + $0x70] ss:$8 sm:$0xf]  ;;  %v1621_v33 = vld [vmem:[%s1868_s29 + $0x4] ss:$8 sm:$0xf] }
  0x18   : > { %v1632_v24 = vld [vmem:[%s1868_s29 + $0x70] ss:$8 sm:$0xf0]  ;;  %v1622_v34 = vld [vmem:[%s1868_s29 + $0x4] ss:$8 sm:$0xf0] }
  0x19   : > { %v237_v16 = vperm.slane %v1872_v13, 0  ;;  %v238_v17 = vperm.slane %v1872_v13, 1  ;;  %v239_v18 = vperm.slane %v1872_v13, 2  ;;  %v240_v19 = vperm.slane %v1872_v13, 3  ;;  %s1614_s6 = sshll.u32 %s224_s5, 3 }
  0x1a   : > { %v241_v20 = vperm.slane %v1872_v13, 4  ;;  %v242_v21 = vperm.slane %v1872_v13, 5  ;;  %v243_v25 = vperm.slane %v1872_v13, 6  ;;  %v304_v26 = vperm.slane %v1882_v22, 0  ;;  %s226_s9 = scalar_lea.vmem %s2668_s3, %s1614_s6 }
  0x1b   : > { %v305_v27 = vperm.slane %v1882_v22, 1  ;;  %v306_v28 = vperm.slane %v1882_v22, 2  ;;  %v307_v29 = vperm.slane %v1882_v22, 3  ;;  %v308_v30 = vperm.slane %v1882_v22, 4 }
  0x1c   : > { %1740 = vset.pattern.permute.xlu0 %v1793_v4  ;;  %1742 = vset.pattern.permute.xlu1 %v1794_v5  ;;  %v309_v31 = vperm.slane %v1882_v22, 5  ;;  %v1893_v32 = vor.u32 %v1632_v24, %v1631_v23  ;;  %v310_v35 = vperm.slane %v1882_v22, 6  ;;  %v1898_v36 = vor.u32 %v1622_v34, %v1621_v33  ;;  %v1615_v39 = vld [vmem:[%s1868_s29 + $0x1] ss:$8 sm:$0xf] }
  0x1d   : > { %263 = vperm.xlu0 %1740, %v227_v3   ;;  %337 = vperm.xlu1 %1742, %v227_v3   ;;  %v1616_v40 = vld [vmem:[%s1868_s29 + $0x1] ss:$8 sm:$0xf0]  ;;  %v1619_v45 = vld [vmem:[%s1868_s29 + $0x3] ss:$8 sm:$0xf] }
  0x1e   : > { %1744 = vset.pattern.permute.xlu2 %v1795_v6  ;;  %v559_v37 = vperm.slane %v1893_v32, 0  ;;  %v1904_v41 = vor.u32 %v1616_v40, %v1615_v39  ;;  %v378_v42 = vperm.slane %v1898_v36, 0  ;;  %v379_v43 = vperm.slane %v1898_v36, 1  ;;  %v1620_v46 = vld [vmem:[%s1868_s29 + $0x3] ss:$8 sm:$0xf0] }
  0x1f   : > { %411 = vperm.xlu2 %1744, %v227_v3   ;;  %v380_v51 = vperm.slane %v1898_v36, 2  ;;  %v1920_v55 = vor.u32 %v1620_v46, %v1619_v45  ;;  %v381_v57 = vperm.slane %v1898_v36, 3  ;;  %v382_v58 = vperm.slane %v1898_v36, 4  ;;  %v1633_v59 = vld [vmem:[%s1868_s29 + $0x71] ss:$8 sm:$0xf] }
  0x20   : > { %v383_v62 = vperm.slane %v1898_v36, 5  ;;  %v384_v63 = vperm.slane %v1898_v36, 6  ;;  %v1624_v4 = vld [vmem:[%s1868_s29 + $0x5] ss:$8 sm:$0xf0]  ;;  %v2697_v22 = vperm.slane %v1893_v32, 3 }
  0x21   : > { %v1634_v5 = vld [vmem:[%s1868_s29 + $0x71] ss:$8 sm:$0xf0]  ;;  %v1626_v6 = vld [vmem:[%s1868_s29 + $0x6] ss:$8 sm:$0xf0] }
  0x22   : > { %v1942_v14 = vor.u32 %v1634_v5, %v1633_v59  ;;  %v1635_v59 = vld [vmem:[%s1868_s29 + $0x72] ss:$8 sm:$0xf]  ;;  %v1628_v1 = vld [vmem:[%s1868_s29 + $0x7] ss:$8 sm:$0xf0] }
  0x23   : > { %v1636_v2 = vld [vmem:[%s1868_s29 + $0x72] ss:$8 sm:$0xf0]  ;;  %v1630_v56 = vld [vmem:[%s1868_s29 + $0x38] ss:$8 sm:$0xf0] }
  0x24   : > { %2686 = vst [vmem:[#allocation3_spill] sm:$0xff] %v1942_v14  ;;  %v2007_v54 = vor.u32 %v1636_v2, %v1635_v59 }
  0x25   : > { %1745 = vset.pattern.permute.xlu1 %v1796_v7  ;;  %1747 = vset.pattern.permute.xlu0 %v1797_v8  ;;  %v1625_v7 = vld [vmem:[%s1868_s29 + $0x6] ss:$8 sm:$0xf] }
  0x26   : > { %448 = vperm.xlu1 %1745, %v227_v3   ;;  %522 = vperm.xlu0 %1747, %v227_v3   ;;  %v620_v49 = vperm.slane %v2007_v54, 2 }
  0x27   : > { %1746 = vset.pattern.permute.xlu2 %v1798_v9  ;;  %v624_v9 = vperm.slane %v2007_v54, 6 }
  0x28   : > { %485 = vperm.xlu2 %1746, %v227_v3   ;;  %v1623_v3 = vld [vmem:[%s1868_s29 + $0x5] ss:$8 sm:$0xf] }
  0x29   : > { %v409_v8 = vor.u32 %v1624_v4, %v1623_v3  ;;  %v1965_v3 = vor.u32 %v1626_v6, %v1625_v7 }
  0x2b   : > { %v415_v15 = vperm.slane %v409_v8, 0  ;;  %v416_v23 = vperm.slane %v409_v8, 1  ;;  %v417_v24 = vperm.slane %v409_v8, 2  ;;  %v418_v33 = vperm.slane %v409_v8, 3 }
  0x2c   : > { %v419_v34 = vperm.slane %v409_v8, 4  ;;  %v420_v36 = vperm.slane %v409_v8, 5  ;;  %v421_v39 = vperm.slane %v409_v8, 6 }
  0x2e   : > { %1748 = vset.pattern.permute.xlu1 %v1790_v0  ;;  %1749 = vset.pattern.permute.xlu0 %v1790_v0  ;;  %v619_v0 = vperm.slane %v2007_v54, 1 }
  0x2f   : > { %1448 = vperm.xlu1 %1748, %v1445_v10   ;;  %v1638_v10 = vld [vmem:[%s1868_s29 + $0x73] ss:$8 sm:$0xf0] }
  0x6f   : > { %v1911_v47 = vpop.permute.xlu2 %374 }
  0x70   : > { %2685 = vst [vmem:[#allocation2_spill] sm:$0xff] %v1911_v47  ;;  %v1952_v5 = vmul.f32 %v378_v42, %v1911_v47  ;;  %v1957_v8 = vmul.f32 %v379_v43, %v1911_v47  ;;  %v1960_v40 = vmul.f32 %v380_v51, %v1911_v47  ;;  %v1963_v46 = vmul.f32 %v381_v57, %v1911_v47  ;;  %v1627_v57 = vld [vmem:[%s1868_s29 + $0x7] ss:$8 sm:$0xf] }
  0x71   : > { %v1970_v4 = vmul.f32 %v382_v58, %v1911_v47  ;;  %v1973_v42 = vmul.f32 %v383_v62, %v1911_v47  ;;  %v1976_v43 = vmul.f32 %v384_v63, %v1911_v47  ;;  %v483_v61 = vor.u32 %v1628_v1, %v1627_v57 }
  0x72   : > { %v618_v63 = vperm.slane %v2007_v54, 0 }
  0x73   : > { %v489_v62 = vperm.slane %v483_v61, 0  ;;  %v491_v1 = vperm.slane %v483_v61, 2  ;;  %v492_v57 = vperm.slane %v483_v61, 3  ;;  %v494_v53 = vperm.slane %v483_v61, 5 }
  0x79   : > { %v1945_v45 = vpop.permute.xlu2 %411 }
  0x7a   : > { %2687 = vst [vmem:[#allocation4_spill] sm:$0xff] %v1945_v45  ;;  %v1979_v51 = vmul.f32 %v415_v15, %v1945_v45  ;;  %v1984_v6 = vmul.f32 %v416_v23, %v1945_v45  ;;  %v1987_v7 = vmul.f32 %v417_v24, %v1945_v45  ;;  %v1990_v58 = vmul.f32 %v418_v33, %v1945_v45  ;;  %v1629_v33 = vld [vmem:[%s1868_s29 + $0x38] ss:$8 sm:$0xf] }
  0x7b   : > { %v1997_v60 = vmul.f32 %v419_v34, %v1945_v45  ;;  %v2000_v23 = vmul.f32 %v420_v36, %v1945_v45  ;;  %v2003_v24 = vmul.f32 %v421_v39, %v1945_v45  ;;  %v490_v15 = vperm.slane %v483_v61, 1 }
  0x7c   : > { %v493_v34 = vperm.slane %v483_v61, 4  ;;  %v495_v39 = vperm.slane %v483_v61, 6  ;;  %v2014_v50 = vor.u32 %v1630_v56, %v1629_v33  ;;  %v621_v61 = vperm.slane %v2007_v54, 3 }
  0x7d   : > { %v622_v56 = vperm.slane %v2007_v54, 4 }
  0x82   : > { %v2011_v52 = vpop.permute.xlu2 %485 }
  0x83   : > { %2688 = vst [vmem:[#allocation5_spill] sm:$0xff] %v2011_v52  ;;  %v2022_v48 = vmul.f32 %v489_v62, %v2011_v52  ;;  %v2025_v12 = vmul.f32 %v490_v15, %v2011_v52  ;;  %v2030_v33 = vmul.f32 %v491_v1, %v2011_v52  ;;  %v2033_v59 = vmul.f32 %v492_v57, %v2011_v52 }
  0x84   : > { %v2036_v2 = vmul.f32 %v493_v34, %v2011_v52  ;;  %v2039_v36 = vmul.f32 %v494_v53, %v2011_v52  ;;  %v2046_v11 = vmul.f32 %v495_v39, %v2011_v52  ;;  %v623_v57 = vperm.slane %v2007_v54, 5  ;;  %v1639_v34 = vld [vmem:[%s1868_s29 + $0x74] ss:$8 sm:$0xf] }
  0x85   : > { %v1640_v52 = vld [vmem:[%s1868_s29 + $0x74] ss:$8 sm:$0xf0] }
  0x86   : > { %v2041_v62 = vpop.permute.xlu0 %233  ;;  %v2043_v15 = vpop.permute.xlu1 %300  ;;  %2691 = vst [vmem:[#allocation8_spill] sm:$0xff] %v2046_v11  ;;  %v1650_v11 = vld [vmem:[%s1868_s29 + $0xe0] ss:$8 sm:$0xf0] }
  0x87   : > { %2689 = vst [vmem:[#allocation6_spill] sm:$0xff] %v2041_v62  ;;  %v251_v38 = vmul.f32 %v237_v16, %v2041_v62  ;;  %v252_v39 = vmul.f32 %v238_v17, %v2041_v62  ;;  %v253_v53 = vmul.f32 %v239_v18, %v2041_v62  ;;  %v254_v44 = vmul.f32 %v240_v19, %v2041_v62 }
  0x88   : > { %2690 = vst [vmem:[#allocation7_spill] sm:$0xff] %v2043_v15  ;;  %v255_v16 = vmul.f32 %v241_v20, %v2041_v62  ;;  %v256_v17 = vmul.f32 %v242_v21, %v2041_v62  ;;  %v257_v54 = vmul.f32 %v243_v25, %v2041_v62  ;;  %v318_v18 = vmul.f32 %v304_v26, %v2043_v15 }
  0x89   : > { %v319_v19 = vmul.f32 %v305_v27, %v2043_v15  ;;  %v320_v20 = vmul.f32 %v306_v28, %v2043_v15  ;;  %v321_v21 = vmul.f32 %v307_v29, %v2043_v15  ;;  %v322_v13 = vmul.f32 %v308_v30, %v2043_v15  ;;  %v1637_v27 = vld [vmem:[%s1868_s29 + $0x73] ss:$8 sm:$0xf] }
  0x8a   : > { %v323_v25 = vmul.f32 %v309_v31, %v2043_v15  ;;  %v324_v26 = vmul.f32 %v310_v35, %v2043_v15  ;;  %v2104_v28 = vmul.f32 %v559_v37, %v2041_v62  ;;  %v2693_v29 = vperm.slane %v1893_v32, 1 }
  0x8b   : > { %v2695_v30 = vperm.slane %v1893_v32, 2  ;;  %v2119_v35 = vmul.f32 %v2697_v22, %v2041_v62  ;;  %v2699_v37 = vperm.slane %v1893_v32, 4  ;;  %v2139_v22 = vmul.f32 %v618_v63, %v2043_v15 }
  0x8c   : > { %2692 = vst [vmem:[#allocation9_spill] sm:$0xff] %v2104_v28  ;;  %v2109_v1 = vmul.f32 %v2693_v29, %v2041_v62  ;;  %v2701_v29 = vperm.slane %v1893_v32, 5  ;;  %v2161_v63 = vmul.f32 %v624_v9, %v2043_v15  ;;  %v2718_v9 = vperm.slane %v1904_v41, 3 }
  0x8d   : > { %v2114_v31 = vmul.f32 %v2695_v30, %v2041_v62  ;;  %2698 = vst [vmem:[#allocation12_spill] sm:$0xff] %v2119_v35  ;;  %v2126_v45 = vmul.f32 %v2699_v37, %v2041_v62  ;;  %v2703_v30 = vperm.slane %v1893_v32, 6  ;;  %v2142_v35 = vmul.f32 %v619_v0, %v2043_v15 }
  0x8e   : > { %2694 = vst [vmem:[#allocation10_spill] sm:$0xff] %v2109_v1  ;;  %v2131_v47 = vmul.f32 %v2701_v29, %v2041_v62  ;;  %v2145_v1 = vmul.f32 %v620_v49, %v2043_v15  ;;  %v2148_v37 = vmul.f32 %v621_v61, %v2043_v15  ;;  %v2151_v29 = vmul.f32 %v622_v56, %v2043_v15 }
  0x8f   : > { %2696 = vst [vmem:[#allocation11_spill] sm:$0xff] %v2114_v31  ;;  %v2136_v31 = vmul.f32 %v2703_v30, %v2041_v62  ;;  %v2155_v32 = vpop.permute.xlu1 %337  ;;  %v2158_v30 = vmul.f32 %v623_v57, %v2043_v15  ;;  %v2163_v0 = vor.u32 %v1638_v10, %v1637_v27  ;;  %v2165_v49 = vor.u32 %v1640_v52, %v1639_v34 }
  0x90   : > { %2700 = vst [vmem:[#allocation13_spill] sm:$0xff] %v2126_v45  ;;  %v2715_v61 = vperm.slane %v1904_v41, 0  ;;  %v2716_v56 = vperm.slane %v1904_v41, 1  ;;  %v2719_v52 = vperm.slane %v1904_v41, 4  ;;  %v2720_v34 = vperm.slane %v1904_v41, 5 }
  0x91   : > { %2702 = vst [vmem:[#allocation14_spill] sm:$0xff] %v2131_v47  ;;  %v2153_v47 = vpop.permute.xlu0 %263 }
  0x92   : > { %2704 = vst [vmem:[#allocation15_spill] sm:$0xff] %v2136_v31  ;;  %v281_v62 = vmul.f32 %v2715_v61, %v2153_v47  ;;  %v284_v15 = vmul.f32 %v2718_v9, %v2153_v47  ;;  %v285_v10 = vmul.f32 %v2719_v52, %v2153_v47  ;;  %v286_v27 = vmul.f32 %v2720_v34, %v2153_v47 }
  0x93   : > { %2705 = vst [vmem:[#allocation16_spill] sm:$0xff] %v2139_v22  ;;  %v2721_v61 = vperm.slane %v1904_v41, 6  ;;  %v2723_v31 = vperm.slane %v1920_v55, 1 }
  0x94   : > { %2706 = vst [vmem:[#allocation17_spill] sm:$0xff] %v2142_v35  ;;  %v292_v35 = vadd.f32 %v285_v10, %v255_v16  ;;  %v293_v52 = vadd.f32 %v286_v27, %v256_v17  ;;  %v2728_v17 = vperm.slane %v1920_v55, 6  ;;  %v2733_v10 = vperm.slane %v1965_v3, 4 }
  0x95   : > { %2707 = vst [vmem:[#allocation18_spill] sm:$0xff] %v2145_v1  ;;  %v291_v1 = vadd.f32 %v284_v15, %v254_v44  ;;  %v356_v34 = vmul.f32 %v2723_v31, %v2155_v32 }
  0x96   : > { %2708 = vst [vmem:[#allocation19_spill] sm:$0xff] %v2148_v37  ;;  %v2717_v37 = vperm.slane %v1904_v41, 2  ;;  %v329_v14 = vadd.f32 %v322_v13, %v292_v35 }
  0x97   : > { %2709 = vst [vmem:[#allocation20_spill] sm:$0xff] %v2151_v29  ;;  %v282_v29 = vmul.f32 %v2716_v56, %v2153_v47  ;;  %v287_v56 = vmul.f32 %v2721_v61, %v2153_v47  ;;  %v328_v28 = vadd.f32 %v321_v21, %v291_v1  ;;  %v1649_v61 = vld [vmem:[%s1868_s29 + $0xe0] ss:$8 sm:$0xf]  ;;  %v2727_v1 = vperm.slane %v1920_v55, 5 }
  0x98   : > { %2710 = vst [vmem:[#allocation21_spill] sm:$0xff] %v2153_v47  ;;  %v283_v57 = vmul.f32 %v2717_v37, %v2153_v47  ;;  %v2722_v37 = vperm.slane %v1920_v55, 0  ;;  %v330_v47 = vadd.f32 %v323_v25, %v293_v52  ;;  %v2211_v21 = vor.u32 %v1650_v11, %v1649_v61  ;;  %v2213_v13 = vpop.permute.xlu1 %448 }
  0x99   : > { %2711 = vst [vmem:[#allocation22_spill] sm:$0xff] %v2158_v30  ;;  %v289_v9 = vadd.f32 %v282_v29, %v252_v39  ;;  %v294_v22 = vadd.f32 %v287_v56, %v257_v54  ;;  %v360_v16 = vmul.f32 %v2727_v1, %v2155_v32  ;;  %v361_v54 = vmul.f32 %v2728_v17, %v2155_v32 }
  0x9a   : > { %2712 = vst [vmem:[#allocation23_spill] sm:$0xff] %v2161_v63  ;;  %v288_v63 = vadd.f32 %v281_v62, %v251_v38  ;;  %v290_v30 = vadd.f32 %v283_v57, %v253_v53  ;;  %v2724_v38 = vperm.slane %v1920_v55, 2  ;;  %v2725_v62 = vperm.slane %v1920_v55, 3 }
  0x9b   : > { %2713 = vst [vmem:[#allocation24_spill] sm:$0xff] %v2163_v0  ;;  %v326_v0 = vadd.f32 %v319_v19, %v289_v9  ;;  %v2726_v53 = vperm.slane %v1920_v55, 4  ;;  %v367_v31 = vadd.f32 %v360_v16, %v330_v47  ;;  %v2729_v55 = vperm.slane %v1965_v3, 0  ;;  %v2225_v47 = vpop.permute.xlu0 %522 }
  0x9c   : > { %2714 = vst [vmem:[#allocation25_spill] sm:$0xff] %v2165_v49  ;;  %v355_v49 = vmul.f32 %v2722_v37, %v2155_v32  ;;  %v325_v45 = vadd.f32 %v318_v18, %v288_v63  ;;  %v327_v41 = vadd.f32 %v320_v20, %v290_v30  ;;  %v331_v37 = vadd.f32 %v324_v26, %v294_v22 }
  0x9d   : > { %v357_v44 = vmul.f32 %v2724_v38, %v2155_v32  ;;  %v358_v15 = vmul.f32 %v2725_v62, %v2155_v32  ;;  %v359_v39 = vmul.f32 %v2726_v53, %v2155_v32  ;;  %v363_v19 = vadd.f32 %v356_v34, %v326_v0 }
  0x9e   : > { %v362_v18 = vadd.f32 %v355_v49, %v325_v45  ;;  %v368_v35 = vadd.f32 %v361_v54, %v331_v37  ;;  %v466_v45 = vmul.f32 %v2729_v55, %v2213_v13  ;;  %v404_v0 = vadd.f32 %v1973_v42, %v367_v31  ;;  %v2744_v31 = vld [vmem:[#allocation8_spill] sm:$0xff] }
  0x9f   : > { %v364_v20 = vadd.f32 %v357_v44, %v327_v41  ;;  %v365_v25 = vadd.f32 %v358_v15, %v328_v28  ;;  %v366_v26 = vadd.f32 %v359_v39, %v329_v14  ;;  %v400_v29 = vadd.f32 %v1957_v8, %v363_v19 }
  0xa0   : > { %v399_v22 = vadd.f32 %v1952_v5, %v362_v18  ;;  %v405_v14 = vadd.f32 %v1976_v43, %v368_v35  ;;  %v2730_v28 = vperm.slane %v1965_v3, 1  ;;  %v441_v42 = vadd.f32 %v2000_v23, %v404_v0 }
  0xa1   : > { %v401_v30 = vadd.f32 %v1960_v40, %v364_v20  ;;  %v402_v63 = vadd.f32 %v1963_v46, %v365_v25  ;;  %v403_v11 = vadd.f32 %v1970_v4, %v366_v26  ;;  %v437_v8 = vadd.f32 %v1984_v6, %v400_v29  ;;  %v2741_v25 = vld [vmem:[#allocation21_spill] sm:$0xff] }
  0xa2   : > { %v436_v5 = vadd.f32 %v1979_v51, %v399_v22  ;;  %v467_v49 = vmul.f32 %v2730_v28, %v2213_v13  ;;  %v442_v43 = vadd.f32 %v2003_v24, %v405_v14  ;;  %v2731_v57 = vperm.slane %v1965_v3, 2 }
  0xa3   : > { %v438_v40 = vadd.f32 %v1987_v7, %v401_v30  ;;  %v439_v46 = vadd.f32 %v1990_v58, %v402_v63  ;;  %v440_v4 = vadd.f32 %v1997_v60, %v403_v11  ;;  %v2732_v6 = vperm.slane %v1965_v3, 3 }
  0xa4   : > { %v468_v51 = vmul.f32 %v2731_v57, %v2213_v13  ;;  %v470_v27 = vmul.f32 %v2733_v10, %v2213_v13  ;;  %v2734_v58 = vperm.slane %v1965_v3, 5  ;;  %v2735_v23 = vperm.slane %v1965_v3, 6 }
  0xa5   : > { %v469_v7 = vmul.f32 %v2732_v6, %v2213_v13  ;;  %v473_v56 = vadd.f32 %v466_v45, %v436_v5  ;;  %v474_v9 = vadd.f32 %v467_v49, %v437_v8  ;;  %v2736_v52 = vperm.slane %v2014_v50, 0 }
  0xa6   : > { %v471_v60 = vmul.f32 %v2734_v58, %v2213_v13  ;;  %v472_v24 = vmul.f32 %v2735_v23, %v2213_v13  ;;  %v475_v41 = vadd.f32 %v468_v51, %v438_v40  ;;  %v477_v37 = vadd.f32 %v470_v27, %v440_v4  ;;  %v2753_v51 = vld [vmem:[#allocation9_spill] sm:$0xff]  ;;  %v2755_v27 = vld [vmem:[#allocation11_spill] sm:$0xff] }
  0xa7   : > { %v540_v34 = vmul.f32 %v2736_v52, %v2225_v47  ;;  %v476_v61 = vadd.f32 %v469_v7, %v439_v46  ;;  %v510_v62 = vadd.f32 %v2022_v48, %v473_v56  ;;  %v511_v15 = vadd.f32 %v2025_v12, %v474_v9  ;;  %v2754_v7 = vld [vmem:[#allocation10_spill] sm:$0xff]  ;;  %v2758_v9 = vld [vmem:[#allocation13_spill] sm:$0xff] }
  0xa8   : > { %v478_v38 = vadd.f32 %v471_v60, %v441_v42  ;;  %v479_v44 = vadd.f32 %v472_v24, %v442_v43  ;;  %v2737_v53 = vperm.slane %v2014_v50, 1  ;;  %v512_v39 = vadd.f32 %v2030_v33, %v475_v41  ;;  %v2742_v33 = vld [vmem:[#allocation3_spill] sm:$0xff]  ;;  %v2756_v60 = vld [vmem:[#allocation12_spill] sm:$0xff] }
  0xa9   : > { %v513_v1 = vadd.f32 %v2033_v59, %v476_v61  ;;  %v514_v16 = vadd.f32 %v2036_v2, %v477_v37  ;;  %v2738_v54 = vperm.slane %v2014_v50, 2  ;;  %v2739_v48 = vperm.slane %v2014_v50, 3  ;;  %v2757_v24 = vld [vmem:[#allocation24_spill] sm:$0xff]  ;;  %v2760_v61 = vld [vmem:[#allocation15_spill] sm:$0xff] }
  0xaa   : > { %v541_v3 = vmul.f32 %v2737_v53, %v2225_v47  ;;  %v515_v17 = vadd.f32 %v2039_v36, %v478_v38  ;;  %v2740_v19 = vperm.slane %v2014_v50, 4  ;;  %v2743_v26 = vperm.slane %v2742_v33, 0  ;;  %v2761_v38 = vld [vmem:[#allocation16_spill] sm:$0xff]  ;;  %v2763_v53 = vld [vmem:[#allocation18_spill] sm:$0xff] }
  0xab   : > { %v542_v18 = vmul.f32 %v2738_v54, %v2225_v47  ;;  %v543_v12 = vmul.f32 %v2739_v48, %v2225_v47  ;;  %v2277_v2 = vadd.f32 %v2744_v31, %v479_v44  ;;  %v2745_v36 = vperm.slane %v2014_v50, 5 }
  0xac   : > { %v544_v20 = vmul.f32 %v2740_v19, %v2225_v47  ;;  %v599_v59 = vmul.f32 %v2743_v26, %v2741_v25  ;;  %v2746_v22 = vperm.slane %v2014_v50, 6  ;;  %v2287_v30 = vadd.f32 %v540_v34, %v510_v62  ;;  %v2759_v34 = vld [vmem:[#allocation14_spill] sm:$0xff]  ;;  %v2762_v62 = vld [vmem:[#allocation17_spill] sm:$0xff] }
  0xad   : > { %v545_v35 = vmul.f32 %v2745_v36, %v2225_v47  ;;  %v2289_v55 = vadd.f32 %v541_v3, %v511_v15  ;;  %v2291_v45 = vadd.f32 %v542_v18, %v512_v39  ;;  %v2293_v63 = vadd.f32 %v543_v12, %v513_v1  ;;  %v2764_v39 = vld [vmem:[#allocation19_spill] sm:$0xff]  ;;  %v2766_v18 = vld [vmem:[#allocation22_spill] sm:$0xff] }
  0xae   : > { %v2285_v29 = vmul.f32 %v2746_v22, %v2225_v47  ;;  %v2747_v11 = vperm.slane %v2742_v33, 1  ;;  %v2298_v14 = vadd.f32 %v544_v20, %v514_v16  ;;  %v2748_v50 = vperm.slane %v2742_v33, 2  ;;  %v2767_v12 = vld [vmem:[#allocation23_spill] sm:$0xff] }
  0xaf   : > { %v2300_v5 = vadd.f32 %v545_v35, %v515_v17  ;;  %v2749_v40 = vperm.slane %v2742_v33, 3  ;;  %v2750_v49 = vperm.slane %v2742_v33, 4  ;;  %v2751_v4 = vperm.slane %v2742_v33, 5  ;;  %v2765_v17 = vld [vmem:[#allocation20_spill] sm:$0xff] }
  0xb0   : > { %v600_v0 = vmul.f32 %v2747_v11, %v2741_v25  ;;  %v601_v8 = vmul.f32 %v2748_v50, %v2741_v25  ;;  %v2752_v43 = vperm.slane %v2742_v33, 6  ;;  %v606_v6 = vadd.f32 %v599_v59, %v2753_v51  ;;  %v2768_v11 = vld [vmem:[#allocation25_spill] sm:$0xff] }
  0xb1   : > { %v602_v28 = vmul.f32 %v2749_v40, %v2741_v25  ;;  %v603_v46 = vmul.f32 %v2750_v49, %v2741_v25  ;;  %v604_v42 = vmul.f32 %v2751_v4, %v2741_v25  ;;  %v651_v56 = vperm.slane %v2757_v24, 0  ;;  %v1641_v49 = vld [vmem:[%s1868_s29 + $0x75] ss:$8 sm:$0xf] }
  0xb2   : > { %v605_v57 = vmul.f32 %v2752_v43, %v2741_v25  ;;  %v607_v10 = vadd.f32 %v600_v0, %v2754_v7  ;;  %v608_v58 = vadd.f32 %v601_v8, %v2755_v27  ;;  %v639_v44 = vadd.f32 %v2761_v38, %v606_v6 }
  0xb3   : > { %v609_v23 = vadd.f32 %v602_v28, %v2756_v60  ;;  %v610_v52 = vadd.f32 %v603_v46, %v2758_v9  ;;  %v611_v41 = vadd.f32 %v604_v42, %v2759_v34  ;;  %v652_v16 = vperm.slane %v2757_v24, 1 }
  0xb4   : > { %v612_v37 = vadd.f32 %v605_v57, %v2760_v61  ;;  %v640_v15 = vadd.f32 %v2762_v62, %v607_v10  ;;  %v641_v3 = vadd.f32 %v2763_v53, %v608_v58  ;;  %v653_v20 = vperm.slane %v2757_v24, 2  ;;  %v1642_v57 = vld [vmem:[%s1868_s29 + $0x75] ss:$8 sm:$0xf0] }
  0xb5   : > { %v642_v1 = vadd.f32 %v2764_v39, %v609_v23  ;;  %v643_v54 = vadd.f32 %v2765_v17, %v610_v52  ;;  %v644_v48 = vadd.f32 %v2766_v18, %v611_v41  ;;  %v654_v33 = vperm.slane %v2757_v24, 3  ;;  %v1643_v17 = vld [vmem:[%s1868_s29 + $0x76] ss:$8 sm:$0xf] }
  0xb6   : > { %v645_v19 = vadd.f32 %v2767_v12, %v612_v37  ;;  %v655_v26 = vperm.slane %v2757_v24, 4  ;;  %v656_v59 = vperm.slane %v2757_v24, 5  ;;  %v657_v31 = vperm.slane %v2757_v24, 6 }
  0xb7   : > { %v665_v36 = vmul.f32 %v651_v56, %v2155_v32  ;;  %v666_v35 = vmul.f32 %v652_v16, %v2155_v32  ;;  %v667_v22 = vmul.f32 %v653_v20, %v2155_v32  ;;  %v684_v0 = vperm.slane %v2768_v11, 0  ;;  %v2769_v56 = vld [vmem:[#allocation2_spill] sm:$0xff] }
  0xb8   : > { %v668_v50 = vmul.f32 %v654_v33, %v2155_v32  ;;  %v669_v8 = vmul.f32 %v655_v26, %v2155_v32  ;;  %v670_v40 = vmul.f32 %v656_v59, %v2155_v32  ;;  %v671_v28 = vmul.f32 %v657_v31, %v2155_v32  ;;  %v2770_v59 = vld [vmem:[#allocation4_spill] sm:$0xff] }
  0xb9   : > { %v672_v46 = vadd.f32 %v665_v36, %v639_v44  ;;  %v673_v4 = vadd.f32 %v666_v35, %v640_v15  ;;  %v674_v42 = vadd.f32 %v667_v22, %v641_v3  ;;  %v685_v43 = vperm.slane %v2768_v11, 1 }
  0xba   : > { %v675_v51 = vadd.f32 %v668_v50, %v642_v1  ;;  %v676_v6 = vadd.f32 %v669_v8, %v643_v54  ;;  %v677_v7 = vadd.f32 %v670_v40, %v644_v48  ;;  %v678_v10 = vadd.f32 %v671_v28, %v645_v19  ;;  %v1644_v54 = vld [vmem:[%s1868_s29 + $0x76] ss:$8 sm:$0xf0]  ;;  %v1645_v28 = vld [vmem:[%s1868_s29 + $0x77] ss:$8 sm:$0xf] }
  0xbb   : > { %v686_v27 = vperm.slane %v2768_v11, 2  ;;  %v687_v58 = vperm.slane %v2768_v11, 3  ;;  %v688_v60 = vperm.slane %v2768_v11, 4  ;;  %v689_v23 = vperm.slane %v2768_v11, 5 }
  0xbc   : > { %v690_v24 = vperm.slane %v2768_v11, 6  ;;  %v698_v9 = vmul.f32 %v684_v0, %v2769_v56  ;;  %v699_v52 = vmul.f32 %v685_v43, %v2769_v56  ;;  %v715_v34 = vor.u32 %v1642_v57, %v1641_v49  ;;  %v1646_v43 = vld [vmem:[%s1868_s29 + $0x77] ss:$8 sm:$0xf0] }
  0xbd   : > { %v700_v41 = vmul.f32 %v686_v27, %v2769_v56  ;;  %v701_v61 = vmul.f32 %v687_v58, %v2769_v56  ;;  %v702_v37 = vmul.f32 %v688_v60, %v2769_v56  ;;  %v703_v38 = vmul.f32 %v689_v23, %v2769_v56 }
  0xbe   : > { %v704_v44 = vmul.f32 %v690_v24, %v2769_v56  ;;  %v705_v62 = vadd.f32 %v698_v9, %v672_v46  ;;  %v706_v15 = vadd.f32 %v699_v52, %v673_v4  ;;  %v717_v53 = vperm.slane %v715_v34, 0 }
  0xbf   : > { %v707_v3 = vadd.f32 %v700_v41, %v674_v42  ;;  %v708_v39 = vadd.f32 %v701_v61, %v675_v51  ;;  %v709_v1 = vadd.f32 %v702_v37, %v676_v6  ;;  %v710_v16 = vadd.f32 %v703_v38, %v677_v7 }
  0xc0   : > { %v711_v18 = vadd.f32 %v704_v44, %v678_v10  ;;  %v718_v48 = vperm.slane %v715_v34, 1  ;;  %v719_v12 = vperm.slane %v715_v34, 2  ;;  %v720_v19 = vperm.slane %v715_v34, 3 }
  0xc1   : > { %v721_v20 = vperm.slane %v715_v34, 4  ;;  %v722_v33 = vperm.slane %v715_v34, 5  ;;  %v723_v26 = vperm.slane %v715_v34, 6  ;;  %v731_v31 = vmul.f32 %v717_v53, %v2770_v59 }
  0xc2   : > { %v732_v36 = vmul.f32 %v718_v48, %v2770_v59  ;;  %v733_v35 = vmul.f32 %v719_v12, %v2770_v59  ;;  %v734_v22 = vmul.f32 %v720_v19, %v2770_v59  ;;  %v748_v11 = vor.u32 %v1644_v54, %v1643_v17  ;;  %v1648_v17 = vld [vmem:[%s1868_s29 + $0xa8] ss:$8 sm:$0xf0] }
  0xc3   : > { %v735_v0 = vmul.f32 %v721_v20, %v2770_v59  ;;  %v736_v50 = vmul.f32 %v722_v33, %v2770_v59  ;;  %v737_v8 = vmul.f32 %v723_v26, %v2770_v59  ;;  %v738_v40 = vadd.f32 %v731_v31, %v705_v62  ;;  %v2771_v26 = vld [vmem:[#allocation5_spill] sm:$0xff] }
  0xc4   : > { %v739_v49 = vadd.f32 %v732_v36, %v706_v15  ;;  %v740_v46 = vadd.f32 %v733_v35, %v707_v3  ;;  %v741_v4 = vadd.f32 %v734_v22, %v708_v39  ;;  %v750_v42 = vperm.slane %v748_v11, 0 }
  0xc5   : > { %v742_v57 = vadd.f32 %v735_v0, %v709_v1  ;;  %v743_v51 = vadd.f32 %v736_v50, %v710_v16  ;;  %v744_v6 = vadd.f32 %v737_v8, %v711_v18  ;;  %v751_v7 = vperm.slane %v748_v11, 1  ;;  %v1647_v16 = vld [vmem:[%s1868_s29 + $0xa8] ss:$8 sm:$0xf] }
  0xc6   : > { %v752_v10 = vperm.slane %v748_v11, 2  ;;  %v753_v27 = vperm.slane %v748_v11, 3  ;;  %v754_v58 = vperm.slane %v748_v11, 4  ;;  %v755_v60 = vperm.slane %v748_v11, 5 }
  0xc7   : > { %v756_v23 = vperm.slane %v748_v11, 6  ;;  %v764_v24 = vmul.f32 %v750_v42, %v2213_v13  ;;  %v765_v9 = vmul.f32 %v751_v7, %v2213_v13  ;;  %v781_v52 = vor.u32 %v1646_v43, %v1645_v28 }
  0xc8   : > { %v766_v34 = vmul.f32 %v752_v10, %v2213_v13  ;;  %v767_v41 = vmul.f32 %v753_v27, %v2213_v13  ;;  %v768_v61 = vmul.f32 %v754_v58, %v2213_v13  ;;  %v769_v37 = vmul.f32 %v755_v60, %v2213_v13 }
  0xc9   : > { %v770_v38 = vmul.f32 %v756_v23, %v2213_v13  ;;  %v771_v44 = vadd.f32 %v764_v24, %v738_v40  ;;  %v772_v62 = vadd.f32 %v765_v9, %v739_v49  ;;  %v783_v15 = vperm.slane %v781_v52, 0 }
  0xca   : > { %v773_v53 = vadd.f32 %v766_v34, %v740_v46  ;;  %v774_v3 = vadd.f32 %v767_v41, %v741_v4  ;;  %v775_v39 = vadd.f32 %v768_v61, %v742_v57  ;;  %v776_v1 = vadd.f32 %v769_v37, %v743_v51 }
  0xcb   : > { %v777_v54 = vadd.f32 %v770_v38, %v744_v6  ;;  %v784_v18 = vperm.slane %v781_v52, 1  ;;  %v785_v48 = vperm.slane %v781_v52, 2  ;;  %v786_v12 = vperm.slane %v781_v52, 3 }
  0xcc   : > { %v787_v19 = vperm.slane %v781_v52, 4  ;;  %v788_v20 = vperm.slane %v781_v52, 5  ;;  %v789_v33 = vperm.slane %v781_v52, 6  ;;  %v797_v31 = vmul.f32 %v783_v15, %v2771_v26 }
  0xcd   : > { %v798_v36 = vmul.f32 %v784_v18, %v2771_v26  ;;  %v799_v35 = vmul.f32 %v785_v48, %v2771_v26  ;;  %v800_v22 = vmul.f32 %v786_v12, %v2771_v26  ;;  %v814_v11 = vor.u32 %v1648_v17, %v1647_v16  ;;  %v1653_v48 = vld [vmem:[%s1868_s29 + $0xe2] ss:$8 sm:$0xf] }
  0xce   : > { %v801_v0 = vmul.f32 %v787_v19, %v2771_v26  ;;  %v802_v50 = vmul.f32 %v788_v20, %v2771_v26  ;;  %v803_v8 = vmul.f32 %v789_v33, %v2771_v26  ;;  %v804_v40 = vadd.f32 %v797_v31, %v771_v44  ;;  %v1654_v12 = vld [vmem:[%s1868_s29 + $0xe2] ss:$8 sm:$0xf0]  ;;  %v1657_v19 = vld [vmem:[%s1868_s29 + $0xe4] ss:$8 sm:$0xf] }
  0xcf   : > { %v805_v28 = vadd.f32 %v798_v36, %v772_v62  ;;  %v806_v49 = vadd.f32 %v799_v35, %v773_v53  ;;  %v807_v46 = vadd.f32 %v800_v22, %v774_v3  ;;  %v816_v4 = vperm.slane %v814_v11, 0  ;;  %v1655_v31 = vld [vmem:[%s1868_s29 + $0xe3] ss:$8 sm:$0xf] }
  0xd0   : > { %v808_v42 = vadd.f32 %v801_v0, %v775_v39  ;;  %v809_v43 = vadd.f32 %v802_v50, %v776_v1  ;;  %v810_v57 = vadd.f32 %v803_v8, %v777_v54  ;;  %v817_v51 = vperm.slane %v814_v11, 1  ;;  %v1651_v39 = vld [vmem:[%s1868_s29 + $0xe1] ss:$8 sm:$0xf] }
  0xd1   : > { %v818_v6 = vperm.slane %v814_v11, 2  ;;  %v819_v7 = vperm.slane %v814_v11, 3  ;;  %v820_v10 = vperm.slane %v814_v11, 4  ;;  %v821_v27 = vperm.slane %v814_v11, 5 }
  0xd2   : > { %v822_v58 = vperm.slane %v814_v11, 6  ;;  %v830_v60 = vmul.f32 %v816_v4, %v2225_v47  ;;  %v831_v23 = vmul.f32 %v817_v51, %v2225_v47  ;;  %v856_v24 = vperm.slane %v2211_v21, 0  ;;  %v1652_v1 = vld [vmem:[%s1868_s29 + $0xe1] ss:$8 sm:$0xf0] }
  0xd3   : > { %v832_v9 = vmul.f32 %v818_v6, %v2225_v47  ;;  %v833_v52 = vmul.f32 %v819_v7, %v2225_v47  ;;  %v834_v34 = vmul.f32 %v820_v10, %v2225_v47  ;;  %v835_v41 = vmul.f32 %v821_v27, %v2225_v47  ;;  %v1658_v36 = vld [vmem:[%s1868_s29 + $0xe4] ss:$8 sm:$0xf0]  ;;  %v1656_v50 = vld [vmem:[%s1868_s29 + $0xe3] ss:$8 sm:$0xf0] }
  0xd4   : > { %v836_v61 = vmul.f32 %v822_v58, %v2225_v47  ;;  %v2396_v37 = vadd.f32 %v830_v60, %v804_v40  ;;  %v2398_v38 = vadd.f32 %v831_v23, %v805_v28  ;;  %v857_v44 = vperm.slane %v2211_v21, 1  ;;  %v2772_v40 = vld [vmem:[#allocation6_spill] sm:$0xff] }
  0xd5   : > { %v2401_v62 = vadd.f32 %v832_v9, %v806_v49  ;;  %v2403_v15 = vadd.f32 %v833_v52, %v807_v46  ;;  %v2405_v53 = vadd.f32 %v834_v34, %v808_v42  ;;  %v2407_v3 = vadd.f32 %v835_v41, %v809_v43 }
  0xd6   : > { %v2413_v16 = vadd.f32 %v2285_v29, %v2277_v2  ;;  %v2415_v17 = vadd.f32 %v836_v61, %v810_v57  ;;  %v844_v54 = vmax.f32 %v2287_v30, %v2396_v37  ;;  %v858_v18 = vperm.slane %v2211_v21, 2 }
  0xd7   : > { %v845_v20 = vmax.f32 %v2289_v55, %v2398_v38  ;;  %v846_v33 = vmax.f32 %v2291_v45, %v2401_v62  ;;  %v847_v2 = vmax.f32 %v2293_v63, %v2403_v15  ;;  %v848_v29 = vmax.f32 %v2298_v14, %v2405_v53  ;;  %v1672_v38 = vld [vmem:[%s1868_s29 + $0x152] ss:$8 sm:$0xf0] }
  0xd8   : > { %v849_v35 = vmax.f32 %v2300_v5, %v2407_v3  ;;  %v859_v22 = vperm.slane %v2211_v21, 3  ;;  %v860_v11 = vperm.slane %v2211_v21, 4  ;;  %v861_v0 = vperm.slane %v2211_v21, 5 }
  0xd9   : > { %v862_v8 = vperm.slane %v2211_v21, 6  ;;  %v870_v28 = vmul.f32 %v856_v24, %v2772_v40  ;;  %v871_v49 = vmul.f32 %v857_v44, %v2772_v40  ;;  %v872_v46 = vmul.f32 %v858_v18, %v2772_v40 }
  0xda   : > { %v873_v4 = vmul.f32 %v859_v22, %v2772_v40  ;;  %v874_v42 = vmul.f32 %v860_v11, %v2772_v40  ;;  %v875_v43 = vmul.f32 %v861_v0, %v2772_v40  ;;  %v880_v57 = vor.u32 %v1652_v1, %v1651_v39 }
  0xdb   : > { %v876_v51 = vmul.f32 %v862_v8, %v2772_v40  ;;  %v913_v6 = vor.u32 %v1654_v12, %v1653_v48  ;;  %v946_v7 = vor.u32 %v1656_v50, %v1655_v31  ;;  %v2447_v10 = vor.u32 %v1658_v36, %v1657_v19 }
  0xdc   : > { %v882_v21 = vperm.slane %v880_v57, 0  ;;  %v883_v27 = vperm.slane %v880_v57, 1  ;;  %v884_v58 = vperm.slane %v880_v57, 2  ;;  %v885_v60 = vperm.slane %v880_v57, 3 }
  0xdd   : > { %v886_v23 = vperm.slane %v880_v57, 4  ;;  %v887_v24 = vperm.slane %v880_v57, 5  ;;  %v888_v9 = vperm.slane %v880_v57, 6  ;;  %v915_v52 = vperm.slane %v913_v6, 0 }
  0xde   : > { %v896_v34 = vmul.f32 %v882_v21, %v2741_v25  ;;  %v897_v41 = vmul.f32 %v883_v27, %v2741_v25  ;;  %v898_v61 = vmul.f32 %v884_v58, %v2741_v25  ;;  %v899_v44 = vmul.f32 %v885_v60, %v2741_v25  ;;  %v2773_v58 = vld [vmem:[#allocation7_spill] sm:$0xff] }
  0xdf   : > { %v900_v39 = vmul.f32 %v886_v23, %v2741_v25  ;;  %v901_v1 = vmul.f32 %v887_v24, %v2741_v25  ;;  %v902_v18 = vmul.f32 %v888_v9, %v2741_v25  ;;  %v916_v48 = vperm.slane %v913_v6, 1 }
  0xe0   : > { %v903_v12 = vadd.f32 %v896_v34, %v870_v28  ;;  %v904_v19 = vadd.f32 %v897_v41, %v871_v49  ;;  %v905_v31 = vadd.f32 %v898_v61, %v872_v46  ;;  %v906_v36 = vadd.f32 %v899_v44, %v873_v4 }
  0xe1   : > { %v907_v22 = vadd.f32 %v900_v39, %v874_v42  ;;  %v908_v11 = vadd.f32 %v901_v1, %v875_v43  ;;  %v909_v0 = vadd.f32 %v902_v18, %v876_v51  ;;  %v917_v50 = vperm.slane %v913_v6, 2 }
  0xe2   : > { %v918_v8 = vperm.slane %v913_v6, 3  ;;  %v919_v57 = vperm.slane %v913_v6, 4  ;;  %v920_v21 = vperm.slane %v913_v6, 5  ;;  %v921_v27 = vperm.slane %v913_v6, 6 }
  0xe3   : > { %v929_v60 = vmul.f32 %v915_v52, %v2773_v58  ;;  %v930_v23 = vmul.f32 %v916_v48, %v2773_v58  ;;  %v931_v24 = vmul.f32 %v917_v50, %v2773_v58  ;;  %v948_v9 = vperm.slane %v946_v7, 0 }
  0xe4   : > { %v932_v28 = vmul.f32 %v918_v8, %v2773_v58  ;;  %v933_v49 = vmul.f32 %v919_v57, %v2773_v58  ;;  %v934_v46 = vmul.f32 %v920_v21, %v2773_v58  ;;  %v935_v4 = vmul.f32 %v921_v27, %v2773_v58 }
  0xe5   : > { %v936_v42 = vadd.f32 %v929_v60, %v903_v12  ;;  %v937_v43 = vadd.f32 %v930_v23, %v904_v19  ;;  %v938_v51 = vadd.f32 %v931_v24, %v905_v31  ;;  %v949_v34 = vperm.slane %v946_v7, 1  ;;  %v1659_v24 = vld [vmem:[%s1868_s29 + $0xe5] ss:$8 sm:$0xf] }
  0xe6   : > { %v939_v6 = vadd.f32 %v932_v28, %v906_v36  ;;  %v940_v41 = vadd.f32 %v933_v49, %v907_v22  ;;  %v941_v52 = vadd.f32 %v934_v46, %v908_v11  ;;  %v942_v61 = vadd.f32 %v935_v4, %v909_v0 }
  0xe7   : > { %v950_v44 = vperm.slane %v946_v7, 2  ;;  %v951_v39 = vperm.slane %v946_v7, 3  ;;  %v952_v1 = vperm.slane %v946_v7, 4  ;;  %v953_v18 = vperm.slane %v946_v7, 5 }
  0xe8   : > { %v954_v48 = vperm.slane %v946_v7, 6  ;;  %v962_v50 = vmul.f32 %v948_v9, %v2155_v32  ;;  %v963_v8 = vmul.f32 %v949_v34, %v2155_v32  ;;  %v981_v12 = vperm.slane %v2447_v10, 0  ;;  %v1660_v9 = vld [vmem:[%s1868_s29 + $0xe5] ss:$8 sm:$0xf0] }
  0xe9   : > { %v964_v19 = vmul.f32 %v950_v44, %v2155_v32  ;;  %v965_v31 = vmul.f32 %v951_v39, %v2155_v32  ;;  %v966_v36 = vmul.f32 %v952_v1, %v2155_v32  ;;  %v967_v22 = vmul.f32 %v953_v18, %v2155_v32 }
  0xea   : > { %v968_v11 = vmul.f32 %v954_v48, %v2155_v32  ;;  %v969_v0 = vadd.f32 %v962_v50, %v936_v42  ;;  %v970_v7 = vadd.f32 %v963_v8, %v937_v43  ;;  %v982_v57 = vperm.slane %v2447_v10, 1  ;;  %v1661_v48 = vld [vmem:[%s1868_s29 + $0xe6] ss:$8 sm:$0xf] }
  0xeb   : > { %v971_v21 = vadd.f32 %v964_v19, %v938_v51  ;;  %v972_v27 = vadd.f32 %v965_v31, %v939_v6  ;;  %v973_v60 = vadd.f32 %v966_v36, %v940_v41  ;;  %v974_v23 = vadd.f32 %v967_v22, %v941_v52  ;;  %v1662_v19 = vld [vmem:[%s1868_s29 + $0xe6] ss:$8 sm:$0xf0] }
  0xec   : > { %v975_v28 = vadd.f32 %v968_v11, %v942_v61  ;;  %v983_v49 = vperm.slane %v2447_v10, 2  ;;  %v984_v46 = vperm.slane %v2447_v10, 3  ;;  %v985_v4 = vperm.slane %v2447_v10, 4 }
  0xed   : > { %v986_v34 = vperm.slane %v2447_v10, 5  ;;  %v987_v42 = vperm.slane %v2447_v10, 6  ;;  %v995_v43 = vmul.f32 %v981_v12, %v2769_v56  ;;  %v996_v51 = vmul.f32 %v982_v57, %v2769_v56 }
  0xee   : > { %v997_v6 = vmul.f32 %v983_v49, %v2769_v56  ;;  %v998_v41 = vmul.f32 %v984_v46, %v2769_v56  ;;  %v999_v52 = vmul.f32 %v985_v4, %v2769_v56  ;;  %v1012_v61 = vor.u32 %v1660_v9, %v1659_v24  ;;  %v1663_v4 = vld [vmem:[%s1868_s29 + $0xe7] ss:$8 sm:$0xf] }
  0xef   : > { %v1000_v44 = vmul.f32 %v986_v34, %v2769_v56  ;;  %v1001_v39 = vmul.f32 %v987_v42, %v2769_v56  ;;  %v1002_v1 = vadd.f32 %v995_v43, %v969_v0  ;;  %v1003_v18 = vadd.f32 %v996_v51, %v970_v7 }
  0xf0   : > { %v1004_v10 = vadd.f32 %v997_v6, %v971_v21  ;;  %v1005_v50 = vadd.f32 %v998_v41, %v972_v27  ;;  %v1006_v8 = vadd.f32 %v999_v52, %v973_v60  ;;  %v1014_v12 = vperm.slane %v1012_v61, 0  ;;  %v1664_v6 = vld [vmem:[%s1868_s29 + $0xe7] ss:$8 sm:$0xf0] }
  0xf1   : > { %v1007_v31 = vadd.f32 %v1000_v44, %v974_v23  ;;  %v1008_v36 = vadd.f32 %v1001_v39, %v975_v28  ;;  %v1015_v22 = vperm.slane %v1012_v61, 1  ;;  %v1016_v11 = vperm.slane %v1012_v61, 2 }
  0xf2   : > { %v1017_v57 = vperm.slane %v1012_v61, 3  ;;  %v1018_v49 = vperm.slane %v1012_v61, 4  ;;  %v1019_v24 = vperm.slane %v1012_v61, 5  ;;  %v1020_v9 = vperm.slane %v1012_v61, 6 }
  0xf3   : > { %v1028_v46 = vmul.f32 %v1014_v12, %v2770_v59  ;;  %v1029_v0 = vmul.f32 %v1015_v22, %v2770_v59  ;;  %v1030_v7 = vmul.f32 %v1016_v11, %v2770_v59  ;;  %v1045_v21 = vor.u32 %v1662_v19, %v1661_v48 }
  0xf4   : > { %v1031_v27 = vmul.f32 %v1017_v57, %v2770_v59  ;;  %v1032_v60 = vmul.f32 %v1018_v49, %v2770_v59  ;;  %v1033_v23 = vmul.f32 %v1019_v24, %v2770_v59  ;;  %v1034_v28 = vmul.f32 %v1020_v9, %v2770_v59 }
  0xf5   : > { %v1035_v34 = vadd.f32 %v1028_v46, %v1002_v1  ;;  %v1036_v42 = vadd.f32 %v1029_v0, %v1003_v18  ;;  %v1037_v43 = vadd.f32 %v1030_v7, %v1004_v10  ;;  %v1047_v51 = vperm.slane %v1045_v21, 0 }
  0xf6   : > { %v1038_v41 = vadd.f32 %v1031_v27, %v1005_v50  ;;  %v1039_v52 = vadd.f32 %v1032_v60, %v1006_v8  ;;  %v1040_v61 = vadd.f32 %v1033_v23, %v1007_v31  ;;  %v1041_v44 = vadd.f32 %v1034_v28, %v1008_v36  ;;  %v1666_v27 = vld [vmem:[%s1868_s29 + $0x118] ss:$8 sm:$0xf0] }
  0xf7   : > { %v1048_v39 = vperm.slane %v1045_v21, 1  ;;  %v1049_v48 = vperm.slane %v1045_v21, 2  ;;  %v1050_v12 = vperm.slane %v1045_v21, 3  ;;  %v1051_v19 = vperm.slane %v1045_v21, 4 }
  0xf8   : > { %v1052_v22 = vperm.slane %v1045_v21, 5  ;;  %v1053_v11 = vperm.slane %v1045_v21, 6  ;;  %v1061_v57 = vmul.f32 %v1047_v51, %v2213_v13  ;;  %v1078_v49 = vor.u32 %v1664_v6, %v1663_v4  ;;  %v1665_v21 = vld [vmem:[%s1868_s29 + $0x118] ss:$8 sm:$0xf] }
  0xf9   : > { %v1062_v1 = vmul.f32 %v1048_v39, %v2213_v13  ;;  %v1063_v18 = vmul.f32 %v1049_v48, %v2213_v13  ;;  %v1064_v10 = vmul.f32 %v1050_v12, %v2213_v13  ;;  %v1065_v50 = vmul.f32 %v1051_v19, %v2213_v13  ;;  %v1667_v19 = vld [vmem:[%s1868_s29 + $0x150] ss:$8 sm:$0xf] }
  0xfa   : > { %v1066_v8 = vmul.f32 %v1052_v22, %v2213_v13  ;;  %v1067_v31 = vmul.f32 %v1053_v11, %v2213_v13  ;;  %v1068_v36 = vadd.f32 %v1061_v57, %v1035_v34  ;;  %v1080_v24 = vperm.slane %v1078_v49, 0 }
  0xfb   : > { %v1069_v9 = vadd.f32 %v1062_v1, %v1036_v42  ;;  %v1070_v46 = vadd.f32 %v1063_v18, %v1037_v43  ;;  %v1071_v0 = vadd.f32 %v1064_v10, %v1038_v41  ;;  %v1072_v7 = vadd.f32 %v1065_v50, %v1039_v52  ;;  %v1668_v1 = vld [vmem:[%s1868_s29 + $0x150] ss:$8 sm:$0xf0] }
  0xfc   : > { %v1073_v60 = vadd.f32 %v1066_v8, %v1040_v61  ;;  %v1074_v23 = vadd.f32 %v1067_v31, %v1041_v44  ;;  %v1081_v28 = vperm.slane %v1078_v49, 1  ;;  %v1082_v4 = vperm.slane %v1078_v49, 2 }
  0xfd   : > { %v1083_v51 = vperm.slane %v1078_v49, 3  ;;  %v1084_v6 = vperm.slane %v1078_v49, 4  ;;  %v1085_v39 = vperm.slane %v1078_v49, 5  ;;  %v1086_v48 = vperm.slane %v1078_v49, 6 }
  0xfe   : > { %v1094_v12 = vmul.f32 %v1080_v24, %v2771_v26  ;;  %v1095_v34 = vmul.f32 %v1081_v28, %v2771_v26  ;;  %v1096_v42 = vmul.f32 %v1082_v4, %v2771_v26  ;;  %v1111_v43 = vor.u32 %v1666_v27, %v1665_v21 }
  0xff   : > { %v1097_v41 = vmul.f32 %v1083_v51, %v2771_v26  ;;  %v1098_v52 = vmul.f32 %v1084_v6, %v2771_v26  ;;  %v1099_v61 = vmul.f32 %v1085_v39, %v2771_v26  ;;  %v1100_v44 = vmul.f32 %v1086_v48, %v2771_v26 }
 0x100   : > { %v1101_v22 = vadd.f32 %v1094_v12, %v1068_v36  ;;  %v1102_v11 = vadd.f32 %v1095_v34, %v1069_v9  ;;  %v1103_v57 = vadd.f32 %v1096_v42, %v1070_v46  ;;  %v1113_v49 = vperm.slane %v1111_v43, 0 }
 0x101   : > { %v1104_v18 = vadd.f32 %v1097_v41, %v1071_v0  ;;  %v1105_v10 = vadd.f32 %v1098_v52, %v1072_v7  ;;  %v1106_v50 = vadd.f32 %v1099_v61, %v1073_v60  ;;  %v1107_v8 = vadd.f32 %v1100_v44, %v1074_v23  ;;  %v1671_v44 = vld [vmem:[%s1868_s29 + $0x152] ss:$8 sm:$0xf] }
 0x102   : > { %v1114_v31 = vperm.slane %v1111_v43, 1  ;;  %v1115_v24 = vperm.slane %v1111_v43, 2  ;;  %v1116_v21 = vperm.slane %v1111_v43, 3  ;;  %v1117_v27 = vperm.slane %v1111_v43, 4 }
 0x103   : > { %v1118_v28 = vperm.slane %v1111_v43, 5  ;;  %v1119_v4 = vperm.slane %v1111_v43, 6  ;;  %v1127_v51 = vmul.f32 %v1113_v49, %v2225_v47  ;;  %v1151_v6 = vor.u32 %v1668_v1, %v1667_v19  ;;  %v1669_v49 = vld [vmem:[%s1868_s29 + $0x151] ss:$8 sm:$0xf] }
 0x104   : > { %v1128_v39 = vmul.f32 %v1114_v31, %v2225_v47  ;;  %v1129_v36 = vmul.f32 %v1115_v24, %v2225_v47  ;;  %v1130_v9 = vmul.f32 %v1116_v21, %v2225_v47  ;;  %v1131_v46 = vmul.f32 %v1117_v27, %v2225_v47  ;;  %v1670_v1 = vld [vmem:[%s1868_s29 + $0x151] ss:$8 sm:$0xf0] }
 0x105   : > { %v850_v0 = vmax.f32 %v2413_v16, %v2415_v17  ;;  %v1132_v7 = vmul.f32 %v1118_v28, %v2225_v47  ;;  %v1133_v60 = vmul.f32 %v1119_v4, %v2225_v47  ;;  %v1134_v23 = vadd.f32 %v1127_v51, %v1101_v22  ;;  %v1449_v16 = vpop.permute.xlu1 %1448 }
 0x106   : > { %v1135_v48 = vadd.f32 %v1128_v39, %v1102_v11  ;;  %v1136_v12 = vadd.f32 %v1129_v36, %v1103_v57  ;;  %v1137_v34 = vadd.f32 %v1130_v9, %v1104_v18  ;;  %v1153_v42 = vperm.slane %v1151_v6, 0 }
 0x107   : > { %v1138_v43 = vadd.f32 %v1131_v46, %v1105_v10  ;;  %v1139_v41 = vadd.f32 %v1132_v7, %v1106_v50  ;;  %v2524_v52 = vadd.f32 %v1133_v60, %v1107_v8  ;;  %v1154_v61 = vperm.slane %v1151_v6, 1 }
 0x108   : > { %v2530_v19 = vmax.f32 %v844_v54, %v1134_v23  ;;  %v2535_v22 = vmax.f32 %v845_v20, %v1135_v48  ;;  %v2540_v11 = vmax.f32 %v846_v33, %v1136_v12  ;;  %v2545_v57 = vmax.f32 %v847_v2, %v1137_v34  ;;  %v1673_v23 = vld [vmem:[%s1868_s29 + $0x153] ss:$8 sm:$0xf] }
 0x109   : > { %v2552_v30 = vmax.f32 %v848_v29, %v1138_v43  ;;  %v2557_v55 = vmax.f32 %v849_v35, %v1139_v41  ;;  %v1155_v45 = vperm.slane %v1151_v6, 2  ;;  %v1156_v37 = vperm.slane %v1151_v6, 3  ;;  %v1674_v48 = vld [vmem:[%s1868_s29 + $0x153] ss:$8 sm:$0xf0] }
 0x10a   : > { %v1157_v62 = vperm.slane %v1151_v6, 4  ;;  %v1158_v54 = vperm.slane %v1151_v6, 5  ;;  %v1159_v63 = vperm.slane %v1151_v6, 6  ;;  %v1167_v15 = vmul.f32 %v1153_v42, %v2772_v40 }
 0x10b   : > { %v1168_v20 = vmul.f32 %v1154_v61, %v2772_v40  ;;  %v1169_v33 = vmul.f32 %v1155_v45, %v2772_v40  ;;  %v1170_v14 = vmul.f32 %v1156_v37, %v2772_v40  ;;  %v1177_v53 = vor.u32 %v1670_v1, %v1669_v49 }
 0x10c   : > { %v1171_v2 = vmul.f32 %v1157_v62, %v2772_v40  ;;  %v1172_v5 = vmul.f32 %v1158_v54, %v2772_v40  ;;  %v1173_v3 = vmul.f32 %v1159_v63, %v2772_v40  ;;  %v1210_v29 = vor.u32 %v1672_v38, %v1671_v44 }
 0x10d   : > { %v1179_v35 = vperm.slane %v1177_v53, 0  ;;  %v1180_v18 = vperm.slane %v1177_v53, 1  ;;  %v1181_v10 = vperm.slane %v1177_v53, 2  ;;  %v1182_v50 = vperm.slane %v1177_v53, 3 }
 0x10e   : > { %v1183_v8 = vperm.slane %v1177_v53, 4  ;;  %v1184_v31 = vperm.slane %v1177_v53, 5  ;;  %v1185_v24 = vperm.slane %v1177_v53, 6  ;;  %v1212_v21 = vperm.slane %v1210_v29, 0 }
 0x10f   : > { %v1193_v27 = vmul.f32 %v1179_v35, %v2741_v25  ;;  %v1194_v28 = vmul.f32 %v1180_v18, %v2741_v25  ;;  %v1195_v4 = vmul.f32 %v1181_v10, %v2741_v25  ;;  %v1196_v51 = vmul.f32 %v1182_v50, %v2741_v25 }
 0x110   : > { %v1197_v40 = vmul.f32 %v1183_v8, %v2741_v25  ;;  %v1198_v6 = vmul.f32 %v1184_v31, %v2741_v25  ;;  %v1199_v39 = vmul.f32 %v1185_v24, %v2741_v25  ;;  %v1213_v36 = vperm.slane %v1210_v29, 1 }
 0x111   : > { %v1200_v9 = vadd.f32 %v1193_v27, %v1167_v15  ;;  %v1201_v46 = vadd.f32 %v1194_v28, %v1168_v20  ;;  %v1202_v7 = vadd.f32 %v1195_v4, %v1169_v33  ;;  %v1203_v60 = vadd.f32 %v1196_v51, %v1170_v14  ;;  %v1675_v15 = vld [vmem:[%s1868_s29 + $0x154] ss:$8 sm:$0xf] }
 0x112   : > { %v1204_v12 = vadd.f32 %v1197_v40, %v1171_v2  ;;  %v1205_v34 = vadd.f32 %v1198_v6, %v1172_v5  ;;  %v1206_v42 = vadd.f32 %v1199_v39, %v1173_v3  ;;  %v1214_v43 = vperm.slane %v1210_v29, 2  ;;  %v1676_v2 = vld [vmem:[%s1868_s29 + $0x154] ss:$8 sm:$0xf0] }
 0x113   : > { %v1215_v41 = vperm.slane %v1210_v29, 3  ;;  %v1216_v61 = vperm.slane %v1210_v29, 4  ;;  %v1217_v44 = vperm.slane %v1210_v29, 5  ;;  %v1218_v49 = vperm.slane %v1210_v29, 6 }
 0x114   : > { %v1226_v1 = vmul.f32 %v1212_v21, %v2773_v58  ;;  %v1227_v25 = vmul.f32 %v1213_v36, %v2773_v58  ;;  %v1228_v45 = vmul.f32 %v1214_v43, %v2773_v58  ;;  %v1243_v37 = vor.u32 %v1674_v48, %v1673_v23  ;;  %v1677_v23 = vld [vmem:[%s1868_s29 + $0x155] ss:$8 sm:$0xf] }
 0x115   : > { %v1229_v38 = vmul.f32 %v1215_v41, %v2773_v58  ;;  %v1230_v62 = vmul.f32 %v1216_v61, %v2773_v58  ;;  %v1231_v54 = vmul.f32 %v1217_v44, %v2773_v58  ;;  %v1232_v63 = vmul.f32 %v1218_v49, %v2773_v58  ;;  %v1678_v48 = vld [vmem:[%s1868_s29 + $0x155] ss:$8 sm:$0xf0] }
 0x116   : > { %v1233_v20 = vadd.f32 %v1226_v1, %v1200_v9  ;;  %v1234_v33 = vadd.f32 %v1227_v25, %v1201_v46  ;;  %v1235_v14 = vadd.f32 %v1228_v45, %v1202_v7  ;;  %v1245_v53 = vperm.slane %v1243_v37, 0 }
 0x117   : > { %v1236_v5 = vadd.f32 %v1229_v38, %v1203_v60  ;;  %v1237_v3 = vadd.f32 %v1230_v62, %v1204_v12  ;;  %v1238_v29 = vadd.f32 %v1231_v54, %v1205_v34  ;;  %v1239_v35 = vadd.f32 %v1232_v63, %v1206_v42  ;;  %v1679_v63 = vld [vmem:[%s1868_s29 + $0x156] ss:$8 sm:$0xf] }
 0x118   : > { %v1246_v18 = vperm.slane %v1243_v37, 1  ;;  %v1247_v10 = vperm.slane %v1243_v37, 2  ;;  %v1248_v50 = vperm.slane %v1243_v37, 3  ;;  %v1249_v8 = vperm.slane %v1243_v37, 4 }
 0x119   : > { %v1250_v31 = vperm.slane %v1243_v37, 5  ;;  %v1251_v24 = vperm.slane %v1243_v37, 6  ;;  %v1259_v58 = vmul.f32 %v1245_v53, %v2155_v32  ;;  %v1276_v21 = vor.u32 %v1676_v2, %v1675_v15  ;;  %v1680_v53 = vld [vmem:[%s1868_s29 + $0x156] ss:$8 sm:$0xf0] }
 0x11a   : > { %v1260_v27 = vmul.f32 %v1246_v18, %v2155_v32  ;;  %v1261_v28 = vmul.f32 %v1247_v10, %v2155_v32  ;;  %v1262_v4 = vmul.f32 %v1248_v50, %v2155_v32  ;;  %v1263_v51 = vmul.f32 %v1249_v8, %v2155_v32 }
 0x11b   : > { %v1264_v40 = vmul.f32 %v1250_v31, %v2155_v32  ;;  %v1265_v6 = vmul.f32 %v1251_v24, %v2155_v32  ;;  %v1266_v39 = vadd.f32 %v1259_v58, %v1233_v20  ;;  %v1278_v36 = vperm.slane %v1276_v21, 0 }
 0x11c   : > { %v1267_v9 = vadd.f32 %v1260_v27, %v1234_v33  ;;  %v1268_v46 = vadd.f32 %v1261_v28, %v1235_v14  ;;  %v1269_v7 = vadd.f32 %v1262_v4, %v1236_v5  ;;  %v1270_v60 = vadd.f32 %v1263_v51, %v1237_v3 }
 0x11d   : > { %v1271_v12 = vadd.f32 %v1264_v40, %v1238_v29  ;;  %v1272_v34 = vadd.f32 %v1265_v6, %v1239_v35  ;;  %v1279_v42 = vperm.slane %v1276_v21, 1  ;;  %v1280_v43 = vperm.slane %v1276_v21, 2 }
 0x11e   : > { %v1281_v41 = vperm.slane %v1276_v21, 3  ;;  %v1282_v61 = vperm.slane %v1276_v21, 4  ;;  %v1283_v44 = vperm.slane %v1276_v21, 5  ;;  %v1284_v49 = vperm.slane %v1276_v21, 6 }
 0x11f   : > { %v1292_v32 = vmul.f32 %v1278_v36, %v2769_v56  ;;  %v1293_v1 = vmul.f32 %v1279_v42, %v2769_v56  ;;  %v1294_v25 = vmul.f32 %v1280_v43, %v2769_v56  ;;  %v1309_v45 = vor.u32 %v1678_v48, %v1677_v23 }
 0x120   : > { %v1295_v37 = vmul.f32 %v1281_v41, %v2769_v56  ;;  %v1296_v38 = vmul.f32 %v1282_v61, %v2769_v56  ;;  %v1297_v62 = vmul.f32 %v1283_v44, %v2769_v56  ;;  %v1298_v54 = vmul.f32 %v1284_v49, %v2769_v56 }
 0x121   : > { %v1299_v15 = vadd.f32 %v1292_v32, %v1266_v39  ;;  %v1300_v20 = vadd.f32 %v1293_v1, %v1267_v9  ;;  %v1301_v33 = vadd.f32 %v1294_v25, %v1268_v46  ;;  %v1311_v14 = vperm.slane %v1309_v45, 0 }
 0x122   : > { %v1302_v2 = vadd.f32 %v1295_v37, %v1269_v7  ;;  %v1303_v5 = vadd.f32 %v1296_v38, %v1270_v60  ;;  %v1304_v3 = vadd.f32 %v1297_v62, %v1271_v12  ;;  %v1305_v29 = vadd.f32 %v1298_v54, %v1272_v34  ;;  %v1681_v7 = vld [vmem:[%s1868_s29 + $0x157] ss:$8 sm:$0xf]  ;;  %v1683_v38 = vld [vmem:[%s1868_s29 + $0x188] ss:$8 sm:$0xf] }
 0x123   : > { %v1312_v35 = vperm.slane %v1309_v45, 1  ;;  %v1313_v18 = vperm.slane %v1309_v45, 2  ;;  %v1314_v10 = vperm.slane %v1309_v45, 3  ;;  %v1315_v50 = vperm.slane %v1309_v45, 4 }
 0x124   : > { %v1316_v8 = vperm.slane %v1309_v45, 5  ;;  %v1317_v31 = vperm.slane %v1309_v45, 6  ;;  %v1325_v56 = vmul.f32 %v1311_v14, %v2770_v59  ;;  %v1342_v24 = vor.u32 %v1680_v53, %v1679_v63  ;;  %v1682_v60 = vld [vmem:[%s1868_s29 + $0x157] ss:$8 sm:$0xf0] }
 0x125   : > { %v1326_v58 = vmul.f32 %v1312_v35, %v2770_v59  ;;  %v1327_v21 = vmul.f32 %v1313_v18, %v2770_v59  ;;  %v1328_v27 = vmul.f32 %v1314_v10, %v2770_v59  ;;  %v1329_v28 = vmul.f32 %v1315_v50, %v2770_v59 }
 0x126   : > { %v1330_v4 = vmul.f32 %v1316_v8, %v2770_v59  ;;  %v1331_v51 = vmul.f32 %v1317_v31, %v2770_v59  ;;  %v1332_v40 = vadd.f32 %v1325_v56, %v1299_v15  ;;  %v1344_v6 = vperm.slane %v1342_v24, 0 }
 0x127   : > { %v1333_v39 = vadd.f32 %v1326_v58, %v1300_v20  ;;  %v1334_v36 = vadd.f32 %v1327_v21, %v1301_v33  ;;  %v1335_v9 = vadd.f32 %v1328_v27, %v1302_v2  ;;  %v1336_v46 = vadd.f32 %v1329_v28, %v1303_v5  ;;  %v1684_v20 = vld [vmem:[%s1868_s29 + $0x188] ss:$8 sm:$0xf0] }
 0x128   : > { %v1337_v23 = vadd.f32 %v1330_v4, %v1304_v3  ;;  %v1338_v48 = vadd.f32 %v1331_v51, %v1305_v29  ;;  %v1345_v12 = vperm.slane %v1342_v24, 1  ;;  %v1346_v34 = vperm.slane %v1342_v24, 2 }
 0x129   : > { %v1347_v42 = vperm.slane %v1342_v24, 3  ;;  %v1348_v43 = vperm.slane %v1342_v24, 4  ;;  %v1349_v41 = vperm.slane %v1342_v24, 5  ;;  %v1350_v61 = vperm.slane %v1342_v24, 6 }
 0x12a   : > { %v1358_v59 = vmul.f32 %v1344_v6, %v2213_v13  ;;  %v1359_v44 = vmul.f32 %v1345_v12, %v2213_v13  ;;  %v1360_v49 = vmul.f32 %v1346_v34, %v2213_v13  ;;  %v1375_v32 = vor.u32 %v1682_v60, %v1681_v7 }
 0x12b   : > { %v1361_v1 = vmul.f32 %v1347_v42, %v2213_v13  ;;  %v1362_v25 = vmul.f32 %v1348_v43, %v2213_v13  ;;  %v1363_v45 = vmul.f32 %v1349_v41, %v2213_v13  ;;  %v1364_v37 = vmul.f32 %v1350_v61, %v2213_v13 }
 0x12c   : > { %v1365_v62 = vadd.f32 %v1358_v59, %v1332_v40  ;;  %v1366_v54 = vadd.f32 %v1359_v44, %v1333_v39  ;;  %v1367_v63 = vadd.f32 %v1360_v49, %v1334_v36  ;;  %v1377_v15 = vperm.slane %v1375_v32, 0 }
 0x12d   : > { %v1368_v33 = vadd.f32 %v1361_v1, %v1335_v9  ;;  %v1369_v14 = vadd.f32 %v1362_v25, %v1336_v46  ;;  %v1370_v53 = vadd.f32 %v1363_v45, %v1337_v23  ;;  %v1371_v2 = vadd.f32 %v1364_v37, %v1338_v48 }
 0x12e   : > { %v1378_v5 = vperm.slane %v1375_v32, 1  ;;  %v1379_v3 = vperm.slane %v1375_v32, 2  ;;  %v1380_v29 = vperm.slane %v1375_v32, 3  ;;  %v1381_v35 = vperm.slane %v1375_v32, 4 }
 0x12f   : > { %v1382_v18 = vperm.slane %v1375_v32, 5  ;;  %v1383_v10 = vperm.slane %v1375_v32, 6  ;;  %v1391_v13 = vmul.f32 %v1377_v15, %v2771_v26  ;;  %v1408_v50 = vor.u32 %v1684_v20, %v1683_v38 }
 0x130   : > { %v1392_v8 = vmul.f32 %v1378_v5, %v2771_v26  ;;  %v1393_v31 = vmul.f32 %v1379_v3, %v2771_v26  ;;  %v1394_v56 = vmul.f32 %v1380_v29, %v2771_v26  ;;  %v1395_v24 = vmul.f32 %v1381_v35, %v2771_v26 }
 0x131   : > { %v1396_v58 = vmul.f32 %v1382_v18, %v2771_v26  ;;  %v1397_v21 = vmul.f32 %v1383_v10, %v2771_v26  ;;  %v1398_v27 = vadd.f32 %v1391_v13, %v1365_v62  ;;  %v1410_v28 = vperm.slane %v1408_v50, 0 }
 0x132   : > { %v1399_v4 = vadd.f32 %v1392_v8, %v1366_v54  ;;  %v1400_v51 = vadd.f32 %v1393_v31, %v1367_v63  ;;  %v1401_v40 = vadd.f32 %v1394_v56, %v1368_v33  ;;  %v1402_v6 = vadd.f32 %v1395_v24, %v1369_v14 }
 0x133   : > { %v1403_v39 = vadd.f32 %v1396_v58, %v1370_v53  ;;  %v1404_v36 = vadd.f32 %v1397_v21, %v1371_v2  ;;  %v1411_v9 = vperm.slane %v1408_v50, 1  ;;  %v1412_v46 = vperm.slane %v1408_v50, 2 }
 0x134   : > { %v1413_v7 = vperm.slane %v1408_v50, 3  ;;  %v1414_v60 = vperm.slane %v1408_v50, 4  ;;  %v1415_v23 = vperm.slane %v1408_v50, 5  ;;  %v1416_v48 = vperm.slane %v1408_v50, 6 }
 0x135   : > { %v1147_v26 = vmax.f32 %v850_v0, %v2524_v52  ;;  %v1424_v12 = vmul.f32 %v1410_v28, %v2225_v47  ;;  %v1425_v34 = vmul.f32 %v1411_v9, %v2225_v47  ;;  %v1426_v42 = vmul.f32 %v1412_v46, %v2225_v47 }
 0x136   : > { %v1427_v43 = vmul.f32 %v1413_v7, %v2225_v47  ;;  %v1428_v41 = vmul.f32 %v1414_v60, %v2225_v47  ;;  %v1429_v61 = vmul.f32 %v1415_v23, %v2225_v47  ;;  %v1430_v59 = vmul.f32 %v1416_v48, %v2225_v47 }
 0x137   : > { %v1431_v44 = vadd.f32 %v1424_v12, %v1398_v27  ;;  %v1432_v49 = vadd.f32 %v1425_v34, %v1399_v4  ;;  %v1433_v32 = vadd.f32 %v1426_v42, %v1400_v51 }
 0x138   : > { %v1434_v17 = vadd.f32 %v1427_v43, %v1401_v40  ;;  %v1435_v0 = vadd.f32 %v1428_v41, %v1402_v6  ;;  %v1436_v52 = vadd.f32 %v1429_v61, %v1403_v39  ;;  %v1437_v1 = vadd.f32 %v1430_v59, %v1404_v36 }
 0x139   : > { %v1438_v25 = vmax.f32 %v2530_v19, %v1431_v44  ;;  %v1439_v45 = vmax.f32 %v2535_v22, %v1432_v49  ;;  %v1440_v37 = vmax.f32 %v2540_v11, %v1433_v32 }
 0x13a   : > { %v1441_v38 = vmax.f32 %v2545_v57, %v1434_v17  ;;  %v1442_v62 = vmax.f32 %v2552_v30, %v1435_v0  ;;  %v1443_v47 = vmax.f32 %v2557_v55, %v1436_v52  ;;  %v1444_v54 = vmax.f32 %v1147_v26, %v1437_v1 }
 0x13b   : > { %v1451_v63 = vadd.f32 %v1449_v16, %v1438_v25  ;;  %v1452_v15 = vadd.f32 %v1449_v16, %v1439_v45  ;;  %v1453_v20 = vadd.f32 %v1449_v16, %v1440_v37 }
 0x13c   : > { %v1454_v33 = vadd.f32 %v1449_v16, %v1441_v38  ;;  %v1455_v19 = vadd.f32 %v1449_v16, %v1442_v62  ;;  %v1456_v14 = vadd.f32 %v1449_v16, %v1443_v47  ;;  %v1457_v22 = vadd.f32 %v1449_v16, %v1444_v54 }
 0x13d   : > { %v1458_v53 = vmax.f32 %v1451_v63, 0.0  ;;  %v1459_v11 = vmax.f32 %v1452_v15, 0.0  ;;  %v1460_v2 = vmax.f32 %v1453_v20, 0.0 }
 0x13e   : > { %v1461_v57 = vmax.f32 %v1454_v33, 0.0  ;;  %v1462_v5 = vmax.f32 %v1455_v19, 0.0  ;;  %v1463_v30 = vmax.f32 %v1456_v14, 0.0  ;;  %v1464_v55 = vmax.f32 %v1457_v22, 0.0 }
 0x13f   : > { %1465 = vst [vmem:[%s226_s9] sm:$0xff] %v1458_v53 }
 0x140   : > { %1466 = vst [vmem:[%s226_s9 + $0x8] sm:$0xff] %v1459_v11 }
 0x141   : > { %1467 = vst [vmem:[%s226_s9 + $0x10] sm:$0xff] %v1460_v2 }
 0x142   : > { %1468 = vst [vmem:[%s226_s9 + $0x18] sm:$0xff] %v1461_v57 }
 0x143   : > { %1469 = vst [vmem:[%s226_s9 + $0x20] sm:$0xff] %v1462_v5 }
 0x144   : > { %1470 = vst [vmem:[%s226_s9 + $0x28] sm:$0xff] %v1463_v30 }
 0x145   : > { %1471 = vst [vmem:[%s226_s9 + $0x30] sm:$0xff] %v1464_v55 }
 0x146 PF: > { %s13_s16 = sadd.s32 1, %s1788_s16   ;;  %s2774_s12 = smov %s1780_s14 }
 0x147   : > { %p10_p7 = scmp.ge.s32.totalorder %s13_s16, 10   ;;  %s2775_s13 = smov %s1784_s15 }
 0x148   : > { %s2776_s14 = smov %s2779_s17  ;;  %s2777_s15 = smov %s2783_s18 }
 0x149   :  { %12 = sbr.rel (!%p10_p7) target bundleno = 3 (0x3), region = 103 }

// kernel: propositional_primitive_forward.3
= control target key start
LH: loop header
LB: loop body
LE: loop exit
PB: predicated region body
PF: predicated region fallthrough
CT: control target
= control target key end

     0   :  { %s12051_s15 = smov 0   ;;  %s12053_s16 = smov 0   ;;  %s14236_s0 = inlined_call_operand.vmem [shape: f32[2,28672], index: 0, kind: input, shape index: {}]   ;;  %s14237_s1 = inlined_call_operand.vmem [shape: bf16[28672,256], index: 1, kind: input, shape index: {}]   ;;  %s14238_s2 = inlined_call_operand.vmem [shape: f32[1,256], index: 2, kind: input, shape index: {}]   ;;  %s14239_s3 = inlined_call_operand.vmem [shape: f32[1,256], index: 3, kind: input, shape index: {}]   ;;  %s14240_s4 = inlined_call_operand.vmem [shape: f32[2,128], index: 4, kind: output, shape index: {}]  }
   0x1   :  { %s12055_s17 = smov 0  }
   0x2 LB: > { %s23_s18 = sadd.s32 1, %s12019_s16  ;;  %p7486_p0 = scmp.ge.s32.totalorder %s12023_s17, 1  ;;  %s12023_s17 = sphi %s12055_s17, %s14_s17   ;;  %s12019_s16 = sphi %s12053_s16, %s14302_s16   ;;  %s12015_s15 = sphi %s12051_s15, %s14301_s15  }
   0x3   : > { %p24_p1 = scmp.ge.s32.totalorder %s23_s18, 4  ;;  %p214_p2 = scmp.lt.s32.totalorder %s12023_s17, 5 }
   0x5   : > { %s14304_s18 = smov (%p24_p1, %s23_s18), 0  ;;  %p215_p3 = pnand %p7486_p0, %p214_p2 }
   0x7   : > { %218 = sbr.rel (%p215_p3) target bundleno = 1205 (0x4b5), region = 36 }
   0xc   : > { %s257_s19 = smul.u32 56, %s12015_s15  ;;  %p7490_p6 = scmp.ne.s32.totalorder %s12015_s15, 0 }
   0xd   : > { %s263_s20 = smul.u32 896, %s12015_s15 }
   0xe   : > { %p258_p4 = scmp.lt.s32.totalorder %s257_s19, 223 }
   0xf   : > { %p265_p5 = scmp.lt.s32.totalorder %s263_s20, 3583  ;;  %292 = sbr.rel (%p7490_p6) target bundleno = 22 (0x16), region = 40 }
  0x10   : > { %s14306_s19 = smov (!%p258_p4, %s257_s19), 223 }
  0x11   : > { %s14308_s20 = smov (!%p265_p5, %s263_s20), 3583  ;;  %s7487_s21 = sshll.u32 %s14306_s19, 1 }
  0x12   : > { %s12076_s24 = scalar_lea.vmem %s14236_s0, %s7487_s21  ;;  %s11079_s25 = sshll.u32 %s14308_s20, 3 }
  0x13   : > { %s12081_s28 = scalar_lea.vmem %s14237_s1, %s11079_s25 }
  0x14   : > { %v12025_v0 = vmov 0.0  }
  0x15   : > { %293 = vst [vmem:[#allocation2] sm:$0xf] %v12025_v0 }
  0x16 PF: > { %v7549_v1 = vld [vmem:[%s12081_s28 + $0x70] sm:$0xf]  ;;  %v11095_v2 = vld [vmem:[%s12081_s28 + $0x74] sm:$0xf0]  ;;  %v7541_v12 = vld [vmem:[%s12081_s28 + $0x60] sm:$0xf] }
  0x17   : > { %v7613_v3 = vld [vmem:[%s12081_s28 + $0xf0] sm:$0xf]  ;;  %v7550_v4 = vor.u32 %v11095_v2, %v7549_v1  ;;  %v11111_v5 = vld [vmem:[%s12081_s28 + $0xf4] sm:$0xf0]  ;;  %v11093_v14 = vld [vmem:[%s12081_s28 + $0x64] sm:$0xf0] }
  0x18   : > { %v7677_v6 = vld [vmem:[%s12081_s28 + $0x170] sm:$0xf]  ;;  %v11127_v7 = vld [vmem:[%s12081_s28 + $0x174] sm:$0xf0]  ;;  %v7614_v8 = vor.u32 %v11111_v5, %v7613_v3  ;;  %v7605_v15 = vld [vmem:[%s12081_s28 + $0xe0] sm:$0xf]  ;;  %v7542_v17 = vor.u32 %v11093_v14, %v7541_v12 }
  0x19   : > { %v7678_v9 = vor.u32 %v11127_v7, %v7677_v6  ;;  %v7741_v10 = vld [vmem:[%s12081_s28 + $0x1f0] sm:$0xf]  ;;  %v11143_v11 = vld [vmem:[%s12081_s28 + $0x1f4] sm:$0xf0]  ;;  %5882 = vmatpush.bf16.msra.mxu0 %v7550_v4  ;;  %v11109_v16 = vld [vmem:[%s12081_s28 + $0xe4] sm:$0xf0] }
  0x1a   : > { %v7742_v13 = vor.u32 %v11143_v11, %v7741_v10  ;;  %5895 = vmatpush.bf16.msra.mxu1 %v7614_v8  ;;  %v7606_v18 = vor.u32 %v11109_v16, %v7605_v15  ;;  %v7669_v19 = vld [vmem:[%s12081_s28 + $0x160] sm:$0xf]  ;;  %v11125_v20 = vld [vmem:[%s12081_s28 + $0x164] sm:$0xf0]  ;;  %v7533_v24 = vld [vmem:[%s12081_s28 + $0x50] sm:$0xf] }
  0x1b   : > { %5908 = vmatpush.bf16.msra.mxu2 %v7678_v9  ;;  %v7733_v21 = vld [vmem:[%s12081_s28 + $0x1e0] sm:$0xf]  ;;  %v7670_v22 = vor.u32 %v11125_v20, %v7669_v19  ;;  %v11141_v23 = vld [vmem:[%s12081_s28 + $0x1e4] sm:$0xf0]  ;;  %v11091_v25 = vld [vmem:[%s12081_s28 + $0x54] sm:$0xf0] }
  0x1c   : > { %5921 = vmatpush.bf16.msra.mxu3 %v7742_v13  ;;  %v7734_v26 = vor.u32 %v11141_v23, %v7733_v21  ;;  %v7597_v27 = vld [vmem:[%s12081_s28 + $0xd0] sm:$0xf]  ;;  %v11107_v28 = vld [vmem:[%s12081_s28 + $0xd4] sm:$0xf0]  ;;  %v7534_v30 = vor.u32 %v11091_v25, %v7533_v24  ;;  %v7525_v36 = vld [vmem:[%s12081_s28 + $0x40] sm:$0xf] }
  0x1d   : > { %v7661_v29 = vld [vmem:[%s12081_s28 + $0x150] sm:$0xf]  ;;  %5883 = vmatpush.bf16.msra.mxu0 %v7542_v17  ;;  %v11123_v31 = vld [vmem:[%s12081_s28 + $0x154] sm:$0xf0]  ;;  %v7598_v34 = vor.u32 %v11107_v28, %v7597_v27  ;;  %v11089_v37 = vld [vmem:[%s12081_s28 + $0x44] sm:$0xf0] }
  0x1e   : > { %v7725_v32 = vld [vmem:[%s12081_s28 + $0x1d0] sm:$0xf]  ;;  %v11139_v33 = vld [vmem:[%s12081_s28 + $0x1d4] sm:$0xf0]  ;;  %5896 = vmatpush.bf16.msra.mxu1 %v7606_v18  ;;  %v7662_v35 = vor.u32 %v11123_v31, %v7661_v29  ;;  %v7589_v38 = vld [vmem:[%s12081_s28 + $0xc0] sm:$0xf]  ;;  %v7526_v45 = vor.u32 %v11089_v37, %v7525_v36 }
  0x1f   : > { %5909 = vmatpush.bf16.msra.mxu2 %v7670_v22  ;;  %v7726_v39 = vor.u32 %v11139_v33, %v7725_v32  ;;  %v11105_v40 = vld [vmem:[%s12081_s28 + $0xc4] sm:$0xf0]  ;;  %v7653_v41 = vld [vmem:[%s12081_s28 + $0x140] sm:$0xf]  ;;  %v7517_v48 = vld [vmem:[%s12081_s28 + $0x30] sm:$0xf] }
  0x20   : > { %5922 = vmatpush.bf16.msra.mxu3 %v7734_v26  ;;  %v11121_v42 = vld [vmem:[%s12081_s28 + $0x144] sm:$0xf0]  ;;  %v7717_v43 = vld [vmem:[%s12081_s28 + $0x1c0] sm:$0xf]  ;;  %v7590_v46 = vor.u32 %v11105_v40, %v7589_v38  ;;  %v11087_v49 = vld [vmem:[%s12081_s28 + $0x34] sm:$0xf0] }
  0x21   : > { %v11137_v44 = vld [vmem:[%s12081_s28 + $0x1c4] sm:$0xf0]  ;;  %5884 = vmatpush.bf16.msra.mxu0 %v7534_v30  ;;  %v7654_v47 = vor.u32 %v11121_v42, %v7653_v41  ;;  %v7581_v50 = vld [vmem:[%s12081_s28 + $0xb0] sm:$0xf]  ;;  %v11103_v52 = vld [vmem:[%s12081_s28 + $0xb4] sm:$0xf0]  ;;  %v7518_v57 = vor.u32 %v11087_v49, %v7517_v48 }
  0x22   : > { %5897 = vmatpush.bf16.msra.mxu1 %v7598_v34  ;;  %v7718_v51 = vor.u32 %v11137_v44, %v7717_v43  ;;  %v7645_v53 = vld [vmem:[%s12081_s28 + $0x130] sm:$0xf]  ;;  %v11119_v54 = vld [vmem:[%s12081_s28 + $0x134] sm:$0xf0]  ;;  %v7582_v58 = vor.u32 %v11103_v52, %v7581_v50  ;;  %v7509_v60 = vld [vmem:[%s12081_s28 + $0x20] sm:$0xf] }
  0x23   : > { %5910 = vmatpush.bf16.msra.mxu2 %v7662_v35  ;;  %v7709_v55 = vld [vmem:[%s12081_s28 + $0x1b0] sm:$0xf]  ;;  %v11135_v56 = vld [vmem:[%s12081_s28 + $0x1b4] sm:$0xf0]  ;;  %v7646_v59 = vor.u32 %v11119_v54, %v7645_v53  ;;  %v11085_v61 = vld [vmem:[%s12081_s28 + $0x24] sm:$0xf0] }
  0x24   : > { %5923 = vmatpush.bf16.msra.mxu3 %v7726_v39  ;;  %v7573_v62 = vld [vmem:[%s12081_s28 + $0xa0] sm:$0xf]  ;;  %v7710_v63 = vor.u32 %v11135_v56, %v7709_v55  ;;  %v11101_v0 = vld [vmem:[%s12081_s28 + $0xa4] sm:$0xf0]  ;;  %v7510_v5 = vor.u32 %v11085_v61, %v7509_v60  ;;  %v7501_v8 = vld [vmem:[%s12081_s28 + $0x10] sm:$0xf] }
  0x25   : > { %5885 = vmatpush.bf16.msra.mxu0 %v7526_v45  ;;  %v7637_v1 = vld [vmem:[%s12081_s28 + $0x120] sm:$0xf]  ;;  %v11117_v2 = vld [vmem:[%s12081_s28 + $0x124] sm:$0xf0]  ;;  %v7574_v6 = vor.u32 %v11101_v0, %v7573_v62  ;;  %v11083_v9 = vld [vmem:[%s12081_s28 + $0x14] sm:$0xf0] }
  0x26   : > { %5898 = vmatpush.bf16.msra.mxu1 %v7590_v46  ;;  %v7701_v3 = vld [vmem:[%s12081_s28 + $0x1a0] sm:$0xf]  ;;  %v11133_v4 = vld [vmem:[%s12081_s28 + $0x1a4] sm:$0xf0]  ;;  %v7638_v7 = vor.u32 %v11117_v2, %v7637_v1  ;;  %v7565_v10 = vld [vmem:[%s12081_s28 + $0x90] sm:$0xf]  ;;  %v7502_v17 = vor.u32 %v11083_v9, %v7501_v8 }
  0x27   : > { %5911 = vmatpush.bf16.msra.mxu2 %v7654_v47  ;;  %v7702_v11 = vor.u32 %v11133_v4, %v7701_v3  ;;  %v11099_v12 = vld [vmem:[%s12081_s28 + $0x94] sm:$0xf0]  ;;  %v7629_v13 = vld [vmem:[%s12081_s28 + $0x110] sm:$0xf]  ;;  %v7493_v18 = vld [vmem:[%s12081_s28] sm:$0xf] }
  0x28   : > { %5924 = vmatpush.bf16.msra.mxu3 %v7718_v51  ;;  %v11115_v14 = vld [vmem:[%s12081_s28 + $0x114] sm:$0xf0]  ;;  %v7693_v15 = vld [vmem:[%s12081_s28 + $0x190] sm:$0xf]  ;;  %v11081_v19 = vld [vmem:[%s12081_s28 + $0x4] sm:$0xf0]  ;;  %v7566_v20 = vor.u32 %v11099_v12, %v7565_v10 }
  0x29   : > { %5886 = vmatpush.bf16.msra.mxu0 %v7518_v57  ;;  %v11131_v16 = vld [vmem:[%s12081_s28 + $0x194] sm:$0xf0]  ;;  %v7630_v21 = vor.u32 %v11115_v14, %v7629_v13  ;;  %v7557_v22 = vld [vmem:[%s12081_s28 + $0x80] sm:$0xf]  ;;  %v11097_v23 = vld [vmem:[%s12081_s28 + $0x84] sm:$0xf0]  ;;  %v7494_v32 = vor.u32 %v11081_v19, %v7493_v18 }
  0x2a   : > { %5899 = vmatpush.bf16.msra.mxu1 %v7582_v58  ;;  %v7621_v24 = vld [vmem:[%s12081_s28 + $0x100] sm:$0xf]  ;;  %v7694_v25 = vor.u32 %v11131_v16, %v7693_v15  ;;  %v11113_v26 = vld [vmem:[%s12081_s28 + $0x104] sm:$0xf0]  ;;  %v7805_v29 = vld [vmem:[%s12081_s28 + $0x270] sm:$0xf]  ;;  %v7558_v36 = vor.u32 %v11097_v23, %v7557_v22 }
  0x2b   : > { %5912 = vmatpush.bf16.msra.mxu2 %v7646_v59  ;;  %v7685_v27 = vld [vmem:[%s12081_s28 + $0x180] sm:$0xf]  ;;  %v11129_v28 = vld [vmem:[%s12081_s28 + $0x184] sm:$0xf0]  ;;  %v11159_v30 = vld [vmem:[%s12081_s28 + $0x274] sm:$0xf0]  ;;  %v7622_v37 = vor.u32 %v11113_v26, %v7621_v24 }
  0x2c   : > { %5925 = vmatpush.bf16.msra.mxu3 %v7710_v63  ;;  %v7869_v31 = vld [vmem:[%s12081_s28 + $0x2f0] sm:$0xf]  ;;  %v11175_v33 = vld [vmem:[%s12081_s28 + $0x2f4] sm:$0xf0]  ;;  %v7686_v40 = vor.u32 %v11129_v28, %v7685_v27  ;;  %v7806_v41 = vor.u32 %v11159_v30, %v7805_v29  ;;  %v7797_v44 = vld [vmem:[%s12081_s28 + $0x260] sm:$0xf] }
  0x2d   : > { %5887 = vmatpush.bf16.msra.mxu0 %v7510_v5  ;;  %v7933_v34 = vld [vmem:[%s12081_s28 + $0x370] sm:$0xf]  ;;  %v11191_v35 = vld [vmem:[%s12081_s28 + $0x374] sm:$0xf0]  ;;  %v7870_v42 = vor.u32 %v11175_v33, %v7869_v31  ;;  %v11157_v45 = vld [vmem:[%s12081_s28 + $0x264] sm:$0xf0] }
  0x2e   : > { %5900 = vmatpush.bf16.msra.mxu1 %v7574_v6  ;;  %v7997_v38 = vld [vmem:[%s12081_s28 + $0x3f0] sm:$0xf]  ;;  %v11207_v39 = vld [vmem:[%s12081_s28 + $0x3f4] sm:$0xf0]  ;;  %v7934_v43 = vor.u32 %v11191_v35, %v7933_v34  ;;  %v7861_v46 = vld [vmem:[%s12081_s28 + $0x2e0] sm:$0xf]  ;;  %v7798_v53 = vor.u32 %v11157_v45, %v7797_v44 }
  0x2f   : > { %5913 = vmatpush.bf16.msra.mxu2 %v7638_v7  ;;  %v7998_v47 = vor.u32 %v11207_v39, %v7997_v38  ;;  %v11173_v48 = vld [vmem:[%s12081_s28 + $0x2e4] sm:$0xf0]  ;;  %v7925_v49 = vld [vmem:[%s12081_s28 + $0x360] sm:$0xf]  ;;  %v7789_v54 = vld [vmem:[%s12081_s28 + $0x250] sm:$0xf] }
  0x30   : > { %5926 = vmatpush.bf16.msra.mxu3 %v7702_v11  ;;  %v11189_v50 = vld [vmem:[%s12081_s28 + $0x364] sm:$0xf0]  ;;  %v7989_v51 = vld [vmem:[%s12081_s28 + $0x3e0] sm:$0xf]  ;;  %v11155_v55 = vld [vmem:[%s12081_s28 + $0x254] sm:$0xf0]  ;;  %v7862_v56 = vor.u32 %v11173_v48, %v7861_v46 }
  0x31   : > { %5888 = vmatpush.bf16.msra.mxu0 %v7502_v17  ;;  %v11205_v52 = vld [vmem:[%s12081_s28 + $0x3e4] sm:$0xf0]  ;;  %v7926_v57 = vor.u32 %v11189_v50, %v7925_v49  ;;  %v7853_v58 = vld [vmem:[%s12081_s28 + $0x2d0] sm:$0xf]  ;;  %v11171_v59 = vld [vmem:[%s12081_s28 + $0x2d4] sm:$0xf0]  ;;  %v7790_v2 = vor.u32 %v11155_v55, %v7789_v54 }
  0x32   : > { %5901 = vmatpush.bf16.msra.mxu1 %v7566_v20  ;;  %v295_v60 = vld [vmem:[%s12076_s24] sm:$0xff]  ;;  %v7990_v61 = vor.u32 %v11205_v52, %v7989_v51  ;;  %v7917_v62 = vld [vmem:[%s12081_s28 + $0x350] sm:$0xf]  ;;  %v11187_v63 = vld [vmem:[%s12081_s28 + $0x354] sm:$0xf0]  ;;  %v7854_v4 = vor.u32 %v11171_v59, %v7853_v58  ;;  %vm7341_vm0 = vcmask 1041408  }
  0x33   : > { %5914 = vmatpush.bf16.msra.mxu2 %v7630_v21  ;;  %323 = vst [vmem:[#allocation1] ss:$4 sm:$0xff] %v295_v60  ;;  %v7981_v0 = vld [vmem:[%s12081_s28 + $0x3d0] sm:$0xf]  ;;  %v11203_v1 = vld [vmem:[%s12081_s28 + $0x3d4] sm:$0xf0]  ;;  %v7918_v5 = vor.u32 %v11187_v63, %v7917_v62 }
  0x34   : > { %5927 = vmatpush.bf16.msra.mxu3 %v7694_v25  ;;  %v7781_v3 = vld [vmem:[%s12081_s28 + $0x240] sm:$0xf]  ;;  %v11153_v6 = vld [vmem:[%s12081_s28 + $0x244] sm:$0xf0]  ;;  %v7982_v9 = vor.u32 %v11203_v1, %v7981_v0  ;;  %v7773_v14 = vld [vmem:[%s12081_s28 + $0x230] sm:$0xf] }
  0x35   : > { %5889 = vmatpush.bf16.msra.mxu0 %v7494_v32  ;;  %v7845_v7 = vld [vmem:[%s12081_s28 + $0x2c0] sm:$0xf]  ;;  %v11169_v8 = vld [vmem:[%s12081_s28 + $0x2c4] sm:$0xf0]  ;;  %v11151_v15 = vld [vmem:[%s12081_s28 + $0x234] sm:$0xf0]  ;;  %v7782_v16 = vor.u32 %v11153_v6, %v7781_v3 }
  0x36   : > { %5902 = vmatpush.bf16.msra.mxu1 %v7558_v36  ;;  %v7909_v10 = vld [vmem:[%s12081_s28 + $0x340] sm:$0xf]  ;;  %v11185_v11 = vld [vmem:[%s12081_s28 + $0x344] sm:$0xf0]  ;;  %v7837_v17 = vld [vmem:[%s12081_s28 + $0x2b0] sm:$0xf]  ;;  %v7846_v22 = vor.u32 %v11169_v8, %v7845_v7  ;;  %v7774_v35 = vor.u32 %v11151_v15, %v7773_v14 }
  0x37   : > { %5915 = vmatpush.bf16.msra.mxu2 %v7622_v37  ;;  %v7973_v12 = vld [vmem:[%s12081_s28 + $0x3c0] sm:$0xf]  ;;  %v11201_v13 = vld [vmem:[%s12081_s28 + $0x3c4] sm:$0xf0]  ;;  %v11167_v18 = vld [vmem:[%s12081_s28 + $0x2b4] sm:$0xf0]  ;;  %v7910_v23 = vor.u32 %v11185_v11, %v7909_v10 }
  0x38   : > { %5928 = vmatpush.bf16.msra.mxu3 %v7686_v40  ;;  %v7901_v19 = vld [vmem:[%s12081_s28 + $0x330] sm:$0xf]  ;;  %v11183_v20 = vld [vmem:[%s12081_s28 + $0x334] sm:$0xf0]  ;;  %v7974_v26 = vor.u32 %v11201_v13, %v7973_v12  ;;  %v7838_v36 = vor.u32 %v11167_v18, %v7837_v17  ;;  %v7765_v38 = vld [vmem:[%s12081_s28 + $0x220] sm:$0xf] }
  0x39   : > { %5934 = vmatpush.bf16.msrb.mxu0 %v7806_v41  ;;  %v297_v21 = vld [vmem:[%s12076_s24 + $0x10] sm:$0xff]  ;;  %v11199_v32 = vld [vmem:[%s12081_s28 + $0x3b4] sm:$0xf0]  ;;  %v7902_v37 = vor.u32 %v11183_v20, %v7901_v19  ;;  %v11149_v39 = vld [vmem:[%s12081_s28 + $0x224] sm:$0xf0]  ;;  %p11075_p7 = scmp.ne.s32.totalorder %s12015_s15, 3 }
  0x3a   : > { %5947 = vmatpush.bf16.msrb.mxu1 %v7870_v42  ;;  %v328_v24 = vld.sshfl [vmem:[#allocation1 + $0x10] sm:$0xff pattern:$0x73625140]  ;;  %v326_v25 = vld.sshfl [vmem:[#allocation1] sm:$0xff pattern:$0x73625140] }
  0x3b   : > { %5960 = vmatpush.bf16.msrb.mxu2 %v7934_v43  ;;  %v12188_v27 = vpack.c.bf16 %v328_v24, %v328_v24  ;;  %v12190_v28 = vpack.c.bf16 %v326_v25, %v326_v25  ;;  %v329_v29 = vld.sshfl [vmem:[#allocation1 + $0x18] sm:$0xff pattern:$0x73625140]  ;;  %v327_v30 = vld.sshfl [vmem:[#allocation1 + $0x8] sm:$0xff pattern:$0x73625140] }
  0x3c   : > { %5973 = vmatpush.bf16.msrb.mxu3 %v7998_v47  ;;  %v7965_v31 = vld [vmem:[%s12081_s28 + $0x3b0] sm:$0xf]  ;;  %v12194_v33 = vpack.c.bf16 %v329_v29, %v329_v29  ;;  %334 = vst [vmem:[#allocation1] ss:$4 sm:$0xff] %v297_v21  ;;  %v12196_v34 = vpack.c.bf16 %v327_v30, %v327_v30  ;;  %v7829_v40 = vld [vmem:[%s12081_s28 + $0x2a0] sm:$0xf]  ;;  %v7766_v47 = vor.u32 %v11149_v39, %v7765_v38 }
  0x3d   : > { %5935 = vmatpush.bf16.msrb.mxu0 %v7798_v53  ;;  %5916 = vmatmul.bf16.vlgmr.msra.gmra.mxu2 %v12188_v27  ;;  %v7966_v41 = vor.u32 %v11199_v32, %v7965_v31  ;;  %v11165_v42 = vld [vmem:[%s12081_s28 + $0x2a4] sm:$0xf0]  ;;  %v7893_v43 = vld [vmem:[%s12081_s28 + $0x320] sm:$0xf]  ;;  %v7757_v48 = vld [vmem:[%s12081_s28 + $0x210] sm:$0xf] }
  0x3e   : > { %5948 = vmatpush.bf16.msrb.mxu1 %v7862_v56  ;;  %v11181_v44 = vld [vmem:[%s12081_s28 + $0x324] sm:$0xf0]  ;;  %5890 = vmatmul.bf16.vlgmr.msra.gmra.mxu0 %v12190_v28  ;;  %v7957_v45 = vld [vmem:[%s12081_s28 + $0x3a0] sm:$0xf]  ;;  %v11147_v49 = vld [vmem:[%s12081_s28 + $0x214] sm:$0xf0]  ;;  %v7830_v50 = vor.u32 %v11165_v42, %v7829_v40 }
  0x3f   : > { %5961 = vmatpush.bf16.msrb.mxu2 %v7926_v57  ;;  %v11197_v46 = vld [vmem:[%s12081_s28 + $0x3a4] sm:$0xf0]  ;;  %5929 = vmatmul.bf16.vlgmr.msra.gmra.mxu3 %v12194_v33  ;;  %v7894_v51 = vor.u32 %v11181_v44, %v7893_v43  ;;  %v7821_v52 = vld [vmem:[%s12081_s28 + $0x290] sm:$0xf]  ;;  %v11163_v53 = vld [vmem:[%s12081_s28 + $0x294] sm:$0xf0] }
  0x40   : > { %5974 = vmatpush.bf16.msrb.mxu3 %v7990_v61  ;;  %5903 = vmatmul.bf16.vlgmr.msra.gmra.mxu1 %v12196_v34  ;;  %v7885_v54 = vld [vmem:[%s12081_s28 + $0x310] sm:$0xf]  ;;  %v7958_v55 = vor.u32 %v11197_v46, %v7957_v45  ;;  %v11179_v56 = vld [vmem:[%s12081_s28 + $0x314] sm:$0xf0]  ;;  %v296_v58 = vld [vmem:[%s12076_s24 + $0x8] sm:$0xff]  ;;  %v7758_v61 = vor.u32 %v11147_v49, %v7757_v48  ;;  %v7822_v1 = vor.u32 %v11163_v53, %v7821_v52 }
  0x41   : > { %5936 = vmatpush.bf16.msrb.mxu0 %v7790_v2  ;;  %v7949_v57 = vld [vmem:[%s12081_s28 + $0x390] sm:$0xf]  ;;  %v11195_v59 = vld [vmem:[%s12081_s28 + $0x394] sm:$0xf0]  ;;  %v7749_v60 = vld [vmem:[%s12081_s28 + $0x200] sm:$0xf]  ;;  %v7886_v2 = vor.u32 %v11179_v56, %v7885_v54 }
  0x42   : > { %5949 = vmatpush.bf16.msrb.mxu1 %v7854_v4  ;;  %325 = vst [vmem:[#allocation1 + $0x20] ss:$4 sm:$0xff] %v296_v58  ;;  %v11145_v62 = vld [vmem:[%s12081_s28 + $0x204] sm:$0xf0]  ;;  %v7813_v63 = vld [vmem:[%s12081_s28 + $0x280] sm:$0xf]  ;;  %v7950_v6 = vor.u32 %v11195_v59, %v7949_v57 }
  0x43   : > { %5962 = vmatpush.bf16.msrb.mxu2 %v7918_v5  ;;  %v11161_v0 = vld [vmem:[%s12081_s28 + $0x284] sm:$0xf0]  ;;  %v7877_v3 = vld [vmem:[%s12081_s28 + $0x300] sm:$0xf]  ;;  %v8061_v8 = vld [vmem:[%s12081_s28 + $0x470] sm:$0xf]  ;;  %v7750_v13 = vor.u32 %v11145_v62, %v7749_v60 }
  0x44   : > { %5975 = vmatpush.bf16.msrb.mxu3 %v7982_v9  ;;  %v11177_v4 = vld [vmem:[%s12081_s28 + $0x304] sm:$0xf0]  ;;  %v7941_v5 = vld [vmem:[%s12081_s28 + $0x380] sm:$0xf]  ;;  %v11223_v9 = vld [vmem:[%s12081_s28 + $0x474] sm:$0xf0]  ;;  %v7814_v17 = vor.u32 %v11161_v0, %v7813_v63 }
  0x45   : > { %5937 = vmatpush.bf16.msrb.mxu0 %v7782_v16  ;;  %v11193_v7 = vld [vmem:[%s12081_s28 + $0x384] sm:$0xf0]  ;;  %v8125_v10 = vld [vmem:[%s12081_s28 + $0x4f0] sm:$0xf]  ;;  %v11239_v11 = vld [vmem:[%s12081_s28 + $0x4f4] sm:$0xf0]  ;;  %v7878_v18 = vor.u32 %v11177_v4, %v7877_v3 }
  0x46   : > { %5950 = vmatpush.bf16.msrb.mxu1 %v7846_v22  ;;  %v8189_v12 = vld [vmem:[%s12081_s28 + $0x570] sm:$0xf]  ;;  %v11255_v14 = vld [vmem:[%s12081_s28 + $0x574] sm:$0xf0]  ;;  %v8053_v19 = vld [vmem:[%s12081_s28 + $0x460] sm:$0xf]  ;;  %v7942_v22 = vor.u32 %v11193_v7, %v7941_v5  ;;  %v8126_v30 = vor.u32 %v11239_v11, %v8125_v10 }
  0x47   : > { %5963 = vmatpush.bf16.msrb.mxu2 %v7910_v23  ;;  %v8253_v15 = vld [vmem:[%s12081_s28 + $0x5f0] sm:$0xf]  ;;  %v11271_v16 = vld [vmem:[%s12081_s28 + $0x5f4] sm:$0xf0]  ;;  %v11221_v20 = vld [vmem:[%s12081_s28 + $0x464] sm:$0xf0]  ;;  %v8062_v23 = vor.u32 %v11223_v9, %v8061_v8  ;;  %v8190_v31 = vor.u32 %v11255_v14, %v8189_v12 }
  0x48   : > { %5976 = vmatpush.bf16.msrb.mxu3 %v7974_v26  ;;  %v298_v21 = vld [vmem:[%s12076_s24 + $0x18] sm:$0xff]  ;;  %v8117_v24 = vld [vmem:[%s12081_s28 + $0x4e0] sm:$0xf]  ;;  %v11237_v25 = vld [vmem:[%s12081_s28 + $0x4e4] sm:$0xf0]  ;;  %v8054_v44 = vor.u32 %v11221_v20, %v8053_v19 }
  0x49   : > { %5938 = vmatpush.bf16.msrb.mxu0 %v7774_v35  ;;  %v332_v26 = vld.sshfl [vmem:[#allocation1 + $0x30] sm:$0xff pattern:$0x73625140]  ;;  %v330_v29 = vld.sshfl [vmem:[#allocation1 + $0x20] sm:$0xff pattern:$0x73625140]  ;;  %v8118_v46 = vor.u32 %v11237_v25, %v8117_v24 }
  0x4a   : > { %5951 = vmatpush.bf16.msrb.mxu1 %v7838_v36  ;;  %v333_v32 = vld.sshfl [vmem:[#allocation1 + $0x38] sm:$0xff pattern:$0x73625140]  ;;  %v331_v35 = vld.sshfl [vmem:[#allocation1 + $0x28] sm:$0xff pattern:$0x73625140]  ;;  %v8254_v36 = vor.u32 %v11271_v16, %v8253_v15  ;;  %v12242_v39 = vpack.c.bf16 %v332_v26, %v332_v26  ;;  %v12246_v42 = vpack.c.bf16 %v330_v29, %v330_v29 }
  0x4b   : > { %5964 = vmatpush.bf16.msrb.mxu2 %v7902_v37  ;;  %v8181_v37 = vld [vmem:[%s12081_s28 + $0x560] sm:$0xf]  ;;  %v11253_v38 = vld [vmem:[%s12081_s28 + $0x564] sm:$0xf0]  ;;  %335 = vst [vmem:[#allocation1 + $0x20] ss:$4 sm:$0xff] %v298_v21  ;;  %v12248_v43 = vpack.c.bf16 %v333_v32, %v333_v32  ;;  %v12250_v45 = vpack.c.bf16 %v331_v35, %v331_v35 }
  0x4c   : > { %5977 = vmatpush.bf16.msrb.mxu3 %v7966_v41  ;;  %v8245_v40 = vld [vmem:[%s12081_s28 + $0x5e0] sm:$0xf]  ;;  %v11269_v41 = vld [vmem:[%s12081_s28 + $0x5e4] sm:$0xf0]  ;;  %v8045_v48 = vld [vmem:[%s12081_s28 + $0x450] sm:$0xf] }
  0x4d   : > { %5939 = vmatpush.bf16.msrb.mxu0 %v7766_v47  ;;  %v8182_v47 = vor.u32 %v11253_v38, %v8181_v37  ;;  %v11219_v49 = vld [vmem:[%s12081_s28 + $0x454] sm:$0xf0]  ;;  %v8173_v53 = vld [vmem:[%s12081_s28 + $0x550] sm:$0xf]  ;;  %v8037_v60 = vld [vmem:[%s12081_s28 + $0x440] sm:$0xf] }
  0x4e   : > { %5952 = vmatpush.bf16.msrb.mxu1 %v7830_v50  ;;  %v8109_v50 = vld [vmem:[%s12081_s28 + $0x4d0] sm:$0xf]  ;;  %v11235_v52 = vld [vmem:[%s12081_s28 + $0x4d4] sm:$0xf0]  ;;  %v8046_v57 = vor.u32 %v11219_v49, %v8045_v48  ;;  %v8101_v62 = vld [vmem:[%s12081_s28 + $0x4c0] sm:$0xf] }
  0x4f   : > { %5965 = vmatpush.bf16.msrb.mxu2 %v7894_v51  ;;  %v8246_v51 = vor.u32 %v11269_v41, %v8245_v40  ;;  %v11251_v54 = vld [vmem:[%s12081_s28 + $0x554] sm:$0xf0]  ;;  %v8110_v58 = vor.u32 %v11235_v52, %v8109_v50  ;;  %v11233_v0 = vld [vmem:[%s12081_s28 + $0x4c4] sm:$0xf0]  ;;  %v8229_v3 = vld [vmem:[%s12081_s28 + $0x5c0] sm:$0xf] }
  0x50   : > { %5978 = vmatpush.bf16.msrb.mxu3 %v7958_v55  ;;  %v8237_v55 = vld [vmem:[%s12081_s28 + $0x5d0] sm:$0xf]  ;;  %v11267_v56 = vld [vmem:[%s12081_s28 + $0x5d4] sm:$0xf0]  ;;  %v8174_v59 = vor.u32 %v11251_v54, %v8173_v53  ;;  %v11265_v4 = vld [vmem:[%s12081_s28 + $0x5c4] sm:$0xf0]  ;;  %v8102_v9 = vor.u32 %v11233_v0, %v8101_v62 }
  0x51   : > { %5940 = vmatpush.bf16.msrb.mxu0 %v7758_v61  ;;  %v11217_v61 = vld [vmem:[%s12081_s28 + $0x444] sm:$0xf0]  ;;  %v8238_v63 = vor.u32 %v11267_v56, %v8237_v55  ;;  %v11215_v7 = vld [vmem:[%s12081_s28 + $0x434] sm:$0xf0]  ;;  %v8093_v8 = vld [vmem:[%s12081_s28 + $0x4b0] sm:$0xf]  ;;  %v8230_v14 = vor.u32 %v11265_v4, %v8229_v3 }
  0x52   : > { %5953 = vmatpush.bf16.msrb.mxu1 %v7822_v1  ;;  %v8165_v1 = vld [vmem:[%s12081_s28 + $0x540] sm:$0xf]  ;;  %v8038_v5 = vor.u32 %v11217_v61, %v8037_v60  ;;  %v11231_v11 = vld [vmem:[%s12081_s28 + $0x4b4] sm:$0xf0]  ;;  %v8157_v12 = vld [vmem:[%s12081_s28 + $0x530] sm:$0xf] }
  0x53   : > { %5966 = vmatpush.bf16.msrb.mxu2 %v7886_v2  ;;  %v11249_v2 = vld [vmem:[%s12081_s28 + $0x544] sm:$0xf0]  ;;  %v8221_v15 = vld [vmem:[%s12081_s28 + $0x5b0] sm:$0xf]  ;;  %v11263_v16 = vld [vmem:[%s12081_s28 + $0x5b4] sm:$0xf0]  ;;  %v8094_v24 = vor.u32 %v11231_v11, %v8093_v8 }
  0x54   : > { %5979 = vmatpush.bf16.msrb.mxu3 %v7950_v6  ;;  %v8029_v6 = vld [vmem:[%s12081_s28 + $0x430] sm:$0xf]  ;;  %v8166_v10 = vor.u32 %v11249_v2, %v8165_v1  ;;  %v12282_v19 = vld.sshfl [vmem:[#allocation1] sm:$0xff pattern:$0x73625140] }
  0x55   : > { %5941 = vmatpush.bf16.msrb.mxu0 %v7750_v13  ;;  %v11247_v13 = vld [vmem:[%s12081_s28 + $0x534] sm:$0xf0]  ;;  %v12284_v20 = vld.sshfl [vmem:[#allocation1 + $0x10] sm:$0xff pattern:$0x73625140]  ;;  %v8030_v21 = vor.u32 %v11215_v7, %v8029_v6 }
  0x56   : > { %5954 = vmatpush.bf16.msrb.mxu1 %v7814_v17  ;;  %v299_v17 = vld [vmem:[%s12076_s24 + $0x20] sm:$0xff]  ;;  %v8158_v25 = vor.u32 %v11247_v13, %v8157_v12  ;;  %v11213_v26 = vld [vmem:[%s12081_s28 + $0x424] sm:$0xf0]  ;;  %v11227_v49 = vld [vmem:[%s12081_s28 + $0x494] sm:$0xf0] }
  0x57   : > { %5967 = vmatpush.bf16.msrb.mxu2 %v7878_v18  ;;  %v8021_v18 = vld [vmem:[%s12081_s28 + $0x420] sm:$0xf]  ;;  %v11245_v35 = vld [vmem:[%s12081_s28 + $0x524] sm:$0xf0]  ;;  %v8141_v50 = vld [vmem:[%s12081_s28 + $0x510] sm:$0xf] }
  0x58   : > { %5980 = vmatpush.bf16.msrb.mxu3 %v7942_v22  ;;  %5942 = vmatmul.bf16.vlgmr.msrb.gmra.mxu0 %v12246_v42  ;;  %v12286_v22 = vld.sshfl [vmem:[#allocation1 + $0x8] sm:$0xff pattern:$0x73625140]  ;;  %v8085_v29 = vld [vmem:[%s12081_s28 + $0x4a0] sm:$0xf]  ;;  %v8022_v38 = vor.u32 %v11213_v26, %v8021_v18 }
  0x59   : > { %5986 = vmatpush.bf16.msra.mxu0 %v8062_v23  ;;  %5955 = vmatmul.bf16.vlgmr.msrb.gmra.mxu1 %v12250_v45  ;;  %v12288_v23 = vld.sshfl [vmem:[#allocation1 + $0x18] sm:$0xff pattern:$0x73625140]  ;;  %v8149_v32 = vld [vmem:[%s12081_s28 + $0x520] sm:$0xf] }
  0x5a   : > { %5999 = vmatpush.bf16.msra.mxu1 %v8126_v30  ;;  %5968 = vmatmul.bf16.vlgmr.msrb.gmra.mxu2 %v12242_v39  ;;  %344 = vst [vmem:[#allocation1] ss:$4 sm:$0xff] %v299_v17  ;;  %v8222_v30 = vor.u32 %v11263_v16, %v8221_v15  ;;  %v11261_v37 = vld [vmem:[%s12081_s28 + $0x5a4] sm:$0xf0]  ;;  %v8150_v41 = vor.u32 %v11245_v35, %v8149_v32  ;;  %v8205_v52 = vld [vmem:[%s12081_s28 + $0x590] sm:$0xf] }
  0x5b   : > { %6012 = vmatpush.bf16.msra.mxu2 %v8190_v31  ;;  %5981 = vmatmul.bf16.vlgmr.msrb.gmra.mxu3 %v12248_v43  ;;  %v11229_v31 = vld [vmem:[%s12081_s28 + $0x4a4] sm:$0xf0]  ;;  %v11259_v53 = vld [vmem:[%s12081_s28 + $0x594] sm:$0xf0]  ;;  %v8005_v55 = vld [vmem:[%s12081_s28 + $0x400] sm:$0xf]  ;;  %v12337_v32 = vpack.c.bf16 %v12286_v22, %v12286_v22 }
  0x5c   : > { %6025 = vmatpush.bf16.msra.mxu3 %v8254_v36  ;;  %v8213_v36 = vld [vmem:[%s12081_s28 + $0x5a0] sm:$0xf]  ;;  %v8086_v40 = vor.u32 %v11229_v31, %v8085_v29  ;;  %v11209_v56 = vld [vmem:[%s12081_s28 + $0x404] sm:$0xf0]  ;;  %v8206_v62 = vor.u32 %v11259_v53, %v8205_v52  ;;  %v8317_v2 = vld [vmem:[%s12081_s28 + $0x670] sm:$0xf]  ;;  %v12333_v31 = vpack.c.bf16 %v12284_v20, %v12284_v20 }
  0x5d   : > { %5987 = vmatpush.bf16.msra.mxu0 %v8054_v44  ;;  %v8013_v44 = vld [vmem:[%s12081_s28 + $0x410] sm:$0xf]  ;;  %v8214_v48 = vor.u32 %v11261_v37, %v8213_v36  ;;  %v11225_v60 = vld [vmem:[%s12081_s28 + $0x484] sm:$0xf0]  ;;  %v8133_v61 = vld [vmem:[%s12081_s28 + $0x500] sm:$0xf] }
  0x5e   : > { %6000 = vmatpush.bf16.msra.mxu1 %v8118_v46  ;;  %v11211_v46 = vld [vmem:[%s12081_s28 + $0x414] sm:$0xf0]  ;;  %v8197_v0 = vld [vmem:[%s12081_s28 + $0x580] sm:$0xf]  ;;  %v11257_v1 = vld [vmem:[%s12081_s28 + $0x584] sm:$0xf0] }
  0x5f   : > { %6013 = vmatpush.bf16.msra.mxu2 %v8182_v47  ;;  %v8077_v47 = vld [vmem:[%s12081_s28 + $0x490] sm:$0xf]  ;;  %v8014_v54 = vor.u32 %v11211_v46, %v8013_v44  ;;  %v11287_v3 = vld [vmem:[%s12081_s28 + $0x674] sm:$0xf0]  ;;  %v8198_v13 = vor.u32 %v11257_v1, %v8197_v0  ;;  %v8309_v17 = vld [vmem:[%s12081_s28 + $0x660] sm:$0xf] }
  0x60   : > { %6026 = vmatpush.bf16.msra.mxu3 %v8246_v51  ;;  %v11243_v51 = vld [vmem:[%s12081_s28 + $0x514] sm:$0xf0]  ;;  %v8381_v4 = vld [vmem:[%s12081_s28 + $0x6f0] sm:$0xf]  ;;  %v11285_v18 = vld [vmem:[%s12081_s28 + $0x664] sm:$0xf0] }
  0x61   : > { %5988 = vmatpush.bf16.msra.mxu0 %v8046_v57  ;;  %v8078_v57 = vor.u32 %v11227_v49, %v8077_v47  ;;  %v11303_v6 = vld [vmem:[%s12081_s28 + $0x6f4] sm:$0xf0]  ;;  %v8445_v7 = vld [vmem:[%s12081_s28 + $0x770] sm:$0xf]  ;;  %v11301_v26 = vld [vmem:[%s12081_s28 + $0x6e4] sm:$0xf0]  ;;  %v8310_v37 = vor.u32 %v11285_v18, %v8309_v17 }
  0x62   : > { %6001 = vmatpush.bf16.msra.mxu1 %v8110_v58  ;;  %v8142_v58 = vor.u32 %v11243_v51, %v8141_v50  ;;  %v11319_v8 = vld [vmem:[%s12081_s28 + $0x774] sm:$0xf0]  ;;  %v8509_v11 = vld [vmem:[%s12081_s28 + $0x7f0] sm:$0xf]  ;;  %v8382_v15 = vor.u32 %v11303_v6, %v8381_v4  ;;  %v8437_v29 = vld [vmem:[%s12081_s28 + $0x760] sm:$0xf] }
  0x63   : > { %6014 = vmatpush.bf16.msra.mxu2 %v8174_v59  ;;  %v8069_v59 = vld [vmem:[%s12081_s28 + $0x480] sm:$0xf]  ;;  %v11335_v12 = vld [vmem:[%s12081_s28 + $0x7f4] sm:$0xf0]  ;;  %v8446_v16 = vor.u32 %v11319_v8, %v8445_v7  ;;  %v11333_v36 = vld [vmem:[%s12081_s28 + $0x7e4] sm:$0xf0] }
  0x64   : > { %6027 = vmatpush.bf16.msra.mxu3 %v8238_v63  ;;  %v11241_v63 = vld [vmem:[%s12081_s28 + $0x504] sm:$0xf0]  ;;  %v8501_v35 = vld [vmem:[%s12081_s28 + $0x7e0] sm:$0xf]  ;;  %v11299_v44 = vld [vmem:[%s12081_s28 + $0x6d4] sm:$0xf0] }
  0x65   : > { %5989 = vmatpush.bf16.msra.mxu0 %v8038_v5  ;;  %v8006_v5 = vor.u32 %v11209_v56, %v8005_v55  ;;  %v8429_v46 = vld [vmem:[%s12081_s28 + $0x750] sm:$0xf]  ;;  %v11315_v47 = vld [vmem:[%s12081_s28 + $0x754] sm:$0xf0]  ;;  %v8293_v50 = vld [vmem:[%s12081_s28 + $0x640] sm:$0xf] }
  0x66   : > { %6002 = vmatpush.bf16.msra.mxu1 %v8102_v9  ;;  %v8070_v9 = vor.u32 %v11225_v60, %v8069_v59  ;;  %v11331_v49 = vld [vmem:[%s12081_s28 + $0x7d4] sm:$0xf0]  ;;  %v11281_v51 = vld [vmem:[%s12081_s28 + $0x644] sm:$0xf0]  ;;  %v8357_v53 = vld [vmem:[%s12081_s28 + $0x6c0] sm:$0xf]  ;;  %v8430_v59 = vor.u32 %v11315_v47, %v8429_v46 }
  0x67   : > { %6015 = vmatpush.bf16.msra.mxu2 %v8166_v10  ;;  %v8134_v10 = vor.u32 %v11241_v63, %v8133_v61  ;;  %v8421_v55 = vld [vmem:[%s12081_s28 + $0x740] sm:$0xf]  ;;  %v11313_v56 = vld [vmem:[%s12081_s28 + $0x744] sm:$0xf0]  ;;  %v8285_v6 = vld [vmem:[%s12081_s28 + $0x630] sm:$0xf] }
  0x68   : > { %6028 = vmatpush.bf16.msra.mxu3 %v8230_v14  ;;  %v8318_v14 = vor.u32 %v11287_v3, %v8317_v2  ;;  %v12364_v60 = vld.sshfl [vmem:[#allocation1 + $0x20] sm:$0xff pattern:$0x73625140]  ;;  %v12366_v61 = vld.sshfl [vmem:[#allocation1 + $0x30] sm:$0xff pattern:$0x73625140]  ;;  %v8294_v3 = vor.u32 %v11281_v51, %v8293_v50 }
  0x69   : > { %5990 = vmatpush.bf16.msra.mxu0 %v8030_v21  ;;  %v8373_v21 = vld [vmem:[%s12081_s28 + $0x6e0] sm:$0xf]  ;;  %v12368_v63 = vld.sshfl [vmem:[#allocation1 + $0x28] sm:$0xff pattern:$0x73625140] }
  0x6a   : > { %6003 = vmatpush.bf16.msra.mxu1 %v8094_v24  ;;  %v8510_v24 = vor.u32 %v11335_v12, %v8509_v11  ;;  %v8374_v20 = vor.u32 %v11301_v26, %v8373_v21  ;;  %v12370_v0 = vld.sshfl [vmem:[#allocation1 + $0x38] sm:$0xff pattern:$0x73625140]  ;;  %v8485_v1 = vld [vmem:[%s12081_s28 + $0x7c0] sm:$0xf] }
  0x6b   : > { %6016 = vmatpush.bf16.msra.mxu2 %v8158_v25  ;;  %v12326_v25 = vpack.c.bf16 %v12282_v19, %v12282_v19  ;;  %v12343_v19 = vpack.c.bf16 %v12288_v23, %v12288_v23  ;;  %v8502_v23 = vor.u32 %v11333_v36, %v8501_v35  ;;  %v11329_v2 = vld [vmem:[%s12081_s28 + $0x7c4] sm:$0xf0]  ;;  %v11279_v7 = vld [vmem:[%s12081_s28 + $0x634] sm:$0xf0]  ;;  %v8349_v8 = vld [vmem:[%s12081_s28 + $0x6b0] sm:$0xf] }
  0x6c   : > { %6029 = vmatpush.bf16.msra.mxu3 %v8222_v30  ;;  %v11317_v30 = vld [vmem:[%s12081_s28 + $0x764] sm:$0xf0]  ;;  %v8413_v11 = vld [vmem:[%s12081_s28 + $0x730] sm:$0xf]  ;;  %v11311_v12 = vld [vmem:[%s12081_s28 + $0x734] sm:$0xf0] }
  0x6d   : > { %5991 = vmatpush.bf16.msra.mxu0 %v8022_v38  ;;  %v8301_v38 = vld [vmem:[%s12081_s28 + $0x650] sm:$0xf]  ;;  %v8438_v22 = vor.u32 %v11317_v30, %v8437_v29  ;;  %v8414_v17 = vor.u32 %v11311_v12, %v8413_v11  ;;  %v8277_v18 = vld [vmem:[%s12081_s28 + $0x620] sm:$0xf]  ;;  %v11277_v21 = vld [vmem:[%s12081_s28 + $0x624] sm:$0xf0] }
  0x6e   : > { %6004 = vmatpush.bf16.msra.mxu1 %v8086_v40  ;;  %v11283_v40 = vld [vmem:[%s12081_s28 + $0x654] sm:$0xf0]  ;;  %v11293_v29 = vld [vmem:[%s12081_s28 + $0x6a4] sm:$0xf0]  ;;  %v8405_v30 = vld [vmem:[%s12081_s28 + $0x720] sm:$0xf] }
  0x6f   : > { %6017 = vmatpush.bf16.msra.mxu2 %v8150_v41  ;;  %v8365_v41 = vld [vmem:[%s12081_s28 + $0x6d0] sm:$0xf]  ;;  %v8302_v52 = vor.u32 %v11283_v40, %v8301_v38  ;;  %v11309_v35 = vld [vmem:[%s12081_s28 + $0x724] sm:$0xf0]  ;;  %v8469_v36 = vld [vmem:[%s12081_s28 + $0x7a0] sm:$0xf]  ;;  %v8278_v38 = vor.u32 %v11277_v21, %v8277_v18 }
  0x70   : > { %6030 = vmatpush.bf16.msra.mxu3 %v8214_v48  ;;  %v8493_v48 = vld [vmem:[%s12081_s28 + $0x7d0] sm:$0xf]  ;;  %v11291_v46 = vld [vmem:[%s12081_s28 + $0x694] sm:$0xf0]  ;;  %v8565_v18 = vld [vmem:[%s12081_s28 + $0x860] sm:$0xf] }
  0x71   : > { %5992 = vmatpush.bf16.msra.mxu0 %v8014_v54  ;;  %v11297_v54 = vld [vmem:[%s12081_s28 + $0x6c4] sm:$0xf0]  ;;  %v8269_v40 = vld [vmem:[%s12081_s28 + $0x610] sm:$0xf]  ;;  %v11323_v50 = vld [vmem:[%s12081_s28 + $0x794] sm:$0xf0] }
  0x72   : > { %6005 = vmatpush.bf16.msra.mxu1 %v8078_v57  ;;  %v300_v57 = vld [vmem:[%s12076_s24 + $0x28] sm:$0xff]  ;;  %v8358_v4 = vor.u32 %v11297_v54, %v8357_v53  ;;  %v8397_v47 = vld [vmem:[%s12081_s28 + $0x710] sm:$0xf] }
  0x73   : > { %6018 = vmatpush.bf16.msra.mxu2 %v8142_v58  ;;  %v8366_v58 = vor.u32 %v11299_v44, %v8365_v41  ;;  %345 = vst [vmem:[#allocation1 + $0x20] ss:$4 sm:$0xff] %v300_v57  ;;  %v11275_v41 = vld [vmem:[%s12081_s28 + $0x614] sm:$0xf0]  ;;  %v8333_v44 = vld [vmem:[%s12081_s28 + $0x690] sm:$0xf] }
  0x74   : > { %6031 = vmatpush.bf16.msra.mxu3 %v8206_v62  ;;  %v8494_v62 = vor.u32 %v11331_v49, %v8493_v48  ;;  %v11307_v48 = vld [vmem:[%s12081_s28 + $0x714] sm:$0xf0]  ;;  %v8461_v49 = vld [vmem:[%s12081_s28 + $0x790] sm:$0xf]  ;;  %v8270_v51 = vor.u32 %v11275_v41, %v8269_v40  ;;  %v11273_v53 = vld [vmem:[%s12081_s28 + $0x604] sm:$0xf0]  ;;  %v8334_v54 = vor.u32 %v11291_v46, %v8333_v44 }
  0x75   : > { %5993 = vmatpush.bf16.msra.mxu0 %v8006_v5  ;;  %v8422_v5 = vor.u32 %v11313_v56, %v8421_v55  ;;  %v8398_v55 = vor.u32 %v11307_v48, %v8397_v47  ;;  %v8325_v56 = vld [vmem:[%s12081_s28 + $0x680] sm:$0xf]  ;;  %v11289_v57 = vld [vmem:[%s12081_s28 + $0x684] sm:$0xf0]  ;;  %v8765_v12 = vld [vmem:[%s12081_s28 + $0x9f0] sm:$0xf] }
  0x76   : > { %6006 = vmatpush.bf16.msra.mxu1 %v8070_v9  ;;  %v8486_v9 = vor.u32 %v11329_v2, %v8485_v1  ;;  %v8453_v1 = vld [vmem:[%s12081_s28 + $0x780] sm:$0xf]  ;;  %v11321_v2 = vld [vmem:[%s12081_s28 + $0x784] sm:$0xf0]  ;;  %v11347_v44 = vld [vmem:[%s12081_s28 + $0x854] sm:$0xf0] }
  0x77   : > { %6019 = vmatpush.bf16.msra.mxu2 %v8134_v10  ;;  %v11295_v10 = vld [vmem:[%s12081_s28 + $0x6b4] sm:$0xf0]  ;;  %v11349_v21 = vld [vmem:[%s12081_s28 + $0x864] sm:$0xf0] }
  0x78   : > { %6032 = vmatpush.bf16.msra.mxu3 %v8198_v13  ;;  %5994 = vmatmul.bf16.vlgmr.msra.gmra.mxu0 %v12326_v25  ;;  %v8477_v13 = vld [vmem:[%s12081_s28 + $0x7b0] sm:$0xf]  ;;  %v8566_v40 = vor.u32 %v11349_v21, %v8565_v18  ;;  %v11363_v47 = vld [vmem:[%s12081_s28 + $0x8d4] sm:$0xf0]  ;;  %v8533_v18 = vld [vmem:[%s12081_s28 + $0x820] sm:$0xf] }
  0x79   : > { %6038 = vmatpush.bf16.msrb.mxu0 %v8318_v14  ;;  %6007 = vmatmul.bf16.vlgmr.msra.gmra.mxu1 %v12337_v32  ;;  %v11327_v14 = vld [vmem:[%s12081_s28 + $0x7b4] sm:$0xf0]  ;;  %v11341_v21 = vld [vmem:[%s12081_s28 + $0x824] sm:$0xf0] }
  0x7a   : > { %6051 = vmatpush.bf16.msrb.mxu1 %v8382_v15  ;;  %6020 = vmatmul.bf16.vlgmr.msra.gmra.mxu2 %v12333_v31  ;;  %v8286_v15 = vor.u32 %v11279_v7, %v8285_v6  ;;  %v8478_v26 = vor.u32 %v11327_v14, %v8477_v13  ;;  %v11367_v7 = vld [vmem:[%s12081_s28 + $0x8f4] sm:$0xf0]  ;;  %v8454_v14 = vor.u32 %v11321_v2, %v8453_v1  ;;  %v8741_v1 = vld [vmem:[%s12081_s28 + $0x9c0] sm:$0xf]  ;;  %v11393_v2 = vld [vmem:[%s12081_s28 + $0x9c4] sm:$0xf0] }
  0x7b   : > { %6064 = vmatpush.bf16.msrb.mxu2 %v8446_v16  ;;  %6033 = vmatmul.bf16.vlgmr.msra.gmra.mxu3 %v12343_v19  ;;  %v8350_v16 = vor.u32 %v11295_v10, %v8349_v8  ;;  %v8701_v8 = vld [vmem:[%s12081_s28 + $0x970] sm:$0xf]  ;;  %v8326_v10 = vor.u32 %v11289_v57, %v8325_v56  ;;  %v11399_v13 = vld [vmem:[%s12081_s28 + $0x9f4] sm:$0xf0]  ;;  %v8613_v56 = vld [vmem:[%s12081_s28 + $0x8c0] sm:$0xf] }
  0x7c   : > { %6077 = vmatpush.bf16.msrb.mxu3 %v8510_v24  ;;  %v8341_v24 = vld [vmem:[%s12081_s28 + $0x6a0] sm:$0xf]  ;;  %v11379_v48 = vld [vmem:[%s12081_s28 + $0x954] sm:$0xf0] }
  0x7d   : > { %6039 = vmatpush.bf16.msrb.mxu0 %v8310_v37  ;;  %v11325_v37 = vld [vmem:[%s12081_s28 + $0x7a4] sm:$0xf0] }
  0x7e   : > { %6052 = vmatpush.bf16.msrb.mxu1 %v8374_v20  ;;  %v8342_v20 = vor.u32 %v11293_v29, %v8341_v24  ;;  %v8629_v24 = vld [vmem:[%s12081_s28 + $0x8e0] sm:$0xf]  ;;  %v12419_v29 = vpack.c.bf16 %v12364_v60, %v12364_v60  ;;  %v11397_v60 = vld [vmem:[%s12081_s28 + $0x9e4] sm:$0xf0] }
  0x7f   : > { %6065 = vmatpush.bf16.msrb.mxu2 %v8438_v22  ;;  %v8406_v22 = vor.u32 %v11309_v35, %v8405_v30  ;;  %v11365_v30 = vld [vmem:[%s12081_s28 + $0x8e4] sm:$0xf0]  ;;  %v8693_v35 = vld [vmem:[%s12081_s28 + $0x960] sm:$0xf] }
  0x80   : > { %6078 = vmatpush.bf16.msrb.mxu3 %v8502_v23  ;;  %v8470_v23 = vor.u32 %v11325_v37, %v8469_v36  ;;  %v11381_v36 = vld [vmem:[%s12081_s28 + $0x964] sm:$0xf0]  ;;  %v12426_v37 = vpack.c.bf16 %v12366_v61, %v12366_v61  ;;  %v8630_v61 = vor.u32 %v11365_v30, %v8629_v24  ;;  %v8597_v24 = vld [vmem:[%s12081_s28 + $0x8a0] sm:$0xf] }
  0x81   : > { %6040 = vmatpush.bf16.msrb.mxu0 %v8302_v52  ;;  %v8261_v52 = vld [vmem:[%s12081_s28 + $0x600] sm:$0xf]  ;;  %v8694_v41 = vor.u32 %v11381_v36, %v8693_v35  ;;  %v11357_v30 = vld [vmem:[%s12081_s28 + $0x8a4] sm:$0xf0] }
  0x82   : > { %6053 = vmatpush.bf16.msrb.mxu1 %v8366_v58  ;;  %v8389_v58 = vld [vmem:[%s12081_s28 + $0x700] sm:$0xf]  ;;  %v8262_v6 = vor.u32 %v11273_v53, %v8261_v52  ;;  %v11373_v36 = vld [vmem:[%s12081_s28 + $0x924] sm:$0xf0] }
  0x83   : > { %6066 = vmatpush.bf16.msrb.mxu2 %v8430_v59  ;;  %v8462_v59 = vor.u32 %v11323_v50, %v8461_v49  ;;  %v8749_v49 = vld [vmem:[%s12081_s28 + $0x9d0] sm:$0xf]  ;;  %v11395_v50 = vld [vmem:[%s12081_s28 + $0x9d4] sm:$0xf0]  ;;  %v8661_v35 = vld [vmem:[%s12081_s28 + $0x920] sm:$0xf] }
  0x84   : > { %6079 = vmatpush.bf16.msrb.mxu3 %v8494_v62  ;;  %v11305_v62 = vld [vmem:[%s12081_s28 + $0x704] sm:$0xf0]  ;;  %v8750_v57 = vor.u32 %v11395_v50, %v8749_v49  ;;  %v8717_v49 = vld [vmem:[%s12081_s28 + $0x990] sm:$0xf]  ;;  %v11387_v50 = vld [vmem:[%s12081_s28 + $0x994] sm:$0xf0] }
  0x85   : > { %6041 = vmatpush.bf16.msrb.mxu0 %v8294_v3  ;;  %v8573_v3 = vld [vmem:[%s12081_s28 + $0x870] sm:$0xf]  ;;  %v8390_v11 = vor.u32 %v11305_v62, %v8389_v58  ;;  %v11361_v58 = vld [vmem:[%s12081_s28 + $0x8c4] sm:$0xf0] }
  0x86   : > { %6054 = vmatpush.bf16.msrb.mxu1 %v8358_v4  ;;  %v11351_v4 = vld [vmem:[%s12081_s28 + $0x874] sm:$0xf0]  ;;  %v11377_v62 = vld [vmem:[%s12081_s28 + $0x944] sm:$0xf0] }
  0x87   : > { %6067 = vmatpush.bf16.msrb.mxu2 %v8422_v5  ;;  %v8637_v5 = vld [vmem:[%s12081_s28 + $0x8f0] sm:$0xf] }
  0x88   : > { %6080 = vmatpush.bf16.msrb.mxu3 %v8486_v9  ;;  %v11383_v9 = vld [vmem:[%s12081_s28 + $0x974] sm:$0xf0] }
  0x89   : > { %6042 = vmatpush.bf16.msrb.mxu0 %v8286_v15  ;;  %v8574_v15 = vor.u32 %v11351_v4, %v8573_v3  ;;  %v8614_v4 = vor.u32 %v11361_v58, %v8613_v56  ;;  %v8645_v58 = vld [vmem:[%s12081_s28 + $0x900] sm:$0xf] }
  0x8a   : > { %6055 = vmatpush.bf16.msrb.mxu1 %v8350_v16  ;;  %v8638_v16 = vor.u32 %v11367_v7, %v8637_v5  ;;  %v11343_v7 = vld [vmem:[%s12081_s28 + $0x834] sm:$0xf0] }
  0x8b   : > { %6068 = vmatpush.bf16.msrb.mxu2 %v8414_v17  ;;  %v8702_v17 = vor.u32 %v11383_v9, %v8701_v8  ;;  %v8605_v8 = vld [vmem:[%s12081_s28 + $0x8b0] sm:$0xf]  ;;  %v8742_v9 = vor.u32 %v11393_v2, %v8741_v1  ;;  %v8718_v1 = vor.u32 %v11387_v50, %v8717_v49  ;;  %v11385_v2 = vld [vmem:[%s12081_s28 + $0x984] sm:$0xf0] }
  0x8c   : > { %6081 = vmatpush.bf16.msrb.mxu3 %v8478_v26  ;;  %v8766_v26 = vor.u32 %v11399_v13, %v8765_v12  ;;  %v11375_v12 = vld [vmem:[%s12081_s28 + $0x934] sm:$0xf0]  ;;  %v8733_v13 = vld [vmem:[%s12081_s28 + $0x9b0] sm:$0xf] }
  0x8d   : > { %6043 = vmatpush.bf16.msrb.mxu0 %v8278_v38  ;;  %v12430_v38 = vpack.c.bf16 %v12368_v63, %v12368_v63  ;;  %v8557_v63 = vld [vmem:[%s12081_s28 + $0x850] sm:$0xf] }
  0x8e   : > { %6056 = vmatpush.bf16.msrb.mxu1 %v8342_v20  ;;  %v8757_v20 = vld [vmem:[%s12081_s28 + $0x9e0] sm:$0xf]  ;;  %v8813_v50 = vld [vmem:[%s12081_s28 + $0xa50] sm:$0xf] }
  0x8f   : > { %6069 = vmatpush.bf16.msrb.mxu2 %v8406_v22  ;;  %v12436_v22 = vpack.c.bf16 %v12370_v0, %v12370_v0  ;;  %v8758_v46 = vor.u32 %v11397_v60, %v8757_v20  ;;  %v8685_v0 = vld [vmem:[%s12081_s28 + $0x950] sm:$0xf]  ;;  %v8725_v20 = vld [vmem:[%s12081_s28 + $0x9a0] sm:$0xf]  ;;  %v11389_v60 = vld [vmem:[%s12081_s28 + $0x9a4] sm:$0xf0] }
  0x90   : > { %6082 = vmatpush.bf16.msrb.mxu3 %v8470_v23  ;;  %v8621_v23 = vld [vmem:[%s12081_s28 + $0x8d0] sm:$0xf]  ;;  %v8686_v53 = vor.u32 %v11379_v48, %v8685_v0  ;;  %v11371_v48 = vld [vmem:[%s12081_s28 + $0x914] sm:$0xf0] }
  0x91   : > { %6044 = vmatpush.bf16.msrb.mxu0 %v8270_v51  ;;  %v8558_v51 = vor.u32 %v11347_v44, %v8557_v63  ;;  %v8622_v52 = vor.u32 %v11363_v47, %v8621_v23  ;;  %v8525_v63 = vld [vmem:[%s12081_s28 + $0x810] sm:$0xf]  ;;  %v11339_v44 = vld [vmem:[%s12081_s28 + $0x814] sm:$0xf0] }
  0x92   : > { %6057 = vmatpush.bf16.msrb.mxu1 %v8334_v54  ;;  %v8549_v54 = vld [vmem:[%s12081_s28 + $0x840] sm:$0xf]  ;;  %v8589_v23 = vld [vmem:[%s12081_s28 + $0x890] sm:$0xf]  ;;  %v11355_v47 = vld [vmem:[%s12081_s28 + $0x894] sm:$0xf0] }
  0x93   : > { %6070 = vmatpush.bf16.msrb.mxu2 %v8398_v55  ;;  %v11345_v55 = vld [vmem:[%s12081_s28 + $0x844] sm:$0xf0]  ;;  %v8653_v0 = vld [vmem:[%s12081_s28 + $0x910] sm:$0xf]  ;;  %v8590_v56 = vor.u32 %v11355_v47, %v8589_v23  ;;  %v9013_v23 = vld [vmem:[%s12081_s28 + $0xbe0] sm:$0xf] }
  0x94   : > { %6083 = vmatpush.bf16.msrb.mxu3 %v8462_v59  ;;  %v8677_v59 = vld [vmem:[%s12081_s28 + $0x940] sm:$0xf]  ;;  %v8550_v3 = vor.u32 %v11345_v55, %v8549_v54  ;;  %v11353_v55 = vld [vmem:[%s12081_s28 + $0x884] sm:$0xf0] }
  0x95   : > { %6045 = vmatpush.bf16.msrb.mxu0 %v8262_v6  ;;  %v8678_v5 = vor.u32 %v11377_v62, %v8677_v59  ;;  %v8541_v6 = vld [vmem:[%s12081_s28 + $0x830] sm:$0xf]  ;;  %v8581_v54 = vld [vmem:[%s12081_s28 + $0x880] sm:$0xf]  ;;  %v11369_v59 = vld [vmem:[%s12081_s28 + $0x904] sm:$0xf0] }
  0x96   : > { %6058 = vmatpush.bf16.msrb.mxu1 %v8326_v10  ;;  %v11359_v10 = vld [vmem:[%s12081_s28 + $0x8b4] sm:$0xf0]  ;;  %v8709_v62 = vld [vmem:[%s12081_s28 + $0x980] sm:$0xf] }
  0x97   : > { %6071 = vmatpush.bf16.msrb.mxu2 %v8390_v11  ;;  %v8669_v11 = vld [vmem:[%s12081_s28 + $0x930] sm:$0xf] }
  0x98   : > { %6084 = vmatpush.bf16.msrb.mxu3 %v8454_v14  ;;  %6046 = vmatmul.bf16.vlgmr.msrb.gmra.mxu0 %v12419_v29  ;;  %v11391_v14 = vld [vmem:[%s12081_s28 + $0x9b4] sm:$0xf0] }
  0x99   : > { %6090 = vmatpush.bf16.msra.mxu0 %v8574_v15  ;;  %6059 = vmatmul.bf16.vlgmr.msrb.gmra.mxu1 %v12430_v38  ;;  %v8542_v15 = vor.u32 %v11343_v7, %v8541_v6  ;;  %v11431_v6 = vld [vmem:[%s12081_s28 + $0xaf4] sm:$0xf0]  ;;  %v8957_v7 = vld [vmem:[%s12081_s28 + $0xb70] sm:$0xf] }
  0x9a   : > { %6103 = vmatpush.bf16.msra.mxu1 %v8638_v16  ;;  %6072 = vmatmul.bf16.vlgmr.msrb.gmra.mxu2 %v12426_v37  ;;  %v8606_v16 = vor.u32 %v11359_v10, %v8605_v8  ;;  %v9021_v10 = vld [vmem:[%s12081_s28 + $0xbf0] sm:$0xf] }
  0x9b   : > { %6116 = vmatpush.bf16.msra.mxu2 %v8702_v17  ;;  %6085 = vmatmul.bf16.vlgmr.msrb.gmra.mxu3 %v12436_v22  ;;  %v8670_v17 = vor.u32 %v11375_v12, %v8669_v11  ;;  %v11463_v11 = vld [vmem:[%s12081_s28 + $0xbf4] sm:$0xf0]  ;;  %v8582_v12 = vor.u32 %v11353_v55, %v8581_v54  ;;  %v8941_v55 = vld [vmem:[%s12081_s28 + $0xb50] sm:$0xf] }
  0x9c   : > { %6129 = vmatpush.bf16.msra.mxu3 %v8766_v26  ;;  %v8734_v26 = vor.u32 %v11391_v14, %v8733_v13  ;;  %v8646_v13 = vor.u32 %v11369_v59, %v8645_v58  ;;  %v346_v14 = vld.sshfl [vmem:[#allocation1] sm:$0xff pattern:$0x73625140]  ;;  %v11427_v54 = vld [vmem:[%s12081_s28 + $0xad4] sm:$0xf0] }
  0x9d   : > { %6091 = vmatpush.bf16.msra.mxu0 %v8566_v40  ;;  %v8534_v40 = vor.u32 %v11341_v21, %v8533_v18  ;;  %v347_v18 = vld.sshfl [vmem:[#allocation1 + $0x8] sm:$0xff pattern:$0x73625140]  ;;  %v349_v21 = vld.sshfl [vmem:[#allocation1 + $0x18] sm:$0xff pattern:$0x73625140] }
  0x9e   : > { %6104 = vmatpush.bf16.msra.mxu1 %v8630_v61  ;;  %v8598_v61 = vor.u32 %v11357_v30, %v8597_v24  ;;  %v8821_v30 = vld [vmem:[%s12081_s28 + $0xa60] sm:$0xf]  ;;  %v12512_v47 = vpack.c.bf16 %v349_v21, %v349_v21  ;;  %v11459_v58 = vld [vmem:[%s12081_s28 + $0xbd4] sm:$0xf0]  ;;  %v8925_v21 = vld [vmem:[%s12081_s28 + $0xb30] sm:$0xf] }
  0x9f   : > { %6117 = vmatpush.bf16.msra.mxu2 %v8694_v41  ;;  %v8662_v41 = vor.u32 %v11373_v36, %v8661_v35  ;;  %v11413_v35 = vld [vmem:[%s12081_s28 + $0xa64] sm:$0xf0]  ;;  %v8885_v36 = vld [vmem:[%s12081_s28 + $0xae0] sm:$0xf] }
  0xa0   : > { %6130 = vmatpush.bf16.msra.mxu3 %v8758_v46  ;;  %v8726_v46 = vor.u32 %v11389_v60, %v8725_v20  ;;  %v9022_v20 = vor.u32 %v11463_v11, %v9021_v10  ;;  %v12501_v60 = vpack.c.bf16 %v346_v14, %v346_v14  ;;  %v11457_v10 = vld [vmem:[%s12081_s28 + $0xbc4] sm:$0xf0]  ;;  %v8797_v14 = vld [vmem:[%s12081_s28 + $0xa30] sm:$0xf] }
  0xa1   : > { %6092 = vmatpush.bf16.msra.mxu0 %v8558_v51  ;;  %v8517_v51 = vld [vmem:[%s12081_s28 + $0x800] sm:$0xf] }
  0xa2   : > { %6105 = vmatpush.bf16.msra.mxu1 %v8622_v52  ;;  %v8526_v52 = vor.u32 %v11339_v44, %v8525_v63  ;;  %v12508_v44 = vpack.c.bf16 %v347_v18, %v347_v18  ;;  %v11423_v18 = vld [vmem:[%s12081_s28 + $0xab4] sm:$0xf0] }
  0xa3   : > { %6118 = vmatpush.bf16.msra.mxu2 %v8686_v53  ;;  %v11337_v53 = vld [vmem:[%s12081_s28 + $0x804] sm:$0xf0] }
  0xa4   : > { %6131 = vmatpush.bf16.msra.mxu3 %v8750_v57  ;;  %v8654_v57 = vor.u32 %v11371_v48, %v8653_v0  ;;  %v8518_v8 = vor.u32 %v11337_v53, %v8517_v51  ;;  %v8822_v0 = vor.u32 %v11413_v35, %v8821_v30  ;;  %v11411_v51 = vld [vmem:[%s12081_s28 + $0xa54] sm:$0xf0] }
  0xa5   : > { %6093 = vmatpush.bf16.msra.mxu0 %v8550_v3  ;;  %v8829_v3 = vld [vmem:[%s12081_s28 + $0xa70] sm:$0xf]  ;;  %v8814_v59 = vor.u32 %v11411_v51, %v8813_v50  ;;  %v11455_v30 = vld [vmem:[%s12081_s28 + $0xbb4] sm:$0xf0]  ;;  %v11453_v50 = vld [vmem:[%s12081_s28 + $0xba4] sm:$0xf0] }
  0xa6   : > { %6106 = vmatpush.bf16.msra.mxu1 %v8614_v4  ;;  %v11415_v4 = vld [vmem:[%s12081_s28 + $0xa74] sm:$0xf0] }
  0xa7   : > { %6119 = vmatpush.bf16.msra.mxu2 %v8678_v5  ;;  %v8893_v5 = vld [vmem:[%s12081_s28 + $0xaf0] sm:$0xf] }
  0xa8   : > { %6132 = vmatpush.bf16.msra.mxu3 %v8742_v9  ;;  %v11447_v9 = vld [vmem:[%s12081_s28 + $0xb74] sm:$0xf0]  ;;  %v8894_v24 = vor.u32 %v11431_v6, %v8893_v5  ;;  %v11425_v6 = vld [vmem:[%s12081_s28 + $0xac4] sm:$0xf0] }
  0xa9   : > { %6094 = vmatpush.bf16.msra.mxu0 %v8542_v15  ;;  %v348_v15 = vld.sshfl [vmem:[#allocation1 + $0x10] sm:$0xff pattern:$0x73625140] }
  0xaa   : > { %6107 = vmatpush.bf16.msra.mxu1 %v8606_v16  ;;  %v8710_v16 = vor.u32 %v11385_v2, %v8709_v62  ;;  %v12506_v63 = vpack.c.bf16 %v348_v15, %v348_v15  ;;  %v8805_v2 = vld [vmem:[%s12081_s28 + $0xa40] sm:$0xf]  ;;  %v11407_v15 = vld [vmem:[%s12081_s28 + $0xa34] sm:$0xf0] }
  0xab   : > { %6120 = vmatpush.bf16.msra.mxu2 %v8670_v17  ;;  %v8830_v17 = vor.u32 %v11415_v4, %v8829_v3  ;;  %v11409_v3 = vld [vmem:[%s12081_s28 + $0xa44] sm:$0xf0]  ;;  %v8869_v4 = vld [vmem:[%s12081_s28 + $0xac0] sm:$0xf]  ;;  %v8798_v35 = vor.u32 %v11407_v15, %v8797_v14 }
  0xac   : > { %6133 = vmatpush.bf16.msra.mxu3 %v8734_v26  ;;  %v8958_v26 = vor.u32 %v11447_v9, %v8957_v7  ;;  %v8933_v7 = vld [vmem:[%s12081_s28 + $0xb40] sm:$0xf]  ;;  %v8806_v11 = vor.u32 %v11409_v3, %v8805_v2  ;;  %v11451_v2 = vld [vmem:[%s12081_s28 + $0xb94] sm:$0xf0]  ;;  %v11449_v15 = vld [vmem:[%s12081_s28 + $0xb84] sm:$0xf0] }
  0xad   : > { %6095 = vmatpush.bf16.msra.mxu0 %v8534_v40  ;;  %v11429_v40 = vld [vmem:[%s12081_s28 + $0xae4] sm:$0xf0]  ;;  %v8997_v9 = vld [vmem:[%s12081_s28 + $0xbc0] sm:$0xf] }
  0xae   : > { %6108 = vmatpush.bf16.msra.mxu1 %v8598_v61  ;;  %v8949_v61 = vld [vmem:[%s12081_s28 + $0xb60] sm:$0xf]  ;;  %v8886_v48 = vor.u32 %v11429_v40, %v8885_v36 }
  0xaf   : > { %6121 = vmatpush.bf16.msra.mxu2 %v8662_v41  ;;  %v11445_v41 = vld [vmem:[%s12081_s28 + $0xb64] sm:$0xf0]  ;;  %v8789_v40 = vld [vmem:[%s12081_s28 + $0xa20] sm:$0xf] }
  0xb0   : > { %6134 = vmatpush.bf16.msra.mxu3 %v8726_v46  ;;  %v11461_v46 = vld [vmem:[%s12081_s28 + $0xbe4] sm:$0xf0]  ;;  %v8950_v49 = vor.u32 %v11445_v41, %v8949_v61  ;;  %v8853_v41 = vld [vmem:[%s12081_s28 + $0xaa0] sm:$0xf] }
  0xb1   : > { %6096 = vmatpush.bf16.msra.mxu0 %v8526_v52  ;;  %v8877_v52 = vld [vmem:[%s12081_s28 + $0xad0] sm:$0xf]  ;;  %v9014_v53 = vor.u32 %v11461_v46, %v9013_v23  ;;  %v11405_v61 = vld [vmem:[%s12081_s28 + $0xa24] sm:$0xf0]  ;;  %v8773_v3 = vld [vmem:[%s12081_s28 + $0xa00] sm:$0xf] }
  0xb2   : > { %6109 = vmatpush.bf16.msra.mxu1 %v8590_v56  ;;  %v11443_v56 = vld [vmem:[%s12081_s28 + $0xb54] sm:$0xf0]  ;;  %v8878_v62 = vor.u32 %v11427_v54, %v8877_v52  ;;  %v11421_v46 = vld [vmem:[%s12081_s28 + $0xaa4] sm:$0xf0]  ;;  %v8790_v51 = vor.u32 %v11405_v61, %v8789_v40  ;;  %v8781_v52 = vld [vmem:[%s12081_s28 + $0xa10] sm:$0xf] }
  0xb3   : > { %6122 = vmatpush.bf16.msra.mxu2 %v8654_v57  ;;  %v9005_v57 = vld [vmem:[%s12081_s28 + $0xbd0] sm:$0xf]  ;;  %v8965_v14 = vld [vmem:[%s12081_s28 + $0xb80] sm:$0xf] }
  0xb4   : > { %6135 = vmatpush.bf16.msra.mxu3 %v8718_v1  ;;  %v8942_v1 = vor.u32 %v11443_v56, %v8941_v55  ;;  %v9006_v5 = vor.u32 %v11459_v58, %v9005_v57  ;;  %v11403_v55 = vld [vmem:[%s12081_s28 + $0xa14] sm:$0xf0]  ;;  %v8845_v56 = vld [vmem:[%s12081_s28 + $0xa90] sm:$0xf] }
  0xb5   : > { %6097 = vmatpush.bf16.msra.mxu0 %v8518_v8  ;;  %v11441_v8 = vld [vmem:[%s12081_s28 + $0xb44] sm:$0xf0]  ;;  %v11419_v57 = vld [vmem:[%s12081_s28 + $0xa94] sm:$0xf0]  ;;  %v9277_v61 = vld [vmem:[%s12081_s28 + $0xdf0] sm:$0xf] }
  0xb6   : > { %6110 = vmatpush.bf16.msra.mxu1 %v8582_v12  ;;  %v8870_v12 = vor.u32 %v11425_v6, %v8869_v4  ;;  %v11401_v4 = vld [vmem:[%s12081_s28 + $0xa04] sm:$0xf0]  ;;  %v8782_v6 = vor.u32 %v11403_v55, %v8781_v52 }
  0xb7   : > { %6123 = vmatpush.bf16.msra.mxu2 %v8646_v13  ;;  %v8934_v13 = vor.u32 %v11441_v8, %v8933_v7  ;;  %v8837_v7 = vld [vmem:[%s12081_s28 + $0xa80] sm:$0xf]  ;;  %v11417_v8 = vld [vmem:[%s12081_s28 + $0xa84] sm:$0xf0]  ;;  %v8774_v40 = vor.u32 %v11401_v4, %v8773_v3 }
  0xb8   : > { %6136 = vmatpush.bf16.msra.mxu3 %v8710_v16  ;;  %6098 = vmatmul.bf16.vlgmr.msra.gmra.mxu0 %v12501_v60  ;;  %v8861_v16 = vld [vmem:[%s12081_s28 + $0xab0] sm:$0xf]  ;;  %v351_v52 = vld.sshfl [vmem:[#allocation1 + $0x28] sm:$0xff pattern:$0x73625140] }
  0xb9   : > { %6142 = vmatpush.bf16.msrb.mxu0 %v8830_v17  ;;  %6111 = vmatmul.bf16.vlgmr.msra.gmra.mxu1 %v12508_v44  ;;  %v8998_v17 = vor.u32 %v11457_v10, %v8997_v9  ;;  %v8862_v36 = vor.u32 %v11423_v18, %v8861_v16  ;;  %v8901_v9 = vld [vmem:[%s12081_s28 + $0xb00] sm:$0xf]  ;;  %v11433_v10 = vld [vmem:[%s12081_s28 + $0xb04] sm:$0xf0]  ;;  %v9085_v16 = vld [vmem:[%s12081_s28 + $0xc70] sm:$0xf] }
  0xba   : > { %6155 = vmatpush.bf16.msrb.mxu1 %v8894_v24  ;;  %6124 = vmatmul.bf16.vlgmr.msra.gmra.mxu2 %v12506_v63  ;;  %v11439_v24 = vld [vmem:[%s12081_s28 + $0xb34] sm:$0xf0]  ;;  %v11493_v4 = vld [vmem:[%s12081_s28 + $0xce4] sm:$0xf0] }
  0xbb   : > { %6168 = vmatpush.bf16.msrb.mxu2 %v8958_v26  ;;  %6137 = vmatmul.bf16.vlgmr.msra.gmra.mxu3 %v12512_v47  ;;  %v8989_v26 = vld [vmem:[%s12081_s28 + $0xbb0] sm:$0xf] }
  0xbc   : > { %6181 = vmatpush.bf16.msrb.mxu3 %v9022_v20  ;;  %v8926_v20 = vor.u32 %v11439_v24, %v8925_v21  ;;  %v8990_v23 = vor.u32 %v11455_v30, %v8989_v26  ;;  %v11479_v21 = vld [vmem:[%s12081_s28 + $0xc74] sm:$0xf0]  ;;  %v9149_v24 = vld [vmem:[%s12081_s28 + $0xcf0] sm:$0xf] }
  0xbd   : > { %6143 = vmatpush.bf16.msrb.mxu0 %v8822_v0  ;;  %v8917_v0 = vld [vmem:[%s12081_s28 + $0xb20] sm:$0xf]  ;;  %v11495_v26 = vld [vmem:[%s12081_s28 + $0xcf4] sm:$0xf0]  ;;  %v9213_v30 = vld [vmem:[%s12081_s28 + $0xd70] sm:$0xf] }
  0xbe   : > { %6156 = vmatpush.bf16.msrb.mxu1 %v8886_v48  ;;  %v11437_v48 = vld [vmem:[%s12081_s28 + $0xb24] sm:$0xf0]  ;;  %v9150_v55 = vor.u32 %v11495_v26, %v9149_v24  ;;  %v11491_v26 = vld [vmem:[%s12081_s28 + $0xcd4] sm:$0xf0] }
  0xbf   : > { %6169 = vmatpush.bf16.msrb.mxu2 %v8950_v49  ;;  %v8981_v49 = vld [vmem:[%s12081_s28 + $0xba0] sm:$0xf]  ;;  %v8918_v54 = vor.u32 %v11437_v48, %v8917_v0  ;;  %v8902_v0 = vor.u32 %v11433_v10, %v8901_v9  ;;  %v12587_v9 = vpack.c.bf16 %v351_v52, %v351_v52  ;;  %v11505_v52 = vld [vmem:[%s12081_s28 + $0xd44] sm:$0xf0] }
  0xc0   : > { %6182 = vmatpush.bf16.msrb.mxu3 %v9014_v53  ;;  %v8854_v53 = vor.u32 %v11421_v46, %v8853_v41  ;;  %v8982_v58 = vor.u32 %v11453_v50, %v8981_v49  ;;  %v11527_v41 = vld [vmem:[%s12081_s28 + $0xdf4] sm:$0xf0]  ;;  %v8838_v46 = vor.u32 %v11417_v8, %v8837_v7  ;;  %v350_v48 = vld.sshfl [vmem:[#allocation1 + $0x20] sm:$0xff pattern:$0x73625140]  ;;  %v8966_v50 = vor.u32 %v11449_v15, %v8965_v14 }
  0xc1   : > { %6144 = vmatpush.bf16.msrb.mxu0 %v8814_v59  ;;  %v8909_v59 = vld [vmem:[%s12081_s28 + $0xb10] sm:$0xf]  ;;  %v12580_v3 = vpack.c.bf16 %v350_v48, %v350_v48  ;;  %v9269_v10 = vld [vmem:[%s12081_s28 + $0xde0] sm:$0xf] }
  0xc2   : > { %6157 = vmatpush.bf16.msrb.mxu1 %v8878_v62  ;;  %v11435_v62 = vld [vmem:[%s12081_s28 + $0xb14] sm:$0xf0]  ;;  %v352_v49 = vld.sshfl [vmem:[#allocation1 + $0x30] sm:$0xff pattern:$0x73625140] }
  0xc3   : > { %6170 = vmatpush.bf16.msrb.mxu2 %v8942_v1  ;;  %v8973_v1 = vld [vmem:[%s12081_s28 + $0xb90] sm:$0xf]  ;;  %v12585_v8 = vpack.c.bf16 %v352_v49, %v352_v49  ;;  %v9125_v48 = vld [vmem:[%s12081_s28 + $0xcc0] sm:$0xf] }
  0xc4   : > { %6183 = vmatpush.bf16.msrb.mxu3 %v9006_v5  ;;  %v5891_v5 = vpop.f32.mrf.mxu0  ;;  %v8974_v18 = vor.u32 %v11451_v2, %v8973_v1  ;;  %v9278_v2 = vor.u32 %v11527_v41, %v9277_v61 }
  0xc5   : > { %6145 = vmatpush.bf16.msrb.mxu0 %v8806_v11  ;;  %v5904_v11 = vpop.f32.mrf.mxu1 }
  0xc6   : > { %6158 = vmatpush.bf16.msrb.mxu1 %v8870_v12  ;;  %v8846_v12 = vor.u32 %v11419_v57, %v8845_v56  ;;  %v9077_v57 = vld [vmem:[%s12081_s28 + $0xc60] sm:$0xf] }
  0xc7   : > { %6171 = vmatpush.bf16.msrb.mxu2 %v8934_v13  ;;  %v8910_v13 = vor.u32 %v11435_v62, %v8909_v59  ;;  %v9141_v59 = vld [vmem:[%s12081_s28 + $0xce0] sm:$0xf] }
  0xc8   : > { %6184 = vmatpush.bf16.msrb.mxu3 %v8998_v17  ;;  %v5905_v17 = vadd.f32 %v5904_v11, %v5891_v5  ;;  %v9205_v5 = vld [vmem:[%s12081_s28 + $0xd60] sm:$0xf]  ;;  %v11525_v11 = vld [vmem:[%s12081_s28 + $0xde4] sm:$0xf0]  ;;  %v9142_v14 = vor.u32 %v11493_v4, %v9141_v59  ;;  %v9053_v59 = vld [vmem:[%s12081_s28 + $0xc30] sm:$0xf] }
  0xc9   : > { %6146 = vmatpush.bf16.msrb.mxu0 %v8798_v35  ;;  %v11511_v35 = vld [vmem:[%s12081_s28 + $0xd74] sm:$0xf0]  ;;  %v9270_v24 = vor.u32 %v11525_v11, %v9269_v10  ;;  %v9181_v10 = vld [vmem:[%s12081_s28 + $0xd30] sm:$0xf] }
  0xca   : > { %6159 = vmatpush.bf16.msrb.mxu1 %v8862_v36  ;;  %v5917_v36 = vpop.f32.mrf.mxu2  ;;  %v9214_v56 = vor.u32 %v11511_v35, %v9213_v30  ;;  %v9197_v30 = vld [vmem:[%s12081_s28 + $0xd50] sm:$0xf]  ;;  %v11507_v35 = vld [vmem:[%s12081_s28 + $0xd54] sm:$0xf0] }
  0xcb   : > { %6172 = vmatpush.bf16.msrb.mxu2 %v8926_v20  ;;  %v301_v20 = vld [vmem:[%s12076_s24 + $0x30] sm:$0xff]  ;;  %v11503_v11 = vld [vmem:[%s12081_s28 + $0xd34] sm:$0xf0] }
  0xcc   : > { %6185 = vmatpush.bf16.msrb.mxu3 %v8990_v23  ;;  %v5918_v23 = vadd.f32 %v5917_v36, %v5905_v17  ;;  %354 = vst [vmem:[#allocation1] ss:$4 sm:$0xff] %v301_v20  ;;  %v5893_v1 = vpop.f32.mrf.mxu0  ;;  %v11475_v17 = vld [vmem:[%s12081_s28 + $0xc54] sm:$0xf0]  ;;  %v9261_v36 = vld [vmem:[%s12081_s28 + $0xdd0] sm:$0xf] }
  0xcd   : > { %6147 = vmatpush.bf16.msrb.mxu0 %v8790_v51  ;;  %v9086_v51 = vor.u32 %v11479_v21, %v9085_v16  ;;  %v5906_v7 = vpop.f32.mrf.mxu1  ;;  %v9069_v16 = vld [vmem:[%s12081_s28 + $0xc50] sm:$0xf]  ;;  %v11523_v20 = vld [vmem:[%s12081_s28 + $0xdd4] sm:$0xf0] }
  0xce   : > { %6160 = vmatpush.bf16.msrb.mxu1 %v8854_v53  ;;  %v353_v53 = vld.sshfl [vmem:[#allocation1 + $0x38] sm:$0xff pattern:$0x73625140]  ;;  %v9262_v49 = vor.u32 %v11523_v20, %v9261_v36  ;;  %v9173_v36 = vld [vmem:[%s12081_s28 + $0xd20] sm:$0xf] }
  0xcf   : > { %6173 = vmatpush.bf16.msrb.mxu2 %v8918_v54  ;;  %v5930_v54 = vpop.f32.mrf.mxu3  ;;  %v11471_v1 = vld [vmem:[%s12081_s28 + $0xc34] sm:$0xf0]  ;;  %v11501_v20 = vld [vmem:[%s12081_s28 + $0xd24] sm:$0xf0] }
  0xd0   : > { %6186 = vmatpush.bf16.msrb.mxu3 %v8982_v58  ;;  %v11477_v58 = vld [vmem:[%s12081_s28 + $0xc64] sm:$0xf0]  ;;  %v12578_v62 = vadd.f32 %v5930_v54, %v5918_v23  ;;  %v9198_v23 = vor.u32 %v11507_v35, %v9197_v30  ;;  %v11487_v7 = vld [vmem:[%s12081_s28 + $0xcb4] sm:$0xf0] }
  0xd1   : > { %6148 = vmatpush.bf16.msrb.mxu0 %v8782_v6  ;;  %v11509_v6 = vld [vmem:[%s12081_s28 + $0xd64] sm:$0xf0] }
  0xd2   : > { %6161 = vmatpush.bf16.msrb.mxu1 %v8846_v12  ;;  %v12591_v12 = vpack.c.bf16 %v353_v53, %v353_v53  ;;  %v9206_v15 = vor.u32 %v11509_v6, %v9205_v5  ;;  %v5919_v21 = vpop.f32.mrf.mxu2  ;;  %v9253_v53 = vld [vmem:[%s12081_s28 + $0xdc0] sm:$0xf]  ;;  %v11521_v54 = vld [vmem:[%s12081_s28 + $0xdc4] sm:$0xf0] }
  0xd3   : > { %6174 = vmatpush.bf16.msrb.mxu2 %v8910_v13  ;;  %v9078_v13 = vor.u32 %v11477_v58, %v9077_v57  ;;  %v9254_v6 = vor.u32 %v11521_v54, %v9253_v53  ;;  %v11469_v21 = vld [vmem:[%s12081_s28 + $0xc24] sm:$0xf0]  ;;  %v9101_v53 = vld [vmem:[%s12081_s28 + $0xc90] sm:$0xf]  ;;  %v11483_v54 = vld [vmem:[%s12081_s28 + $0xc94] sm:$0xf0] }
  0xd4   : > { %6187 = vmatpush.bf16.msrb.mxu3 %v8974_v18  ;;  %v9133_v18 = vld [vmem:[%s12081_s28 + $0xcd0] sm:$0xf]  ;;  %v11485_v35 = vld [vmem:[%s12081_s28 + $0xca4] sm:$0xf0] }
  0xd5   : > { %6149 = vmatpush.bf16.msrb.mxu0 %v8774_v40  ;;  %v9070_v40 = vor.u32 %v11475_v17, %v9069_v16  ;;  %v9134_v41 = vor.u32 %v11491_v26, %v9133_v18  ;;  %v9054_v16 = vor.u32 %v11471_v1, %v9053_v59  ;;  %v9182_v17 = vor.u32 %v11503_v11, %v9181_v10  ;;  %v9045_v18 = vld [vmem:[%s12081_s28 + $0xc20] sm:$0xf]  ;;  %v9229_v59 = vld [vmem:[%s12081_s28 + $0xd90] sm:$0xf]  ;;  %v11515_v1 = vld [vmem:[%s12081_s28 + $0xd94] sm:$0xf0] }
  0xd6   : > { %6162 = vmatpush.bf16.msrb.mxu1 %v8838_v46  ;;  %v9061_v46 = vld [vmem:[%s12081_s28 + $0xc40] sm:$0xf]  ;;  %v5956_v5 = vpop.f32.mrf.mxu1  ;;  %v11497_v11 = vld [vmem:[%s12081_s28 + $0xd04] sm:$0xf0] }
  0xd7   : > { %6175 = vmatpush.bf16.msrb.mxu2 %v8902_v0  ;;  %v5932_v61 = vpop.f32.mrf.mxu3  ;;  %v11473_v0 = vld [vmem:[%s12081_s28 + $0xc44] sm:$0xf0]  ;;  %v9157_v10 = vld [vmem:[%s12081_s28 + $0xd00] sm:$0xf] }
  0xd8   : > { %6188 = vmatpush.bf16.msrb.mxu3 %v8966_v50  ;;  %6150 = vmatmul.bf16.vlgmr.msrb.gmra.mxu0 %v12580_v3  ;;  %v11489_v50 = vld [vmem:[%s12081_s28 + $0xcc4] sm:$0xf0] }
  0xd9   : > { %6194 = vmatpush.bf16.msra.mxu0 %v9086_v51  ;;  %6163 = vmatmul.bf16.vlgmr.msrb.gmra.mxu1 %v12587_v9  ;;  %v9189_v51 = vld [vmem:[%s12081_s28 + $0xd40] sm:$0xf]  ;;  %v9126_v57 = vor.u32 %v11489_v50, %v9125_v48  ;;  %v9037_v48 = vld [vmem:[%s12081_s28 + $0xc10] sm:$0xf] }
  0xda   : > { %6207 = vmatpush.bf16.msra.mxu1 %v9150_v55  ;;  %6176 = vmatmul.bf16.vlgmr.msrb.gmra.mxu2 %v12585_v8  ;;  %v9062_v55 = vor.u32 %v11473_v0, %v9061_v46  ;;  %v9190_v58 = vor.u32 %v11505_v52, %v9189_v51  ;;  %v9046_v46 = vor.u32 %v11469_v21, %v9045_v18  ;;  %v11467_v52 = vld [vmem:[%s12081_s28 + $0xc14] sm:$0xf0] }
  0xdb   : > { %6220 = vmatpush.bf16.msra.mxu2 %v9214_v56  ;;  %6189 = vmatmul.bf16.vlgmr.msrb.gmra.mxu3 %v12591_v12  ;;  %v5943_v56 = vpop.f32.mrf.mxu0  ;;  %v9174_v51 = vor.u32 %v11501_v20, %v9173_v36  ;;  %v9230_v18 = vor.u32 %v11515_v1, %v9229_v59  ;;  %v11543_v21 = vld [vmem:[%s12081_s28 + $0xe74] sm:$0xf0] }
  0xdc   : > { %6233 = vmatpush.bf16.msra.mxu3 %v9278_v2  ;;  %v9117_v2 = vld [vmem:[%s12081_s28 + $0xcb0] sm:$0xf]  ;;  %v5944_v4 = vadd.f32 %v5943_v56, %v12578_v62  ;;  %v11575_v36 = vld [vmem:[%s12081_s28 + $0xf74] sm:$0xf0] }
  0xdd   : > { %6195 = vmatpush.bf16.msra.mxu0 %v9078_v13  ;;  %v9245_v13 = vld [vmem:[%s12081_s28 + $0xdb0] sm:$0xf]  ;;  %v9118_v62 = vor.u32 %v11487_v7, %v9117_v2  ;;  %v5969_v26 = vpop.f32.mrf.mxu2  ;;  %v9029_v2 = vld [vmem:[%s12081_s28 + $0xc00] sm:$0xf]  ;;  %v11481_v7 = vld [vmem:[%s12081_s28 + $0xc84] sm:$0xf0] }
  0xde   : > { %6208 = vmatpush.bf16.msra.mxu1 %v9142_v14  ;;  %v11519_v14 = vld [vmem:[%s12081_s28 + $0xdb4] sm:$0xf0] }
  0xdf   : > { %6221 = vmatpush.bf16.msra.mxu2 %v9206_v15  ;;  %v5957_v15 = vadd.f32 %v5956_v5, %v5944_v4  ;;  %v9246_v30 = vor.u32 %v11519_v14, %v9245_v13  ;;  %v5982_v61 = vpop.f32.mrf.mxu3  ;;  %v11465_v4 = vld [vmem:[%s12081_s28 + $0xc04] sm:$0xf0]  ;;  %v9038_v5 = vor.u32 %v11467_v52, %v9037_v48  ;;  %v9102_v13 = vor.u32 %v11483_v54, %v9101_v53  ;;  %v302_v20 = vld [vmem:[%s12076_s24 + $0x38] sm:$0xff]  ;;  %v356_v48 = vld.sshfl [vmem:[#allocation1] sm:$0xff pattern:$0x73625140] }
  0xe0   : > { %6234 = vmatpush.bf16.msra.mxu3 %v9270_v24  ;;  %v9109_v24 = vld [vmem:[%s12081_s28 + $0xca0] sm:$0xf]  ;;  %355 = vst [vmem:[#allocation1 + $0x20] ss:$4 sm:$0xff] %v302_v20  ;;  %v12660_v1 = vpack.c.bf16 %v356_v48, %v356_v48 }
  0xe1   : > { %6196 = vmatpush.bf16.msra.mxu0 %v9070_v40  ;;  %v5970_v40 = vadd.f32 %v5969_v26, %v5957_v15  ;;  %v9110_v50 = vor.u32 %v11485_v35, %v9109_v24  ;;  %v9221_v15 = vld [vmem:[%s12081_s28 + $0xd80] sm:$0xf]  ;;  %v9405_v24 = vld [vmem:[%s12081_s28 + $0xef0] sm:$0xf]  ;;  %v11559_v26 = vld [vmem:[%s12081_s28 + $0xef4] sm:$0xf0] }
  0xe2   : > { %6209 = vmatpush.bf16.msra.mxu1 %v9134_v41  ;;  %v9237_v41 = vld [vmem:[%s12081_s28 + $0xda0] sm:$0xf]  ;;  %v9469_v35 = vld [vmem:[%s12081_s28 + $0xf70] sm:$0xf]  ;;  %v9406_v54 = vor.u32 %v11559_v26, %v9405_v24  ;;  %v11555_v24 = vld [vmem:[%s12081_s28 + $0xed4] sm:$0xf0] }
  0xe3   : > { %6222 = vmatpush.bf16.msra.mxu2 %v9198_v23  ;;  %v11517_v23 = vld [vmem:[%s12081_s28 + $0xda4] sm:$0xf0]  ;;  %v12630_v0 = vadd.f32 %v5982_v61, %v5970_v40  ;;  %v9030_v40 = vor.u32 %v11465_v4, %v9029_v2  ;;  %v9533_v61 = vld [vmem:[%s12081_s28 + $0xff0] sm:$0xf]  ;;  %v9461_v4 = vld [vmem:[%s12081_s28 + $0xf60] sm:$0xf] }
  0xe4   : > { %6235 = vmatpush.bf16.msra.mxu3 %v9262_v49  ;;  %v5945_v49 = vpop.f32.mrf.mxu0  ;;  %v9238_v56 = vor.u32 %v11517_v23, %v9237_v41  ;;  %v11591_v41 = vld [vmem:[%s12081_s28 + $0xff4] sm:$0xf0]  ;;  %v357_v52 = vld.sshfl [vmem:[#allocation1 + $0x8] sm:$0xff pattern:$0x73625140] }
  0xe5   : > { %6197 = vmatpush.bf16.msra.mxu0 %v9062_v55  ;;  %v5958_v55 = vpop.f32.mrf.mxu1  ;;  %v358_v49 = vld.sshfl [vmem:[#allocation1 + $0x10] sm:$0xff pattern:$0x73625140]  ;;  %v359_v53 = vld.sshfl [vmem:[#allocation1 + $0x18] sm:$0xff pattern:$0x73625140]  ;;  %v9534_v59 = vor.u32 %v11591_v41, %v9533_v61 }
  0xe6   : > { %6210 = vmatpush.bf16.msra.mxu1 %v9126_v57  ;;  %v9165_v57 = vld [vmem:[%s12081_s28 + $0xd10] sm:$0xf]  ;;  %v9470_v55 = vor.u32 %v11575_v36, %v9469_v35  ;;  %v11557_v2 = vld [vmem:[%s12081_s28 + $0xee4] sm:$0xf0]  ;;  %v11587_v36 = vld [vmem:[%s12081_s28 + $0xfd4] sm:$0xf0] }
  0xe7   : > { %6223 = vmatpush.bf16.msra.mxu2 %v9190_v58  ;;  %v11499_v58 = vld [vmem:[%s12081_s28 + $0xd14] sm:$0xf0]  ;;  %v9453_v26 = vld [vmem:[%s12081_s28 + $0xf50] sm:$0xf]  ;;  %v9317_v41 = vld [vmem:[%s12081_s28 + $0xe40] sm:$0xf] }
  0xe8   : > { %6236 = vmatpush.bf16.msra.mxu3 %v9254_v6  ;;  %v9093_v6 = vld [vmem:[%s12081_s28 + $0xc80] sm:$0xf]  ;;  %v9166_v14 = vor.u32 %v11499_v58, %v9165_v57  ;;  %v11541_v57 = vld [vmem:[%s12081_s28 + $0xe64] sm:$0xf0]  ;;  %v9517_v35 = vld [vmem:[%s12081_s28 + $0xfd0] sm:$0xf] }
  0xe9   : > { %6198 = vmatpush.bf16.msra.mxu0 %v9054_v16  ;;  %v11513_v16 = vld [vmem:[%s12081_s28 + $0xd84] sm:$0xf0]  ;;  %v9094_v23 = vor.u32 %v11481_v7, %v9093_v6  ;;  %v9397_v58 = vld [vmem:[%s12081_s28 + $0xee0] sm:$0xf]  ;;  %v12665_v6 = vpack.c.bf16 %v358_v49, %v358_v49  ;;  %v12667_v7 = vpack.c.bf16 %v357_v52, %v357_v52  ;;  %v9518_v48 = vor.u32 %v11587_v36, %v9517_v35 }
  0xea   : > { %6211 = vmatpush.bf16.msra.mxu1 %v9118_v62  ;;  %v9341_v62 = vld [vmem:[%s12081_s28 + $0xe70] sm:$0xf]  ;;  %v11553_v49 = vld [vmem:[%s12081_s28 + $0xec4] sm:$0xf0] }
  0xeb   : > { %6224 = vmatpush.bf16.msra.mxu2 %v9182_v17  ;;  %v5971_v17 = vpop.f32.mrf.mxu2 }
  0xec   : > { %6237 = vmatpush.bf16.msra.mxu3 %v9246_v30  ;;  %v5984_v30 = vpop.f32.mrf.mxu3  ;;  %v11539_v17 = vld [vmem:[%s12081_s28 + $0xe54] sm:$0xf0] }
  0xed   : > { %6199 = vmatpush.bf16.msra.mxu0 %v9046_v46  ;;  %v9158_v46 = vor.u32 %v11497_v11, %v9157_v10  ;;  %v9525_v10 = vld [vmem:[%s12081_s28 + $0xfe0] sm:$0xf]  ;;  %v11589_v11 = vld [vmem:[%s12081_s28 + $0xfe4] sm:$0xf0]  ;;  %v11571_v30 = vld [vmem:[%s12081_s28 + $0xf54] sm:$0xf0] }
  0xee   : > { %6212 = vmatpush.bf16.msra.mxu1 %v9110_v50  ;;  %v9222_v50 = vor.u32 %v11513_v16, %v9221_v15  ;;  %v9398_v15 = vor.u32 %v11557_v2, %v9397_v58  ;;  %v9454_v61 = vor.u32 %v11571_v30, %v9453_v26  ;;  %v9309_v2 = vld [vmem:[%s12081_s28 + $0xe30] sm:$0xf]  ;;  %v11533_v26 = vld [vmem:[%s12081_s28 + $0xe24] sm:$0xf0]  ;;  %v9365_v30 = vld [vmem:[%s12081_s28 + $0xea0] sm:$0xf] }
  0xef   : > { %6225 = vmatpush.bf16.msra.mxu2 %v9174_v51  ;;  %v9342_v51 = vor.u32 %v11543_v21, %v9341_v62  ;;  %v9325_v62 = vld [vmem:[%s12081_s28 + $0xe50] sm:$0xf]  ;;  %v9526_v21 = vor.u32 %v11589_v11, %v9525_v10 }
  0xf0   : > { %6238 = vmatpush.bf16.msra.mxu3 %v9238_v56  ;;  %v9333_v56 = vld [vmem:[%s12081_s28 + $0xe60] sm:$0xf]  ;;  %v9326_v20 = vor.u32 %v11539_v17, %v9325_v62  ;;  %v11583_v62 = vld [vmem:[%s12081_s28 + $0xfb4] sm:$0xf0] }
  0xf1   : > { %6200 = vmatpush.bf16.msra.mxu0 %v9038_v5  ;;  %v11573_v5 = vld [vmem:[%s12081_s28 + $0xf64] sm:$0xf0] }
  0xf2   : > { %6213 = vmatpush.bf16.msra.mxu1 %v9102_v13  ;;  %v12671_v13 = vpack.c.bf16 %v359_v53, %v359_v53  ;;  %v9462_v16 = vor.u32 %v11573_v5, %v9461_v4  ;;  %v9509_v53 = vld [vmem:[%s12081_s28 + $0xfc0] sm:$0xf]  ;;  %v11535_v4 = vld [vmem:[%s12081_s28 + $0xe34] sm:$0xf0]  ;;  %v9373_v5 = vld [vmem:[%s12081_s28 + $0xeb0] sm:$0xf] }
  0xf3   : > { %6226 = vmatpush.bf16.msra.mxu2 %v9166_v14  ;;  %v9334_v14 = vor.u32 %v11541_v57, %v9333_v56  ;;  %v9310_v17 = vor.u32 %v11535_v4, %v9309_v2  ;;  %v9421_v2 = vld [vmem:[%s12081_s28 + $0xf10] sm:$0xf]  ;;  %v11563_v4 = vld [vmem:[%s12081_s28 + $0xf14] sm:$0xf0] }
  0xf4   : > { %6239 = vmatpush.bf16.msra.mxu3 %v9230_v18  ;;  %v9389_v18 = vld [vmem:[%s12081_s28 + $0xed0] sm:$0xf] }
  0xf5   : > { %6201 = vmatpush.bf16.msra.mxu0 %v9030_v40  ;;  %v9390_v40 = vor.u32 %v11555_v24, %v9389_v18  ;;  %v5995_v52 = vpop.f32.mrf.mxu0  ;;  %v9301_v24 = vld [vmem:[%s12081_s28 + $0xe20] sm:$0xf] }
  0xf6   : > { %6214 = vmatpush.bf16.msra.mxu1 %v9094_v23  ;;  %v11537_v23 = vld [vmem:[%s12081_s28 + $0xe44] sm:$0xf0]  ;;  %v6008_v57 = vpop.f32.mrf.mxu1 }
  0xf7   : > { %6227 = vmatpush.bf16.msra.mxu2 %v9158_v46  ;;  %v9381_v46 = vld [vmem:[%s12081_s28 + $0xec0] sm:$0xf]  ;;  %v9318_v56 = vor.u32 %v11537_v23, %v9317_v41 }
  0xf8   : > { %6240 = vmatpush.bf16.msra.mxu3 %v9222_v50  ;;  %6202 = vmatmul.bf16.vlgmr.msra.gmra.mxu0 %v12660_v1  ;;  %v9445_v50 = vld [vmem:[%s12081_s28 + $0xf40] sm:$0xf]  ;;  %v9382_v58 = vor.u32 %v11553_v49, %v9381_v46 }
  0xf9   : > { %6246 = vmatpush.bf16.msrb.mxu0 %v9342_v51  ;;  %6215 = vmatmul.bf16.vlgmr.msra.gmra.mxu1 %v12667_v7  ;;  %v11569_v51 = vld [vmem:[%s12081_s28 + $0xf44] sm:$0xf0]  ;;  %v9493_v46 = vld [vmem:[%s12081_s28 + $0xfa0] sm:$0xf] }
  0xfa   : > { %6259 = vmatpush.bf16.msrb.mxu1 %v9406_v54  ;;  %6228 = vmatmul.bf16.vlgmr.msra.gmra.mxu2 %v12665_v6  ;;  %v11585_v54 = vld [vmem:[%s12081_s28 + $0xfc4] sm:$0xf0] }
  0xfb   : > { %6272 = vmatpush.bf16.msrb.mxu2 %v9470_v55  ;;  %6241 = vmatmul.bf16.vlgmr.msra.gmra.mxu3 %v12671_v13  ;;  %v5996_v55 = vadd.f32 %v5995_v52, %v12630_v0  ;;  %v9510_v10 = vor.u32 %v11585_v54, %v9509_v53  ;;  %v11567_v0 = vld [vmem:[%s12081_s28 + $0xf34] sm:$0xf0] }
  0xfc   : > { %6285 = vmatpush.bf16.msrb.mxu3 %v9534_v59  ;;  %v9446_v59 = vor.u32 %v11569_v51, %v9445_v50  ;;  %v9302_v50 = vor.u32 %v11533_v26, %v9301_v24  ;;  %v9293_v51 = vld [vmem:[%s12081_s28 + $0xe10] sm:$0xf]  ;;  %v9477_v24 = vld [vmem:[%s12081_s28 + $0xf80] sm:$0xf]  ;;  %v11577_v26 = vld [vmem:[%s12081_s28 + $0xf84] sm:$0xf0] }
  0xfd   : > { %6247 = vmatpush.bf16.msrb.mxu0 %v9334_v14  ;;  %v6009_v11 = vadd.f32 %v6008_v57, %v5996_v55  ;;  %v11551_v14 = vld [vmem:[%s12081_s28 + $0xeb4] sm:$0xf0]  ;;  %v6021_v36 = vpop.f32.mrf.mxu2  ;;  %v5997_v49 = vpop.f32.mrf.mxu0  ;;  %v9357_v57 = vld [vmem:[%s12081_s28 + $0xe90] sm:$0xf] }
  0xfe   : > { %6260 = vmatpush.bf16.msrb.mxu1 %v9398_v15  ;;  %v9437_v15 = vld [vmem:[%s12081_s28 + $0xf30] sm:$0xf]  ;;  %v9374_v18 = vor.u32 %v11551_v14, %v9373_v5  ;;  %v6034_v23 = vpop.f32.mrf.mxu3  ;;  %v6010_v52 = vpop.f32.mrf.mxu1  ;;  %v11529_v14 = vld [vmem:[%s12081_s28 + $0xe04] sm:$0xf0] }
  0xff   : > { %6273 = vmatpush.bf16.msrb.mxu2 %v9462_v16  ;;  %v9501_v16 = vld [vmem:[%s12081_s28 + $0xfb0] sm:$0xf]  ;;  %v6022_v41 = vadd.f32 %v6021_v36, %v6009_v11  ;;  %v9285_v11 = vld [vmem:[%s12081_s28 + $0xe00] sm:$0xf]  ;;  %v11607_v36 = vld [vmem:[%s12081_s28 + $0x1074] sm:$0xf0] }
 0x100   : > { %6286 = vmatpush.bf16.msrb.mxu3 %v9526_v21  ;;  %v9438_v21 = vor.u32 %v11567_v0, %v9437_v15  ;;  %v9502_v35 = vor.u32 %v11583_v62, %v9501_v16  ;;  %v9485_v5 = vld [vmem:[%s12081_s28 + $0xf90] sm:$0xf]  ;;  %v9349_v0 = vld [vmem:[%s12081_s28 + $0xe80] sm:$0xf]  ;;  %v11545_v16 = vld [vmem:[%s12081_s28 + $0xe84] sm:$0xf0]  ;;  %v9286_v49 = vor.u32 %v11529_v14, %v9285_v11 }
 0x101   : > { %6248 = vmatpush.bf16.msrb.mxu0 %v9326_v20  ;;  %v11549_v20 = vld [vmem:[%s12081_s28 + $0xea4] sm:$0xf0]  ;;  %v12711_v53 = vadd.f32 %v6034_v23, %v6022_v41  ;;  %v9413_v62 = vld [vmem:[%s12081_s28 + $0xf00] sm:$0xf]  ;;  %v9725_v41 = vld [vmem:[%s12081_s28 + $0x1170] sm:$0xf]  ;;  %v9350_v52 = vor.u32 %v11545_v16, %v9349_v0 }
 0x102   : > { %6261 = vmatpush.bf16.msrb.mxu1 %v9390_v40  ;;  %v9429_v40 = vld [vmem:[%s12081_s28 + $0xf20] sm:$0xf]  ;;  %v9366_v54 = vor.u32 %v11549_v20, %v9365_v30  ;;  %v9597_v30 = vld [vmem:[%s12081_s28 + $0x1070] sm:$0xf]  ;;  %v11639_v23 = vld [vmem:[%s12081_s28 + $0x1174] sm:$0xf0] }
 0x103   : > { %6274 = vmatpush.bf16.msrb.mxu2 %v9454_v61  ;;  %v11565_v61 = vld [vmem:[%s12081_s28 + $0xf24] sm:$0xf0]  ;;  %v9661_v20 = vld [vmem:[%s12081_s28 + $0x10f0] sm:$0xf]  ;;  %v9653_v14 = vld [vmem:[%s12081_s28 + $0x10e0] sm:$0xf] }
 0x104   : > { %6287 = vmatpush.bf16.msrb.mxu3 %v9518_v48  ;;  %v11581_v48 = vld [vmem:[%s12081_s28 + $0xfa4] sm:$0xf0]  ;;  %v9430_v55 = vor.u32 %v11565_v61, %v9429_v40  ;;  %v11623_v40 = vld [vmem:[%s12081_s28 + $0x10f4] sm:$0xf0] }
 0x105   : > { %6249 = vmatpush.bf16.msrb.mxu0 %v9318_v56  ;;  %v11531_v56 = vld [vmem:[%s12081_s28 + $0xe14] sm:$0xf0]  ;;  %v6023_v61 = vpop.f32.mrf.mxu2  ;;  %v11605_v11 = vld [vmem:[%s12081_s28 + $0x1064] sm:$0xf0] }
 0x106   : > { %6262 = vmatpush.bf16.msrb.mxu1 %v9382_v58  ;;  %v11547_v58 = vld [vmem:[%s12081_s28 + $0xe94] sm:$0xf0]  ;;  %v9294_v15 = vor.u32 %v11531_v56, %v9293_v51  ;;  %v362_v56 = vld.sshfl [vmem:[#allocation1 + $0x30] sm:$0xff pattern:$0x73625140] }
 0x107   : > { %6275 = vmatpush.bf16.msrb.mxu2 %v9446_v59  ;;  %v9494_v59 = vor.u32 %v11581_v48, %v9493_v46  ;;  %v6036_v46 = vpop.f32.mrf.mxu3  ;;  %v303_v48 = vld [vmem:[%s12076_s24 + $0x40] sm:$0xff]  ;;  %v11655_v51 = vld [vmem:[%s12081_s28 + $0x11f4] sm:$0xf0]  ;;  %v11621_v16 = vld [vmem:[%s12081_s28 + $0x10e4] sm:$0xf0] }
 0x108   : > { %6288 = vmatpush.bf16.msrb.mxu3 %v9510_v10  ;;  %v11579_v10 = vld [vmem:[%s12081_s28 + $0xf94] sm:$0xf0]  ;;  %364 = vst [vmem:[#allocation1] ss:$4 sm:$0xff] %v303_v48  ;;  %v9709_v48 = vld [vmem:[%s12081_s28 + $0x1150] sm:$0xf] }
 0x109   : > { %6250 = vmatpush.bf16.msrb.mxu0 %v9310_v17  ;;  %v11561_v17 = vld [vmem:[%s12081_s28 + $0xf04] sm:$0xf0]  ;;  %v11603_v61 = vld [vmem:[%s12081_s28 + $0x1054] sm:$0xf0] }
 0x10a   : > { %6263 = vmatpush.bf16.msrb.mxu1 %v9374_v18  ;;  %v9358_v18 = vor.u32 %v11547_v58, %v9357_v57  ;;  %v9478_v57 = vor.u32 %v11577_v26, %v9477_v24  ;;  %v9598_v58 = vor.u32 %v11607_v36, %v9597_v30  ;;  %v9781_v24 = vld [vmem:[%s12081_s28 + $0x11e0] sm:$0xf]  ;;  %v11653_v26 = vld [vmem:[%s12081_s28 + $0x11e4] sm:$0xf0]  ;;  %v9654_v36 = vor.u32 %v11621_v16, %v9653_v14  ;;  %v11619_v46 = vld [vmem:[%s12081_s28 + $0x10d4] sm:$0xf0] }
 0x10b   : > { %6276 = vmatpush.bf16.msrb.mxu2 %v9438_v21  ;;  %v9422_v21 = vor.u32 %v11563_v4, %v9421_v2  ;;  %v363_v2 = vld.sshfl [vmem:[#allocation1 + $0x38] sm:$0xff pattern:$0x73625140]  ;;  %v9662_v4 = vor.u32 %v11623_v40, %v9661_v20  ;;  %v9581_v40 = vld [vmem:[%s12081_s28 + $0x1050] sm:$0xf] }
 0x10c   : > { %6289 = vmatpush.bf16.msrb.mxu3 %v9502_v35  ;;  %v9486_v35 = vor.u32 %v11579_v10, %v9485_v5  ;;  %v9726_v5 = vor.u32 %v11639_v23, %v9725_v41  ;;  %v9589_v10 = vld [vmem:[%s12081_s28 + $0x1060] sm:$0xf]  ;;  %v12751_v30 = vpack.c.bf16 %v363_v2, %v363_v2  ;;  %v9645_v41 = vld [vmem:[%s12081_s28 + $0x10d0] sm:$0xf]  ;;  %v9782_v23 = vor.u32 %v11653_v26, %v9781_v24  ;;  %v11617_v2 = vld [vmem:[%s12081_s28 + $0x10c4] sm:$0xf0] }
 0x10d   : > { %6251 = vmatpush.bf16.msrb.mxu0 %v9302_v50  ;;  %v9789_v50 = vld [vmem:[%s12081_s28 + $0x11f0] sm:$0xf]  ;;  %v11649_v14 = vld [vmem:[%s12081_s28 + $0x11c4] sm:$0xf0] }
 0x10e   : > { %6264 = vmatpush.bf16.msrb.mxu1 %v9366_v54  ;;  %v9414_v54 = vor.u32 %v11561_v17, %v9413_v62  ;;  %v9717_v62 = vld [vmem:[%s12081_s28 + $0x1160] sm:$0xf]  ;;  %v11637_v17 = vld [vmem:[%s12081_s28 + $0x1164] sm:$0xf0]  ;;  %v9565_v26 = vld [vmem:[%s12081_s28 + $0x1030] sm:$0xf] }
 0x10f   : > { %6277 = vmatpush.bf16.msrb.mxu2 %v9430_v55  ;;  %v360_v55 = vld.sshfl [vmem:[#allocation1 + $0x20] sm:$0xff pattern:$0x73625140]  ;;  %v9718_v20 = vor.u32 %v11637_v17, %v9717_v62 }
 0x110   : > { %6290 = vmatpush.bf16.msrb.mxu3 %v9494_v59  ;;  %v361_v59 = vld.sshfl [vmem:[#allocation1 + $0x28] sm:$0xff pattern:$0x73625140]  ;;  %v12740_v0 = vpack.c.bf16 %v360_v55, %v360_v55 }
 0x111   : > { %6252 = vmatpush.bf16.msrb.mxu0 %v9294_v15  ;;  %v9790_v15 = vor.u32 %v11655_v51, %v9789_v50  ;;  %v9773_v50 = vld [vmem:[%s12081_s28 + $0x11d0] sm:$0xf]  ;;  %v11651_v51 = vld [vmem:[%s12081_s28 + $0x11d4] sm:$0xf0] }
 0x112   : > { %6265 = vmatpush.bf16.msrb.mxu1 %v9358_v18  ;;  %v12745_v18 = vpack.c.bf16 %v362_v56, %v362_v56  ;;  %v9573_v56 = vld [vmem:[%s12081_s28 + $0x1040] sm:$0xf] }
 0x113   : > { %6278 = vmatpush.bf16.msrb.mxu2 %v9422_v21  ;;  %v12747_v21 = vpack.c.bf16 %v361_v59, %v361_v59  ;;  %v9774_v59 = vor.u32 %v11651_v51, %v9773_v50  ;;  %v9557_v51 = vld [vmem:[%s12081_s28 + $0x1020] sm:$0xf] }
 0x114   : > { %6291 = vmatpush.bf16.msrb.mxu3 %v9486_v35  ;;  %v9590_v35 = vor.u32 %v11605_v11, %v9589_v10  ;;  %v9765_v11 = vld [vmem:[%s12081_s28 + $0x11c0] sm:$0xf] }
 0x115   : > { %6253 = vmatpush.bf16.msrb.mxu0 %v9286_v49  ;;  %v11635_v49 = vld [vmem:[%s12081_s28 + $0x1154] sm:$0xf0]  ;;  %v6047_v10 = vpop.f32.mrf.mxu0 }
 0x116   : > { %6266 = vmatpush.bf16.msrb.mxu1 %v9350_v52  ;;  %v9582_v52 = vor.u32 %v11603_v61, %v9581_v40  ;;  %v9710_v55 = vor.u32 %v11635_v49, %v9709_v48  ;;  %v6060_v62 = vpop.f32.mrf.mxu1  ;;  %v11615_v61 = vld [vmem:[%s12081_s28 + $0x10b4] sm:$0xf0] }
 0x117   : > { %6279 = vmatpush.bf16.msrb.mxu2 %v9414_v54  ;;  %v9646_v54 = vor.u32 %v11619_v46, %v9645_v41  ;;  %v9693_v41 = vld [vmem:[%s12081_s28 + $0x1130] sm:$0xf]  ;;  %v11647_v46 = vld [vmem:[%s12081_s28 + $0x11b4] sm:$0xf0] }
 0x118   : > { %6292 = vmatpush.bf16.msrb.mxu3 %v9478_v57  ;;  %6254 = vmatmul.bf16.vlgmr.msrb.gmra.mxu0 %v12740_v0  ;;  %v11601_v57 = vld [vmem:[%s12081_s28 + $0x1044] sm:$0xf0] }
 0x119   : > { %6298 = vmatpush.bf16.msra.mxu0 %v9598_v58  ;;  %6267 = vmatmul.bf16.vlgmr.msrb.gmra.mxu1 %v12747_v21  ;;  %v9637_v58 = vld [vmem:[%s12081_s28 + $0x10c0] sm:$0xf]  ;;  %v9574_v16 = vor.u32 %v11601_v57, %v9573_v56  ;;  %v11613_v57 = vld [vmem:[%s12081_s28 + $0x10a4] sm:$0xf0] }
 0x11a   : > { %6311 = vmatpush.bf16.msra.mxu1 %v9662_v4  ;;  %6280 = vmatmul.bf16.vlgmr.msrb.gmra.mxu2 %v12745_v18  ;;  %v9701_v4 = vld [vmem:[%s12081_s28 + $0x1140] sm:$0xf]  ;;  %v9638_v17 = vor.u32 %v11617_v2, %v9637_v58 }
 0x11b   : > { %6324 = vmatpush.bf16.msra.mxu2 %v9726_v5  ;;  %6293 = vmatmul.bf16.vlgmr.msrb.gmra.mxu3 %v12751_v30  ;;  %v11633_v5 = vld [vmem:[%s12081_s28 + $0x1144] sm:$0xf0]  ;;  %v9685_v58 = vld [vmem:[%s12081_s28 + $0x1120] sm:$0xf] }
 0x11c   : > { %6337 = vmatpush.bf16.msra.mxu3 %v9790_v15  ;;  %v6048_v15 = vadd.f32 %v6047_v10, %v12711_v53  ;;  %v9702_v24 = vor.u32 %v11633_v5, %v9701_v4  ;;  %v11631_v53 = vld [vmem:[%s12081_s28 + $0x1134] sm:$0xf0]  ;;  %v9749_v5 = vld [vmem:[%s12081_s28 + $0x11a0] sm:$0xf]  ;;  %v11645_v10 = vld [vmem:[%s12081_s28 + $0x11a4] sm:$0xf0] }
 0x11d   : > { %6299 = vmatpush.bf16.msra.mxu0 %v9590_v35  ;;  %v11599_v35 = vld [vmem:[%s12081_s28 + $0x1034] sm:$0xf0]  ;;  %v9694_v50 = vor.u32 %v11631_v53, %v9693_v41  ;;  %v6073_v56 = vpop.f32.mrf.mxu2  ;;  %v9741_v41 = vld [vmem:[%s12081_s28 + $0x1190] sm:$0xf] }
 0x11e   : > { %6312 = vmatpush.bf16.msra.mxu1 %v9654_v36  ;;  %v9629_v36 = vld [vmem:[%s12081_s28 + $0x10b0] sm:$0xf]  ;;  %v6061_v40 = vadd.f32 %v6060_v62, %v6048_v15  ;;  %v9566_v48 = vor.u32 %v11599_v35, %v9565_v26  ;;  %v6086_v4 = vpop.f32.mrf.mxu3  ;;  %v11595_v26 = vld [vmem:[%s12081_s28 + $0x1014] sm:$0xf0] }
 0x11f   : > { %6325 = vmatpush.bf16.msra.mxu2 %v9718_v20  ;;  %v9766_v20 = vor.u32 %v11649_v14, %v9765_v11  ;;  %v9630_v49 = vor.u32 %v11615_v61, %v9629_v36  ;;  %v6049_v11 = vpop.f32.mrf.mxu0  ;;  %v9549_v15 = vld [vmem:[%s12081_s28 + $0x1010] sm:$0xf]  ;;  %v11611_v36 = vld [vmem:[%s12081_s28 + $0x1094] sm:$0xf0] }
 0x120   : > { %6338 = vmatpush.bf16.msra.mxu3 %v9782_v23  ;;  %v9757_v23 = vld [vmem:[%s12081_s28 + $0x11b0] sm:$0xf]  ;;  %v6074_v2 = vadd.f32 %v6073_v56, %v6061_v40  ;;  %v11627_v61 = vld [vmem:[%s12081_s28 + $0x1114] sm:$0xf0]  ;;  %v9733_v56 = vld [vmem:[%s12081_s28 + $0x1180] sm:$0xf] }
 0x121   : > { %6300 = vmatpush.bf16.msra.mxu0 %v9582_v52  ;;  %v11597_v52 = vld [vmem:[%s12081_s28 + $0x1024] sm:$0xf0]  ;;  %v9613_v35 = vld [vmem:[%s12081_s28 + $0x1090] sm:$0xf]  ;;  %v11643_v53 = vld [vmem:[%s12081_s28 + $0x1194] sm:$0xf0] }
 0x122   : > { %6313 = vmatpush.bf16.msra.mxu1 %v9646_v54  ;;  %v9621_v54 = vld [vmem:[%s12081_s28 + $0x10a0] sm:$0xf]  ;;  %v9558_v14 = vor.u32 %v11597_v52, %v9557_v51  ;;  %v12791_v62 = vadd.f32 %v6086_v4, %v6074_v2  ;;  %v9677_v40 = vld [vmem:[%s12081_s28 + $0x1110] sm:$0xf]  ;;  %v11625_v52 = vld [vmem:[%s12081_s28 + $0x1104] sm:$0xf0] }
 0x123   : > { %6326 = vmatpush.bf16.msra.mxu2 %v9710_v55  ;;  %v9758_v55 = vor.u32 %v11647_v46, %v9757_v23  ;;  %v9541_v23 = vld [vmem:[%s12081_s28 + $0x1000] sm:$0xf]  ;;  %v11593_v46 = vld [vmem:[%s12081_s28 + $0x1004] sm:$0xf0]  ;;  %v11671_v2 = vld [vmem:[%s12081_s28 + $0x1274] sm:$0xf0] }
 0x124   : > { %6339 = vmatpush.bf16.msra.mxu3 %v9774_v59  ;;  %v11629_v59 = vld [vmem:[%s12081_s28 + $0x1124] sm:$0xf0]  ;;  %v9669_v51 = vld [vmem:[%s12081_s28 + $0x1100] sm:$0xf]  ;;  %v9917_v4 = vld [vmem:[%s12081_s28 + $0x12f0] sm:$0xf] }
 0x125   : > { %6301 = vmatpush.bf16.msra.mxu0 %v9574_v16  ;;  %v6062_v16 = vpop.f32.mrf.mxu1  ;;  %v9981_v11 = vld [vmem:[%s12081_s28 + $0x1370] sm:$0xf] }
 0x126   : > { %6314 = vmatpush.bf16.msra.mxu1 %v9638_v17  ;;  %v9622_v17 = vor.u32 %v11613_v57, %v9621_v54  ;;  %v9614_v54 = vor.u32 %v11611_v36, %v9613_v35  ;;  %v11641_v57 = vld [vmem:[%s12081_s28 + $0x1184] sm:$0xf0]  ;;  %v9670_v36 = vor.u32 %v11625_v52, %v9669_v51  ;;  %v9973_v52 = vld [vmem:[%s12081_s28 + $0x1360] sm:$0xf] }
 0x127   : > { %6327 = vmatpush.bf16.msra.mxu2 %v9702_v24  ;;  %v9686_v24 = vor.u32 %v11629_v59, %v9685_v58  ;;  %v9853_v58 = vld [vmem:[%s12081_s28 + $0x1270] sm:$0xf]  ;;  %v9742_v59 = vor.u32 %v11643_v53, %v9741_v41  ;;  %v304_v16 = vld [vmem:[%s12076_s24 + $0x48] sm:$0xff] }
 0x128   : > { %6340 = vmatpush.bf16.msra.mxu3 %v9766_v20  ;;  %v9750_v20 = vor.u32 %v11645_v10, %v9749_v5  ;;  %v11687_v5 = vld [vmem:[%s12081_s28 + $0x12f4] sm:$0xf0]  ;;  %v6075_v10 = vpop.f32.mrf.mxu2  ;;  %365 = vst [vmem:[#allocation1 + $0x20] ss:$4 sm:$0xff] %v304_v16  ;;  %v9854_v41 = vor.u32 %v11671_v2, %v9853_v58  ;;  %v11685_v51 = vld [vmem:[%s12081_s28 + $0x12e4] sm:$0xf0] }
 0x129   : > { %6302 = vmatpush.bf16.msra.mxu0 %v9566_v48  ;;  %v9550_v48 = vor.u32 %v11595_v26, %v9549_v15  ;;  %v6088_v15 = vpop.f32.mrf.mxu3  ;;  %v11719_v26 = vld [vmem:[%s12081_s28 + $0x13f4] sm:$0xf0]  ;;  %v367_v53 = vld.sshfl [vmem:[#allocation1 + $0x8] sm:$0xff pattern:$0x73625140] }
 0x12a   : > { %6315 = vmatpush.bf16.msra.mxu1 %v9630_v49  ;;  %v9605_v49 = vld [vmem:[%s12081_s28 + $0x1080] sm:$0xf]  ;;  %v11669_v15 = vld [vmem:[%s12081_s28 + $0x1264] sm:$0xf0]  ;;  %v11667_v16 = vld [vmem:[%s12081_s28 + $0x1254] sm:$0xf0] }
 0x12b   : > { %6328 = vmatpush.bf16.msra.mxu2 %v9694_v50  ;;  %v11609_v50 = vld [vmem:[%s12081_s28 + $0x1084] sm:$0xf0]  ;;  %v9845_v10 = vld [vmem:[%s12081_s28 + $0x1260] sm:$0xf] }
 0x12c   : > { %6341 = vmatpush.bf16.msra.mxu3 %v9758_v55  ;;  %v9678_v55 = vor.u32 %v11627_v61, %v9677_v40  ;;  %v9606_v35 = vor.u32 %v11609_v50, %v9605_v49  ;;  %v368_v40 = vld.sshfl [vmem:[#allocation1 + $0x10] sm:$0xff pattern:$0x73625140]  ;;  %v9734_v61 = vor.u32 %v11641_v57, %v9733_v56  ;;  %v12827_v57 = vpack.c.bf16 %v367_v53, %v367_v53  ;;  %v10037_v58 = vld [vmem:[%s12081_s28 + $0x13e0] sm:$0xf] }
 0x12d   : > { %6303 = vmatpush.bf16.msra.mxu0 %v9558_v14  ;;  %v11703_v14 = vld [vmem:[%s12081_s28 + $0x1374] sm:$0xf0]  ;;  %v12825_v56 = vpack.c.bf16 %v368_v40, %v368_v40 }
 0x12e   : > { %6316 = vmatpush.bf16.msra.mxu1 %v9622_v17  ;;  %v9542_v17 = vor.u32 %v11593_v46, %v9541_v23  ;;  %v369_v23 = vld.sshfl [vmem:[#allocation1 + $0x18] sm:$0xff pattern:$0x73625140]  ;;  %v9918_v46 = vor.u32 %v11687_v5, %v9917_v4  ;;  %14262 = vst [vmem:[#allocation4_spill] sm:$0xff] %v12827_v57  ;;  %v9846_v4 = vor.u32 %v11669_v15, %v9845_v10  ;;  %v11681_v15 = vld [vmem:[%s12081_s28 + $0x12c4] sm:$0xf0] }
 0x12f   : > { %6329 = vmatpush.bf16.msra.mxu2 %v9686_v24  ;;  %v10045_v24 = vld [vmem:[%s12081_s28 + $0x13f0] sm:$0xf]  ;;  %14261 = vst [vmem:[#allocation3_spill] sm:$0xff] %v12825_v56  ;;  %v12831_v2 = vpack.c.bf16 %v369_v23, %v369_v23  ;;  %v11715_v40 = vld [vmem:[%s12081_s28 + $0x13d4] sm:$0xf0] }
 0x130   : > { %6342 = vmatpush.bf16.msra.mxu3 %v9750_v20  ;;  %v366_v20 = vld.sshfl [vmem:[#allocation1] sm:$0xff pattern:$0x73625140]  ;;  %v10046_v49 = vor.u32 %v11719_v26, %v10045_v24  ;;  %v11683_v26 = vld [vmem:[%s12081_s28 + $0x12d4] sm:$0xf0] }
 0x131   : > { %6304 = vmatpush.bf16.msra.mxu0 %v9550_v48  ;;  %v9982_v48 = vor.u32 %v11703_v14, %v9981_v11  ;;  %v12820_v50 = vpack.c.bf16 %v366_v20, %v366_v20  ;;  %14263 = vst [vmem:[#allocation5_spill] sm:$0xff] %v12831_v2  ;;  %v9837_v14 = vld [vmem:[%s12081_s28 + $0x1250] sm:$0xf]  ;;  %v9829_v23 = vld [vmem:[%s12081_s28 + $0x1240] sm:$0xf] }
 0x132   : > { %6317 = vmatpush.bf16.msra.mxu1 %v9614_v54  ;;  %v9909_v54 = vld [vmem:[%s12081_s28 + $0x12e0] sm:$0xf]  ;;  %v10029_v20 = vld [vmem:[%s12081_s28 + $0x13d0] sm:$0xf] }
 0x133   : > { %6330 = vmatpush.bf16.msra.mxu2 %v9678_v55  ;;  %v11701_v55 = vld [vmem:[%s12081_s28 + $0x1364] sm:$0xf0]  ;;  %v9910_v5 = vor.u32 %v11685_v51, %v9909_v54  ;;  %v10030_v10 = vor.u32 %v11715_v40, %v10029_v20  ;;  %v9957_v54 = vld [vmem:[%s12081_s28 + $0x1340] sm:$0xf]  ;;  %v10013_v20 = vld [vmem:[%s12081_s28 + $0x13b0] sm:$0xf] }
 0x134   : > { %6343 = vmatpush.bf16.msra.mxu3 %v9742_v59  ;;  %v11717_v59 = vld [vmem:[%s12081_s28 + $0x13e4] sm:$0xf0]  ;;  %v9974_v11 = vor.u32 %v11701_v55, %v9973_v52  ;;  %v10021_v52 = vld [vmem:[%s12081_s28 + $0x13c0] sm:$0xf]  ;;  %v11711_v40 = vld [vmem:[%s12081_s28 + $0x13b4] sm:$0xf0] }
 0x135   : > { %6305 = vmatpush.bf16.msra.mxu0 %v9542_v17  ;;  %v9901_v17 = vld [vmem:[%s12081_s28 + $0x12d0] sm:$0xf]  ;;  %v10038_v24 = vor.u32 %v11717_v59, %v10037_v58  ;;  %v6099_v51 = vpop.f32.mrf.mxu0  ;;  %v11713_v55 = vld [vmem:[%s12081_s28 + $0x13c4] sm:$0xf0] }
 0x136   : > { %6318 = vmatpush.bf16.msra.mxu1 %v9606_v35  ;;  %v9965_v35 = vld [vmem:[%s12081_s28 + $0x1350] sm:$0xf]  ;;  %v6100_v58 = vadd.f32 %v6099_v51, %v12791_v62  ;;  %v11695_v62 = vld [vmem:[%s12081_s28 + $0x1334] sm:$0xf0]  ;;  %v11693_v51 = vld [vmem:[%s12081_s28 + $0x1324] sm:$0xf0] }
 0x137   : > { %6331 = vmatpush.bf16.msra.mxu2 %v9670_v36  ;;  %v11699_v36 = vld [vmem:[%s12081_s28 + $0x1354] sm:$0xf0] }
 0x138   : > { %6344 = vmatpush.bf16.msra.mxu3 %v9734_v61  ;;  %6306 = vmatmul.bf16.vlgmr.msra.gmra.mxu0 %v12820_v50  ;;  %v9838_v61 = vor.u32 %v11667_v16, %v9837_v14  ;;  %v9966_v53 = vor.u32 %v11699_v36, %v9965_v35  ;;  %v9821_v14 = vld [vmem:[%s12081_s28 + $0x1230] sm:$0xf]  ;;  %v11663_v16 = vld [vmem:[%s12081_s28 + $0x1234] sm:$0xf0] }
 0x139   : > { %6350 = vmatpush.bf16.msrb.mxu0 %v9854_v41  ;;  %6319 = vmatmul.bf16.vlgmr.msra.gmra.mxu1 %v12827_v57  ;;  %v9902_v41 = vor.u32 %v11683_v26, %v9901_v17  ;;  %v9885_v17 = vld [vmem:[%s12081_s28 + $0x12b0] sm:$0xf]  ;;  %v11679_v35 = vld [vmem:[%s12081_s28 + $0x12b4] sm:$0xf0] }
 0x13a   : > { %6363 = vmatpush.bf16.msrb.mxu1 %v9918_v46  ;;  %6332 = vmatmul.bf16.vlgmr.msra.gmra.mxu2 %v12825_v56  ;;  %v11665_v46 = vld [vmem:[%s12081_s28 + $0x1244] sm:$0xf0]  ;;  %v9949_v36 = vld [vmem:[%s12081_s28 + $0x1330] sm:$0xf] }
 0x13b   : > { %6376 = vmatpush.bf16.msrb.mxu2 %v9982_v48  ;;  %6345 = vmatmul.bf16.vlgmr.msra.gmra.mxu3 %v12831_v2  ;;  %v9893_v48 = vld [vmem:[%s12081_s28 + $0x12c0] sm:$0xf]  ;;  %v9830_v59 = vor.u32 %v11665_v46, %v9829_v23  ;;  %v11661_v46 = vld [vmem:[%s12081_s28 + $0x1224] sm:$0xf0]  ;;  %v11767_v2 = vld [vmem:[%s12081_s28 + $0x1574] sm:$0xf0] }
 0x13c   : > { %6389 = vmatpush.bf16.msrb.mxu3 %v10046_v49  ;;  %v11697_v49 = vld [vmem:[%s12081_s28 + $0x1344] sm:$0xf0]  ;;  %v9813_v23 = vld [vmem:[%s12081_s28 + $0x1220] sm:$0xf]  ;;  %v305_v56 = vld [vmem:[%s12076_s24 + $0x50] sm:$0xff] }
 0x13d   : > { %6351 = vmatpush.bf16.msrb.mxu0 %v9846_v4  ;;  %v6112_v4 = vpop.f32.mrf.mxu1  ;;  %374 = vst [vmem:[#allocation1] ss:$4 sm:$0xff] %v305_v56  ;;  %v10101_v56 = vld [vmem:[%s12081_s28 + $0x1460] sm:$0xf] }
 0x13e   : > { %6364 = vmatpush.bf16.msrb.mxu1 %v9910_v5  ;;  %v9894_v5 = vor.u32 %v11681_v15, %v9893_v48  ;;  %v6113_v26 = vadd.f32 %v6112_v4, %v6100_v58  ;;  %v9877_v48 = vld [vmem:[%s12081_s28 + $0x12a0] sm:$0xf]  ;;  %v6125_v15 = vpop.f32.mrf.mxu2  ;;  %v6101_v4 = vpop.f32.mrf.mxu0 }
 0x13f   : > { %6377 = vmatpush.bf16.msrb.mxu2 %v9974_v11  ;;  %v9958_v11 = vor.u32 %v11697_v49, %v9957_v54  ;;  %v11677_v54 = vld [vmem:[%s12081_s28 + $0x12a4] sm:$0xf0]  ;;  %v9941_v49 = vld [vmem:[%s12081_s28 + $0x1320] sm:$0xf]  ;;  %v11735_v4 = vld [vmem:[%s12081_s28 + $0x1474] sm:$0xf0] }
 0x140   : > { %6390 = vmatpush.bf16.msrb.mxu3 %v10038_v24  ;;  %v10022_v24 = vor.u32 %v11713_v55, %v10021_v52  ;;  %v6126_v52 = vadd.f32 %v6125_v15, %v6113_v26  ;;  %v6138_v55 = vpop.f32.mrf.mxu3  ;;  %v10005_v58 = vld [vmem:[%s12081_s28 + $0x13a0] sm:$0xf]  ;;  %v11659_v26 = vld [vmem:[%s12081_s28 + $0x1214] sm:$0xf0]  ;;  %v11673_v15 = vld [vmem:[%s12081_s28 + $0x1284] sm:$0xf0] }
 0x141   : > { %6352 = vmatpush.bf16.msrb.mxu0 %v9838_v61  ;;  %v9822_v61 = vor.u32 %v11663_v16, %v9821_v14 }
 0x142   : > { %6365 = vmatpush.bf16.msrb.mxu1 %v9902_v41  ;;  %v9886_v41 = vor.u32 %v11679_v35, %v9885_v17  ;;  %v12871_v16 = vadd.f32 %v6138_v55, %v6126_v52  ;;  %v9878_v17 = vor.u32 %v11677_v54, %v9877_v48  ;;  %v9869_v35 = vld [vmem:[%s12081_s28 + $0x1290] sm:$0xf]  ;;  %v9861_v48 = vld [vmem:[%s12081_s28 + $0x1280] sm:$0xf]  ;;  %v11705_v55 = vld [vmem:[%s12081_s28 + $0x1384] sm:$0xf0] }
 0x143   : > { %6378 = vmatpush.bf16.msrb.mxu2 %v9966_v53  ;;  %v9950_v53 = vor.u32 %v11695_v62, %v9949_v36  ;;  %v11675_v36 = vld [vmem:[%s12081_s28 + $0x1294] sm:$0xf0]  ;;  %v9925_v54 = vld [vmem:[%s12081_s28 + $0x1300] sm:$0xf] }
 0x144   : > { %6391 = vmatpush.bf16.msrb.mxu3 %v10030_v10  ;;  %v10014_v10 = vor.u32 %v11711_v40, %v10013_v20  ;;  %v9933_v20 = vld [vmem:[%s12081_s28 + $0x1310] sm:$0xf]  ;;  %v11691_v40 = vld [vmem:[%s12081_s28 + $0x1314] sm:$0xf0]  ;;  %v9989_v52 = vld [vmem:[%s12081_s28 + $0x1380] sm:$0xf] }
 0x145   : > { %6353 = vmatpush.bf16.msrb.mxu0 %v9830_v59  ;;  %v11709_v59 = vld [vmem:[%s12081_s28 + $0x13a4] sm:$0xf0]  ;;  %v6114_v14 = vpop.f32.mrf.mxu1 }
 0x146   : > { %6366 = vmatpush.bf16.msrb.mxu1 %v9894_v5  ;;  %v9814_v5 = vor.u32 %v11661_v46, %v9813_v23  ;;  %v10006_v62 = vor.u32 %v11709_v59, %v10005_v58  ;;  %v11657_v23 = vld [vmem:[%s12081_s28 + $0x1204] sm:$0xf0]  ;;  %v10109_v58 = vld [vmem:[%s12081_s28 + $0x1470] sm:$0xf]  ;;  %v6127_v14 = vpop.f32.mrf.mxu2 }
 0x147   : > { %6379 = vmatpush.bf16.msrb.mxu2 %v9958_v11  ;;  %v9805_v11 = vld [vmem:[%s12081_s28 + $0x1210] sm:$0xf]  ;;  %v11733_v14 = vld [vmem:[%s12081_s28 + $0x1464] sm:$0xf0] }
 0x148   : > { %6392 = vmatpush.bf16.msrb.mxu3 %v10022_v24  ;;  %v9942_v24 = vor.u32 %v11693_v51, %v9941_v49  ;;  %v9806_v46 = vor.u32 %v11659_v26, %v9805_v11  ;;  %v9870_v49 = vor.u32 %v11675_v36, %v9869_v35  ;;  %v9934_v51 = vor.u32 %v11691_v40, %v9933_v20  ;;  %v11751_v11 = vld [vmem:[%s12081_s28 + $0x14f4] sm:$0xf0]  ;;  %v10237_v26 = vld [vmem:[%s12081_s28 + $0x1570] sm:$0xf]  ;;  %v6140_v57 = vpop.f32.mrf.mxu3 }
 0x149   : > { %6354 = vmatpush.bf16.msrb.mxu0 %v9822_v61  ;;  %v9997_v61 = vld [vmem:[%s12081_s28 + $0x1390] sm:$0xf]  ;;  %v11783_v35 = vld [vmem:[%s12081_s28 + $0x15f4] sm:$0xf0]  ;;  %v9862_v36 = vor.u32 %v11673_v15, %v9861_v48  ;;  %v9990_v57 = vor.u32 %v11705_v55, %v9989_v52 }
 0x14a   : > { %6367 = vmatpush.bf16.msrb.mxu1 %v9886_v41  ;;  %v11707_v41 = vld [vmem:[%s12081_s28 + $0x1394] sm:$0xf0]  ;;  %v370_v20 = vld.sshfl [vmem:[#allocation1 + $0x20] sm:$0xff pattern:$0x73625140] }
 0x14b   : > { %6380 = vmatpush.bf16.msrb.mxu2 %v9950_v53  ;;  %v9797_v53 = vld [vmem:[%s12081_s28 + $0x1200] sm:$0xf]  ;;  %v9998_v59 = vor.u32 %v11707_v41, %v9997_v61  ;;  %v372_v40 = vld.sshfl [vmem:[#allocation1 + $0x30] sm:$0xff pattern:$0x73625140]  ;;  %v10110_v61 = vor.u32 %v11735_v4, %v10109_v58  ;;  %v12900_v15 = vpack.c.bf16 %v370_v20, %v370_v20  ;;  %v10102_v4 = vor.u32 %v11733_v14, %v10101_v56 }
 0x14c   : > { %6393 = vmatpush.bf16.msrb.mxu3 %v10014_v10  ;;  %v11689_v10 = vld [vmem:[%s12081_s28 + $0x1304] sm:$0xf0]  ;;  %v12905_v52 = vpack.c.bf16 %v372_v40, %v372_v40  ;;  %v11763_v20 = vld [vmem:[%s12081_s28 + $0x1554] sm:$0xf0]  ;;  %v10285_v40 = vld [vmem:[%s12081_s28 + $0x15d0] sm:$0xf] }
 0x14d   : > { %6355 = vmatpush.bf16.msrb.mxu0 %v9814_v5  ;;  %v10173_v5 = vld [vmem:[%s12081_s28 + $0x14f0] sm:$0xf]  ;;  %v371_v41 = vld.sshfl [vmem:[#allocation1 + $0x28] sm:$0xff pattern:$0x73625140]  ;;  %14264 = vst [vmem:[#allocation6_spill] sm:$0xff] %v12900_v15 }
 0x14e   : > { %6368 = vmatpush.bf16.msrb.mxu1 %v9878_v17  ;;  %v9798_v17 = vor.u32 %v11657_v23, %v9797_v53  ;;  %v373_v53 = vld.sshfl [vmem:[#allocation1 + $0x38] sm:$0xff pattern:$0x73625140]  ;;  %v10174_v23 = vor.u32 %v11751_v11, %v10173_v5  ;;  %14265 = vst [vmem:[#allocation7_spill] sm:$0xff] %v12905_v52  ;;  %v12907_v55 = vpack.c.bf16 %v371_v41, %v371_v41  ;;  %v11781_v58 = vld [vmem:[%s12081_s28 + $0x15e4] sm:$0xf0] }
 0x14f   : > { %6381 = vmatpush.bf16.msrb.mxu2 %v9942_v24  ;;  %v10301_v24 = vld [vmem:[%s12081_s28 + $0x15f0] sm:$0xf]  ;;  %v10149_v56 = vld [vmem:[%s12081_s28 + $0x14c0] sm:$0xf] }
 0x150   : > { %6394 = vmatpush.bf16.msrb.mxu3 %v10006_v62  ;;  %v9926_v62 = vor.u32 %v11689_v10, %v9925_v54  ;;  %v10302_v48 = vor.u32 %v11783_v35, %v10301_v24  ;;  %v11749_v54 = vld [vmem:[%s12081_s28 + $0x14e4] sm:$0xf0]  ;;  %v10229_v10 = vld [vmem:[%s12081_s28 + $0x1560] sm:$0xf]  ;;  %14266 = vst [vmem:[#allocation8_spill] sm:$0xff] %v12907_v55 }
 0x151   : > { %6356 = vmatpush.bf16.msrb.mxu0 %v9806_v46  ;;  %v10238_v46 = vor.u32 %v11767_v2, %v10237_v26  ;;  %v10293_v2 = vld [vmem:[%s12081_s28 + $0x15e0] sm:$0xf]  ;;  %v10093_v26 = vld [vmem:[%s12081_s28 + $0x1450] sm:$0xf] }
 0x152   : > { %6369 = vmatpush.bf16.msrb.mxu1 %v9870_v49  ;;  %v10165_v49 = vld [vmem:[%s12081_s28 + $0x14e0] sm:$0xf]  ;;  %v10157_v24 = vld [vmem:[%s12081_s28 + $0x14d0] sm:$0xf]  ;;  %v10294_v35 = vor.u32 %v11781_v58, %v10293_v2  ;;  %v11777_v2 = vld [vmem:[%s12081_s28 + $0x15c4] sm:$0xf0] }
 0x153   : > { %6382 = vmatpush.bf16.msrb.mxu2 %v9934_v51  ;;  %v11765_v51 = vld [vmem:[%s12081_s28 + $0x1564] sm:$0xf0]  ;;  %v10166_v5 = vor.u32 %v11749_v54, %v10165_v49 }
 0x154   : > { %6395 = vmatpush.bf16.msrb.mxu3 %v9998_v59  ;;  %v12911_v59 = vpack.c.bf16 %v373_v53, %v373_v53  ;;  %v10230_v11 = vor.u32 %v11765_v51, %v10229_v10  ;;  %v11745_v49 = vld [vmem:[%s12081_s28 + $0x14c4] sm:$0xf0]  ;;  %v10277_v51 = vld [vmem:[%s12081_s28 + $0x15c0] sm:$0xf] }
 0x155   : > { %6357 = vmatpush.bf16.msrb.mxu0 %v9798_v17  ;;  %v11731_v17 = vld [vmem:[%s12081_s28 + $0x1454] sm:$0xf0]  ;;  %v11761_v54 = vld [vmem:[%s12081_s28 + $0x1544] sm:$0xf0]  ;;  %v6151_v10 = vpop.f32.mrf.mxu0 }
 0x156   : > { %6370 = vmatpush.bf16.msrb.mxu1 %v9862_v36  ;;  %14267 = vst [vmem:[#allocation9_spill] sm:$0xff] %v12911_v59  ;;  %v11747_v36 = vld [vmem:[%s12081_s28 + $0x14d4] sm:$0xf0]  ;;  %v6152_v58 = vadd.f32 %v6151_v10, %v12871_v16  ;;  %v10197_v10 = vld [vmem:[%s12081_s28 + $0x1520] sm:$0xf] }
 0x157   : > { %6383 = vmatpush.bf16.msrb.mxu2 %v9926_v62  ;;  %v10221_v62 = vld [vmem:[%s12081_s28 + $0x1550] sm:$0xf]  ;;  %v10158_v41 = vor.u32 %v11747_v36, %v10157_v24  ;;  %v11727_v24 = vld [vmem:[%s12081_s28 + $0x1434] sm:$0xf0]  ;;  %v10278_v36 = vor.u32 %v11777_v2, %v10277_v51  ;;  %v11757_v51 = vld [vmem:[%s12081_s28 + $0x1524] sm:$0xf0] }
 0x158   : > { %6396 = vmatpush.bf16.msrb.mxu3 %v9990_v57  ;;  %6358 = vmatmul.bf16.vlgmr.msrb.gmra.mxu0 %v12900_v15  ;;  %v11779_v57 = vld [vmem:[%s12081_s28 + $0x15d4] sm:$0xf0]  ;;  %v10222_v53 = vor.u32 %v11763_v20, %v10221_v62 }
 0x159   : > { %6402 = vmatpush.bf16.msra.mxu0 %v10110_v61  ;;  %6371 = vmatmul.bf16.vlgmr.msrb.gmra.mxu1 %v12907_v55  ;;  %v10094_v61 = vor.u32 %v11731_v17, %v10093_v26  ;;  %v10286_v14 = vor.u32 %v11779_v57, %v10285_v40  ;;  %v10077_v17 = vld [vmem:[%s12081_s28 + $0x1430] sm:$0xf]  ;;  %v11743_v20 = vld [vmem:[%s12081_s28 + $0x14b4] sm:$0xf0] }
 0x15a   : > { %6415 = vmatpush.bf16.msra.mxu1 %v10174_v23  ;;  %6384 = vmatmul.bf16.vlgmr.msrb.gmra.mxu2 %v12905_v52  ;;  %v10085_v23 = vld [vmem:[%s12081_s28 + $0x1440] sm:$0xf]  ;;  %v10205_v40 = vld [vmem:[%s12081_s28 + $0x1530] sm:$0xf]  ;;  %v11759_v16 = vld [vmem:[%s12081_s28 + $0x1534] sm:$0xf0] }
 0x15b   : > { %6428 = vmatpush.bf16.msra.mxu2 %v10238_v46  ;;  %6397 = vmatmul.bf16.vlgmr.msrb.gmra.mxu3 %v12911_v59  ;;  %v11729_v46 = vld [vmem:[%s12081_s28 + $0x1444] sm:$0xf0]  ;;  %v10269_v57 = vld [vmem:[%s12081_s28 + $0x15b0] sm:$0xf]  ;;  %v11831_v55 = vld [vmem:[%s12081_s28 + $0x1774] sm:$0xf0] }
 0x15c   : > { %6441 = vmatpush.bf16.msra.mxu3 %v10302_v48  ;;  %v10213_v48 = vld [vmem:[%s12081_s28 + $0x1540] sm:$0xf]  ;;  %v10493_v59 = vld [vmem:[%s12081_s28 + $0x1770] sm:$0xf]  ;;  %v306_v15 = vld [vmem:[%s12076_s24 + $0x58] sm:$0xff] }
 0x15d   : > { %6403 = vmatpush.bf16.msra.mxu0 %v10102_v4  ;;  %v10086_v4 = vor.u32 %v11729_v46, %v10085_v23  ;;  %v10214_v26 = vor.u32 %v11761_v54, %v10213_v48  ;;  %v10206_v23 = vor.u32 %v11759_v16, %v10205_v40  ;;  %v10069_v46 = vld [vmem:[%s12081_s28 + $0x1420] sm:$0xf]  ;;  %v6177_v48 = vpop.f32.mrf.mxu2  ;;  %v11741_v54 = vld [vmem:[%s12081_s28 + $0x14a4] sm:$0xf0]  ;;  %v10125_v40 = vld [vmem:[%s12081_s28 + $0x1490] sm:$0xf] }
 0x15e   : > { %6416 = vmatpush.bf16.msra.mxu1 %v10166_v5  ;;  %v6164_v5 = vpop.f32.mrf.mxu1  ;;  %v11739_v16 = vld [vmem:[%s12081_s28 + $0x1494] sm:$0xf0]  ;;  %375 = vst [vmem:[#allocation1 + $0x20] ss:$4 sm:$0xff] %v306_v15  ;;  %v10357_v15 = vld [vmem:[%s12081_s28 + $0x1660] sm:$0xf] }
 0x15f   : > { %6429 = vmatpush.bf16.msra.mxu2 %v10230_v11  ;;  %v10150_v11 = vor.u32 %v11745_v49, %v10149_v56  ;;  %v6165_v62 = vadd.f32 %v6164_v5, %v6152_v58  ;;  %v11725_v56 = vld [vmem:[%s12081_s28 + $0x1424] sm:$0xf0]  ;;  %v6190_v58 = vpop.f32.mrf.mxu3 }
 0x160   : > { %6442 = vmatpush.bf16.msra.mxu3 %v10294_v35  ;;  %v10141_v35 = vld [vmem:[%s12081_s28 + $0x14b0] sm:$0xf]  ;;  %v11773_v5 = vld [vmem:[%s12081_s28 + $0x15a4] sm:$0xf0] }
 0x161   : > { %6404 = vmatpush.bf16.msra.mxu0 %v10094_v61  ;;  %v11775_v61 = vld [vmem:[%s12081_s28 + $0x15b4] sm:$0xf0]  ;;  %v6178_v2 = vadd.f32 %v6177_v48, %v6165_v62  ;;  %v10198_v62 = vor.u32 %v11757_v51, %v10197_v10  ;;  %v10117_v48 = vld [vmem:[%s12081_s28 + $0x1480] sm:$0xf]  ;;  %v10126_v51 = vor.u32 %v11739_v16, %v10125_v40 }
 0x162   : > { %6417 = vmatpush.bf16.msra.mxu1 %v10158_v41  ;;  %v10078_v41 = vor.u32 %v11727_v24, %v10077_v17  ;;  %v10270_v49 = vor.u32 %v11775_v61, %v10269_v57  ;;  %v10061_v17 = vld [vmem:[%s12081_s28 + $0x1410] sm:$0xf]  ;;  %v10181_v10 = vld [vmem:[%s12081_s28 + $0x1500] sm:$0xf]  ;;  %v11847_v40 = vld [vmem:[%s12081_s28 + $0x17f4] sm:$0xf0] }
 0x163   : > { %6430 = vmatpush.bf16.msra.mxu2 %v10222_v53  ;;  %v10142_v53 = vor.u32 %v11743_v20, %v10141_v35  ;;  %v12951_v35 = vadd.f32 %v6190_v58, %v6178_v2  ;;  %v11723_v20 = vld [vmem:[%s12081_s28 + $0x1414] sm:$0xf0]  ;;  %v10189_v61 = vld [vmem:[%s12081_s28 + $0x1510] sm:$0xf]  ;;  %v10245_v58 = vld [vmem:[%s12081_s28 + $0x1580] sm:$0xf] }
 0x164   : > { %6443 = vmatpush.bf16.msra.mxu3 %v10286_v14  ;;  %v10133_v14 = vld [vmem:[%s12081_s28 + $0x14a0] sm:$0xf] }
 0x165   : > { %6405 = vmatpush.bf16.msra.mxu0 %v10086_v4  ;;  %v10261_v4 = vld [vmem:[%s12081_s28 + $0x15a0] sm:$0xf] }
 0x166   : > { %6418 = vmatpush.bf16.msra.mxu1 %v10150_v11  ;;  %v6153_v11 = vpop.f32.mrf.mxu0  ;;  %v6166_v24 = vpop.f32.mrf.mxu1  ;;  %v10262_v57 = vor.u32 %v11773_v5, %v10261_v4  ;;  %v11769_v4 = vld [vmem:[%s12081_s28 + $0x1584] sm:$0xf0]  ;;  %v10365_v5 = vld [vmem:[%s12081_s28 + $0x1670] sm:$0xf] }
 0x167   : > { %6431 = vmatpush.bf16.msra.mxu2 %v10214_v26  ;;  %v10070_v26 = vor.u32 %v11725_v56, %v10069_v46  ;;  %v10253_v46 = vld [vmem:[%s12081_s28 + $0x1590] sm:$0xf]  ;;  %v11721_v56 = vld [vmem:[%s12081_s28 + $0x1404] sm:$0xf0]  ;;  %v11815_v24 = vld [vmem:[%s12081_s28 + $0x16f4] sm:$0xf0]  ;;  %v6192_v52 = vpop.f32.mrf.mxu3 }
 0x168   : > { %6444 = vmatpush.bf16.msra.mxu3 %v10278_v36  ;;  %v10134_v36 = vor.u32 %v11741_v54, %v10133_v14  ;;  %v10062_v14 = vor.u32 %v11723_v20, %v10061_v17  ;;  %v11737_v54 = vld [vmem:[%s12081_s28 + $0x1484] sm:$0xf0]  ;;  %v10429_v17 = vld [vmem:[%s12081_s28 + $0x16f0] sm:$0xf]  ;;  %v6179_v20 = vpop.f32.mrf.mxu2  ;;  %v10246_v52 = vor.u32 %v11769_v4, %v10245_v58 }
 0x169   : > { %6406 = vmatpush.bf16.msra.mxu0 %v10078_v41  ;;  %v11755_v41 = vld [vmem:[%s12081_s28 + $0x1514] sm:$0xf0]  ;;  %v10118_v16 = vor.u32 %v11737_v54, %v10117_v48  ;;  %v11797_v20 = vld [vmem:[%s12081_s28 + $0x1664] sm:$0xf0] }
 0x16a   : > { %6419 = vmatpush.bf16.msra.mxu1 %v10142_v53  ;;  %v11771_v53 = vld [vmem:[%s12081_s28 + $0x1594] sm:$0xf0]  ;;  %v10190_v2 = vor.u32 %v11755_v41, %v10189_v61  ;;  %v376_v61 = vld.sshfl [vmem:[#allocation1] sm:$0xff pattern:$0x73625140] }
 0x16b   : > { %6432 = vmatpush.bf16.msra.mxu2 %v10206_v23  ;;  %v10053_v23 = vld [vmem:[%s12081_s28 + $0x1400] sm:$0xf]  ;;  %v10254_v11 = vor.u32 %v11771_v53, %v10253_v46  ;;  %v378_v41 = vld.sshfl [vmem:[#allocation1 + $0x10] sm:$0xff pattern:$0x73625140]  ;;  %v12980_v54 = vpack.c.bf16 %v376_v61, %v376_v61 }
 0x16c   : > { %6445 = vmatpush.bf16.msra.mxu3 %v10270_v49  ;;  %v11753_v49 = vld [vmem:[%s12081_s28 + $0x1504] sm:$0xf0]  ;;  %v12985_v58 = vpack.c.bf16 %v378_v41, %v378_v41  ;;  %v11827_v61 = vld [vmem:[%s12081_s28 + $0x1754] sm:$0xf0]  ;;  %v10541_v41 = vld [vmem:[%s12081_s28 + $0x17d0] sm:$0xf] }
 0x16d   : > { %6407 = vmatpush.bf16.msra.mxu0 %v10070_v26  ;;  %v11799_v26 = vld [vmem:[%s12081_s28 + $0x1674] sm:$0xf0]  ;;  %v377_v53 = vld.sshfl [vmem:[#allocation1 + $0x8] sm:$0xff pattern:$0x73625140]  ;;  %14268 = vst [vmem:[#allocation10_spill] sm:$0xff] %v12980_v54 }
 0x16e   : > { %6420 = vmatpush.bf16.msra.mxu1 %v10134_v36  ;;  %v10054_v36 = vor.u32 %v11721_v56, %v10053_v23  ;;  %v10366_v46 = vor.u32 %v11799_v26, %v10365_v5  ;;  %v379_v23 = vld.sshfl [vmem:[#allocation1 + $0x18] sm:$0xff pattern:$0x73625140]  ;;  %v10430_v56 = vor.u32 %v11815_v24, %v10429_v17  ;;  %14269 = vst [vmem:[#allocation11_spill] sm:$0xff] %v12985_v58  ;;  %v10349_v24 = vld [vmem:[%s12081_s28 + $0x1650] sm:$0xf] }
 0x16f   : > { %6433 = vmatpush.bf16.msra.mxu2 %v10198_v62  ;;  %v10557_v62 = vld [vmem:[%s12081_s28 + $0x17f0] sm:$0xf]  ;;  %v12987_v4 = vpack.c.bf16 %v377_v53, %v377_v53  ;;  %v12991_v5 = vpack.c.bf16 %v379_v23, %v379_v23 }
 0x170   : > { %6446 = vmatpush.bf16.msra.mxu3 %v10262_v57  ;;  %v10182_v57 = vor.u32 %v11753_v49, %v10181_v10  ;;  %v10558_v48 = vor.u32 %v11847_v40, %v10557_v62  ;;  %v11813_v10 = vld [vmem:[%s12081_s28 + $0x16e4] sm:$0xf0]  ;;  %v10485_v49 = vld [vmem:[%s12081_s28 + $0x1760] sm:$0xf]  ;;  %v10413_v62 = vld [vmem:[%s12081_s28 + $0x16d0] sm:$0xf] }
 0x171   : > { %6408 = vmatpush.bf16.msra.mxu0 %v10062_v14  ;;  %v10494_v14 = vor.u32 %v11831_v55, %v10493_v59  ;;  %14270 = vst [vmem:[#allocation12_spill] sm:$0xff] %v12987_v4  ;;  %v10549_v55 = vld [vmem:[%s12081_s28 + $0x17e0] sm:$0xf]  ;;  %v11845_v59 = vld [vmem:[%s12081_s28 + $0x17e4] sm:$0xf0] }
 0x172   : > { %6421 = vmatpush.bf16.msra.mxu1 %v10126_v51  ;;  %v10421_v51 = vld [vmem:[%s12081_s28 + $0x16e0] sm:$0xf]  ;;  %14271 = vst [vmem:[#allocation13_spill] sm:$0xff] %v12991_v5  ;;  %v10550_v40 = vor.u32 %v11845_v59, %v10549_v55  ;;  %v11841_v55 = vld [vmem:[%s12081_s28 + $0x17c4] sm:$0xf0] }
 0x173   : > { %6434 = vmatpush.bf16.msra.mxu2 %v10190_v2  ;;  %v11829_v2 = vld [vmem:[%s12081_s28 + $0x1764] sm:$0xf0]  ;;  %v10422_v26 = vor.u32 %v11813_v10, %v10421_v51 }
 0x174   : > { %6447 = vmatpush.bf16.msra.mxu3 %v10254_v11  ;;  %v10358_v11 = vor.u32 %v11797_v20, %v10357_v15  ;;  %v10486_v17 = vor.u32 %v11829_v2, %v10485_v49  ;;  %v10405_v15 = vld [vmem:[%s12081_s28 + $0x16c0] sm:$0xf]  ;;  %v11809_v51 = vld [vmem:[%s12081_s28 + $0x16c4] sm:$0xf0] }
 0x175   : > { %6409 = vmatpush.bf16.msra.mxu0 %v10054_v36  ;;  %v11795_v36 = vld [vmem:[%s12081_s28 + $0x1654] sm:$0xf0]  ;;  %v11825_v10 = vld [vmem:[%s12081_s28 + $0x1744] sm:$0xf0]  ;;  %v6203_v49 = vpop.f32.mrf.mxu0  ;;  %v10533_v2 = vld [vmem:[%s12081_s28 + $0x17c0] sm:$0xf] }
 0x176   : > { %6422 = vmatpush.bf16.msra.mxu1 %v10118_v16  ;;  %v11811_v16 = vld [vmem:[%s12081_s28 + $0x16d4] sm:$0xf0]  ;;  %v6204_v59 = vadd.f32 %v6203_v49, %v12951_v35  ;;  %v10453_v49 = vld [vmem:[%s12081_s28 + $0x1720] sm:$0xf] }
 0x177   : > { %6435 = vmatpush.bf16.msra.mxu2 %v10182_v57  ;;  %v10477_v57 = vld [vmem:[%s12081_s28 + $0x1750] sm:$0xf]  ;;  %v10414_v53 = vor.u32 %v11811_v16, %v10413_v62  ;;  %v11791_v62 = vld [vmem:[%s12081_s28 + $0x1634] sm:$0xf0]  ;;  %v10534_v16 = vor.u32 %v11841_v55, %v10533_v2  ;;  %v11821_v2 = vld [vmem:[%s12081_s28 + $0x1724] sm:$0xf0] }
 0x178   : > { %6448 = vmatpush.bf16.msra.mxu3 %v10246_v52  ;;  %6410 = vmatmul.bf16.vlgmr.msra.gmra.mxu0 %v12980_v54  ;;  %v11843_v52 = vld [vmem:[%s12081_s28 + $0x17d4] sm:$0xf0]  ;;  %v10478_v23 = vor.u32 %v11827_v61, %v10477_v57  ;;  %v307_v54 = vld [vmem:[%s12076_s24 + $0x60] sm:$0xff] }
 0x179   : > { %6454 = vmatpush.bf16.msrb.mxu0 %v10366_v46  ;;  %6423 = vmatmul.bf16.vlgmr.msra.gmra.mxu1 %v12987_v4  ;;  %v10350_v46 = vor.u32 %v11795_v36, %v10349_v24  ;;  %v10542_v20 = vor.u32 %v11843_v52, %v10541_v41  ;;  %v10333_v36 = vld [vmem:[%s12081_s28 + $0x1630] sm:$0xf]  ;;  %v11807_v61 = vld [vmem:[%s12081_s28 + $0x16b4] sm:$0xf0]  ;;  %384 = vst [vmem:[#allocation1] ss:$4 sm:$0xff] %v307_v54 }
 0x17a   : > { %6467 = vmatpush.bf16.msrb.mxu1 %v10430_v56  ;;  %6436 = vmatmul.bf16.vlgmr.msra.gmra.mxu2 %v12985_v58  ;;  %v10341_v56 = vld [vmem:[%s12081_s28 + $0x1640] sm:$0xf]  ;;  %v10461_v41 = vld [vmem:[%s12081_s28 + $0x1730] sm:$0xf]  ;;  %v11823_v35 = vld [vmem:[%s12081_s28 + $0x1734] sm:$0xf0] }
 0x17b   : > { %6480 = vmatpush.bf16.msrb.mxu2 %v10494_v14  ;;  %6449 = vmatmul.bf16.vlgmr.msra.gmra.mxu3 %v12991_v5  ;;  %v11793_v14 = vld [vmem:[%s12081_s28 + $0x1644] sm:$0xf0]  ;;  %v10525_v52 = vld [vmem:[%s12081_s28 + $0x17b0] sm:$0xf]  ;;  %v11895_v4 = vld [vmem:[%s12081_s28 + $0x1974] sm:$0xf0] }
 0x17c   : > { %6493 = vmatpush.bf16.msrb.mxu3 %v10558_v48  ;;  %v10469_v48 = vld [vmem:[%s12081_s28 + $0x1740] sm:$0xf]  ;;  %v10749_v5 = vld [vmem:[%s12081_s28 + $0x1970] sm:$0xf] }
 0x17d   : > { %6455 = vmatpush.bf16.msrb.mxu0 %v10358_v11  ;;  %v10342_v11 = vor.u32 %v11793_v14, %v10341_v56  ;;  %v10470_v24 = vor.u32 %v11825_v10, %v10469_v48  ;;  %v10462_v56 = vor.u32 %v11823_v35, %v10461_v41  ;;  %v10325_v14 = vld [vmem:[%s12081_s28 + $0x1620] sm:$0xf]  ;;  %v6229_v48 = vpop.f32.mrf.mxu2  ;;  %v11805_v10 = vld [vmem:[%s12081_s28 + $0x16a4] sm:$0xf0]  ;;  %v10381_v41 = vld [vmem:[%s12081_s28 + $0x1690] sm:$0xf] }
 0x17e   : > { %6468 = vmatpush.bf16.msrb.mxu1 %v10422_v26  ;;  %v6216_v26 = vpop.f32.mrf.mxu1  ;;  %v11803_v35 = vld [vmem:[%s12081_s28 + $0x1694] sm:$0xf0]  ;;  %v10613_v54 = vld [vmem:[%s12081_s28 + $0x1860] sm:$0xf] }
 0x17f   : > { %6481 = vmatpush.bf16.msrb.mxu2 %v10486_v17  ;;  %v10406_v17 = vor.u32 %v11809_v51, %v10405_v15  ;;  %v6217_v57 = vadd.f32 %v6216_v26, %v6204_v59  ;;  %v11789_v15 = vld [vmem:[%s12081_s28 + $0x1624] sm:$0xf0]  ;;  %v6242_v59 = vpop.f32.mrf.mxu3 }
 0x180   : > { %6494 = vmatpush.bf16.msrb.mxu3 %v10550_v40  ;;  %v10397_v40 = vld [vmem:[%s12081_s28 + $0x16b0] sm:$0xf]  ;;  %v11837_v26 = vld [vmem:[%s12081_s28 + $0x17a4] sm:$0xf0] }
 0x181   : > { %6456 = vmatpush.bf16.msrb.mxu0 %v10350_v46  ;;  %v11839_v46 = vld [vmem:[%s12081_s28 + $0x17b4] sm:$0xf0]  ;;  %v6230_v55 = vadd.f32 %v6229_v48, %v6217_v57  ;;  %v10454_v57 = vor.u32 %v11821_v2, %v10453_v49  ;;  %v10373_v48 = vld [vmem:[%s12081_s28 + $0x1680] sm:$0xf]  ;;  %v10382_v2 = vor.u32 %v11803_v35, %v10381_v41 }
 0x182   : > { %6469 = vmatpush.bf16.msrb.mxu1 %v10414_v53  ;;  %v10334_v53 = vor.u32 %v11791_v62, %v10333_v36  ;;  %v10526_v51 = vor.u32 %v11839_v46, %v10525_v52  ;;  %v10317_v36 = vld [vmem:[%s12081_s28 + $0x1610] sm:$0xf]  ;;  %v10437_v49 = vld [vmem:[%s12081_s28 + $0x1700] sm:$0xf]  ;;  %v11911_v41 = vld [vmem:[%s12081_s28 + $0x19f4] sm:$0xf0] }
 0x183   : > { %6482 = vmatpush.bf16.msrb.mxu2 %v10478_v23  ;;  %v10398_v23 = vor.u32 %v11807_v61, %v10397_v40  ;;  %v13031_v40 = vadd.f32 %v6242_v59, %v6230_v55  ;;  %v11787_v61 = vld [vmem:[%s12081_s28 + $0x1614] sm:$0xf0]  ;;  %v10445_v46 = vld [vmem:[%s12081_s28 + $0x1710] sm:$0xf]  ;;  %v10501_v59 = vld [vmem:[%s12081_s28 + $0x1780] sm:$0xf] }
 0x184   : > { %6495 = vmatpush.bf16.msrb.mxu3 %v10542_v20  ;;  %v10389_v20 = vld [vmem:[%s12081_s28 + $0x16a0] sm:$0xf] }
 0x185   : > { %6457 = vmatpush.bf16.msrb.mxu0 %v10342_v11  ;;  %v10517_v11 = vld [vmem:[%s12081_s28 + $0x17a0] sm:$0xf] }
 0x186   : > { %6470 = vmatpush.bf16.msrb.mxu1 %v10406_v17  ;;  %v6205_v17 = vpop.f32.mrf.mxu0  ;;  %v6218_v62 = vpop.f32.mrf.mxu1  ;;  %v10518_v52 = vor.u32 %v11837_v26, %v10517_v11  ;;  %v11833_v11 = vld [vmem:[%s12081_s28 + $0x1784] sm:$0xf0]  ;;  %v10621_v26 = vld [vmem:[%s12081_s28 + $0x1870] sm:$0xf] }
 0x187   : > { %6483 = vmatpush.bf16.msrb.mxu2 %v10470_v24  ;;  %v10326_v24 = vor.u32 %v11789_v15, %v10325_v14  ;;  %v10509_v14 = vld [vmem:[%s12081_s28 + $0x1790] sm:$0xf]  ;;  %v11785_v15 = vld [vmem:[%s12081_s28 + $0x1604] sm:$0xf0]  ;;  %v11879_v62 = vld [vmem:[%s12081_s28 + $0x18f4] sm:$0xf0]  ;;  %v6244_v58 = vpop.f32.mrf.mxu3 }
 0x188   : > { %6496 = vmatpush.bf16.msrb.mxu3 %v10534_v16  ;;  %v10390_v16 = vor.u32 %v11805_v10, %v10389_v20  ;;  %v10318_v20 = vor.u32 %v11787_v61, %v10317_v36  ;;  %v11801_v10 = vld [vmem:[%s12081_s28 + $0x1684] sm:$0xf0]  ;;  %v10685_v36 = vld [vmem:[%s12081_s28 + $0x18f0] sm:$0xf]  ;;  %v6231_v61 = vpop.f32.mrf.mxu2  ;;  %v10502_v58 = vor.u32 %v11833_v11, %v10501_v59 }
 0x189   : > { %6458 = vmatpush.bf16.msrb.mxu0 %v10334_v53  ;;  %v11819_v53 = vld [vmem:[%s12081_s28 + $0x1714] sm:$0xf0]  ;;  %v10374_v35 = vor.u32 %v11801_v10, %v10373_v48  ;;  %v11861_v61 = vld [vmem:[%s12081_s28 + $0x1864] sm:$0xf0] }
 0x18a   : > { %6471 = vmatpush.bf16.msrb.mxu1 %v10398_v23  ;;  %v11835_v23 = vld [vmem:[%s12081_s28 + $0x1794] sm:$0xf0]  ;;  %v10446_v55 = vor.u32 %v11819_v53, %v10445_v46  ;;  %v380_v46 = vld.sshfl [vmem:[#allocation1 + $0x20] sm:$0xff pattern:$0x73625140] }
 0x18b   : > { %6484 = vmatpush.bf16.msrb.mxu2 %v10462_v56  ;;  %v10309_v56 = vld [vmem:[%s12081_s28 + $0x1600] sm:$0xf]  ;;  %v10510_v17 = vor.u32 %v11835_v23, %v10509_v14  ;;  %v382_v53 = vld.sshfl [vmem:[#allocation1 + $0x30] sm:$0xff pattern:$0x73625140]  ;;  %v13060_v10 = vpack.c.bf16 %v380_v46, %v380_v46 }
 0x18c   : > { %6497 = vmatpush.bf16.msrb.mxu3 %v10526_v51  ;;  %v11817_v51 = vld [vmem:[%s12081_s28 + $0x1704] sm:$0xf0]  ;;  %v13065_v59 = vpack.c.bf16 %v382_v53, %v382_v53  ;;  %v11891_v46 = vld [vmem:[%s12081_s28 + $0x1954] sm:$0xf0]  ;;  %v10797_v53 = vld [vmem:[%s12081_s28 + $0x19d0] sm:$0xf] }
 0x18d   : > { %6459 = vmatpush.bf16.msrb.mxu0 %v10326_v24  ;;  %v11863_v24 = vld [vmem:[%s12081_s28 + $0x1874] sm:$0xf0]  ;;  %v381_v23 = vld.sshfl [vmem:[#allocation1 + $0x28] sm:$0xff pattern:$0x73625140]  ;;  %14272 = vst [vmem:[#allocation14_spill] sm:$0xff] %v13060_v10 }
 0x18e   : > { %6472 = vmatpush.bf16.msrb.mxu1 %v10390_v16  ;;  %v10310_v16 = vor.u32 %v11785_v15, %v10309_v56  ;;  %v10622_v14 = vor.u32 %v11863_v24, %v10621_v26  ;;  %v383_v56 = vld.sshfl [vmem:[#allocation1 + $0x38] sm:$0xff pattern:$0x73625140]  ;;  %v10686_v15 = vor.u32 %v11879_v62, %v10685_v36  ;;  %14273 = vst [vmem:[#allocation15_spill] sm:$0xff] %v13065_v59  ;;  %v10605_v62 = vld [vmem:[%s12081_s28 + $0x1850] sm:$0xf] }
 0x18f   : > { %6485 = vmatpush.bf16.msrb.mxu2 %v10454_v57  ;;  %v10813_v57 = vld [vmem:[%s12081_s28 + $0x19f0] sm:$0xf]  ;;  %v13067_v11 = vpack.c.bf16 %v381_v23, %v381_v23  ;;  %v13071_v26 = vpack.c.bf16 %v383_v56, %v383_v56 }
 0x190   : > { %6498 = vmatpush.bf16.msrb.mxu3 %v10518_v52  ;;  %v10438_v52 = vor.u32 %v11817_v51, %v10437_v49  ;;  %v10814_v48 = vor.u32 %v11911_v41, %v10813_v57  ;;  %v11877_v49 = vld [vmem:[%s12081_s28 + $0x18e4] sm:$0xf0]  ;;  %v10741_v51 = vld [vmem:[%s12081_s28 + $0x1960] sm:$0xf]  ;;  %v10669_v57 = vld [vmem:[%s12081_s28 + $0x18d0] sm:$0xf] }
 0x191   : > { %6460 = vmatpush.bf16.msrb.mxu0 %v10318_v20  ;;  %v10750_v20 = vor.u32 %v11895_v4, %v10749_v5  ;;  %14274 = vst [vmem:[#allocation16_spill] sm:$0xff] %v13067_v11  ;;  %v10805_v4 = vld [vmem:[%s12081_s28 + $0x19e0] sm:$0xf]  ;;  %v11909_v5 = vld [vmem:[%s12081_s28 + $0x19e4] sm:$0xf0] }
 0x192   : > { %6473 = vmatpush.bf16.msrb.mxu1 %v10382_v2  ;;  %v10677_v2 = vld [vmem:[%s12081_s28 + $0x18e0] sm:$0xf]  ;;  %14275 = vst [vmem:[#allocation17_spill] sm:$0xff] %v13071_v26  ;;  %v10806_v41 = vor.u32 %v11909_v5, %v10805_v4  ;;  %v11905_v4 = vld [vmem:[%s12081_s28 + $0x19c4] sm:$0xf0] }
 0x193   : > { %6486 = vmatpush.bf16.msrb.mxu2 %v10446_v55  ;;  %v11893_v55 = vld [vmem:[%s12081_s28 + $0x1964] sm:$0xf0]  ;;  %v10678_v24 = vor.u32 %v11877_v49, %v10677_v2 }
 0x194   : > { %6499 = vmatpush.bf16.msrb.mxu3 %v10510_v17  ;;  %v10614_v17 = vor.u32 %v11861_v61, %v10613_v54  ;;  %v10742_v36 = vor.u32 %v11893_v55, %v10741_v51  ;;  %v10661_v54 = vld [vmem:[%s12081_s28 + $0x18c0] sm:$0xf]  ;;  %v11873_v2 = vld [vmem:[%s12081_s28 + $0x18c4] sm:$0xf0] }
 0x195   : > { %6461 = vmatpush.bf16.msrb.mxu0 %v10310_v16  ;;  %v11859_v16 = vld [vmem:[%s12081_s28 + $0x1854] sm:$0xf0]  ;;  %v11889_v49 = vld [vmem:[%s12081_s28 + $0x1944] sm:$0xf0]  ;;  %v6255_v51 = vpop.f32.mrf.mxu0  ;;  %v10789_v55 = vld [vmem:[%s12081_s28 + $0x19c0] sm:$0xf] }
 0x196   : > { %6474 = vmatpush.bf16.msrb.mxu1 %v10374_v35  ;;  %v11875_v35 = vld [vmem:[%s12081_s28 + $0x18d4] sm:$0xf0]  ;;  %v6256_v5 = vadd.f32 %v6255_v51, %v13031_v40  ;;  %v10709_v51 = vld [vmem:[%s12081_s28 + $0x1920] sm:$0xf] }
 0x197   : > { %6487 = vmatpush.bf16.msrb.mxu2 %v10438_v52  ;;  %v10733_v52 = vld [vmem:[%s12081_s28 + $0x1950] sm:$0xf]  ;;  %v10670_v23 = vor.u32 %v11875_v35, %v10669_v57  ;;  %v11855_v57 = vld [vmem:[%s12081_s28 + $0x1834] sm:$0xf0]  ;;  %v10790_v35 = vor.u32 %v11905_v4, %v10789_v55  ;;  %v11885_v55 = vld [vmem:[%s12081_s28 + $0x1924] sm:$0xf0] }
 0x198   : > { %6500 = vmatpush.bf16.msrb.mxu3 %v10502_v58  ;;  %6462 = vmatmul.bf16.vlgmr.msrb.gmra.mxu0 %v13060_v10  ;;  %v11907_v58 = vld [vmem:[%s12081_s28 + $0x19d4] sm:$0xf0]  ;;  %v10734_v56 = vor.u32 %v11891_v46, %v10733_v52  ;;  %v308_v10 = vld [vmem:[%s12076_s24 + $0x68] sm:$0xff] }
 0x199   : > { %6506 = vmatpush.bf16.msra.mxu0 %v10622_v14  ;;  %6475 = vmatmul.bf16.vlgmr.msrb.gmra.mxu1 %v13067_v11  ;;  %v10606_v14 = vor.u32 %v11859_v16, %v10605_v62  ;;  %v10798_v61 = vor.u32 %v11907_v58, %v10797_v53  ;;  %v10589_v16 = vld [vmem:[%s12081_s28 + $0x1830] sm:$0xf]  ;;  %v11871_v46 = vld [vmem:[%s12081_s28 + $0x18b4] sm:$0xf0]  ;;  %385 = vst [vmem:[#allocation1 + $0x20] ss:$4 sm:$0xff] %v308_v10 }
 0x19a   : > { %6519 = vmatpush.bf16.msra.mxu1 %v10686_v15  ;;  %6488 = vmatmul.bf16.vlgmr.msrb.gmra.mxu2 %v13065_v59  ;;  %v10597_v15 = vld [vmem:[%s12081_s28 + $0x1840] sm:$0xf]  ;;  %v10717_v53 = vld [vmem:[%s12081_s28 + $0x1930] sm:$0xf]  ;;  %v11887_v40 = vld [vmem:[%s12081_s28 + $0x1934] sm:$0xf0] }
 0x19b   : > { %6532 = vmatpush.bf16.msra.mxu2 %v10750_v20  ;;  %6501 = vmatmul.bf16.vlgmr.msrb.gmra.mxu3 %v13071_v26  ;;  %v11857_v20 = vld [vmem:[%s12081_s28 + $0x1844] sm:$0xf0]  ;;  %v10781_v58 = vld [vmem:[%s12081_s28 + $0x19b0] sm:$0xf]  ;;  %v11959_v11 = vld [vmem:[%s12081_s28 + $0x1b74] sm:$0xf0] }
 0x19c   : > { %6545 = vmatpush.bf16.msra.mxu3 %v10814_v48  ;;  %v10725_v48 = vld [vmem:[%s12081_s28 + $0x1940] sm:$0xf]  ;;  %v11005_v26 = vld [vmem:[%s12081_s28 + $0x1b70] sm:$0xf] }
 0x19d   : > { %6507 = vmatpush.bf16.msra.mxu0 %v10614_v17  ;;  %v10598_v17 = vor.u32 %v11857_v20, %v10597_v15  ;;  %v10726_v62 = vor.u32 %v11889_v49, %v10725_v48  ;;  %v10718_v15 = vor.u32 %v11887_v40, %v10717_v53  ;;  %v10581_v20 = vld [vmem:[%s12081_s28 + $0x1820] sm:$0xf]  ;;  %v6281_v48 = vpop.f32.mrf.mxu2  ;;  %v11869_v49 = vld [vmem:[%s12081_s28 + $0x18a4] sm:$0xf0]  ;;  %v10637_v53 = vld [vmem:[%s12081_s28 + $0x1890] sm:$0xf] }
 0x19e   : > { %6520 = vmatpush.bf16.msra.mxu1 %v10678_v24  ;;  %v6268_v24 = vpop.f32.mrf.mxu1  ;;  %v11867_v40 = vld [vmem:[%s12081_s28 + $0x1894] sm:$0xf0]  ;;  %v10869_v10 = vld [vmem:[%s12081_s28 + $0x1a60] sm:$0xf] }
 0x19f   : > { %6533 = vmatpush.bf16.msra.mxu2 %v10742_v36  ;;  %v10662_v36 = vor.u32 %v11873_v2, %v10661_v54  ;;  %v6269_v52 = vadd.f32 %v6268_v24, %v6256_v5  ;;  %v11853_v54 = vld [vmem:[%s12081_s28 + $0x1824] sm:$0xf0]  ;;  %v6294_v5 = vpop.f32.mrf.mxu3 }
 0x1a0   : > { %6546 = vmatpush.bf16.msra.mxu3 %v10806_v41  ;;  %v10653_v41 = vld [vmem:[%s12081_s28 + $0x18b0] sm:$0xf]  ;;  %v11901_v24 = vld [vmem:[%s12081_s28 + $0x19a4] sm:$0xf0] }
 0x1a1   : > { %6508 = vmatpush.bf16.msra.mxu0 %v10606_v14  ;;  %v11903_v14 = vld [vmem:[%s12081_s28 + $0x19b4] sm:$0xf0]  ;;  %v6282_v4 = vadd.f32 %v6281_v48, %v6269_v52  ;;  %v10710_v52 = vor.u32 %v11885_v55, %v10709_v51  ;;  %v10629_v48 = vld [vmem:[%s12081_s28 + $0x1880] sm:$0xf]  ;;  %v10638_v55 = vor.u32 %v11867_v40, %v10637_v53 }
 0x1a2   : > { %6521 = vmatpush.bf16.msra.mxu1 %v10670_v23  ;;  %v10590_v23 = vor.u32 %v11855_v57, %v10589_v16  ;;  %v10782_v2 = vor.u32 %v11903_v14, %v10781_v58  ;;  %v10573_v16 = vld [vmem:[%s12081_s28 + $0x1810] sm:$0xf]  ;;  %v10693_v51 = vld [vmem:[%s12081_s28 + $0x1900] sm:$0xf]  ;;  %v11975_v53 = vld [vmem:[%s12081_s28 + $0x1bf4] sm:$0xf0] }
 0x1a3   : > { %6534 = vmatpush.bf16.msra.mxu2 %v10734_v56  ;;  %v10654_v56 = vor.u32 %v11871_v46, %v10653_v41  ;;  %v13111_v41 = vadd.f32 %v6294_v5, %v6282_v4  ;;  %v11851_v46 = vld [vmem:[%s12081_s28 + $0x1814] sm:$0xf0]  ;;  %v10701_v14 = vld [vmem:[%s12081_s28 + $0x1910] sm:$0xf]  ;;  %v10757_v5 = vld [vmem:[%s12081_s28 + $0x1980] sm:$0xf] }
 0x1a4   : > { %6547 = vmatpush.bf16.msra.mxu3 %v10798_v61  ;;  %v10645_v61 = vld [vmem:[%s12081_s28 + $0x18a0] sm:$0xf] }
 0x1a5   : > { %6509 = vmatpush.bf16.msra.mxu0 %v10598_v17  ;;  %v10773_v17 = vld [vmem:[%s12081_s28 + $0x19a0] sm:$0xf] }
 0x1a6   : > { %6522 = vmatpush.bf16.msra.mxu1 %v10662_v36  ;;  %v6257_v36 = vpop.f32.mrf.mxu0  ;;  %v6270_v57 = vpop.f32.mrf.mxu1  ;;  %v10774_v58 = vor.u32 %v11901_v24, %v10773_v17  ;;  %v11897_v17 = vld [vmem:[%s12081_s28 + $0x1984] sm:$0xf0]  ;;  %v10877_v24 = vld [vmem:[%s12081_s28 + $0x1a70] sm:$0xf] }
 0x1a7   : > { %6535 = vmatpush.bf16.msra.mxu2 %v10726_v62  ;;  %v10582_v62 = vor.u32 %v11853_v54, %v10581_v20  ;;  %v10765_v20 = vld [vmem:[%s12081_s28 + $0x1990] sm:$0xf]  ;;  %v11849_v54 = vld [vmem:[%s12081_s28 + $0x1804] sm:$0xf0]  ;;  %v11943_v57 = vld [vmem:[%s12081_s28 + $0x1af4] sm:$0xf0]  ;;  %v6296_v59 = vpop.f32.mrf.mxu3 }
 0x1a8   : > { %6548 = vmatpush.bf16.msra.mxu3 %v10790_v35  ;;  %v10646_v35 = vor.u32 %v11869_v49, %v10645_v61  ;;  %v10574_v61 = vor.u32 %v11851_v46, %v10573_v16  ;;  %v11865_v49 = vld [vmem:[%s12081_s28 + $0x1884] sm:$0xf0]  ;;  %v10941_v16 = vld [vmem:[%s12081_s28 + $0x1af0] sm:$0xf]  ;;  %v6283_v46 = vpop.f32.mrf.mxu2  ;;  %v10758_v59 = vor.u32 %v11897_v17, %v10757_v5 }
 0x1a9   : > { %6510 = vmatpush.bf16.msra.mxu0 %v10590_v23  ;;  %v11883_v23 = vld [vmem:[%s12081_s28 + $0x1914] sm:$0xf0]  ;;  %v10630_v40 = vor.u32 %v11865_v49, %v10629_v48  ;;  %v11925_v46 = vld [vmem:[%s12081_s28 + $0x1a64] sm:$0xf0] }
 0x1aa   : > { %6523 = vmatpush.bf16.msra.mxu1 %v10654_v56  ;;  %v11899_v56 = vld [vmem:[%s12081_s28 + $0x1994] sm:$0xf0]  ;;  %v10702_v4 = vor.u32 %v11883_v23, %v10701_v14  ;;  %v386_v14 = vld.sshfl [vmem:[#allocation1] sm:$0xff pattern:$0x73625140] }
 0x1ab   : > { %6536 = vmatpush.bf16.msra.mxu2 %v10718_v15  ;;  %v10565_v15 = vld [vmem:[%s12081_s28 + $0x1800] sm:$0xf]  ;;  %v10766_v36 = vor.u32 %v11899_v56, %v10765_v20  ;;  %v388_v23 = vld.sshfl [vmem:[#allocation1 + $0x10] sm:$0xff pattern:$0x73625140]  ;;  %v13140_v49 = vpack.c.bf16 %v386_v14, %v386_v14 }
 0x1ac   : > { %6549 = vmatpush.bf16.msra.mxu3 %v10782_v2  ;;  %v11881_v2 = vld [vmem:[%s12081_s28 + $0x1904] sm:$0xf0]  ;;  %v13145_v5 = vpack.c.bf16 %v388_v23, %v388_v23  ;;  %v11955_v14 = vld [vmem:[%s12081_s28 + $0x1b54] sm:$0xf0]  ;;  %v11053_v23 = vld [vmem:[%s12081_s28 + $0x1bd0] sm:$0xf] }
 0x1ad   : > { %6511 = vmatpush.bf16.msra.mxu0 %v10582_v62  ;;  %v11927_v62 = vld [vmem:[%s12081_s28 + $0x1a74] sm:$0xf0]  ;;  %v387_v56 = vld.sshfl [vmem:[#allocation1 + $0x8] sm:$0xff pattern:$0x73625140]  ;;  %14276 = vst [vmem:[#allocation18_spill] sm:$0xff] %v13140_v49 }
 0x1ae   : > { %6524 = vmatpush.bf16.msra.mxu1 %v10646_v35  ;;  %v10566_v35 = vor.u32 %v11849_v54, %v10565_v15  ;;  %v10878_v20 = vor.u32 %v11927_v62, %v10877_v24  ;;  %v389_v15 = vld.sshfl [vmem:[#allocation1 + $0x18] sm:$0xff pattern:$0x73625140]  ;;  %v10942_v54 = vor.u32 %v11943_v57, %v10941_v16  ;;  %14277 = vst [vmem:[#allocation19_spill] sm:$0xff] %v13145_v5  ;;  %v10861_v57 = vld [vmem:[%s12081_s28 + $0x1a50] sm:$0xf] }
 0x1af   : > { %6537 = vmatpush.bf16.msra.mxu2 %v10710_v52  ;;  %v11069_v52 = vld [vmem:[%s12081_s28 + $0x1bf0] sm:$0xf]  ;;  %v13147_v17 = vpack.c.bf16 %v387_v56, %v387_v56  ;;  %v13151_v24 = vpack.c.bf16 %v389_v15, %v389_v15 }
 0x1b0   : > { %6550 = vmatpush.bf16.msra.mxu3 %v10774_v58  ;;  %v10694_v58 = vor.u32 %v11881_v2, %v10693_v51  ;;  %v11070_v48 = vor.u32 %v11975_v53, %v11069_v52  ;;  %v11941_v51 = vld [vmem:[%s12081_s28 + $0x1ae4] sm:$0xf0]  ;;  %v10997_v2 = vld [vmem:[%s12081_s28 + $0x1b60] sm:$0xf]  ;;  %v10925_v52 = vld [vmem:[%s12081_s28 + $0x1ad0] sm:$0xf] }
 0x1b1   : > { %6512 = vmatpush.bf16.msra.mxu0 %v10574_v61  ;;  %v11006_v61 = vor.u32 %v11959_v11, %v11005_v26  ;;  %14278 = vst [vmem:[#allocation20_spill] sm:$0xff] %v13147_v17  ;;  %v11061_v11 = vld [vmem:[%s12081_s28 + $0x1be0] sm:$0xf]  ;;  %v11973_v26 = vld [vmem:[%s12081_s28 + $0x1be4] sm:$0xf0] }
 0x1b2   : > { %6525 = vmatpush.bf16.msra.mxu1 %v10638_v55  ;;  %v10933_v55 = vld [vmem:[%s12081_s28 + $0x1ae0] sm:$0xf]  ;;  %14279 = vst [vmem:[#allocation21_spill] sm:$0xff] %v13151_v24  ;;  %v11062_v53 = vor.u32 %v11973_v26, %v11061_v11  ;;  %v11969_v11 = vld [vmem:[%s12081_s28 + $0x1bc4] sm:$0xf0] }
 0x1b3   : > { %6538 = vmatpush.bf16.msra.mxu2 %v10702_v4  ;;  %v11957_v4 = vld [vmem:[%s12081_s28 + $0x1b64] sm:$0xf0]  ;;  %v10934_v62 = vor.u32 %v11941_v51, %v10933_v55 }
 0x1b4   : > { %6551 = vmatpush.bf16.msra.mxu3 %v10766_v36  ;;  %v10870_v36 = vor.u32 %v11925_v46, %v10869_v10  ;;  %v10998_v16 = vor.u32 %v11957_v4, %v10997_v2  ;;  %v10917_v10 = vld [vmem:[%s12081_s28 + $0x1ac0] sm:$0xf]  ;;  %v11937_v55 = vld [vmem:[%s12081_s28 + $0x1ac4] sm:$0xf0] }
 0x1b5   : > { %6513 = vmatpush.bf16.msra.mxu0 %v10566_v35  ;;  %v11923_v35 = vld [vmem:[%s12081_s28 + $0x1a54] sm:$0xf0]  ;;  %v11953_v51 = vld [vmem:[%s12081_s28 + $0x1b44] sm:$0xf0]  ;;  %v6307_v2 = vpop.f32.mrf.mxu0  ;;  %v11045_v4 = vld [vmem:[%s12081_s28 + $0x1bc0] sm:$0xf] }
 0x1b6   : > { %6526 = vmatpush.bf16.msra.mxu1 %v10630_v40  ;;  %v11939_v40 = vld [vmem:[%s12081_s28 + $0x1ad4] sm:$0xf0]  ;;  %v6308_v26 = vadd.f32 %v6307_v2, %v13111_v41  ;;  %v10965_v2 = vld [vmem:[%s12081_s28 + $0x1b20] sm:$0xf] }
 0x1b7   : > { %6539 = vmatpush.bf16.msra.mxu2 %v10694_v58  ;;  %v10989_v58 = vld [vmem:[%s12081_s28 + $0x1b50] sm:$0xf]  ;;  %v10926_v56 = vor.u32 %v11939_v40, %v10925_v52  ;;  %v11919_v52 = vld [vmem:[%s12081_s28 + $0x1a34] sm:$0xf0]  ;;  %v11046_v40 = vor.u32 %v11969_v11, %v11045_v4  ;;  %v11949_v4 = vld [vmem:[%s12081_s28 + $0x1b24] sm:$0xf0] }
 0x1b8   : > { %6552 = vmatpush.bf16.msra.mxu3 %v10758_v59  ;;  %6514 = vmatmul.bf16.vlgmr.msra.gmra.mxu0 %v13140_v49  ;;  %v11971_v59 = vld [vmem:[%s12081_s28 + $0x1bd4] sm:$0xf0]  ;;  %v10990_v15 = vor.u32 %v11955_v14, %v10989_v58  ;;  %v7543_v49 = vld [vmem:[%s12081_s28 + $0x68] sm:$0xf0] }
 0x1b9   : > { %6558 = vmatpush.bf16.msrb.mxu0 %v10878_v20  ;;  %6527 = vmatmul.bf16.vlgmr.msra.gmra.mxu1 %v13147_v17  ;;  %v10862_v20 = vor.u32 %v11923_v35, %v10861_v57  ;;  %v11054_v46 = vor.u32 %v11971_v59, %v11053_v23  ;;  %v10845_v35 = vld [vmem:[%s12081_s28 + $0x1a30] sm:$0xf]  ;;  %v11935_v14 = vld [vmem:[%s12081_s28 + $0x1ab4] sm:$0xf0] }
 0x1ba   : > { %6571 = vmatpush.bf16.msrb.mxu1 %v10942_v54  ;;  %6540 = vmatmul.bf16.vlgmr.msra.gmra.mxu2 %v13145_v5  ;;  %v10853_v54 = vld [vmem:[%s12081_s28 + $0x1a40] sm:$0xf]  ;;  %v10973_v23 = vld [vmem:[%s12081_s28 + $0x1b30] sm:$0xf]  ;;  %v11951_v41 = vld [vmem:[%s12081_s28 + $0x1b34] sm:$0xf0] }
 0x1bb   : > { %6584 = vmatpush.bf16.msrb.mxu2 %v11006_v61  ;;  %6553 = vmatmul.bf16.vlgmr.msra.gmra.mxu3 %v13151_v24  ;;  %v11921_v61 = vld [vmem:[%s12081_s28 + $0x1a44] sm:$0xf0]  ;;  %v11037_v59 = vld [vmem:[%s12081_s28 + $0x1bb0] sm:$0xf]  ;;  %v11126_v24 = vld [vmem:[%s12081_s28 + $0x174] sm:$0xf] }
 0x1bc   : > { %6597 = vmatpush.bf16.msrb.mxu3 %v11070_v48  ;;  %v10981_v48 = vld [vmem:[%s12081_s28 + $0x1b40] sm:$0xf]  ;;  %v11092_v5 = vld [vmem:[%s12081_s28 + $0x64] sm:$0xf] }
 0x1bd   : > { %6559 = vmatpush.bf16.msrb.mxu0 %v10870_v36  ;;  %v10854_v36 = vor.u32 %v11921_v61, %v10853_v54  ;;  %v10982_v57 = vor.u32 %v11953_v51, %v10981_v48  ;;  %v10974_v54 = vor.u32 %v11951_v41, %v10973_v23  ;;  %v10837_v61 = vld [vmem:[%s12081_s28 + $0x1a20] sm:$0xf]  ;;  %v6333_v48 = vpop.f32.mrf.mxu2  ;;  %v11933_v51 = vld [vmem:[%s12081_s28 + $0x1aa4] sm:$0xf0]  ;;  %v10893_v23 = vld [vmem:[%s12081_s28 + $0x1a90] sm:$0xf] }
 0x1be   : > { %6572 = vmatpush.bf16.msrb.mxu1 %v10934_v62  ;;  %v6320_v62 = vpop.f32.mrf.mxu1 }
 0x1bf   : > { %6585 = vmatpush.bf16.msrb.mxu2 %v10998_v16  ;;  %v10918_v16 = vor.u32 %v11937_v55, %v10917_v10  ;;  %v6321_v58 = vadd.f32 %v6320_v62, %v6308_v26  ;;  %v11917_v10 = vld [vmem:[%s12081_s28 + $0x1a24] sm:$0xf0]  ;;  %v6346_v26 = vpop.f32.mrf.mxu3 }
 0x1c0   : > { %6598 = vmatpush.bf16.msrb.mxu3 %v11062_v53  ;;  %v10909_v53 = vld [vmem:[%s12081_s28 + $0x1ab0] sm:$0xf]  ;;  %v11965_v62 = vld [vmem:[%s12081_s28 + $0x1ba4] sm:$0xf0] }
 0x1c1   : > { %6560 = vmatpush.bf16.msrb.mxu0 %v10862_v20  ;;  %v11967_v20 = vld [vmem:[%s12081_s28 + $0x1bb4] sm:$0xf0]  ;;  %v6334_v11 = vadd.f32 %v6333_v48, %v6321_v58  ;;  %v10829_v58 = vld [vmem:[%s12081_s28 + $0x1a10] sm:$0xf]  ;;  %v10885_v48 = vld [vmem:[%s12081_s28 + $0x1a80] sm:$0xf] }
 0x1c2   : > { %6573 = vmatpush.bf16.msrb.mxu1 %v10926_v56  ;;  %v10846_v56 = vor.u32 %v11919_v52, %v10845_v35  ;;  %v11038_v55 = vor.u32 %v11967_v20, %v11037_v59  ;;  %v11931_v59 = vld [vmem:[%s12081_s28 + $0x1a94] sm:$0xf0]  ;;  %v10957_v20 = vld [vmem:[%s12081_s28 + $0x1b10] sm:$0xf] }
 0x1c3   : > { %6586 = vmatpush.bf16.msrb.mxu2 %v10990_v15  ;;  %v10910_v15 = vor.u32 %v11935_v14, %v10909_v53  ;;  %v13190_v52 = vadd.f32 %v6346_v26, %v6334_v11  ;;  %v11915_v14 = vld [vmem:[%s12081_s28 + $0x1a14] sm:$0xf0]  ;;  %v11945_v11 = vld [vmem:[%s12081_s28 + $0x1b04] sm:$0xf0]  ;;  %v11013_v26 = vld [vmem:[%s12081_s28 + $0x1b80] sm:$0xf] }
 0x1c4   : > { %6599 = vmatpush.bf16.msrb.mxu3 %v11054_v46  ;;  %v10901_v46 = vld [vmem:[%s12081_s28 + $0x1aa0] sm:$0xf] }
 0x1c5   : > { %6561 = vmatpush.bf16.msrb.mxu0 %v10854_v36  ;;  %v11029_v36 = vld [vmem:[%s12081_s28 + $0x1ba0] sm:$0xf]  ;;  %v10902_v53 = vor.u32 %v11933_v51, %v10901_v46  ;;  %v11913_v46 = vld [vmem:[%s12081_s28 + $0x1a04] sm:$0xf0]  ;;  %v10894_v51 = vor.u32 %v11931_v59, %v10893_v23  ;;  %v11142_v23 = vld [vmem:[%s12081_s28 + $0x1f4] sm:$0xf] }
 0x1c6   : > { %6574 = vmatpush.bf16.msrb.mxu1 %v10918_v16  ;;  %v6309_v16 = vpop.f32.mrf.mxu0  ;;  %v6322_v35 = vpop.f32.mrf.mxu1  ;;  %v11030_v41 = vor.u32 %v11965_v62, %v11029_v36  ;;  %v11961_v62 = vld [vmem:[%s12081_s28 + $0x1b84] sm:$0xf0]  ;;  %v7743_v59 = vld [vmem:[%s12081_s28 + $0x1f8] sm:$0xf0] }
 0x1c7   : > { %6587 = vmatpush.bf16.msrb.mxu2 %v10982_v57  ;;  %v10838_v57 = vor.u32 %v11917_v10, %v10837_v61  ;;  %v10821_v61 = vld [vmem:[%s12081_s28 + $0x1a00] sm:$0xf]  ;;  %v10830_v10 = vor.u32 %v11915_v14, %v10829_v58  ;;  %v11094_v16 = vld [vmem:[%s12081_s28 + $0x74] sm:$0xf]  ;;  %v6335_v35 = vpop.f32.mrf.mxu2  ;;  %v7615_v14 = vld [vmem:[%s12081_s28 + $0xf8] sm:$0xf0]  ;;  %v6348_v17 = vpop.f32.mrf.mxu3 }
 0x1c8   : > { %6600 = vmatpush.bf16.msrb.mxu3 %v11046_v40  ;;  %v10966_v40 = vor.u32 %v11949_v4, %v10965_v2  ;;  %v10949_v4 = vld [vmem:[%s12081_s28 + $0x1b00] sm:$0xf]  ;;  %v11110_v58 = vld [vmem:[%s12081_s28 + $0xf4] sm:$0xf] }
 0x1c9   : > { %6562 = vmatpush.bf16.msrb.mxu0 %v10846_v56  ;;  %v11947_v56 = vld [vmem:[%s12081_s28 + $0x1b14] sm:$0xf0] }
 0x1ca   : > { %6575 = vmatpush.bf16.msrb.mxu1 %v10910_v15  ;;  %v11021_v15 = vld [vmem:[%s12081_s28 + $0x1b90] sm:$0xf]  ;;  %v10958_v2 = vor.u32 %v11947_v56, %v10957_v20  ;;  %v10950_v20 = vor.u32 %v11945_v11, %v10949_v4  ;;  %v390_v56 = vld.sshfl [vmem:[#allocation1 + $0x20] sm:$0xff pattern:$0x73625140] }
 0x1cb   : > { %6588 = vmatpush.bf16.msrb.mxu2 %v10974_v54  ;;  %v11963_v54 = vld [vmem:[%s12081_s28 + $0x1b94] sm:$0xf0]  ;;  %v11124_v4 = vld [vmem:[%s12081_s28 + $0x164] sm:$0xf]  ;;  %v7671_v11 = vld [vmem:[%s12081_s28 + $0x168] sm:$0xf0] }
 0x1cc   : > { %6601 = vmatpush.bf16.msrb.mxu3 %v11038_v55  ;;  %v11929_v55 = vld [vmem:[%s12081_s28 + $0x1a84] sm:$0xf0]  ;;  %v11022_v36 = vor.u32 %v11963_v54, %v11021_v15  ;;  %v392_v15 = vld.sshfl [vmem:[#allocation1 + $0x30] sm:$0xff pattern:$0x73625140]  ;;  %v11014_v54 = vor.u32 %v11961_v62, %v11013_v26 }
 0x1cd   : > { %6563 = vmatpush.bf16.msrb.mxu0 %v10838_v57  ;;  %v7551_v57 = vld [vmem:[%s12081_s28 + $0x78] sm:$0xf0]  ;;  %v13224_v26 = vpack.c.bf16 %v392_v15, %v392_v15  ;;  %v7735_v62 = vld [vmem:[%s12081_s28 + $0x1e8] sm:$0xf0] }
 0x1ce   : > { %6576 = vmatpush.bf16.msrb.mxu1 %v10902_v53  ;;  %v10822_v53 = vor.u32 %v11913_v46, %v10821_v61  ;;  %v7554_v17 = vor.u32 %v11094_v16, %v7551_v57  ;;  %v393_v61 = vld.sshfl [vmem:[#allocation1 + $0x38] sm:$0xff pattern:$0x73625140]  ;;  %v7618_v46 = vor.u32 %v11110_v58, %v7615_v14  ;;  %v7546_v57 = vor.u32 %v11092_v5, %v7543_v49  ;;  %v11138_v49 = vld [vmem:[%s12081_s28 + $0x1d4] sm:$0xf] }
 0x1cf   : > { %6589 = vmatpush.bf16.msrb.mxu2 %v10966_v40  ;;  %v7679_v40 = vld [vmem:[%s12081_s28 + $0x178] sm:$0xf0]  ;;  %v13230_v16 = vpack.c.bf16 %v393_v61, %v393_v61  ;;  %v7674_v14 = vor.u32 %v11124_v4, %v7671_v11  ;;  %v7527_v61 = vld [vmem:[%s12081_s28 + $0x48] sm:$0xf0]  ;;  %v11136_v11 = vld [vmem:[%s12081_s28 + $0x1c4] sm:$0xf] }
 0x1d0   : > { %6602 = vmatpush.bf16.msrb.mxu3 %v11030_v41  ;;  %v10886_v41 = vor.u32 %v11929_v55, %v10885_v48  ;;  %v7682_v35 = vor.u32 %v11126_v24, %v7679_v40  ;;  %v7746_v48 = vor.u32 %v11142_v23, %v7743_v59  ;;  %v13219_v55 = vpack.c.bf16 %v390_v56, %v390_v56  ;;  %v11140_v24 = vld [vmem:[%s12081_s28 + $0x1e4] sm:$0xf]  ;;  %v7535_v40 = vld [vmem:[%s12081_s28 + $0x58] sm:$0xf0]  ;;  %v11106_v23 = vld [vmem:[%s12081_s28 + $0xd4] sm:$0xf] }
 0x1d1   : > { %6564 = vmatpush.bf16.msrb.mxu0 %v10830_v10  ;;  %v391_v10 = vld.sshfl [vmem:[#allocation1 + $0x28] sm:$0xff pattern:$0x73625140]  ;;  %14280 = vst [vmem:[#allocation22_spill] sm:$0xff] %v13230_v16  ;;  %v7738_v59 = vor.u32 %v11140_v24, %v7735_v62  ;;  %v7663_v56 = vld [vmem:[%s12081_s28 + $0x158] sm:$0xf0] }
 0x1d2   : > { %6577 = vmatpush.bf16.msrb.mxu1 %v10894_v51  ;;  %v11108_v51 = vld [vmem:[%s12081_s28 + $0xe4] sm:$0xf]  ;;  %v7727_v5 = vld [vmem:[%s12081_s28 + $0x1d8] sm:$0xf0]  ;;  %v7719_v24 = vld [vmem:[%s12081_s28 + $0x1c8] sm:$0xf0] }
 0x1d3   : > { %6590 = vmatpush.bf16.msrb.mxu2 %v10958_v2  ;;  %v7607_v2 = vld [vmem:[%s12081_s28 + $0xe8] sm:$0xf0] }
 0x1d4   : > { %6603 = vmatpush.bf16.msrb.mxu3 %v11022_v36  ;;  %v13226_v36 = vpack.c.bf16 %v391_v10, %v391_v10  ;;  %v7610_v58 = vor.u32 %v11108_v51, %v7607_v2  ;;  %v11088_v10 = vld [vmem:[%s12081_s28 + $0x44] sm:$0xf]  ;;  %v7591_v51 = vld [vmem:[%s12081_s28 + $0xc8] sm:$0xf0] }
 0x1d5   : > { %6565 = vmatpush.bf16.msrb.mxu0 %v10822_v53  ;;  %v11090_v53 = vld [vmem:[%s12081_s28 + $0x54] sm:$0xf]  ;;  %v7655_v2 = vld [vmem:[%s12081_s28 + $0x148] sm:$0xf0]  ;;  %v6359_v4 = vpop.f32.mrf.mxu0 }
 0x1d6   : > { %6578 = vmatpush.bf16.msrb.mxu1 %v10886_v41  ;;  %v7599_v41 = vld [vmem:[%s12081_s28 + $0xd8] sm:$0xf0]  ;;  %v7538_v15 = vor.u32 %v11090_v53, %v7535_v40  ;;  %v6360_v62 = vadd.f32 %v6359_v4, %v13190_v52  ;;  %v11086_v40 = vld [vmem:[%s12081_s28 + $0x34] sm:$0xf]  ;;  %v11116_v4 = vld [vmem:[%s12081_s28 + $0x124] sm:$0xf] }
 0x1d7   : > { %6591 = vmatpush.bf16.msrb.mxu2 %v10950_v20  ;;  %v11122_v20 = vld [vmem:[%s12081_s28 + $0x154] sm:$0xf]  ;;  %v7647_v52 = vld [vmem:[%s12081_s28 + $0x138] sm:$0xf0] }
 0x1d8   : > { %6604 = vmatpush.bf16.msrb.mxu3 %v11014_v54  ;;  %6566 = vmatmul.bf16.vlgmr.msrb.gmra.mxu0 %v13219_v55  ;;  %v7602_v54 = vor.u32 %v11106_v23, %v7599_v41  ;;  %v7519_v23 = vld [vmem:[%s12081_s28 + $0x38] sm:$0xf0]  ;;  %v7722_v41 = vor.u32 %v11136_v11, %v7719_v24  ;;  %v7639_v11 = vld [vmem:[%s12081_s28 + $0x128] sm:$0xf0] }
 0x1d9   : > { %6610 = vmatpush.bf16.msra.mxu0 %v7554_v17  ;;  %6579 = vmatmul.bf16.vlgmr.msrb.gmra.mxu1 %v13226_v36  ;;  %v7666_v17 = vor.u32 %v11122_v20, %v7663_v56  ;;  %v7583_v56 = vld [vmem:[%s12081_s28 + $0xb8] sm:$0xf0] }
 0x1da   : > { %6623 = vmatpush.bf16.msra.mxu1 %v7618_v46  ;;  %6592 = vmatmul.bf16.vlgmr.msrb.gmra.mxu2 %v13224_v26  ;;  %v11104_v46 = vld [vmem:[%s12081_s28 + $0xc4] sm:$0xf] }
 0x1db   : > { %6636 = vmatpush.bf16.msra.mxu2 %v7682_v35  ;;  %6605 = vmatmul.bf16.vlgmr.msrb.gmra.mxu3 %v13230_v16  ;;  %v7730_v35 = vor.u32 %v11138_v49, %v7727_v5  ;;  %v11118_v49 = vld [vmem:[%s12081_s28 + $0x134] sm:$0xf]  ;;  %v11172_v16 = vld [vmem:[%s12081_s28 + $0x2e4] sm:$0xf] }
 0x1dc   : > { %6649 = vmatpush.bf16.msra.mxu3 %v7746_v48  ;;  %v11120_v48 = vld [vmem:[%s12081_s28 + $0x144] sm:$0xf]  ;;  %v11134_v5 = vld [vmem:[%s12081_s28 + $0x1b4] sm:$0xf] }
 0x1dd   : > { %6611 = vmatpush.bf16.msra.mxu0 %v7546_v57  ;;  %v7530_v57 = vor.u32 %v11088_v10, %v7527_v61  ;;  %v7658_v53 = vor.u32 %v11120_v48, %v7655_v2  ;;  %v7650_v10 = vor.u32 %v11118_v49, %v7647_v52  ;;  %v11084_v61 = vld [vmem:[%s12081_s28 + $0x24] sm:$0xf]  ;;  %v6385_v48 = vpop.f32.mrf.mxu2  ;;  %v7575_v2 = vld [vmem:[%s12081_s28 + $0xa8] sm:$0xf0]  ;;  %v11098_v49 = vld [vmem:[%s12081_s28 + $0x94] sm:$0xf] }
 0x1de   : > { %6624 = vmatpush.bf16.msra.mxu1 %v7610_v58  ;;  %v6372_v58 = vpop.f32.mrf.mxu1 }
 0x1df   : > { %6637 = vmatpush.bf16.msra.mxu2 %v7674_v14  ;;  %v7594_v14 = vor.u32 %v11104_v46, %v7591_v51  ;;  %v6373_v20 = vadd.f32 %v6372_v58, %v6360_v62  ;;  %v7511_v46 = vld [vmem:[%s12081_s28 + $0x28] sm:$0xf0]  ;;  %v6398_v62 = vpop.f32.mrf.mxu3 }
 0x1e0   : > { %6650 = vmatpush.bf16.msra.mxu3 %v7738_v59  ;;  %v11102_v59 = vld [vmem:[%s12081_s28 + $0xb4] sm:$0xf]  ;;  %v7703_v58 = vld [vmem:[%s12081_s28 + $0x1a8] sm:$0xf0] }
 0x1e1   : > { %6612 = vmatpush.bf16.msra.mxu0 %v7538_v15  ;;  %v7711_v15 = vld [vmem:[%s12081_s28 + $0x1b8] sm:$0xf0]  ;;  %v6386_v24 = vadd.f32 %v6385_v48, %v6373_v20  ;;  %v11082_v20 = vld [vmem:[%s12081_s28 + $0x14] sm:$0xf] }
 0x1e2   : > { %6625 = vmatpush.bf16.msra.mxu1 %v7602_v54  ;;  %v7522_v54 = vor.u32 %v11086_v40, %v7519_v23  ;;  %v7714_v51 = vor.u32 %v11134_v5, %v7711_v15  ;;  %v7567_v5 = vld [vmem:[%s12081_s28 + $0x98] sm:$0xf0]  ;;  %v11114_v15 = vld [vmem:[%s12081_s28 + $0x114] sm:$0xf] }
 0x1e3   : > { %6638 = vmatpush.bf16.msra.mxu2 %v7666_v17  ;;  %v7586_v17 = vor.u32 %v11102_v59, %v7583_v56  ;;  %v13269_v23 = vadd.f32 %v6398_v62, %v6386_v24  ;;  %v7503_v56 = vld [vmem:[%s12081_s28 + $0x18] sm:$0xf0]  ;;  %v7623_v62 = vld [vmem:[%s12081_s28 + $0x108] sm:$0xf0] }
 0x1e4   : > { %6651 = vmatpush.bf16.msra.mxu3 %v7730_v35  ;;  %v11100_v35 = vld [vmem:[%s12081_s28 + $0xa4] sm:$0xf] }
 0x1e5   : > { %6613 = vmatpush.bf16.msra.mxu0 %v7530_v57  ;;  %v11132_v57 = vld [vmem:[%s12081_s28 + $0x1a4] sm:$0xf]  ;;  %v7578_v59 = vor.u32 %v11100_v35, %v7575_v2  ;;  %v7495_v35 = vld [vmem:[%s12081_s28 + $0x8] sm:$0xf0] }
 0x1e6   : > { %6626 = vmatpush.bf16.msra.mxu1 %v7594_v14  ;;  %v6361_v14 = vpop.f32.mrf.mxu0  ;;  %v6374_v40 = vpop.f32.mrf.mxu1  ;;  %v7706_v52 = vor.u32 %v11132_v57, %v7703_v58  ;;  %v11096_v2 = vld [vmem:[%s12081_s28 + $0x84] sm:$0xf]  ;;  %v7687_v58 = vld [vmem:[%s12081_s28 + $0x188] sm:$0xf0] }
 0x1e7   : > { %6639 = vmatpush.bf16.msra.mxu2 %v7658_v53  ;;  %v7514_v53 = vor.u32 %v11084_v61, %v7511_v46  ;;  %v7506_v61 = vor.u32 %v11082_v20, %v7503_v56  ;;  %v11080_v46 = vld [vmem:[%s12081_s28 + $0x4] sm:$0xf]  ;;  %v6387_v14 = vpop.f32.mrf.mxu2  ;;  %v7807_v40 = vld [vmem:[%s12081_s28 + $0x278] sm:$0xf0] }
 0x1e8   : > { %6652 = vmatpush.bf16.msra.mxu3 %v7722_v41  ;;  %v7642_v41 = vor.u32 %v11116_v4, %v7639_v11  ;;  %v7559_v4 = vld [vmem:[%s12081_s28 + $0x88] sm:$0xf0]  ;;  %v11112_v11 = vld [vmem:[%s12081_s28 + $0x104] sm:$0xf]  ;;  %v7498_v20 = vor.u32 %v11080_v46, %v7495_v35  ;;  %v7871_v56 = vld [vmem:[%s12081_s28 + $0x2f8] sm:$0xf0] }
 0x1e9   : > { %6614 = vmatpush.bf16.msra.mxu0 %v7522_v54  ;;  %v7631_v54 = vld [vmem:[%s12081_s28 + $0x118] sm:$0xf0]  ;;  %v11128_v57 = vld [vmem:[%s12081_s28 + $0x184] sm:$0xf] }
 0x1ea   : > { %6627 = vmatpush.bf16.msra.mxu1 %v7586_v17  ;;  %v11130_v17 = vld [vmem:[%s12081_s28 + $0x194] sm:$0xf]  ;;  %v7634_v48 = vor.u32 %v11114_v15, %v7631_v54  ;;  %v7626_v15 = vor.u32 %v11112_v11, %v7623_v62  ;;  %v11156_v14 = vld [vmem:[%s12081_s28 + $0x264] sm:$0xf] }
 0x1eb   : > { %6640 = vmatpush.bf16.msra.mxu2 %v7650_v10  ;;  %v7695_v10 = vld [vmem:[%s12081_s28 + $0x198] sm:$0xf0]  ;;  %v11206_v54 = vld [vmem:[%s12081_s28 + $0x3f4] sm:$0xf]  ;;  %v11204_v11 = vld [vmem:[%s12081_s28 + $0x3e4] sm:$0xf] }
 0x1ec   : > { %6653 = vmatpush.bf16.msra.mxu3 %v7714_v51  ;;  %v7570_v51 = vor.u32 %v11098_v49, %v7567_v5  ;;  %v7698_v24 = vor.u32 %v11130_v17, %v7695_v10  ;;  %v11190_v49 = vld [vmem:[%s12081_s28 + $0x374] sm:$0xf]  ;;  %v7935_v5 = vld [vmem:[%s12081_s28 + $0x378] sm:$0xf0]  ;;  %v7690_v10 = vor.u32 %v11128_v57, %v7687_v58 }
 0x1ed   : > { %6615 = vmatpush.bf16.msra.mxu0 %v7514_v53  ;;  %v11158_v53 = vld [vmem:[%s12081_s28 + $0x274] sm:$0xf]  ;;  %v7999_v17 = vld [vmem:[%s12081_s28 + $0x3f8] sm:$0xf0]  ;;  %v7938_v35 = vor.u32 %v11190_v49, %v7935_v5 }
 0x1ee   : > { %6628 = vmatpush.bf16.msra.mxu1 %v7578_v59  ;;  %v11174_v59 = vld [vmem:[%s12081_s28 + $0x2f4] sm:$0xf]  ;;  %v7919_v5 = vld [vmem:[%s12081_s28 + $0x358] sm:$0xf0] }
 0x1ef   : > { %6641 = vmatpush.bf16.msra.mxu2 %v7642_v41  ;;  %v6400_v41 = vpop.f32.mrf.mxu3  ;;  %v7874_v46 = vor.u32 %v11174_v59, %v7871_v56  ;;  %v11170_v59 = vld [vmem:[%s12081_s28 + $0x2d4] sm:$0xf]  ;;  %v7855_v56 = vld [vmem:[%s12081_s28 + $0x2d8] sm:$0xf0] }
 0x1f0   : > { %6654 = vmatpush.bf16.msra.mxu3 %v7706_v52  ;;  %v7562_v52 = vor.u32 %v11096_v2, %v7559_v4  ;;  %v7799_v41 = vld [vmem:[%s12081_s28 + $0x268] sm:$0xf0]  ;;  %v11188_v2 = vld [vmem:[%s12081_s28 + $0x364] sm:$0xf]  ;;  %v11186_v49 = vld [vmem:[%s12081_s28 + $0x354] sm:$0xf] }
 0x1f1   : > { %6616 = vmatpush.bf16.msra.mxu0 %v7506_v61  ;;  %v7810_v61 = vor.u32 %v11158_v53, %v7807_v40  ;;  %v7927_v4 = vld [vmem:[%s12081_s28 + $0x368] sm:$0xf0]  ;;  %v7802_v62 = vor.u32 %v11156_v14, %v7799_v41  ;;  %v11154_v53 = vld [vmem:[%s12081_s28 + $0x254] sm:$0xf]  ;;  %v7791_v40 = vld [vmem:[%s12081_s28 + $0x258] sm:$0xf0] }
 0x1f2   : > { %6629 = vmatpush.bf16.msra.mxu1 %v7570_v51  ;;  %v8002_v51 = vor.u32 %v11206_v54, %v7999_v17  ;;  %v7930_v58 = vor.u32 %v11188_v2, %v7927_v4  ;;  %v7858_v54 = vor.u32 %v11170_v59, %v7855_v56  ;;  %v7922_v17 = vor.u32 %v11186_v49, %v7919_v5  ;;  %v11200_v41 = vld [vmem:[%s12081_s28 + $0x3c4] sm:$0xf]  ;;  %v11182_v59 = vld [vmem:[%s12081_s28 + $0x334] sm:$0xf]  ;;  %v7967_v56 = vld [vmem:[%s12081_s28 + $0x3b8] sm:$0xf0] }
 0x1f3   : > { %6642 = vmatpush.bf16.msra.mxu2 %v7634_v48  ;;  %v7863_v48 = vld [vmem:[%s12081_s28 + $0x2e8] sm:$0xf0] }
 0x1f4   : > { %6655 = vmatpush.bf16.msra.mxu3 %v7698_v24  ;;  %v7991_v24 = vld [vmem:[%s12081_s28 + $0x3e8] sm:$0xf0]  ;;  %v7866_v57 = vor.u32 %v11172_v16, %v7863_v48  ;;  %v7794_v16 = vor.u32 %v11154_v53, %v7791_v40  ;;  %v7839_v40 = vld [vmem:[%s12081_s28 + $0x2b8] sm:$0xf0] }
 0x1f5   : > { %6617 = vmatpush.bf16.msra.mxu0 %v7498_v20  ;;  %v7994_v20 = vor.u32 %v11204_v11, %v7991_v24  ;;  %v6411_v14 = vpop.f32.mrf.mxu0  ;;  %v11150_v24 = vld [vmem:[%s12081_s28 + $0x234] sm:$0xf] }
 0x1f6   : > { %6630 = vmatpush.bf16.msra.mxu1 %v7562_v52  ;;  %v11202_v52 = vld [vmem:[%s12081_s28 + $0x3d4] sm:$0xf]  ;;  %v6424_v2 = vpop.f32.mrf.mxu1 }
 0x1f7   : > { %6643 = vmatpush.bf16.msra.mxu2 %v7626_v15  ;;  %v7983_v15 = vld [vmem:[%s12081_s28 + $0x3d8] sm:$0xf0] }
 0x1f8   : > { %6656 = vmatpush.bf16.msra.mxu3 %v7690_v10  ;;  %6618 = vmatmul.bf16.vlgmr.msra.gmra.mxu0 %v12190_v28  ;;  %v7783_v10 = vld [vmem:[%s12081_s28 + $0x248] sm:$0xf0] }
 0x1f9   : > { %6662 = vmatpush.bf16.msrb.mxu0 %v7810_v61  ;;  %6631 = vmatmul.bf16.vlgmr.msra.gmra.mxu1 %v12196_v34  ;;  %v11168_v61 = vld [vmem:[%s12081_s28 + $0x2c4] sm:$0xf]  ;;  %v7847_v28 = vld [vmem:[%s12081_s28 + $0x2c8] sm:$0xf0]  ;;  %v6412_v34 = vadd.f32 %v6411_v14, %v13269_v23  ;;  %v7903_v23 = vld [vmem:[%s12081_s28 + $0x338] sm:$0xf0] }
 0x1fa   : > { %6675 = vmatpush.bf16.msrb.mxu1 %v7874_v46  ;;  %6644 = vmatmul.bf16.vlgmr.msra.gmra.mxu2 %v12188_v27  ;;  %v11152_v27 = vld [vmem:[%s12081_s28 + $0x244] sm:$0xf]  ;;  %v7986_v46 = vor.u32 %v11202_v52, %v7983_v15  ;;  %v7850_v4 = vor.u32 %v11168_v61, %v7847_v28  ;;  %v7906_v52 = vor.u32 %v11182_v59, %v7903_v23  ;;  %v7959_v14 = vld [vmem:[%s12081_s28 + $0x3a8] sm:$0xf0]  ;;  %v11194_v59 = vld [vmem:[%s12081_s28 + $0x394] sm:$0xf] }
 0x1fb   : > { %6688 = vmatpush.bf16.msrb.mxu2 %v7938_v35  ;;  %6657 = vmatmul.bf16.vlgmr.msra.gmra.mxu3 %v12194_v33  ;;  %v11184_v33 = vld [vmem:[%s12081_s28 + $0x344] sm:$0xf]  ;;  %v7911_v35 = vld [vmem:[%s12081_s28 + $0x348] sm:$0xf0]  ;;  %v7786_v48 = vor.u32 %v11152_v27, %v7783_v10  ;;  %v6425_v53 = vadd.f32 %v6424_v2, %v6412_v34  ;;  %v7951_v23 = vld [vmem:[%s12081_s28 + $0x398] sm:$0xf0] }
 0x1fc   : > { %6701 = vmatpush.bf16.msrb.mxu3 %v8002_v51  ;;  %v7975_v51 = vld [vmem:[%s12081_s28 + $0x3c8] sm:$0xf0]  ;;  %v7914_v11 = vor.u32 %v11184_v33, %v7911_v35  ;;  %v11148_v15 = vld [vmem:[%s12081_s28 + $0x224] sm:$0xf] }
 0x1fd   : > { %6663 = vmatpush.bf16.msrb.mxu0 %v7802_v62  ;;  %v7775_v62 = vld [vmem:[%s12081_s28 + $0x238] sm:$0xf0]  ;;  %v6437_v27 = vpop.f32.mrf.mxu2  ;;  %v7831_v10 = vld [vmem:[%s12081_s28 + $0x2a8] sm:$0xf0]  ;;  %v11180_v61 = vld [vmem:[%s12081_s28 + $0x324] sm:$0xf] }
 0x1fe   : > { %6676 = vmatpush.bf16.msrb.mxu1 %v7866_v57  ;;  %v11166_v57 = vld [vmem:[%s12081_s28 + $0x2b4] sm:$0xf]  ;;  %v7778_v49 = vor.u32 %v11150_v24, %v7775_v62  ;;  %v6438_v28 = vadd.f32 %v6437_v27, %v6425_v53  ;;  %v6450_v33 = vpop.f32.mrf.mxu3  ;;  %v11196_v35 = vld [vmem:[%s12081_s28 + $0x3a4] sm:$0xf]  ;;  %v6426_v34 = vpop.f32.mrf.mxu1  ;;  %v7759_v24 = vld [vmem:[%s12081_s28 + $0x218] sm:$0xf0] }
 0x1ff   : > { %6689 = vmatpush.bf16.msrb.mxu2 %v7930_v58  ;;  %v7978_v58 = vor.u32 %v11200_v41, %v7975_v51  ;;  %v7842_v5 = vor.u32 %v11166_v57, %v7839_v40  ;;  %v6413_v41 = vpop.f32.mrf.mxu0  ;;  %v11162_v62 = vld [vmem:[%s12081_s28 + $0x294] sm:$0xf]  ;;  %v7962_v57 = vor.u32 %v11196_v35, %v7959_v14  ;;  %v7887_v40 = vld [vmem:[%s12081_s28 + $0x318] sm:$0xf0]  ;;  %v7879_v27 = vld [vmem:[%s12081_s28 + $0x308] sm:$0xf0] }
 0x200   : > { %6702 = vmatpush.bf16.msrb.mxu3 %v7994_v20  ;;  %v11198_v20 = vld [vmem:[%s12081_s28 + $0x3b4] sm:$0xf] }
 0x201   : > { %6664 = vmatpush.bf16.msrb.mxu0 %v7794_v16  ;;  %v7767_v16 = vld [vmem:[%s12081_s28 + $0x228] sm:$0xf0]  ;;  %v11178_v53 = vld [vmem:[%s12081_s28 + $0x314] sm:$0xf] }
 0x202   : > { %6677 = vmatpush.bf16.msrb.mxu1 %v7858_v54  ;;  %v11164_v54 = vld [vmem:[%s12081_s28 + $0x2a4] sm:$0xf]  ;;  %v7770_v51 = vor.u32 %v11148_v15, %v7767_v16  ;;  %v7815_v16 = vld [vmem:[%s12081_s28 + $0x288] sm:$0xf0]  ;;  %v11238_v35 = vld [vmem:[%s12081_s28 + $0x4f4] sm:$0xf] }
 0x203   : > { %6690 = vmatpush.bf16.msrb.mxu2 %v7922_v17  ;;  %v7970_v17 = vor.u32 %v11198_v20, %v7967_v56  ;;  %v7834_v2 = vor.u32 %v11164_v54, %v7831_v10  ;;  %v11144_v56 = vld [vmem:[%s12081_s28 + $0x204] sm:$0xf]  ;;  %v11254_v34 = vld [vmem:[%s12081_s28 + $0x574] sm:$0xf] }
 0x204   : > { %6703 = vmatpush.bf16.msrb.mxu3 %v7986_v46  ;;  %v7895_v46 = vld [vmem:[%s12081_s28 + $0x328] sm:$0xf0]  ;;  %v11160_v15 = vld [vmem:[%s12081_s28 + $0x284] sm:$0xf] }
 0x205   : > { %6665 = vmatpush.bf16.msrb.mxu0 %v7786_v48  ;;  %v13340_v48 = vadd.f32 %v6450_v33, %v6438_v28  ;;  %v11176_v54 = vld [vmem:[%s12081_s28 + $0x304] sm:$0xf]  ;;  %v11222_v28 = vld [vmem:[%s12081_s28 + $0x474] sm:$0xf]  ;;  %v8063_v33 = vld [vmem:[%s12081_s28 + $0x478] sm:$0xf0] }
 0x206   : > { %6678 = vmatpush.bf16.msrb.mxu1 %v7850_v4  ;;  %v7898_v4 = vor.u32 %v11180_v61, %v7895_v46  ;;  %v11192_v10 = vld [vmem:[%s12081_s28 + $0x384] sm:$0xf]  ;;  %v7943_v61 = vld [vmem:[%s12081_s28 + $0x388] sm:$0xf0]  ;;  %v6439_v46 = vpop.f32.mrf.mxu2  ;;  %v6452_v14 = vpop.f32.mrf.mxu3 }
 0x207   : > { %6691 = vmatpush.bf16.msrb.mxu2 %v7914_v11  ;;  %v11146_v11 = vld [vmem:[%s12081_s28 + $0x214] sm:$0xf]  ;;  %v8175_v14 = vld [vmem:[%s12081_s28 + $0x558] sm:$0xf0] }
 0x208   : > { %6704 = vmatpush.bf16.msrb.mxu3 %v7978_v58  ;;  %v7823_v58 = vld [vmem:[%s12081_s28 + $0x298] sm:$0xf0]  ;;  %v7762_v20 = vor.u32 %v11146_v11, %v7759_v24  ;;  %v7882_v11 = vor.u32 %v11176_v54, %v7879_v27  ;;  %v11270_v24 = vld [vmem:[%s12081_s28 + $0x5f4] sm:$0xf] }
 0x209   : > { %6666 = vmatpush.bf16.msrb.mxu0 %v7778_v49  ;;  %v7751_v49 = vld [vmem:[%s12081_s28 + $0x208] sm:$0xf0]  ;;  %v11234_v46 = vld [vmem:[%s12081_s28 + $0x4d4] sm:$0xf] }
 0x20a   : > { %6679 = vmatpush.bf16.msrb.mxu1 %v7842_v5  ;;  %v7826_v5 = vor.u32 %v11162_v62, %v7823_v58  ;;  %v7754_v41 = vor.u32 %v11144_v56, %v7751_v49  ;;  %v8255_v62 = vld [vmem:[%s12081_s28 + $0x5f8] sm:$0xf0]  ;;  %v8066_v58 = vor.u32 %v11222_v28, %v8063_v33  ;;  %v8119_v49 = vld [vmem:[%s12081_s28 + $0x4e8] sm:$0xf0] }
 0x20b   : > { %6692 = vmatpush.bf16.msrb.mxu2 %v7906_v52  ;;  %v7890_v52 = vor.u32 %v11178_v53, %v7887_v40  ;;  %v8258_v56 = vor.u32 %v11270_v24, %v8255_v62  ;;  %v8111_v33 = vld [vmem:[%s12081_s28 + $0x4d8] sm:$0xf0]  ;;  %v8103_v24 = vld [vmem:[%s12081_s28 + $0x4c8] sm:$0xf0]  ;;  %v11248_v62 = vld [vmem:[%s12081_s28 + $0x544] sm:$0xf] }
 0x20c   : > { %6705 = vmatpush.bf16.msrb.mxu3 %v7970_v17  ;;  %v7954_v17 = vor.u32 %v11194_v59, %v7951_v23  ;;  %v11220_v59 = vld [vmem:[%s12081_s28 + $0x464] sm:$0xf]  ;;  %v8055_v23 = vld [vmem:[%s12081_s28 + $0x468] sm:$0xf0] }
 0x20d   : > { %6667 = vmatpush.bf16.msrb.mxu0 %v7770_v51  ;;  %v8127_v51 = vld [vmem:[%s12081_s28 + $0x4f8] sm:$0xf0]  ;;  %v8058_v54 = vor.u32 %v11220_v59, %v8055_v23 }
 0x20e   : > { %6680 = vmatpush.bf16.msrb.mxu1 %v7834_v2  ;;  %v8191_v2 = vld [vmem:[%s12081_s28 + $0x578] sm:$0xf0]  ;;  %v8130_v53 = vor.u32 %v11238_v35, %v8127_v51  ;;  %v11250_v35 = vld [vmem:[%s12081_s28 + $0x554] sm:$0xf] }
 0x20f   : > { %6693 = vmatpush.bf16.msrb.mxu2 %v7898_v4  ;;  %v7818_v4 = vor.u32 %v11160_v15, %v7815_v16  ;;  %v8194_v40 = vor.u32 %v11254_v34, %v8191_v2  ;;  %v11268_v15 = vld [vmem:[%s12081_s28 + $0x5e4] sm:$0xf]  ;;  %v8247_v16 = vld [vmem:[%s12081_s28 + $0x5e8] sm:$0xf0]  ;;  %v8239_v51 = vld [vmem:[%s12081_s28 + $0x5d8] sm:$0xf0]  ;;  %v8178_v2 = vor.u32 %v11250_v35, %v8175_v14 }
 0x210   : > { %6706 = vmatpush.bf16.msrb.mxu3 %v7962_v57  ;;  %v7946_v57 = vor.u32 %v11192_v10, %v7943_v61  ;;  %v11218_v10 = vld [vmem:[%s12081_s28 + $0x454] sm:$0xf]  ;;  %v8047_v61 = vld [vmem:[%s12081_s28 + $0x458] sm:$0xf0]  ;;  %v8250_v28 = vor.u32 %v11268_v15, %v8247_v16  ;;  %v8023_v35 = vld [vmem:[%s12081_s28 + $0x428] sm:$0xf0] }
 0x211   : > { %6668 = vmatpush.bf16.msrb.mxu0 %v7762_v20  ;;  %v11236_v20 = vld [vmem:[%s12081_s28 + $0x4e4] sm:$0xf]  ;;  %v8050_v34 = vor.u32 %v11218_v10, %v8047_v61  ;;  %v8223_v10 = vld [vmem:[%s12081_s28 + $0x5b8] sm:$0xf0] }
 0x212   : > { %6681 = vmatpush.bf16.msrb.mxu1 %v7826_v5  ;;  %v11252_v5 = vld [vmem:[%s12081_s28 + $0x564] sm:$0xf] }
 0x213   : > { %6694 = vmatpush.bf16.msrb.mxu2 %v7890_v52  ;;  %v8183_v52 = vld [vmem:[%s12081_s28 + $0x568] sm:$0xf0]  ;;  %v11228_v14 = vld [vmem:[%s12081_s28 + $0x4a4] sm:$0xf] }
 0x214   : > { %6707 = vmatpush.bf16.msrb.mxu3 %v7954_v17  ;;  %v8122_v17 = vor.u32 %v11236_v20, %v8119_v49  ;;  %v8186_v27 = vor.u32 %v11252_v5, %v8183_v52  ;;  %v11214_v49 = vld [vmem:[%s12081_s28 + $0x434] sm:$0xf]  ;;  %v8031_v5 = vld [vmem:[%s12081_s28 + $0x438] sm:$0xf0] }
 0x215   : > { %6669 = vmatpush.bf16.msrb.mxu0 %v7754_v41  ;;  %v11266_v41 = vld [vmem:[%s12081_s28 + $0x5d4] sm:$0xf]  ;;  %v8034_v61 = vor.u32 %v11214_v49, %v8031_v5  ;;  %v8143_v5 = vld [vmem:[%s12081_s28 + $0x518] sm:$0xf0] }
 0x216   : > { %6682 = vmatpush.bf16.msrb.mxu1 %v7818_v4  ;;  %v11216_v4 = vld [vmem:[%s12081_s28 + $0x444] sm:$0xf]  ;;  %v6476_v23 = vpop.f32.mrf.mxu1  ;;  %v11230_v52 = vld [vmem:[%s12081_s28 + $0x4b4] sm:$0xf] }
 0x217   : > { %6695 = vmatpush.bf16.msrb.mxu2 %v7882_v11  ;;  %v8039_v11 = vld [vmem:[%s12081_s28 + $0x448] sm:$0xf0]  ;;  %v11242_v49 = vld [vmem:[%s12081_s28 + $0x514] sm:$0xf] }
 0x218   : > { %6708 = vmatpush.bf16.msrb.mxu3 %v7946_v57  ;;  %6670 = vmatmul.bf16.vlgmr.msrb.gmra.mxu0 %v12246_v42  ;;  %v11232_v42 = vld [vmem:[%s12081_s28 + $0x4c4] sm:$0xf]  ;;  %v8167_v57 = vld [vmem:[%s12081_s28 + $0x548] sm:$0xf0]  ;;  %v8042_v59 = vor.u32 %v11216_v4, %v8039_v11 }
 0x219   : > { %6714 = vmatpush.bf16.msra.mxu0 %v8066_v58  ;;  %6683 = vmatmul.bf16.vlgmr.msrb.gmra.mxu1 %v12250_v45  ;;  %v6463_v58 = vpop.f32.mrf.mxu0  ;;  %v8106_v20 = vor.u32 %v11232_v42, %v8103_v24  ;;  %v11260_v42 = vld [vmem:[%s12081_s28 + $0x5a4] sm:$0xf] }
 0x21a   : > { %6727 = vmatpush.bf16.msra.mxu1 %v8130_v53  ;;  %6696 = vmatmul.bf16.vlgmr.msrb.gmra.mxu2 %v12242_v39  ;;  %v8114_v39 = vor.u32 %v11234_v46, %v8111_v33  ;;  %v11264_v53 = vld [vmem:[%s12081_s28 + $0x5c4] sm:$0xf]  ;;  %v6464_v45 = vadd.f32 %v6463_v58, %v13340_v48  ;;  %v8159_v48 = vld [vmem:[%s12081_s28 + $0x538] sm:$0xf0] }
 0x21b   : > { %6740 = vmatpush.bf16.msra.mxu2 %v8194_v40  ;;  %6709 = vmatmul.bf16.vlgmr.msrb.gmra.mxu3 %v12248_v43  ;;  %v8242_v43 = vor.u32 %v11266_v41, %v8239_v51  ;;  %v8231_v40 = vld [vmem:[%s12081_s28 + $0x5c8] sm:$0xf0]  ;;  %v11212_v33 = vld [vmem:[%s12081_s28 + $0x424] sm:$0xf] }
 0x21c   : > { %6753 = vmatpush.bf16.msra.mxu3 %v8258_v56  ;;  %v8170_v56 = vor.u32 %v11248_v62, %v8167_v57  ;;  %v8234_v15 = vor.u32 %v11264_v53, %v8231_v40  ;;  %v6477_v16 = vadd.f32 %v6476_v23, %v6464_v45  ;;  %v8026_v62 = vor.u32 %v11212_v33, %v8023_v35  ;;  %v11210_v45 = vld [vmem:[%s12081_s28 + $0x414] sm:$0xf]  ;;  %v8135_v33 = vld [vmem:[%s12081_s28 + $0x508] sm:$0xf0]  ;;  %v11256_v35 = vld [vmem:[%s12081_s28 + $0x584] sm:$0xf] }
 0x21d   : > { %6715 = vmatpush.bf16.msra.mxu0 %v8058_v54  ;;  %v8095_v54 = vld [vmem:[%s12081_s28 + $0x4b8] sm:$0xf0]  ;;  %v6489_v51 = vpop.f32.mrf.mxu2  ;;  %v11226_v23 = vld [vmem:[%s12081_s28 + $0x494] sm:$0xf] }
 0x21e   : > { %6728 = vmatpush.bf16.msra.mxu1 %v8122_v17  ;;  %v11246_v17 = vld [vmem:[%s12081_s28 + $0x534] sm:$0xf]  ;;  %v8098_v46 = vor.u32 %v11230_v52, %v8095_v54  ;;  %v6490_v4 = vadd.f32 %v6489_v51, %v6477_v16  ;;  %v6502_v11 = vpop.f32.mrf.mxu3  ;;  %v6478_v57 = vpop.f32.mrf.mxu1  ;;  %v11208_v54 = vld [vmem:[%s12081_s28 + $0x404] sm:$0xf] }
 0x21f   : > { %6741 = vmatpush.bf16.msra.mxu2 %v8186_v27  ;;  %v11262_v27 = vld [vmem:[%s12081_s28 + $0x5b4] sm:$0xf] }
 0x220   : > { %6754 = vmatpush.bf16.msra.mxu3 %v8250_v28  ;;  %v8162_v28 = vor.u32 %v11246_v17, %v8159_v48  ;;  %v8226_v41 = vor.u32 %v11262_v27, %v8223_v10  ;;  %v13411_v58 = vadd.f32 %v6502_v11, %v6490_v4  ;;  %v11258_v52 = vld [vmem:[%s12081_s28 + $0x594] sm:$0xf]  ;;  %v8007_v17 = vld [vmem:[%s12081_s28 + $0x408] sm:$0xf0]  ;;  %v8146_v27 = vor.u32 %v11242_v49, %v8143_v5  ;;  %v11224_v10 = vld [vmem:[%s12081_s28 + $0x484] sm:$0xf] }
 0x221   : > { %6716 = vmatpush.bf16.msra.mxu0 %v8050_v34  ;;  %v8087_v34 = vld [vmem:[%s12081_s28 + $0x4a8] sm:$0xf0]  ;;  %v6465_v24 = vpop.f32.mrf.mxu0  ;;  %v11286_v51 = vld [vmem:[%s12081_s28 + $0x674] sm:$0xf]  ;;  %v8010_v4 = vor.u32 %v11208_v54, %v8007_v17  ;;  %v8383_v11 = vld [vmem:[%s12081_s28 + $0x6f8] sm:$0xf0] }
 0x222   : > { %6729 = vmatpush.bf16.msra.mxu1 %v8114_v39  ;;  %v11244_v39 = vld [vmem:[%s12081_s28 + $0x524] sm:$0xf]  ;;  %v8090_v53 = vor.u32 %v11228_v14, %v8087_v34  ;;  %v8199_v14 = vld [vmem:[%s12081_s28 + $0x588] sm:$0xf0]  ;;  %v8319_v34 = vld [vmem:[%s12081_s28 + $0x678] sm:$0xf0] }
 0x223   : > { %6742 = vmatpush.bf16.msra.mxu2 %v8178_v2  ;;  %v8151_v2 = vld [vmem:[%s12081_s28 + $0x528] sm:$0xf0]  ;;  %v11334_v57 = vld [vmem:[%s12081_s28 + $0x7f4] sm:$0xf]  ;;  %v11300_v49 = vld [vmem:[%s12081_s28 + $0x6e4] sm:$0xf] }
 0x224   : > { %6755 = vmatpush.bf16.msra.mxu3 %v8242_v43  ;;  %v8215_v43 = vld [vmem:[%s12081_s28 + $0x5a8] sm:$0xf0]  ;;  %v8154_v40 = vor.u32 %v11244_v39, %v8151_v2  ;;  %v11302_v39 = vld [vmem:[%s12081_s28 + $0x6f4] sm:$0xf]  ;;  %v11332_v54 = vld [vmem:[%s12081_s28 + $0x7e4] sm:$0xf] }
 0x225   : > { %6717 = vmatpush.bf16.msra.mxu0 %v8042_v59  ;;  %v8015_v59 = vld [vmem:[%s12081_s28 + $0x418] sm:$0xf0]  ;;  %v8503_v17 = vld [vmem:[%s12081_s28 + $0x7e8] sm:$0xf0] }
 0x226   : > { %6730 = vmatpush.bf16.msra.mxu1 %v8106_v20  ;;  %v8218_v20 = vor.u32 %v11260_v42, %v8215_v43  ;;  %v8018_v16 = vor.u32 %v11210_v45, %v8015_v59  ;;  %v6504_v2 = vpop.f32.mrf.mxu3  ;;  %v11318_v42 = vld [vmem:[%s12081_s28 + $0x774] sm:$0xf]  ;;  %v8447_v43 = vld [vmem:[%s12081_s28 + $0x778] sm:$0xf0]  ;;  %v8322_v45 = vor.u32 %v11286_v51, %v8319_v34  ;;  %v8386_v59 = vor.u32 %v11302_v39, %v8383_v11  ;;  %v8295_v11 = vld [vmem:[%s12081_s28 + $0x648] sm:$0xf0] }
 0x227   : > { %6743 = vmatpush.bf16.msra.mxu2 %v8170_v56  ;;  %v8079_v56 = vld [vmem:[%s12081_s28 + $0x498] sm:$0xf0]  ;;  %v11330_v51 = vld [vmem:[%s12081_s28 + $0x7d4] sm:$0xf] }
 0x228   : > { %6756 = vmatpush.bf16.msra.mxu3 %v8234_v15  ;;  %v8207_v15 = vld [vmem:[%s12081_s28 + $0x598] sm:$0xf0]  ;;  %v8082_v48 = vor.u32 %v11226_v23, %v8079_v56  ;;  %v8450_v23 = vor.u32 %v11318_v42, %v8447_v43  ;;  %v8311_v56 = vld [vmem:[%s12081_s28 + $0x668] sm:$0xf0]  ;;  %v11312_v43 = vld [vmem:[%s12081_s28 + $0x744] sm:$0xf] }
 0x229   : > { %6718 = vmatpush.bf16.msra.mxu0 %v8034_v61  ;;  %v8071_v61 = vld [vmem:[%s12081_s28 + $0x488] sm:$0xf0]  ;;  %v8495_v34 = vld [vmem:[%s12081_s28 + $0x7d8] sm:$0xf0] }
 0x22a   : > { %6731 = vmatpush.bf16.msra.mxu1 %v8098_v46  ;;  %v11240_v46 = vld [vmem:[%s12081_s28 + $0x504] sm:$0xf]  ;;  %v8074_v24 = vor.u32 %v11224_v10, %v8071_v61  ;;  %v11282_v61 = vld [vmem:[%s12081_s28 + $0x654] sm:$0xf]  ;;  %v8359_v42 = vld [vmem:[%s12081_s28 + $0x6c8] sm:$0xf0] }
 0x22b   : > { %6744 = vmatpush.bf16.msra.mxu2 %v8162_v28  ;;  %v8210_v28 = vor.u32 %v11258_v52, %v8207_v15  ;;  %v8375_v52 = vld [vmem:[%s12081_s28 + $0x6e8] sm:$0xf0]  ;;  %v11316_v15 = vld [vmem:[%s12081_s28 + $0x764] sm:$0xf] }
 0x22c   : > { %6757 = vmatpush.bf16.msra.mxu3 %v8226_v41  ;;  %v6491_v41 = vpop.f32.mrf.mxu2 }
 0x22d   : > { %6719 = vmatpush.bf16.msra.mxu0 %v8026_v62  ;;  %v8138_v62 = vor.u32 %v11240_v46, %v8135_v33  ;;  %v8303_v46 = vld [vmem:[%s12081_s28 + $0x658] sm:$0xf0]  ;;  %v8506_v33 = vor.u32 %v11332_v54, %v8503_v17  ;;  %v11326_v54 = vld [vmem:[%s12081_s28 + $0x7b4] sm:$0xf] }
 0x22e   : > { %6732 = vmatpush.bf16.msra.mxu1 %v8090_v53  ;;  %v8511_v53 = vld [vmem:[%s12081_s28 + $0x7f8] sm:$0xf0] }
 0x22f   : > { %6745 = vmatpush.bf16.msra.mxu2 %v8154_v40  ;;  %v8202_v40 = vor.u32 %v11256_v35, %v8199_v14  ;;  %v8514_v5 = vor.u32 %v11334_v57, %v8511_v53  ;;  %v8367_v35 = vld [vmem:[%s12081_s28 + $0x6d8] sm:$0xf0]  ;;  %v11314_v14 = vld [vmem:[%s12081_s28 + $0x754] sm:$0xf]  ;;  %v8487_v57 = vld [vmem:[%s12081_s28 + $0x7c8] sm:$0xf0] }
 0x230   : > { %6758 = vmatpush.bf16.msra.mxu3 %v8218_v20  ;;  %v11284_v20 = vld [vmem:[%s12081_s28 + $0x664] sm:$0xf]  ;;  %v8431_v41 = vld [vmem:[%s12081_s28 + $0x758] sm:$0xf0] }
 0x231   : > { %6720 = vmatpush.bf16.msra.mxu0 %v8018_v16  ;;  %v8439_v16 = vld [vmem:[%s12081_s28 + $0x768] sm:$0xf0]  ;;  %v8434_v2 = vor.u32 %v11314_v14, %v8431_v41  ;;  %v8479_v17 = vld [vmem:[%s12081_s28 + $0x7b8] sm:$0xf0]  ;;  %v11308_v41 = vld [vmem:[%s12081_s28 + $0x724] sm:$0xf] }
 0x232   : > { %6733 = vmatpush.bf16.msra.mxu1 %v8082_v48  ;;  %v8314_v48 = vor.u32 %v11284_v20, %v8311_v56  ;;  %v8442_v10 = vor.u32 %v11316_v15, %v8439_v16  ;;  %v11278_v20 = vld [vmem:[%s12081_s28 + $0x634] sm:$0xf]  ;;  %v8287_v56 = vld [vmem:[%s12081_s28 + $0x638] sm:$0xf0]  ;;  %v8343_v14 = vld [vmem:[%s12081_s28 + $0x6a8] sm:$0xf0] }
 0x233   : > { %6746 = vmatpush.bf16.msra.mxu2 %v8146_v27  ;;  %v8378_v27 = vor.u32 %v11300_v49, %v8375_v52  ;;  %v11294_v49 = vld [vmem:[%s12081_s28 + $0x6b4] sm:$0xf]  ;;  %v8351_v15 = vld [vmem:[%s12081_s28 + $0x6b8] sm:$0xf0] }
 0x234   : > { %6759 = vmatpush.bf16.msra.mxu3 %v8210_v28  ;;  %v11298_v28 = vld [vmem:[%s12081_s28 + $0x6d4] sm:$0xf] }
 0x235   : > { %6721 = vmatpush.bf16.msra.mxu0 %v8010_v4  ;;  %v8370_v39 = vor.u32 %v11298_v28, %v8367_v35  ;;  %v11280_v4 = vld [vmem:[%s12081_s28 + $0x644] sm:$0xf]  ;;  %v11310_v16 = vld [vmem:[%s12081_s28 + $0x734] sm:$0xf] }
 0x236   : > { %6734 = vmatpush.bf16.msra.mxu1 %v8074_v24  ;;  %v8423_v24 = vld [vmem:[%s12081_s28 + $0x748] sm:$0xf0]  ;;  %v11292_v28 = vld [vmem:[%s12081_s28 + $0x6a4] sm:$0xf] }
 0x237   : > { %6747 = vmatpush.bf16.msra.mxu2 %v8138_v62  ;;  %v11328_v62 = vld [vmem:[%s12081_s28 + $0x7c4] sm:$0xf] }
 0x238   : > { %6760 = vmatpush.bf16.msra.mxu3 %v8202_v40  ;;  %6722 = vmatmul.bf16.vlgmr.msra.gmra.mxu0 %v12326_v25  ;;  %v8306_v25 = vor.u32 %v11282_v61, %v8303_v46  ;;  %v8298_v40 = vor.u32 %v11280_v4, %v8295_v11  ;;  %v11276_v61 = vld [vmem:[%s12081_s28 + $0x624] sm:$0xf]  ;;  %v8279_v46 = vld [vmem:[%s12081_s28 + $0x628] sm:$0xf0] }
 0x239   : > { %6766 = vmatpush.bf16.msrb.mxu0 %v8322_v45  ;;  %6735 = vmatmul.bf16.vlgmr.msra.gmra.mxu1 %v12337_v32  ;;  %v8498_v32 = vor.u32 %v11330_v51, %v8495_v34  ;;  %v6528_v45 = vpop.f32.mrf.mxu1  ;;  %v8407_v51 = vld [vmem:[%s12081_s28 + $0x728] sm:$0xf0]  ;;  %v8282_v11 = vor.u32 %v11276_v61, %v8279_v46  ;;  %v11350_v61 = vld [vmem:[%s12081_s28 + $0x874] sm:$0xf]  ;;  %v8575_v46 = vld [vmem:[%s12081_s28 + $0x878] sm:$0xf0] }
 0x23a   : > { %6779 = vmatpush.bf16.msrb.mxu1 %v8386_v59  ;;  %6748 = vmatmul.bf16.vlgmr.msra.gmra.mxu2 %v12333_v31  ;;  %v11296_v31 = vld [vmem:[%s12081_s28 + $0x6c4] sm:$0xf] }
 0x23b   : > { %6792 = vmatpush.bf16.msrb.mxu2 %v8450_v23  ;;  %6761 = vmatmul.bf16.vlgmr.msra.gmra.mxu3 %v12343_v19  ;;  %v6515_v19 = vpop.f32.mrf.mxu0  ;;  %v8362_v59 = vor.u32 %v11296_v31, %v8359_v42  ;;  %v8426_v23 = vor.u32 %v11312_v43, %v8423_v24  ;;  %v8346_v42 = vor.u32 %v11292_v28, %v8343_v14  ;;  %v11274_v24 = vld [vmem:[%s12081_s28 + $0x614] sm:$0xf]  ;;  %v8639_v14 = vld [vmem:[%s12081_s28 + $0x8f8] sm:$0xf0] }
 0x23c   : > { %6805 = vmatpush.bf16.msrb.mxu3 %v8514_v5  ;;  %v6516_v53 = vadd.f32 %v6515_v19, %v13411_v58  ;;  %v8490_v5 = vor.u32 %v11328_v62, %v8487_v57  ;;  %v8415_v58 = vld [vmem:[%s12081_s28 + $0x738] sm:$0xf0]  ;;  %v8410_v43 = vor.u32 %v11308_v41, %v8407_v51  ;;  %v11290_v62 = vld [vmem:[%s12081_s28 + $0x694] sm:$0xf] }
 0x23d   : > { %6767 = vmatpush.bf16.msrb.mxu0 %v8314_v48  ;;  %v8290_v48 = vor.u32 %v11278_v20, %v8287_v56  ;;  %v6541_v35 = vpop.f32.mrf.mxu2  ;;  %v8271_v19 = vld [vmem:[%s12081_s28 + $0x618] sm:$0xf0]  ;;  %v11272_v56 = vld [vmem:[%s12081_s28 + $0x604] sm:$0xf]  ;;  %v11366_v28 = vld [vmem:[%s12081_s28 + $0x8f4] sm:$0xf] }
 0x23e   : > { %6780 = vmatpush.bf16.msrb.mxu1 %v8378_v27  ;;  %v6529_v52 = vadd.f32 %v6528_v45, %v6516_v53  ;;  %v8354_v27 = vor.u32 %v11294_v49, %v8351_v15  ;;  %v8335_v53 = vld [vmem:[%s12081_s28 + $0x698] sm:$0xf0]  ;;  %v8274_v20 = vor.u32 %v11274_v24, %v8271_v19  ;;  %v8263_v49 = vld [vmem:[%s12081_s28 + $0x608] sm:$0xf0]  ;;  %v11288_v15 = vld [vmem:[%s12081_s28 + $0x684] sm:$0xf] }
 0x23f   : > { %6793 = vmatpush.bf16.msrb.mxu2 %v8442_v10  ;;  %v8418_v10 = vor.u32 %v11310_v16, %v8415_v58  ;;  %v8399_v45 = vld [vmem:[%s12081_s28 + $0x718] sm:$0xf0]  ;;  %v8327_v16 = vld [vmem:[%s12081_s28 + $0x688] sm:$0xf0]  ;;  %v11304_v58 = vld [vmem:[%s12081_s28 + $0x704] sm:$0xf] }
 0x240   : > { %6806 = vmatpush.bf16.msrb.mxu3 %v8506_v33  ;;  %v8482_v33 = vor.u32 %v11326_v54, %v8479_v17  ;;  %v6542_v34 = vadd.f32 %v6541_v35, %v6529_v52  ;;  %v8391_v17 = vld [vmem:[%s12081_s28 + $0x708] sm:$0xf0]  ;;  %v8266_v35 = vor.u32 %v11272_v56, %v8263_v49  ;;  %v11382_v41 = vld [vmem:[%s12081_s28 + $0x974] sm:$0xf]  ;;  %v8703_v51 = vld [vmem:[%s12081_s28 + $0x978] sm:$0xf0] }
 0x241   : > { %6768 = vmatpush.bf16.msrb.mxu0 %v8306_v25  ;;  %v6554_v25 = vpop.f32.mrf.mxu3  ;;  %v6530_v31 = vpop.f32.mrf.mxu1  ;;  %v8567_v24 = vld [vmem:[%s12081_s28 + $0x868] sm:$0xf0]  ;;  %v11364_v19 = vld [vmem:[%s12081_s28 + $0x8e4] sm:$0xf]  ;;  %v11346_v49 = vld [vmem:[%s12081_s28 + $0x854] sm:$0xf] }
 0x242   : > { %6781 = vmatpush.bf16.msrb.mxu1 %v8370_v39  ;;  %v11324_v39 = vld [vmem:[%s12081_s28 + $0x7a4] sm:$0xf]  ;;  %v8642_v31 = vor.u32 %v11366_v28, %v8639_v14  ;;  %v8615_v28 = vld [vmem:[%s12081_s28 + $0x8c8] sm:$0xf0] }
 0x243   : > { %6794 = vmatpush.bf16.msrb.mxu2 %v8434_v2  ;;  %v8471_v2 = vld [vmem:[%s12081_s28 + $0x7a8] sm:$0xf0]  ;;  %v6517_v4 = vpop.f32.mrf.mxu0  ;;  %v11392_v14 = vld [vmem:[%s12081_s28 + $0x9c4] sm:$0xf] }
 0x244   : > { %6807 = vmatpush.bf16.msrb.mxu3 %v8498_v32  ;;  %v13482_v32 = vadd.f32 %v6554_v25, %v6542_v34  ;;  %v8474_v57 = vor.u32 %v11324_v39, %v8471_v2  ;;  %v8330_v34 = vor.u32 %v11288_v15, %v8327_v16  ;;  %v8394_v25 = vor.u32 %v11304_v58, %v8391_v17  ;;  %v11398_v39 = vld [vmem:[%s12081_s28 + $0x9f4] sm:$0xf]  ;;  %v8767_v2 = vld [vmem:[%s12081_s28 + $0x9f8] sm:$0xf0] }
 0x245   : > { %6769 = vmatpush.bf16.msrb.mxu0 %v8298_v40  ;;  %v11306_v40 = vld [vmem:[%s12081_s28 + $0x714] sm:$0xf]  ;;  %v8623_v16 = vld [vmem:[%s12081_s28 + $0x8d8] sm:$0xf0] }
 0x246   : > { %6782 = vmatpush.bf16.msrb.mxu1 %v8362_v59  ;;  %v11322_v59 = vld [vmem:[%s12081_s28 + $0x794] sm:$0xf]  ;;  %v8402_v52 = vor.u32 %v11306_v40, %v8399_v45  ;;  %v8695_v40 = vld [vmem:[%s12081_s28 + $0x968] sm:$0xf0]  ;;  %v11396_v45 = vld [vmem:[%s12081_s28 + $0x9e4] sm:$0xf] }
 0x247   : > { %6795 = vmatpush.bf16.msrb.mxu2 %v8426_v23  ;;  %v8463_v23 = vld [vmem:[%s12081_s28 + $0x798] sm:$0xf0]  ;;  %v11378_v58 = vld [vmem:[%s12081_s28 + $0x954] sm:$0xf] }
 0x248   : > { %6808 = vmatpush.bf16.msrb.mxu3 %v8490_v5  ;;  %v8338_v5 = vor.u32 %v11290_v62, %v8335_v53  ;;  %v8466_v54 = vor.u32 %v11322_v59, %v8463_v23  ;;  %v8770_v62 = vor.u32 %v11398_v39, %v8767_v2  ;;  %v11380_v53 = vld [vmem:[%s12081_s28 + $0x964] sm:$0xf]  ;;  %v8759_v59 = vld [vmem:[%s12081_s28 + $0x9e8] sm:$0xf0]  ;;  %v11394_v17 = vld [vmem:[%s12081_s28 + $0x9d4] sm:$0xf] }
 0x249   : > { %6770 = vmatpush.bf16.msrb.mxu0 %v8290_v48  ;;  %v11320_v48 = vld [vmem:[%s12081_s28 + $0x784] sm:$0xf]  ;;  %v8698_v56 = vor.u32 %v11380_v53, %v8695_v40  ;;  %v8762_v15 = vor.u32 %v11396_v45, %v8759_v59 }
 0x24a   : > { %6783 = vmatpush.bf16.msrb.mxu1 %v8354_v27  ;;  %v8455_v27 = vld [vmem:[%s12081_s28 + $0x788] sm:$0xf0]  ;;  %v11340_v59 = vld [vmem:[%s12081_s28 + $0x824] sm:$0xf] }
 0x24b   : > { %6796 = vmatpush.bf16.msrb.mxu2 %v8418_v10  ;;  %v6543_v10 = vpop.f32.mrf.mxu2  ;;  %v8458_v4 = vor.u32 %v11320_v48, %v8455_v27  ;;  %v8751_v48 = vld [vmem:[%s12081_s28 + $0x9d8] sm:$0xf0] }
 0x24c   : > { %6809 = vmatpush.bf16.msrb.mxu3 %v8482_v33  ;;  %v6556_v33 = vpop.f32.mrf.mxu3 }
 0x24d   : > { %6771 = vmatpush.bf16.msrb.mxu0 %v8282_v11  ;;  %v8578_v11 = vor.u32 %v11350_v61, %v8575_v46  ;;  %v11344_v61 = vld [vmem:[%s12081_s28 + $0x844] sm:$0xf]  ;;  %v8551_v46 = vld [vmem:[%s12081_s28 + $0x848] sm:$0xf0] }
 0x24e   : > { %6784 = vmatpush.bf16.msrb.mxu1 %v8346_v42  ;;  %v8706_v42 = vor.u32 %v11382_v41, %v8703_v51  ;;  %v11376_v33 = vld [vmem:[%s12081_s28 + $0x944] sm:$0xf]  ;;  %v8743_v41 = vld [vmem:[%s12081_s28 + $0x9c8] sm:$0xf0] }
 0x24f   : > { %6797 = vmatpush.bf16.msrb.mxu2 %v8410_v43  ;;  %v11348_v43 = vld [vmem:[%s12081_s28 + $0x864] sm:$0xf] }
 0x250   : > { %6810 = vmatpush.bf16.msrb.mxu3 %v8474_v57  ;;  %v8631_v57 = vld [vmem:[%s12081_s28 + $0x8e8] sm:$0xf0]  ;;  %v8570_v23 = vor.u32 %v11348_v43, %v8567_v24  ;;  %v8607_v24 = vld [vmem:[%s12081_s28 + $0x8b8] sm:$0xf0] }
 0x251   : > { %6772 = vmatpush.bf16.msrb.mxu0 %v8274_v20  ;;  %v8634_v20 = vor.u32 %v11364_v19, %v8631_v57  ;;  %v11374_v19 = vld [vmem:[%s12081_s28 + $0x934] sm:$0xf]  ;;  %v8735_v57 = vld [vmem:[%s12081_s28 + $0x9b8] sm:$0xf0] }
 0x252   : > { %6785 = vmatpush.bf16.msrb.mxu1 %v8338_v5  ;;  %v8559_v5 = vld [vmem:[%s12081_s28 + $0x858] sm:$0xf0] }
 0x253   : > { %6798 = vmatpush.bf16.msrb.mxu2 %v8402_v52  ;;  %v11362_v52 = vld [vmem:[%s12081_s28 + $0x8d4] sm:$0xf] }
 0x254   : > { %6811 = vmatpush.bf16.msrb.mxu3 %v8466_v54  ;;  %v8687_v54 = vld [vmem:[%s12081_s28 + $0x958] sm:$0xf0]  ;;  %v8626_v27 = vor.u32 %v11362_v52, %v8623_v16  ;;  %v11372_v52 = vld [vmem:[%s12081_s28 + $0x924] sm:$0xf] }
 0x255   : > { %6773 = vmatpush.bf16.msrb.mxu0 %v8266_v35  ;;  %v8690_v10 = vor.u32 %v11378_v58, %v8687_v54  ;;  %v8679_v35 = vld [vmem:[%s12081_s28 + $0x948] sm:$0xf0]  ;;  %v11388_v54 = vld [vmem:[%s12081_s28 + $0x9a4] sm:$0xf] }
 0x256   : > { %6786 = vmatpush.bf16.msrb.mxu1 %v8330_v34  ;;  %v8554_v34 = vor.u32 %v11344_v61, %v8551_v46  ;;  %v8682_v2 = vor.u32 %v11376_v33, %v8679_v35  ;;  %v8591_v35 = vld [vmem:[%s12081_s28 + $0x898] sm:$0xf0] }
 0x257   : > { %6799 = vmatpush.bf16.msrb.mxu2 %v8394_v25  ;;  %v6580_v25 = vpop.f32.mrf.mxu1 }
 0x258   : > { %6812 = vmatpush.bf16.msrb.mxu3 %v8458_v4  ;;  %6774 = vmatmul.bf16.vlgmr.msrb.gmra.mxu0 %v12419_v29  ;;  %v8562_v29 = vor.u32 %v11346_v49, %v8559_v5  ;;  %v11342_v4 = vld [vmem:[%s12081_s28 + $0x834] sm:$0xf]  ;;  %v8599_v5 = vld [vmem:[%s12081_s28 + $0x8a8] sm:$0xf0] }
 0x259   : > { %6818 = vmatpush.bf16.msra.mxu0 %v8578_v11  ;;  %6787 = vmatmul.bf16.vlgmr.msrb.gmra.mxu1 %v12430_v38  ;;  %v8754_v38 = vor.u32 %v11394_v17, %v8751_v48  ;;  %v8543_v11 = vld [vmem:[%s12081_s28 + $0x838] sm:$0xf0]  ;;  %v8727_v17 = vld [vmem:[%s12081_s28 + $0x9a8] sm:$0xf0] }
 0x25a   : > { %6831 = vmatpush.bf16.msra.mxu1 %v8642_v31  ;;  %6800 = vmatmul.bf16.vlgmr.msrb.gmra.mxu2 %v12426_v37  ;;  %v11360_v37 = vld [vmem:[%s12081_s28 + $0x8c4] sm:$0xf]  ;;  %v11358_v31 = vld [vmem:[%s12081_s28 + $0x8b4] sm:$0xf]  ;;  %v8546_v53 = vor.u32 %v11342_v4, %v8543_v11  ;;  %v8730_v33 = vor.u32 %v11388_v54, %v8727_v17 }
 0x25b   : > { %6844 = vmatpush.bf16.msra.mxu2 %v8706_v42  ;;  %6813 = vmatmul.bf16.vlgmr.msrb.gmra.mxu3 %v12436_v22  ;;  %v6567_v22 = vpop.f32.mrf.mxu0  ;;  %v8618_v39 = vor.u32 %v11360_v37, %v8615_v28  ;;  %v8746_v42 = vor.u32 %v11392_v14, %v8743_v41  ;;  %v8610_v40 = vor.u32 %v11358_v31, %v8607_v24  ;;  %v11338_v37 = vld [vmem:[%s12081_s28 + $0x814] sm:$0xf]  ;;  %v8655_v14 = vld [vmem:[%s12081_s28 + $0x918] sm:$0xf0]  ;;  %v11352_v11 = vld [vmem:[%s12081_s28 + $0x884] sm:$0xf] }
 0x25c   : > { %6857 = vmatpush.bf16.msra.mxu3 %v8770_v62  ;;  %v6568_v51 = vadd.f32 %v6567_v22, %v13482_v32  ;;  %v8671_v32 = vld [vmem:[%s12081_s28 + $0x938] sm:$0xf0]  ;;  %v11390_v62 = vld [vmem:[%s12081_s28 + $0x9b4] sm:$0xf]  ;;  %v8583_v31 = vld [vmem:[%s12081_s28 + $0x888] sm:$0xf0] }
 0x25d   : > { %6819 = vmatpush.bf16.msra.mxu0 %v8570_v23  ;;  %v8674_v45 = vor.u32 %v11374_v19, %v8671_v32  ;;  %v8535_v23 = vld [vmem:[%s12081_s28 + $0x828] sm:$0xf0]  ;;  %v6593_v49 = vpop.f32.mrf.mxu2  ;;  %v11354_v28 = vld [vmem:[%s12081_s28 + $0x894] sm:$0xf]  ;;  %v11384_v19 = vld [vmem:[%s12081_s28 + $0x984] sm:$0xf] }
 0x25e   : > { %6832 = vmatpush.bf16.msra.mxu1 %v8634_v20  ;;  %v6581_v43 = vadd.f32 %v6580_v25, %v6568_v51  ;;  %v11356_v20 = vld [vmem:[%s12081_s28 + $0x8a4] sm:$0xf]  ;;  %v6606_v58 = vpop.f32.mrf.mxu3  ;;  %v11370_v22 = vld [vmem:[%s12081_s28 + $0x914] sm:$0xf]  ;;  %v8719_v51 = vld [vmem:[%s12081_s28 + $0x998] sm:$0xf0] }
 0x25f   : > { %6845 = vmatpush.bf16.msra.mxu2 %v8698_v56  ;;  %v8738_v56 = vor.u32 %v11390_v62, %v8735_v57  ;;  %v8602_v61 = vor.u32 %v11356_v20, %v8599_v5  ;;  %v11386_v41 = vld [vmem:[%s12081_s28 + $0x994] sm:$0xf]  ;;  %v11336_v25 = vld [vmem:[%s12081_s28 + $0x804] sm:$0xf]  ;;  %v8658_v4 = vor.u32 %v11370_v22, %v8655_v14  ;;  %v8647_v24 = vld [vmem:[%s12081_s28 + $0x908] sm:$0xf0] }
 0x260   : > { %6858 = vmatpush.bf16.msra.mxu3 %v8762_v15  ;;  %v8663_v15 = vld [vmem:[%s12081_s28 + $0x928] sm:$0xf0]  ;;  %v6594_v16 = vadd.f32 %v6593_v49, %v6581_v43  ;;  %v8722_v43 = vor.u32 %v11386_v41, %v8719_v51  ;;  %v11414_v57 = vld [vmem:[%s12081_s28 + $0xa74] sm:$0xf]  ;;  %v8586_v49 = vor.u32 %v11352_v11, %v8583_v31  ;;  %v8815_v51 = vld [vmem:[%s12081_s28 + $0xa58] sm:$0xf0] }
 0x261   : > { %6820 = vmatpush.bf16.msra.mxu0 %v8562_v29  ;;  %v8538_v29 = vor.u32 %v11340_v59, %v8535_v23  ;;  %v8666_v46 = vor.u32 %v11372_v52, %v8663_v15  ;;  %v8711_v32 = vld [vmem:[%s12081_s28 + $0x988] sm:$0xf0]  ;;  %v8895_v23 = vld [vmem:[%s12081_s28 + $0xaf8] sm:$0xf0]  ;;  %v11446_v20 = vld [vmem:[%s12081_s28 + $0xb74] sm:$0xf] }
 0x262   : > { %6833 = vmatpush.bf16.msra.mxu1 %v8626_v27  ;;  %v6582_v27 = vpop.f32.mrf.mxu1  ;;  %v11462_v52 = vld [vmem:[%s12081_s28 + $0xbf4] sm:$0xf]  ;;  %v9023_v15 = vld [vmem:[%s12081_s28 + $0xbf8] sm:$0xf0] }
 0x263   : > { %6846 = vmatpush.bf16.msra.mxu2 %v8690_v10  ;;  %v6569_v48 = vpop.f32.mrf.mxu0  ;;  %v13553_v10 = vadd.f32 %v6606_v58, %v6594_v16  ;;  %v8714_v16 = vor.u32 %v11384_v19, %v8711_v32  ;;  %v11428_v27 = vld [vmem:[%s12081_s28 + $0xae4] sm:$0xf]  ;;  %v11410_v41 = vld [vmem:[%s12081_s28 + $0xa54] sm:$0xf]  ;;  %v9007_v31 = vld [vmem:[%s12081_s28 + $0xbd8] sm:$0xf0] }
 0x264   : > { %6859 = vmatpush.bf16.msra.mxu3 %v8754_v38  ;;  %v8527_v38 = vld [vmem:[%s12081_s28 + $0x818] sm:$0xf0]  ;;  %v11412_v48 = vld [vmem:[%s12081_s28 + $0xa64] sm:$0xf]  ;;  %v11458_v11 = vld [vmem:[%s12081_s28 + $0xbd4] sm:$0xf] }
 0x265   : > { %6821 = vmatpush.bf16.msra.mxu0 %v8554_v34  ;;  %v8530_v34 = vor.u32 %v11338_v37, %v8527_v38  ;;  %v6595_v62 = vpop.f32.mrf.mxu2  ;;  %v11444_v37 = vld [vmem:[%s12081_s28 + $0xb64] sm:$0xf]  ;;  %v8951_v38 = vld [vmem:[%s12081_s28 + $0xb68] sm:$0xf0] }
 0x266   : > { %6834 = vmatpush.bf16.msra.mxu1 %v8618_v39  ;;  %v8519_v39 = vld [vmem:[%s12081_s28 + $0x808] sm:$0xf0]  ;;  %v8954_v14 = vor.u32 %v11444_v37, %v8951_v38  ;;  %v11440_v62 = vld [vmem:[%s12081_s28 + $0xb44] sm:$0xf] }
 0x267   : > { %6847 = vmatpush.bf16.msra.mxu2 %v8682_v2  ;;  %v8594_v2 = vor.u32 %v11354_v28, %v8591_v35  ;;  %v8522_v59 = vor.u32 %v11336_v25, %v8519_v39  ;;  %v11460_v28 = vld [vmem:[%s12081_s28 + $0xbe4] sm:$0xf]  ;;  %v8879_v39 = vld [vmem:[%s12081_s28 + $0xad8] sm:$0xf0]  ;;  %v8807_v19 = vld [vmem:[%s12081_s28 + $0xa48] sm:$0xf0] }
 0x268   : > { %6860 = vmatpush.bf16.msra.mxu3 %v8746_v42  ;;  %v11368_v42 = vld [vmem:[%s12081_s28 + $0x904] sm:$0xf]  ;;  %v8871_v32 = vld [vmem:[%s12081_s28 + $0xac8] sm:$0xf0] }
 0x269   : > { %6822 = vmatpush.bf16.msra.mxu0 %v8546_v53  ;;  %v8831_v53 = vld [vmem:[%s12081_s28 + $0xa78] sm:$0xf0]  ;;  %v8650_v5 = vor.u32 %v11368_v42, %v8647_v24  ;;  %v11408_v24 = vld [vmem:[%s12081_s28 + $0xa44] sm:$0xf]  ;;  %v8791_v37 = vld [vmem:[%s12081_s28 + $0xa28] sm:$0xf0] }
 0x26a   : > { %6835 = vmatpush.bf16.msra.mxu1 %v8610_v40  ;;  %v11430_v40 = vld [vmem:[%s12081_s28 + $0xaf4] sm:$0xf]  ;;  %v8834_v58 = vor.u32 %v11414_v57, %v8831_v53  ;;  %v8935_v57 = vld [vmem:[%s12081_s28 + $0xb48] sm:$0xf0]  ;;  %v11420_v38 = vld [vmem:[%s12081_s28 + $0xaa4] sm:$0xf] }
 0x26b   : > { %6848 = vmatpush.bf16.msra.mxu2 %v8674_v45  ;;  %v6608_v45 = vpop.f32.mrf.mxu3  ;;  %v8898_v54 = vor.u32 %v11430_v40, %v8895_v23  ;;  %v8999_v53 = vld [vmem:[%s12081_s28 + $0xbc8] sm:$0xf0]  ;;  %v8810_v40 = vor.u32 %v11408_v24, %v8807_v19  ;;  %v8938_v23 = vor.u32 %v11440_v62, %v8935_v57  ;;  %v11450_v62 = vld [vmem:[%s12081_s28 + $0xb94] sm:$0xf]  ;;  %v8975_v57 = vld [vmem:[%s12081_s28 + $0xb98] sm:$0xf0] }
 0x26c   : > { %6861 = vmatpush.bf16.msra.mxu3 %v8738_v56  ;;  %v8959_v56 = vld [vmem:[%s12081_s28 + $0xb78] sm:$0xf0] }
 0x26d   : > { %6823 = vmatpush.bf16.msra.mxu0 %v8538_v29  ;;  %v8962_v17 = vor.u32 %v11446_v20, %v8959_v56  ;;  %v8823_v29 = vld [vmem:[%s12081_s28 + $0xa68] sm:$0xf0]  ;;  %v11406_v20 = vld [vmem:[%s12081_s28 + $0xa34] sm:$0xf]  ;;  %v8799_v56 = vld [vmem:[%s12081_s28 + $0xa38] sm:$0xf0] }
 0x26e   : > { %6836 = vmatpush.bf16.msra.mxu1 %v8602_v61  ;;  %v9026_v61 = vor.u32 %v11462_v52, %v9023_v15  ;;  %v8826_v35 = vor.u32 %v11412_v48, %v8823_v29  ;;  %v8863_v15 = vld [vmem:[%s12081_s28 + $0xab8] sm:$0xf0]  ;;  %v8802_v29 = vor.u32 %v11406_v20, %v8799_v56  ;;  %v8839_v20 = vld [vmem:[%s12081_s28 + $0xa88] sm:$0xf0]  ;;  %v11432_v56 = vld [vmem:[%s12081_s28 + $0xb04] sm:$0xf] }
 0x26f   : > { %6849 = vmatpush.bf16.msra.mxu2 %v8666_v46  ;;  %v8887_v46 = vld [vmem:[%s12081_s28 + $0xae8] sm:$0xf0]  ;;  %v8991_v48 = vld [vmem:[%s12081_s28 + $0xbb8] sm:$0xf0] }
 0x270   : > { %6862 = vmatpush.bf16.msra.mxu3 %v8730_v33  ;;  %v9015_v33 = vld [vmem:[%s12081_s28 + $0xbe8] sm:$0xf0]  ;;  %v8890_v22 = vor.u32 %v11428_v27, %v8887_v46  ;;  %v11404_v46 = vld [vmem:[%s12081_s28 + $0xa24] sm:$0xf] }
 0x271   : > { %6824 = vmatpush.bf16.msra.mxu0 %v8530_v34  ;;  %v11426_v34 = vld [vmem:[%s12081_s28 + $0xad4] sm:$0xf]  ;;  %v9018_v25 = vor.u32 %v11460_v28, %v9015_v33 }
 0x272   : > { %6837 = vmatpush.bf16.msra.mxu1 %v8594_v2  ;;  %v11442_v2 = vld [vmem:[%s12081_s28 + $0xb54] sm:$0xf]  ;;  %v8882_v42 = vor.u32 %v11426_v34, %v8879_v39  ;;  %v11452_v34 = vld [vmem:[%s12081_s28 + $0xba4] sm:$0xf]  ;;  %v8794_v39 = vor.u32 %v11404_v46, %v8791_v37  ;;  %v9215_v46 = vld [vmem:[%s12081_s28 + $0xd78] sm:$0xf0] }
 0x273   : > { %6850 = vmatpush.bf16.msra.mxu2 %v8658_v4  ;;  %v8943_v4 = vld [vmem:[%s12081_s28 + $0xb58] sm:$0xf0] }
 0x274   : > { %6863 = vmatpush.bf16.msra.mxu3 %v8722_v43  ;;  %v8946_v43 = vor.u32 %v11442_v2, %v8943_v4 }
 0x275   : > { %6825 = vmatpush.bf16.msra.mxu0 %v8522_v59  ;;  %v6619_v45 = vpop.f32.mrf.mxu0 }
 0x276   : > { %6838 = vmatpush.bf16.msra.mxu1 %v8586_v49  ;;  %v11422_v49 = vld [vmem:[%s12081_s28 + $0xab4] sm:$0xf] }
 0x277   : > { %6851 = vmatpush.bf16.msra.mxu2 %v8650_v5  ;;  %v6632_v5 = vpop.f32.mrf.mxu1  ;;  %v8866_v27 = vor.u32 %v11422_v49, %v8863_v15  ;;  %v11448_v15 = vld [vmem:[%s12081_s28 + $0xb84] sm:$0xf] }
 0x278   : > { %6864 = vmatpush.bf16.msra.mxu3 %v8714_v16  ;;  %6826 = vmatmul.bf16.vlgmr.msra.gmra.mxu0 %v12501_v60  ;;  %v8818_v60 = vor.u32 %v11410_v41, %v8815_v51  ;;  %v11438_v16 = vld [vmem:[%s12081_s28 + $0xb34] sm:$0xf] }
 0x279   : > { %6870 = vmatpush.bf16.msrb.mxu0 %v8834_v58  ;;  %6839 = vmatmul.bf16.vlgmr.msra.gmra.mxu1 %v12508_v44  ;;  %v9010_v44 = vor.u32 %v11458_v11, %v9007_v31  ;;  %v8927_v58 = vld [vmem:[%s12081_s28 + $0xb38] sm:$0xf0] }
 0x27a   : > { %6883 = vmatpush.bf16.msrb.mxu1 %v8898_v54  ;;  %6852 = vmatmul.bf16.vlgmr.msra.gmra.mxu2 %v12506_v63  ;;  %v11424_v63 = vld [vmem:[%s12081_s28 + $0xac4] sm:$0xf]  ;;  %v6633_v54 = vadd.f32 %v6632_v5, %v6619_v45  ;;  %v8978_v5 = vor.u32 %v11450_v62, %v8975_v57  ;;  %v9135_v57 = vld [vmem:[%s12081_s28 + $0xcd8] sm:$0xf0] }
 0x27b   : > { %6896 = vmatpush.bf16.msrb.mxu2 %v8962_v17  ;;  %6865 = vmatmul.bf16.vlgmr.msra.gmra.mxu3 %v12512_v47  ;;  %v11456_v47 = vld [vmem:[%s12081_s28 + $0xbc4] sm:$0xf]  ;;  %v8874_v59 = vor.u32 %v11424_v63, %v8871_v32  ;;  %v11454_v17 = vld [vmem:[%s12081_s28 + $0xbb4] sm:$0xf]  ;;  %v8847_v63 = vld [vmem:[%s12081_s28 + $0xa98] sm:$0xf0] }
 0x27c   : > { %6909 = vmatpush.bf16.msrb.mxu3 %v9026_v61  ;;  %v9002_v52 = vor.u32 %v11456_v47, %v8999_v53  ;;  %v8930_v61 = vor.u32 %v11438_v16, %v8927_v58  ;;  %v8994_v33 = vor.u32 %v11454_v17, %v8991_v48  ;;  %v8911_v32 = vld [vmem:[%s12081_s28 + $0xb18] sm:$0xf0]  ;;  %v11400_v53 = vld [vmem:[%s12081_s28 + $0xa04] sm:$0xf]  ;;  %v8967_v16 = vld [vmem:[%s12081_s28 + $0xb88] sm:$0xf0] }
 0x27d   : > { %6871 = vmatpush.bf16.msrb.mxu0 %v8826_v35  ;;  %v6645_v28 = vpop.f32.mrf.mxu2  ;;  %v8855_v35 = vld [vmem:[%s12081_s28 + $0xaa8] sm:$0xf0]  ;;  %v6621_v4 = vpop.f32.mrf.mxu0  ;;  %v9087_v17 = vld [vmem:[%s12081_s28 + $0xc78] sm:$0xf0]  ;;  %v11494_v48 = vld [vmem:[%s12081_s28 + $0xcf4] sm:$0xf] }
 0x27e   : > { %6884 = vmatpush.bf16.msrb.mxu1 %v8890_v22  ;;  %v11436_v22 = vld [vmem:[%s12081_s28 + $0xb24] sm:$0xf]  ;;  %v6646_v41 = vadd.f32 %v6645_v28, %v6633_v54  ;;  %v6658_v51 = vpop.f32.mrf.mxu3  ;;  %v8858_v11 = vor.u32 %v11420_v38, %v8855_v35  ;;  %v11478_v54 = vld [vmem:[%s12081_s28 + $0xc74] sm:$0xf]  ;;  %v8970_v35 = vor.u32 %v11448_v15, %v8967_v16  ;;  %v9143_v4 = vld [vmem:[%s12081_s28 + $0xce8] sm:$0xf0] }
 0x27f   : > { %6897 = vmatpush.bf16.msrb.mxu2 %v8954_v14  ;;  %v8919_v14 = vld [vmem:[%s12081_s28 + $0xb28] sm:$0xf0]  ;;  %v6634_v24 = vpop.f32.mrf.mxu1  ;;  %v11526_v28 = vld [vmem:[%s12081_s28 + $0xdf4] sm:$0xf]  ;;  %v11520_v15 = vld [vmem:[%s12081_s28 + $0xdc4] sm:$0xf] }
 0x280   : > { %6910 = vmatpush.bf16.msrb.mxu3 %v9018_v25  ;;  %v8983_v25 = vld [vmem:[%s12081_s28 + $0xba8] sm:$0xf0]  ;;  %v13623_v2 = vadd.f32 %v6658_v51, %v6646_v41  ;;  %v8922_v31 = vor.u32 %v11436_v22, %v8919_v14  ;;  %v9090_v22 = vor.u32 %v11478_v54, %v9087_v17  ;;  %v11476_v51 = vld [vmem:[%s12081_s28 + $0xc64] sm:$0xf] }
 0x281   : > { %6872 = vmatpush.bf16.msrb.mxu0 %v8818_v60  ;;  %v11402_v60 = vld [vmem:[%s12081_s28 + $0xa14] sm:$0xf]  ;;  %v8986_v19 = vor.u32 %v11452_v34, %v8983_v25  ;;  %v9079_v34 = vld [vmem:[%s12081_s28 + $0xc68] sm:$0xf0]  ;;  %v11492_v25 = vld [vmem:[%s12081_s28 + $0xce4] sm:$0xf] }
 0x282   : > { %6885 = vmatpush.bf16.msrb.mxu1 %v8882_v42  ;;  %v8783_v42 = vld [vmem:[%s12081_s28 + $0xa18] sm:$0xf0]  ;;  %v9146_v24 = vor.u32 %v11492_v25, %v9143_v4  ;;  %v9047_v25 = vld [vmem:[%s12081_s28 + $0xc28] sm:$0xf0] }
 0x283   : > { %6898 = vmatpush.bf16.msrb.mxu2 %v8946_v43  ;;  %v11418_v43 = vld [vmem:[%s12081_s28 + $0xa94] sm:$0xf]  ;;  %v8786_v47 = vor.u32 %v11402_v60, %v8783_v42  ;;  %v11524_v60 = vld [vmem:[%s12081_s28 + $0xde4] sm:$0xf]  ;;  %v9271_v42 = vld [vmem:[%s12081_s28 + $0xde8] sm:$0xf0] }
 0x284   : > { %6911 = vmatpush.bf16.msrb.mxu3 %v9010_v44  ;;  %v11434_v44 = vld [vmem:[%s12081_s28 + $0xb14] sm:$0xf]  ;;  %v8850_v45 = vor.u32 %v11418_v43, %v8847_v63  ;;  %v9082_v43 = vor.u32 %v11476_v51, %v9079_v34  ;;  %v9274_v62 = vor.u32 %v11524_v60, %v9271_v42  ;;  %v11468_v34 = vld [vmem:[%s12081_s28 + $0xc24] sm:$0xf]  ;;  %v9175_v42 = vld [vmem:[%s12081_s28 + $0xd28] sm:$0xf0] }
 0x285   : > { %6873 = vmatpush.bf16.msrb.mxu0 %v8810_v40  ;;  %v8775_v40 = vld [vmem:[%s12081_s28 + $0xa08] sm:$0xf0]  ;;  %v6647_v49 = vpop.f32.mrf.mxu2  ;;  %v11474_v63 = vld [vmem:[%s12081_s28 + $0xc54] sm:$0xf]  ;;  %v11500_v60 = vld [vmem:[%s12081_s28 + $0xd24] sm:$0xf] }
 0x286   : > { %6886 = vmatpush.bf16.msrb.mxu1 %v8874_v59  ;;  %v8914_v59 = vor.u32 %v11434_v44, %v8911_v32  ;;  %v6660_v58 = vpop.f32.mrf.mxu3  ;;  %v9071_v44 = vld [vmem:[%s12081_s28 + $0xc58] sm:$0xf0]  ;;  %v11490_v32 = vld [vmem:[%s12081_s28 + $0xcd4] sm:$0xf]  ;;  %v9127_v49 = vld [vmem:[%s12081_s28 + $0xcc8] sm:$0xf0] }
 0x287   : > { %6899 = vmatpush.bf16.msrb.mxu2 %v8938_v23  ;;  %v11416_v23 = vld [vmem:[%s12081_s28 + $0xa84] sm:$0xf] }
 0x288   : > { %6912 = vmatpush.bf16.msrb.mxu3 %v9002_v52  ;;  %v8903_v52 = vld [vmem:[%s12081_s28 + $0xb08] sm:$0xf0]  ;;  %v8842_v37 = vor.u32 %v11416_v23, %v8839_v20  ;;  %v11472_v20 = vld [vmem:[%s12081_s28 + $0xc44] sm:$0xf] }
 0x289   : > { %6874 = vmatpush.bf16.msrb.mxu0 %v8802_v29  ;;  %v8778_v29 = vor.u32 %v11400_v53, %v8775_v40  ;;  %v8906_v38 = vor.u32 %v11432_v56, %v8903_v52  ;;  %v9199_v53 = vld [vmem:[%s12081_s28 + $0xd58] sm:$0xf0]  ;;  %v11522_v40 = vld [vmem:[%s12081_s28 + $0xdd4] sm:$0xf]  ;;  %v9063_v56 = vld [vmem:[%s12081_s28 + $0xc48] sm:$0xf0] }
 0x28a   : > { %6887 = vmatpush.bf16.msrb.mxu1 %v8866_v27  ;;  %v9151_v27 = vld [vmem:[%s12081_s28 + $0xcf8] sm:$0xf0]  ;;  %v9191_v52 = vld [vmem:[%s12081_s28 + $0xd48] sm:$0xf0]  ;;  %v9066_v16 = vor.u32 %v11472_v20, %v9063_v56  ;;  %v11498_v20 = vld [vmem:[%s12081_s28 + $0xd14] sm:$0xf] }
 0x28b   : > { %6900 = vmatpush.bf16.msrb.mxu2 %v8930_v61  ;;  %v11510_v61 = vld [vmem:[%s12081_s28 + $0xd74] sm:$0xf]  ;;  %v9154_v14 = vor.u32 %v11494_v48, %v9151_v27  ;;  %v9167_v56 = vld [vmem:[%s12081_s28 + $0xd18] sm:$0xf0] }
 0x28c   : > { %6913 = vmatpush.bf16.msrb.mxu3 %v8994_v33  ;;  %v9279_v33 = vld [vmem:[%s12081_s28 + $0xdf8] sm:$0xf0]  ;;  %v9218_v41 = vor.u32 %v11510_v61, %v9215_v46  ;;  %v11470_v48 = vld [vmem:[%s12081_s28 + $0xc34] sm:$0xf] }
 0x28d   : > { %6875 = vmatpush.bf16.msrb.mxu0 %v8794_v39  ;;  %v9282_v39 = vor.u32 %v11526_v28, %v9279_v33  ;;  %v11486_v27 = vld [vmem:[%s12081_s28 + $0xcb4] sm:$0xf]  ;;  %v9183_v33 = vld [vmem:[%s12081_s28 + $0xd38] sm:$0xf0] }
 0x28e   : > { %6888 = vmatpush.bf16.msrb.mxu1 %v8858_v11  ;;  %v11508_v11 = vld [vmem:[%s12081_s28 + $0xd64] sm:$0xf]  ;;  %v11502_v28 = vld [vmem:[%s12081_s28 + $0xd34] sm:$0xf] }
 0x28f   : > { %6901 = vmatpush.bf16.msrb.mxu2 %v8922_v31  ;;  %v9207_v31 = vld [vmem:[%s12081_s28 + $0xd68] sm:$0xf0]  ;;  %v9186_v51 = vor.u32 %v11502_v28, %v9183_v33  ;;  %v11558_v28 = vld [vmem:[%s12081_s28 + $0xef4] sm:$0xf] }
 0x290   : > { %6914 = vmatpush.bf16.msrb.mxu3 %v8986_v19  ;;  %v9210_v19 = vor.u32 %v11508_v11, %v9207_v31  ;;  %v9111_v31 = vld [vmem:[%s12081_s28 + $0xca8] sm:$0xf0] }
 0x291   : > { %6876 = vmatpush.bf16.msrb.mxu0 %v8786_v47  ;;  %v11506_v47 = vld [vmem:[%s12081_s28 + $0xd54] sm:$0xf] }
 0x292   : > { %6889 = vmatpush.bf16.msrb.mxu1 %v8850_v45  ;;  %v9263_v45 = vld [vmem:[%s12081_s28 + $0xdd8] sm:$0xf0]  ;;  %v9202_v23 = vor.u32 %v11506_v47, %v9199_v53  ;;  %v9178_v47 = vor.u32 %v11500_v60, %v9175_v42  ;;  %v11466_v53 = vld [vmem:[%s12081_s28 + $0xc14] sm:$0xf]  ;;  %v9335_v60 = vld [vmem:[%s12081_s28 + $0xe68] sm:$0xf0] }
 0x293   : > { %6902 = vmatpush.bf16.msrb.mxu2 %v8914_v59  ;;  %v9138_v59 = vor.u32 %v11490_v32, %v9135_v57  ;;  %v11556_v42 = vld [vmem:[%s12081_s28 + $0xee4] sm:$0xf] }
 0x294   : > { %6915 = vmatpush.bf16.msrb.mxu3 %v8978_v5  ;;  %v11504_v5 = vld [vmem:[%s12081_s28 + $0xd44] sm:$0xf] }
 0x295   : > { %6877 = vmatpush.bf16.msrb.mxu0 %v8778_v29  ;;  %v6671_v58 = vpop.f32.mrf.mxu0  ;;  %v9194_v17 = vor.u32 %v11504_v5, %v9191_v52  ;;  %v9055_v29 = vld [vmem:[%s12081_s28 + $0xc38] sm:$0xf0]  ;;  %v11464_v5 = vld [vmem:[%s12081_s28 + $0xc04] sm:$0xf]  ;;  %v9031_v52 = vld [vmem:[%s12081_s28 + $0xc08] sm:$0xf0] }
 0x296   : > { %6890 = vmatpush.bf16.msrb.mxu1 %v8842_v37  ;;  %v6672_v61 = vadd.f32 %v6671_v58, %v13623_v2  ;;  %v6684_v46 = vpop.f32.mrf.mxu1  ;;  %v9095_v58 = vld [vmem:[%s12081_s28 + $0xc88] sm:$0xf0]  ;;  %v9034_v33 = vor.u32 %v11464_v5, %v9031_v52  ;;  %v11536_v52 = vld [vmem:[%s12081_s28 + $0xe44] sm:$0xf] }
 0x297   : > { %6903 = vmatpush.bf16.msrb.mxu2 %v8906_v38  ;;  %v9119_v38 = vld [vmem:[%s12081_s28 + $0xcb8] sm:$0xf0] }
 0x298   : > { %6916 = vmatpush.bf16.msrb.mxu3 %v8970_v35  ;;  %6878 = vmatmul.bf16.vlgmr.msrb.gmra.mxu0 %v12580_v3  ;;  %v9074_v3 = vor.u32 %v11474_v63, %v9071_v44  ;;  %v11518_v35 = vld [vmem:[%s12081_s28 + $0xdb4] sm:$0xf]  ;;  %v9122_v2 = vor.u32 %v11486_v27, %v9119_v38  ;;  %v9239_v63 = vld [vmem:[%s12081_s28 + $0xda8] sm:$0xf0]  ;;  %v9050_v44 = vor.u32 %v11468_v34, %v9047_v25  ;;  %v11512_v27 = vld [vmem:[%s12081_s28 + $0xd84] sm:$0xf] }
 0x299   : > { %6922 = vmatpush.bf16.msra.mxu0 %v9090_v22  ;;  %6891 = vmatmul.bf16.vlgmr.msrb.gmra.mxu1 %v12587_v9  ;;  %v9266_v9 = vor.u32 %v11522_v40, %v9263_v45  ;;  %v9247_v22 = vld [vmem:[%s12081_s28 + $0xdb8] sm:$0xf0]  ;;  %v11482_v45 = vld [vmem:[%s12081_s28 + $0xc94] sm:$0xf] }
 0x29a   : > { %6935 = vmatpush.bf16.msra.mxu1 %v9154_v14  ;;  %6904 = vmatmul.bf16.vlgmr.msrb.gmra.mxu2 %v12585_v8  ;;  %v11488_v8 = vld [vmem:[%s12081_s28 + $0xcc4] sm:$0xf]  ;;  %v6685_v14 = vadd.f32 %v6684_v46, %v6672_v61  ;;  %v9250_v11 = vor.u32 %v11518_v35, %v9247_v22  ;;  %v9039_v40 = vld [vmem:[%s12081_s28 + $0xc18] sm:$0xf0]  ;;  %v9223_v61 = vld [vmem:[%s12081_s28 + $0xd88] sm:$0xf0] }
 0x29b   : > { %6948 = vmatpush.bf16.msra.mxu2 %v9218_v41  ;;  %6917 = vmatmul.bf16.vlgmr.msrb.gmra.mxu3 %v12591_v12  ;;  %v9255_v12 = vld [vmem:[%s12081_s28 + $0xdc8] sm:$0xf0]  ;;  %v9130_v54 = vor.u32 %v11488_v8, %v9127_v49  ;;  %v9058_v41 = vor.u32 %v11470_v48, %v9055_v29  ;;  %v11514_v8 = vld [vmem:[%s12081_s28 + $0xd94] sm:$0xf]  ;;  %v9042_v49 = vor.u32 %v11466_v53, %v9039_v40  ;;  %v9343_v38 = vld [vmem:[%s12081_s28 + $0xe78] sm:$0xf0] }
 0x29c   : > { %6961 = vmatpush.bf16.msra.mxu3 %v9282_v39  ;;  %v9258_v37 = vor.u32 %v11520_v15, %v9255_v12  ;;  %v11484_v39 = vld [vmem:[%s12081_s28 + $0xca4] sm:$0xf]  ;;  %v9170_v12 = vor.u32 %v11498_v20, %v9167_v56  ;;  %v9159_v29 = vld [vmem:[%s12081_s28 + $0xd08] sm:$0xf0]  ;;  %v9407_v35 = vld [vmem:[%s12081_s28 + $0xef8] sm:$0xf0]  ;;  %v9226_v25 = vor.u32 %v11512_v27, %v9223_v61 }
 0x29d   : > { %6923 = vmatpush.bf16.msra.mxu0 %v9082_v43  ;;  %v6697_v4 = vpop.f32.mrf.mxu2  ;;  %v9114_v57 = vor.u32 %v11484_v39, %v9111_v31  ;;  %v11574_v22 = vld [vmem:[%s12081_s28 + $0xf74] sm:$0xf]  ;;  %v9535_v34 = vld [vmem:[%s12081_s28 + $0xff8] sm:$0xf0]  ;;  %v11540_v31 = vld [vmem:[%s12081_s28 + $0xe64] sm:$0xf] }
 0x29e   : > { %6936 = vmatpush.bf16.msra.mxu1 %v9146_v24  ;;  %v6698_v43 = vadd.f32 %v6697_v4, %v6685_v14  ;;  %v6710_v24 = vpop.f32.mrf.mxu3  ;;  %v9471_v14 = vld [vmem:[%s12081_s28 + $0xf78] sm:$0xf0]  ;;  %v9410_v4 = vor.u32 %v11558_v28, %v9407_v35  ;;  %v11538_v40 = vld [vmem:[%s12081_s28 + $0xe54] sm:$0xf] }
 0x29f   : > { %6949 = vmatpush.bf16.msra.mxu2 %v9210_v19  ;;  %v11516_v19 = vld [vmem:[%s12081_s28 + $0xda4] sm:$0xf]  ;;  %v11570_v20 = vld [vmem:[%s12081_s28 + $0xf54] sm:$0xf]  ;;  %v9455_v56 = vld [vmem:[%s12081_s28 + $0xf58] sm:$0xf0] }
 0x2a0   : > { %6962 = vmatpush.bf16.msra.mxu3 %v9274_v62  ;;  %v13694_v32 = vadd.f32 %v6710_v24, %v6698_v43  ;;  %v6673_v62 = vpop.f32.mrf.mxu0  ;;  %v9399_v24 = vld [vmem:[%s12081_s28 + $0xee8] sm:$0xf0]  ;;  %v9458_v5 = vor.u32 %v11570_v20, %v9455_v56  ;;  %v11550_v28 = vld [vmem:[%s12081_s28 + $0xeb4] sm:$0xf] }
 0x2a1   : > { %6924 = vmatpush.bf16.msra.mxu0 %v9074_v3  ;;  %v6686_v3 = vpop.f32.mrf.mxu1  ;;  %v9527_v62 = vld [vmem:[%s12081_s28 + $0xfe8] sm:$0xf0]  ;;  %v11546_v20 = vld [vmem:[%s12081_s28 + $0xe94] sm:$0xf] }
 0x2a2   : > { %6937 = vmatpush.bf16.msra.mxu1 %v9138_v59  ;;  %v9242_v59 = vor.u32 %v11516_v19, %v9239_v63  ;;  %v11572_v19 = vld [vmem:[%s12081_s28 + $0xf64] sm:$0xf]  ;;  %v9463_v63 = vld [vmem:[%s12081_s28 + $0xf68] sm:$0xf0]  ;;  %v11554_v3 = vld [vmem:[%s12081_s28 + $0xed4] sm:$0xf] }
 0x2a3   : > { %6950 = vmatpush.bf16.msra.mxu2 %v9202_v23  ;;  %v9103_v23 = vld [vmem:[%s12081_s28 + $0xc98] sm:$0xf0]  ;;  %v9466_v53 = vor.u32 %v11572_v19, %v9463_v63 }
 0x2a4   : > { %6963 = vmatpush.bf16.msra.mxu3 %v9266_v9  ;;  %v9231_v9 = vld [vmem:[%s12081_s28 + $0xd98] sm:$0xf0]  ;;  %v9106_v15 = vor.u32 %v11482_v45, %v9103_v23 }
 0x2a5   : > { %6925 = vmatpush.bf16.msra.mxu0 %v9066_v16  ;;  %v11480_v16 = vld [vmem:[%s12081_s28 + $0xc84] sm:$0xf]  ;;  %v9234_v48 = vor.u32 %v11514_v8, %v9231_v9  ;;  %v9327_v45 = vld [vmem:[%s12081_s28 + $0xe58] sm:$0xf0]  ;;  %v11586_v8 = vld [vmem:[%s12081_s28 + $0xfd4] sm:$0xf] }
 0x2a6   : > { %6938 = vmatpush.bf16.msra.mxu1 %v9130_v54  ;;  %v11496_v54 = vld [vmem:[%s12081_s28 + $0xd04] sm:$0xf]  ;;  %v6712_v46 = vpop.f32.mrf.mxu3  ;;  %v9391_v23 = vld [vmem:[%s12081_s28 + $0xed8] sm:$0xf0] }
 0x2a7   : > { %6951 = vmatpush.bf16.msra.mxu2 %v9194_v17  ;;  %v6699_v17 = vpop.f32.mrf.mxu2  ;;  %v9519_v9 = vld [vmem:[%s12081_s28 + $0xfd8] sm:$0xf0] }
 0x2a8   : > { %6964 = vmatpush.bf16.msra.mxu3 %v9258_v37  ;;  %v11542_v37 = vld [vmem:[%s12081_s28 + $0xe74] sm:$0xf]  ;;  %v9511_v17 = vld [vmem:[%s12081_s28 + $0xfc8] sm:$0xf0] }
 0x2a9   : > { %6926 = vmatpush.bf16.msra.mxu0 %v9058_v41  ;;  %v9098_v41 = vor.u32 %v11480_v16, %v9095_v58  ;;  %v9346_v39 = vor.u32 %v11542_v37, %v9343_v38  ;;  %v11568_v16 = vld [vmem:[%s12081_s28 + $0xf44] sm:$0xf]  ;;  %v9447_v58 = vld [vmem:[%s12081_s28 + $0xf48] sm:$0xf0]  ;;  %v11534_v37 = vld [vmem:[%s12081_s28 + $0xe34] sm:$0xf] }
 0x2aa   : > { %6939 = vmatpush.bf16.msra.mxu1 %v9122_v2  ;;  %v9162_v2 = vor.u32 %v11496_v54, %v9159_v29  ;;  %v11584_v54 = vld [vmem:[%s12081_s28 + $0xfc4] sm:$0xf]  ;;  %v9450_v46 = vor.u32 %v11568_v16, %v9447_v58  ;;  %v9311_v38 = vld [vmem:[%s12081_s28 + $0xe38] sm:$0xf0]  ;;  %v9351_v58 = vld [vmem:[%s12081_s28 + $0xe88] sm:$0xf0] }
 0x2ab   : > { %6952 = vmatpush.bf16.msra.mxu2 %v9186_v51  ;;  %v11590_v51 = vld [vmem:[%s12081_s28 + $0xff4] sm:$0xf]  ;;  %v11544_v16 = vld [vmem:[%s12081_s28 + $0xe84] sm:$0xf] }
 0x2ac   : > { %6965 = vmatpush.bf16.msra.mxu3 %v9250_v11  ;;  %v9474_v11 = vor.u32 %v11574_v22, %v9471_v14  ;;  %v9538_v43 = vor.u32 %v11590_v51, %v9535_v34  ;;  %v9375_v22 = vld [vmem:[%s12081_s28 + $0xeb8] sm:$0xf0]  ;;  %v11566_v14 = vld [vmem:[%s12081_s28 + $0xf34] sm:$0xf]  ;;  %v9314_v51 = vor.u32 %v11534_v37, %v9311_v38 }
 0x2ad   : > { %6927 = vmatpush.bf16.msra.mxu0 %v9050_v44  ;;  %v11588_v44 = vld [vmem:[%s12081_s28 + $0xfe4] sm:$0xf]  ;;  %v9378_v34 = vor.u32 %v11550_v28, %v9375_v22  ;;  %v11622_v37 = vld [vmem:[%s12081_s28 + $0x10f4] sm:$0xf]  ;;  %v9727_v22 = vld [vmem:[%s12081_s28 + $0x1178] sm:$0xf0] }
 0x2ae   : > { %6940 = vmatpush.bf16.msra.mxu1 %v9114_v57  ;;  %v9338_v57 = vor.u32 %v11540_v31, %v9335_v60 }
 0x2af   : > { %6953 = vmatpush.bf16.msra.mxu2 %v9178_v47  ;;  %v9402_v47 = vor.u32 %v11556_v42, %v9399_v24  ;;  %v9367_v42 = vld [vmem:[%s12081_s28 + $0xea8] sm:$0xf0] }
 0x2b0   : > { %6966 = vmatpush.bf16.msra.mxu3 %v9242_v59  ;;  %v9530_v59 = vor.u32 %v11588_v44, %v9527_v62  ;;  %v9431_v24 = vld [vmem:[%s12081_s28 + $0xf28] sm:$0xf0]  ;;  %v11580_v44 = vld [vmem:[%s12081_s28 + $0xfa4] sm:$0xf] }
 0x2b1   : > { %6928 = vmatpush.bf16.msra.mxu0 %v9042_v49  ;;  %v9394_v49 = vor.u32 %v11554_v3, %v9391_v23  ;;  %v9495_v62 = vld [vmem:[%s12081_s28 + $0xfa8] sm:$0xf0]  ;;  %v9295_v23 = vld [vmem:[%s12081_s28 + $0xe18] sm:$0xf0] }
 0x2b2   : > { %6941 = vmatpush.bf16.msra.mxu1 %v9106_v15  ;;  %v9319_v15 = vld [vmem:[%s12081_s28 + $0xe48] sm:$0xf0]  ;;  %v9498_v56 = vor.u32 %v11580_v44, %v9495_v62 }
 0x2b3   : > { %6954 = vmatpush.bf16.msra.mxu2 %v9170_v12  ;;  %v9383_v12 = vld [vmem:[%s12081_s28 + $0xec8] sm:$0xf0]  ;;  %v9322_v29 = vor.u32 %v11536_v52, %v9319_v15  ;;  %v11528_v15 = vld [vmem:[%s12081_s28 + $0xe04] sm:$0xf] }
 0x2b4   : > { %6967 = vmatpush.bf16.msra.mxu3 %v9234_v48 }
 0x2b5   : > { %6929 = vmatpush.bf16.msra.mxu0 %v9034_v33  ;;  %v9514_v33 = vor.u32 %v11584_v54, %v9511_v17  ;;  %v9415_v17 = vld [vmem:[%s12081_s28 + $0xf08] sm:$0xf0] }
 0x2b6   : > { %6942 = vmatpush.bf16.msra.mxu1 %v9098_v41  ;;  %v6736_v27 = vpop.f32.mrf.mxu1  ;;  %v11582_v41 = vld [vmem:[%s12081_s28 + $0xfb4] sm:$0xf] }
 0x2b7   : > { %6955 = vmatpush.bf16.msra.mxu2 %v9162_v2  ;;  %v9503_v2 = vld [vmem:[%s12081_s28 + $0xfb8] sm:$0xf0] }
 0x2b8   : > { %6968 = vmatpush.bf16.msra.mxu3 %v9226_v25  ;;  %6930 = vmatmul.bf16.vlgmr.msra.gmra.mxu0 %v12660_v1  ;;  %v9330_v1 = vor.u32 %v11538_v40, %v9327_v45  ;;  %v9506_v31 = vor.u32 %v11582_v41, %v9503_v2  ;;  %v11654_v41 = vld [vmem:[%s12081_s28 + $0x11f4] sm:$0xf]  ;;  %v9791_v2 = vld [vmem:[%s12081_s28 + $0x11f8] sm:$0xf0] }
 0x2b9   : > { %6974 = vmatpush.bf16.msrb.mxu0 %v9346_v39  ;;  %6943 = vmatmul.bf16.vlgmr.msra.gmra.mxu1 %v12667_v7  ;;  %v9522_v7 = vor.u32 %v11586_v8, %v9519_v9  ;;  %v11532_v39 = vld [vmem:[%s12081_s28 + $0xe24] sm:$0xf]  ;;  %v9359_v8 = vld [vmem:[%s12081_s28 + $0xe98] sm:$0xf0]  ;;  %v11562_v9 = vld [vmem:[%s12081_s28 + $0xf14] sm:$0xf] }
 0x2ba   : > { %6987 = vmatpush.bf16.msrb.mxu1 %v9410_v4  ;;  %6956 = vmatmul.bf16.vlgmr.msra.gmra.mxu2 %v12665_v6  ;;  %v11552_v6 = vld [vmem:[%s12081_s28 + $0xec4] sm:$0xf]  ;;  %v9303_v4 = vld [vmem:[%s12081_s28 + $0xe28] sm:$0xf0] }
 0x2bb   : > { %7000 = vmatpush.bf16.msrb.mxu2 %v9474_v11  ;;  %6969 = vmatmul.bf16.vlgmr.msra.gmra.mxu3 %v12671_v13  ;;  %v6723_v13 = vpop.f32.mrf.mxu0  ;;  %v9386_v61 = vor.u32 %v11552_v6, %v9383_v12  ;;  %v11548_v11 = vld [vmem:[%s12081_s28 + $0xea4] sm:$0xf]  ;;  %v9287_v6 = vld [vmem:[%s12081_s28 + $0xe08] sm:$0xf0] }
 0x2bc   : > { %7013 = vmatpush.bf16.msrb.mxu3 %v9538_v43  ;;  %v6724_v48 = vadd.f32 %v6723_v13, %v13694_v32  ;;  %v9439_v32 = vld [vmem:[%s12081_s28 + $0xf38] sm:$0xf0]  ;;  %v11564_v43 = vld [vmem:[%s12081_s28 + $0xf24] sm:$0xf]  ;;  %v9370_v45 = vor.u32 %v11548_v11, %v9367_v42  ;;  %v9290_v28 = vor.u32 %v11528_v15, %v9287_v6  ;;  %v9591_v11 = vld [vmem:[%s12081_s28 + $0x1068] sm:$0xf0] }
 0x2bd   : > { %6975 = vmatpush.bf16.msrb.mxu0 %v9338_v57  ;;  %v9442_v25 = vor.u32 %v11566_v14, %v9439_v32  ;;  %v6749_v60 = vpop.f32.mrf.mxu2  ;;  %v9434_v3 = vor.u32 %v11564_v43, %v9431_v24  ;;  %v11560_v13 = vld [vmem:[%s12081_s28 + $0xf04] sm:$0xf]  ;;  %v9354_v14 = vor.u32 %v11544_v16, %v9351_v58  ;;  %v9655_v42 = vld [vmem:[%s12081_s28 + $0x10e8] sm:$0xf0] }
 0x2be   : > { %6988 = vmatpush.bf16.msrb.mxu1 %v9402_v47  ;;  %v6737_v35 = vadd.f32 %v6736_v27, %v6724_v48  ;;  %v6762_v63 = vpop.f32.mrf.mxu3  ;;  %v9306_v47 = vor.u32 %v11532_v39, %v9303_v4  ;;  %v11576_v48 = vld [vmem:[%s12081_s28 + $0xf84] sm:$0xf]  ;;  %v9418_v32 = vor.u32 %v11560_v13, %v9415_v17  ;;  %v9719_v24 = vld [vmem:[%s12081_s28 + $0x1168] sm:$0xf0] }
 0x2bf   : > { %7001 = vmatpush.bf16.msrb.mxu2 %v9466_v53  ;;  %v6738_v53 = vpop.f32.mrf.mxu1  ;;  %v11604_v4 = vld [vmem:[%s12081_s28 + $0x1064] sm:$0xf]  ;;  %v9703_v6 = vld [vmem:[%s12081_s28 + $0x1148] sm:$0xf0] }
 0x2c0   : > { %7014 = vmatpush.bf16.msrb.mxu3 %v9530_v59  ;;  %v6750_v19 = vadd.f32 %v6749_v60, %v6737_v35  ;;  %v11530_v59 = vld [vmem:[%s12081_s28 + $0xe14] sm:$0xf]  ;;  %v9794_v60 = vor.u32 %v11654_v41, %v9791_v2  ;;  %v11636_v43 = vld [vmem:[%s12081_s28 + $0x1164] sm:$0xf]  ;;  %v9594_v44 = vor.u32 %v11604_v4, %v9591_v11  ;;  %v9583_v53 = vld [vmem:[%s12081_s28 + $0x1058] sm:$0xf0] }
 0x2c1   : > { %6976 = vmatpush.bf16.msrb.mxu0 %v9330_v1  ;;  %v9423_v1 = vld [vmem:[%s12081_s28 + $0xf18] sm:$0xf0]  ;;  %v9298_v52 = vor.u32 %v11530_v59, %v9295_v23  ;;  %v11638_v35 = vld [vmem:[%s12081_s28 + $0x1174] sm:$0xf]  ;;  %v11632_v15 = vld [vmem:[%s12081_s28 + $0x1144] sm:$0xf] }
 0x2c2   : > { %6989 = vmatpush.bf16.msrb.mxu1 %v9394_v49  ;;  %v13765_v40 = vadd.f32 %v6762_v63, %v6750_v19  ;;  %v11578_v49 = vld [vmem:[%s12081_s28 + $0xf94] sm:$0xf]  ;;  %v9426_v12 = vor.u32 %v11562_v9, %v9423_v1  ;;  %v9730_v39 = vor.u32 %v11638_v35, %v9727_v22  ;;  %v11652_v19 = vld [vmem:[%s12081_s28 + $0x11e4] sm:$0xf]  ;;  %v9783_v63 = vld [vmem:[%s12081_s28 + $0x11e8] sm:$0xf0]  ;;  %v9706_v17 = vor.u32 %v11632_v15, %v9703_v6 }
 0x2c3   : > { %7002 = vmatpush.bf16.msrb.mxu2 %v9458_v5  ;;  %v6725_v57 = vpop.f32.mrf.mxu0  ;;  %v9487_v5 = vld [vmem:[%s12081_s28 + $0xf98] sm:$0xf0]  ;;  %v11634_v23 = vld [vmem:[%s12081_s28 + $0x1154] sm:$0xf]  ;;  %v9559_v41 = vld [vmem:[%s12081_s28 + $0x1028] sm:$0xf0] }
 0x2c4   : > { %7015 = vmatpush.bf16.msrb.mxu3 %v9522_v7  ;;  %v9362_v7 = vor.u32 %v11546_v20, %v9359_v8  ;;  %v9490_v54 = vor.u32 %v11578_v49, %v9487_v5  ;;  %v9722_v57 = vor.u32 %v11636_v43, %v9719_v24  ;;  %v9647_v59 = vld [vmem:[%s12081_s28 + $0x10d8] sm:$0xf0]  ;;  %v11600_v49 = vld [vmem:[%s12081_s28 + $0x1044] sm:$0xf]  ;;  %v9575_v5 = vld [vmem:[%s12081_s28 + $0x1048] sm:$0xf0] }
 0x2c5   : > { %6977 = vmatpush.bf16.msrb.mxu0 %v9322_v29  ;;  %v9479_v29 = vld [vmem:[%s12081_s28 + $0xf88] sm:$0xf0]  ;;  %v6751_v27 = vpop.f32.mrf.mxu2  ;;  %v9711_v20 = vld [vmem:[%s12081_s28 + $0x1158] sm:$0xf0]  ;;  %v9578_v58 = vor.u32 %v11600_v49, %v9575_v5  ;;  %v11612_v2 = vld [vmem:[%s12081_s28 + $0x10a4] sm:$0xf] }
 0x2c6   : > { %6990 = vmatpush.bf16.msrb.mxu1 %v9386_v61  ;;  %v11606_v61 = vld [vmem:[%s12081_s28 + $0x1074] sm:$0xf]  ;;  %v6764_v38 = vpop.f32.mrf.mxu3  ;;  %v9775_v8 = vld [vmem:[%s12081_s28 + $0x11d8] sm:$0xf0]  ;;  %v9714_v1 = vor.u32 %v11634_v23, %v9711_v20  ;;  %v9687_v4 = vld [vmem:[%s12081_s28 + $0x1128] sm:$0xf0] }
 0x2c7   : > { %7003 = vmatpush.bf16.msrb.mxu2 %v9450_v46  ;;  %v9599_v46 = vld [vmem:[%s12081_s28 + $0x1078] sm:$0xf0]  ;;  %v11614_v27 = vld [vmem:[%s12081_s28 + $0x10b4] sm:$0xf]  ;;  %v11608_v5 = vld [vmem:[%s12081_s28 + $0x1084] sm:$0xf] }
 0x2c8   : > { %7016 = vmatpush.bf16.msrb.mxu3 %v9514_v33  ;;  %v9663_v33 = vld [vmem:[%s12081_s28 + $0x10f8] sm:$0xf0]  ;;  %v11630_v38 = vld [vmem:[%s12081_s28 + $0x1134] sm:$0xf]  ;;  %v9671_v15 = vld [vmem:[%s12081_s28 + $0x1108] sm:$0xf0] }
 0x2c9   : > { %6978 = vmatpush.bf16.msrb.mxu0 %v9314_v51  ;;  %v9482_v51 = vor.u32 %v11576_v48, %v9479_v29  ;;  %v11598_v48 = vld [vmem:[%s12081_s28 + $0x1034] sm:$0xf]  ;;  %v9567_v29 = vld [vmem:[%s12081_s28 + $0x1038] sm:$0xf0]  ;;  %v11640_v6 = vld [vmem:[%s12081_s28 + $0x1184] sm:$0xf] }
 0x2ca   : > { %6991 = vmatpush.bf16.msrb.mxu1 %v9378_v34  ;;  %v9602_v34 = vor.u32 %v11606_v61, %v9599_v46  ;;  %v9570_v35 = vor.u32 %v11598_v48, %v9567_v29  ;;  %v9679_v23 = vld [vmem:[%s12081_s28 + $0x1118] sm:$0xf0]  ;;  %v11642_v20 = vld [vmem:[%s12081_s28 + $0x1194] sm:$0xf] }
 0x2cb   : > { %7004 = vmatpush.bf16.msrb.mxu2 %v9442_v25  ;;  %v9666_v25 = vor.u32 %v11622_v37, %v9663_v33  ;;  %v9631_v37 = vld [vmem:[%s12081_s28 + $0x10b8] sm:$0xf0]  ;;  %v11702_v48 = vld [vmem:[%s12081_s28 + $0x1374] sm:$0xf] }
 0x2cc   : > { %7017 = vmatpush.bf16.msrb.mxu3 %v9506_v31  ;;  %v11620_v31 = vld [vmem:[%s12081_s28 + $0x10e4] sm:$0xf]  ;;  %v9759_v33 = vld [vmem:[%s12081_s28 + $0x11b8] sm:$0xf0]  ;;  %v9634_v22 = vor.u32 %v11614_v27, %v9631_v37 }
 0x2cd   : > { %6979 = vmatpush.bf16.msrb.mxu0 %v9306_v47  ;;  %v9658_v62 = vor.u32 %v11620_v31, %v9655_v42  ;;  %v11602_v47 = vld [vmem:[%s12081_s28 + $0x1054] sm:$0xf]  ;;  %v9751_v42 = vld [vmem:[%s12081_s28 + $0x11a8] sm:$0xf0]  ;;  %v9983_v29 = vld [vmem:[%s12081_s28 + $0x1378] sm:$0xf0] }
 0x2ce   : > { %6992 = vmatpush.bf16.msrb.mxu1 %v9370_v45  ;;  %v11618_v45 = vld [vmem:[%s12081_s28 + $0x10d4] sm:$0xf]  ;;  %v10047_v37 = vld [vmem:[%s12081_s28 + $0x13f8] sm:$0xf0] }
 0x2cf   : > { %7005 = vmatpush.bf16.msrb.mxu2 %v9434_v3  ;;  %v9786_v3 = vor.u32 %v11652_v19, %v9783_v63  ;;  %v9650_v9 = vor.u32 %v11618_v45, %v9647_v59  ;;  %v11626_v59 = vld [vmem:[%s12081_s28 + $0x1114] sm:$0xf] }
 0x2d0   : > { %7018 = vmatpush.bf16.msrb.mxu3 %v9498_v56  ;;  %v11650_v56 = vld [vmem:[%s12081_s28 + $0x11d4] sm:$0xf]  ;;  %v9682_v49 = vor.u32 %v11626_v59, %v9679_v23  ;;  %v11664_v23 = vld [vmem:[%s12081_s28 + $0x1244] sm:$0xf] }
 0x2d1   : > { %6980 = vmatpush.bf16.msrb.mxu0 %v9298_v52  ;;  %v9639_v52 = vld [vmem:[%s12081_s28 + $0x10c8] sm:$0xf0] }
 0x2d2   : > { %6993 = vmatpush.bf16.msrb.mxu1 %v9362_v7  ;;  %v11648_v7 = vld [vmem:[%s12081_s28 + $0x11c4] sm:$0xf] }
 0x2d3   : > { %7006 = vmatpush.bf16.msrb.mxu2 %v9426_v12  ;;  %v9767_v12 = vld [vmem:[%s12081_s28 + $0x11c8] sm:$0xf0] }
 0x2d4   : > { %7019 = vmatpush.bf16.msrb.mxu3 %v9490_v54  ;;  %v9770_v61 = vor.u32 %v11648_v7, %v9767_v12  ;;  %v11670_v12 = vld [vmem:[%s12081_s28 + $0x1274] sm:$0xf] }
 0x2d5   : > { %6981 = vmatpush.bf16.msrb.mxu0 %v9290_v28  ;;  %v11646_v28 = vld [vmem:[%s12081_s28 + $0x11b4] sm:$0xf] }
 0x2d6   : > { %6994 = vmatpush.bf16.msrb.mxu1 %v9354_v14  ;;  %v6788_v13 = vpop.f32.mrf.mxu1 }
 0x2d7   : > { %7007 = vmatpush.bf16.msrb.mxu2 %v9418_v32  ;;  %v11596_v32 = vld [vmem:[%s12081_s28 + $0x1024] sm:$0xf] }
 0x2d8   : > { %7020 = vmatpush.bf16.msrb.mxu3 %v9482_v51  ;;  %6982 = vmatmul.bf16.vlgmr.msrb.gmra.mxu0 %v12740_v0  ;;  %v9586_v0 = vor.u32 %v11602_v47, %v9583_v53  ;;  %v9762_v51 = vor.u32 %v11646_v28, %v9759_v33  ;;  %v9562_v24 = vor.u32 %v11596_v32, %v9559_v41  ;;  %v9551_v47 = vld [vmem:[%s12081_s28 + $0x1018] sm:$0xf0]  ;;  %v11610_v53 = vld [vmem:[%s12081_s28 + $0x1094] sm:$0xf]  ;;  %v9911_v41 = vld [vmem:[%s12081_s28 + $0x12e8] sm:$0xf0] }
 0x2d9   : > { %7026 = vmatpush.bf16.msra.mxu0 %v9602_v34  ;;  %6995 = vmatmul.bf16.vlgmr.msrb.gmra.mxu1 %v12747_v21  ;;  %v9778_v21 = vor.u32 %v11650_v56, %v9775_v8  ;;  %v9743_v56 = vld [vmem:[%s12081_s28 + $0x1198] sm:$0xf0]  ;;  %v9986_v33 = vor.u32 %v11702_v48, %v9983_v29  ;;  %v11710_v48 = vld [vmem:[%s12081_s28 + $0x13b4] sm:$0xf] }
 0x2da   : > { %7039 = vmatpush.bf16.msra.mxu1 %v9666_v25  ;;  %7008 = vmatmul.bf16.vlgmr.msrb.gmra.mxu2 %v12745_v18  ;;  %v11616_v18 = vld [vmem:[%s12081_s28 + $0x10c4] sm:$0xf]  ;;  %v9623_v25 = vld [vmem:[%s12081_s28 + $0x10a8] sm:$0xf0]  ;;  %v10015_v29 = vld [vmem:[%s12081_s28 + $0x13b8] sm:$0xf0] }
 0x2db   : > { %7052 = vmatpush.bf16.msra.mxu2 %v9730_v39  ;;  %7021 = vmatmul.bf16.vlgmr.msrb.gmra.mxu3 %v12751_v30  ;;  %v6775_v30 = vpop.f32.mrf.mxu0  ;;  %v9642_v54 = vor.u32 %v11616_v18, %v9639_v52  ;;  %v11628_v39 = vld [vmem:[%s12081_s28 + $0x1124] sm:$0xf]  ;;  %v9607_v18 = vld [vmem:[%s12081_s28 + $0x1088] sm:$0xf0]  ;;  %v9746_v52 = vor.u32 %v11642_v20, %v9743_v56 }
 0x2dc   : > { %7065 = vmatpush.bf16.msra.mxu3 %v9794_v60  ;;  %v6776_v16 = vadd.f32 %v6775_v30, %v13765_v40  ;;  %v9695_v40 = vld [vmem:[%s12081_s28 + $0x1138] sm:$0xf0]  ;;  %v11644_v60 = vld [vmem:[%s12081_s28 + $0x11a4] sm:$0xf]  ;;  %v9735_v30 = vld [vmem:[%s12081_s28 + $0x1188] sm:$0xf0]  ;;  %v9610_v27 = vor.u32 %v11608_v5, %v9607_v18 }
 0x2dd   : > { %7027 = vmatpush.bf16.msra.mxu0 %v9594_v44  ;;  %v9698_v14 = vor.u32 %v11630_v38, %v9695_v40  ;;  %v6801_v34 = vpop.f32.mrf.mxu2  ;;  %v9626_v44 = vor.u32 %v11612_v2, %v9623_v25  ;;  %v9754_v45 = vor.u32 %v11644_v60, %v9751_v42  ;;  %v9738_v38 = vor.u32 %v11640_v6, %v9735_v30  ;;  %v11700_v2 = vld [vmem:[%s12081_s28 + $0x1364] sm:$0xf]  ;;  %v10039_v25 = vld [vmem:[%s12081_s28 + $0x13e8] sm:$0xf0]  ;;  %v9839_v60 = vld [vmem:[%s12081_s28 + $0x1258] sm:$0xf0] }
 0x2de   : > { %7040 = vmatpush.bf16.msra.mxu1 %v9658_v62  ;;  %v6789_v46 = vadd.f32 %v6788_v13, %v6776_v16  ;;  %v6814_v31 = vpop.f32.mrf.mxu3  ;;  %v6790_v19 = vpop.f32.mrf.mxu1  ;;  %v9690_v62 = vor.u32 %v11628_v39, %v9687_v4  ;;  %v9855_v16 = vld [vmem:[%s12081_s28 + $0x1278] sm:$0xf0]  ;;  %v11682_v42 = vld [vmem:[%s12081_s28 + $0x12d4] sm:$0xf]  ;;  %v9831_v20 = vld [vmem:[%s12081_s28 + $0x1248] sm:$0xf0] }
 0x2df   : > { %7053 = vmatpush.bf16.msra.mxu2 %v9722_v57  ;;  %v11594_v57 = vld [vmem:[%s12081_s28 + $0x1014] sm:$0xf]  ;;  %v9858_v40 = vor.u32 %v11670_v12, %v9855_v16  ;;  %v11680_v56 = vld [vmem:[%s12081_s28 + $0x12c4] sm:$0xf]  ;;  %v10023_v18 = vld [vmem:[%s12081_s28 + $0x13c8] sm:$0xf0] }
 0x2e0   : > { %7066 = vmatpush.bf16.msra.mxu3 %v9786_v3  ;;  %v6802_v11 = vadd.f32 %v6801_v34, %v6789_v46  ;;  %v9615_v3 = vld [vmem:[%s12081_s28 + $0x1098] sm:$0xf0]  ;;  %v9554_v8 = vor.u32 %v11594_v57, %v9551_v47  ;;  %v11718_v46 = vld [vmem:[%s12081_s28 + $0x13f4] sm:$0xf]  ;;  %v11716_v34 = vld [vmem:[%s12081_s28 + $0x13e4] sm:$0xf] }
 0x2e1   : > { %7028 = vmatpush.bf16.msra.mxu0 %v9586_v0  ;;  %v11592_v0 = vld [vmem:[%s12081_s28 + $0x1004] sm:$0xf]  ;;  %v10050_v32 = vor.u32 %v11718_v46, %v10047_v37  ;;  %v11698_v19 = vld [vmem:[%s12081_s28 + $0x1354] sm:$0xf]  ;;  %v9823_v12 = vld [vmem:[%s12081_s28 + $0x1238] sm:$0xf0] }
 0x2e2   : > { %7041 = vmatpush.bf16.msra.mxu1 %v9650_v9  ;;  %v13836_v63 = vadd.f32 %v6814_v31, %v6802_v11  ;;  %v9543_v9 = vld [vmem:[%s12081_s28 + $0x1008] sm:$0xf0]  ;;  %v11666_v31 = vld [vmem:[%s12081_s28 + $0x1254] sm:$0xf]  ;;  %v11712_v5 = vld [vmem:[%s12081_s28 + $0x13c4] sm:$0xf] }
 0x2e3   : > { %7054 = vmatpush.bf16.msra.mxu2 %v9714_v1  ;;  %v6777_v43 = vpop.f32.mrf.mxu0  ;;  %v9618_v1 = vor.u32 %v11610_v53, %v9615_v3  ;;  %v14282_v57 = vld [vmem:[#allocation4_spill] sm:$0xff]  ;;  %v10031_v53 = vld [vmem:[%s12081_s28 + $0x13d8] sm:$0xf0]  ;;  %v11660_v37 = vld [vmem:[%s12081_s28 + $0x1224] sm:$0xf] }
 0x2e4   : > { %7067 = vmatpush.bf16.msra.mxu3 %v9778_v21  ;;  %v11624_v21 = vld [vmem:[%s12081_s28 + $0x1104] sm:$0xf]  ;;  %v10042_v43 = vor.u32 %v11716_v34, %v10039_v25  ;;  %v11714_v47 = vld [vmem:[%s12081_s28 + $0x13d4] sm:$0xf] }
 0x2e5   : > { %7029 = vmatpush.bf16.msra.mxu0 %v9578_v58  ;;  %v6803_v7 = vpop.f32.mrf.mxu2  ;;  %v11686_v58 = vld [vmem:[%s12081_s28 + $0x12f4] sm:$0xf] }
 0x2e6   : > { %7042 = vmatpush.bf16.msra.mxu1 %v9642_v54  ;;  %v6816_v13 = vpop.f32.mrf.mxu3  ;;  %v9546_v54 = vor.u32 %v11592_v0, %v9543_v9  ;;  %v9895_v0 = vld [vmem:[%s12081_s28 + $0x12c8] sm:$0xf0]  ;;  %v11696_v9 = vld [vmem:[%s12081_s28 + $0x1344] sm:$0xf]  ;;  %v11662_v7 = vld [vmem:[%s12081_s28 + $0x1234] sm:$0xf] }
 0x2e7   : > { %7055 = vmatpush.bf16.msra.mxu2 %v9706_v17  ;;  %v9919_v17 = vld [vmem:[%s12081_s28 + $0x12f8] sm:$0xf0]  ;;  %v9898_v6 = vor.u32 %v11680_v56, %v9895_v0  ;;  %v11678_v16 = vld [vmem:[%s12081_s28 + $0x12b4] sm:$0xf]  ;;  %v11688_v56 = vld [vmem:[%s12081_s28 + $0x1304] sm:$0xf] }
 0x2e8   : > { %7068 = vmatpush.bf16.msra.mxu3 %v9770_v61  ;;  %v9674_v61 = vor.u32 %v11624_v21, %v9671_v15  ;;  %v9922_v28 = vor.u32 %v11686_v58, %v9919_v17  ;;  %v10026_v58 = vor.u32 %v11712_v5, %v10023_v18  ;;  %v11694_v17 = vld [vmem:[%s12081_s28 + $0x1334] sm:$0xf]  ;;  %v9927_v0 = vld [vmem:[%s12081_s28 + $0x1308] sm:$0xf0]  ;;  %v10111_v18 = vld [vmem:[%s12081_s28 + $0x1478] sm:$0xf0] }
 0x2e9   : > { %7030 = vmatpush.bf16.msra.mxu0 %v9570_v35  ;;  %v11668_v35 = vld [vmem:[%s12081_s28 + $0x1264] sm:$0xf]  ;;  %v11734_v5 = vld [vmem:[%s12081_s28 + $0x1474] sm:$0xf] }
 0x2ea   : > { %7043 = vmatpush.bf16.msra.mxu1 %v9634_v22  ;;  %v9847_v22 = vld [vmem:[%s12081_s28 + $0x1268] sm:$0xf0] }
 0x2eb   : > { %7056 = vmatpush.bf16.msra.mxu2 %v9698_v14  ;;  %v11684_v14 = vld [vmem:[%s12081_s28 + $0x12e4] sm:$0xf]  ;;  %v9850_v39 = vor.u32 %v11668_v35, %v9847_v22  ;;  %v9879_v35 = vld [vmem:[%s12081_s28 + $0x12a8] sm:$0xf0] }
 0x2ec   : > { %7069 = vmatpush.bf16.msra.mxu3 %v9762_v51  ;;  %v9975_v51 = vld [vmem:[%s12081_s28 + $0x1368] sm:$0xf0]  ;;  %v9914_v4 = vor.u32 %v11684_v14, %v9911_v41  ;;  %v11692_v22 = vld [vmem:[%s12081_s28 + $0x1324] sm:$0xf] }
 0x2ed   : > { %7031 = vmatpush.bf16.msra.mxu0 %v9562_v24  ;;  %v9978_v11 = vor.u32 %v11700_v2, %v9975_v51  ;;  %v9903_v24 = vld [vmem:[%s12081_s28 + $0x12d8] sm:$0xf0]  ;;  %v9943_v14 = vld [vmem:[%s12081_s28 + $0x1328] sm:$0xf0]  ;;  %v11708_v2 = vld [vmem:[%s12081_s28 + $0x13a4] sm:$0xf] }
 0x2ee   : > { %7044 = vmatpush.bf16.msra.mxu1 %v9626_v44  ;;  %v9967_v44 = vld [vmem:[%s12081_s28 + $0x1358] sm:$0xf0]  ;;  %v9906_v3 = vor.u32 %v11682_v42, %v9903_v24  ;;  %v10007_v51 = vld [vmem:[%s12081_s28 + $0x13a8] sm:$0xf0] }
 0x2ef   : > { %7057 = vmatpush.bf16.msra.mxu2 %v9690_v62  ;;  %v14281_v62 = vld [vmem:[#allocation3_spill] sm:$0xff]  ;;  %v9970_v59 = vor.u32 %v11698_v19, %v9967_v44  ;;  %v9807_v42 = vld [vmem:[%s12081_s28 + $0x1218] sm:$0xf0]  ;;  %v10010_v24 = vor.u32 %v11708_v2, %v10007_v51  ;;  %v11690_v44 = vld [vmem:[%s12081_s28 + $0x1314] sm:$0xf] }
 0x2f0   : > { %7070 = vmatpush.bf16.msra.mxu3 %v9754_v45  ;;  %v14283_v45 = vld [vmem:[#allocation5_spill] sm:$0xff]  ;;  %v11746_v2 = vld [vmem:[%s12081_s28 + $0x14d4] sm:$0xf]  ;;  %v14284_v51 = vld [vmem:[#allocation6_spill] sm:$0xff] }
 0x2f1   : > { %7032 = vmatpush.bf16.msra.mxu0 %v9554_v8  ;;  %v10034_v8 = vor.u32 %v11714_v47, %v10031_v53  ;;  %v9871_v19 = vld [vmem:[%s12081_s28 + $0x1298] sm:$0xf0] }
 0x2f2   : > { %7045 = vmatpush.bf16.msra.mxu1 %v9618_v1  ;;  %v9959_v1 = vld [vmem:[%s12081_s28 + $0x1348] sm:$0xf0]  ;;  %v9999_v47 = vld [vmem:[%s12081_s28 + $0x1398] sm:$0xf0] }
 0x2f3   : > { %7058 = vmatpush.bf16.msra.mxu2 %v9682_v49  ;;  %v9962_v30 = vor.u32 %v11696_v9, %v9959_v1  ;;  %v11704_v9 = vld [vmem:[%s12081_s28 + $0x1384] sm:$0xf]  ;;  %v9991_v1 = vld [vmem:[%s12081_s28 + $0x1388] sm:$0xf0] }
 0x2f4   : > { %7071 = vmatpush.bf16.msra.mxu3 %v9746_v52  ;;  %v9834_v52 = vor.u32 %v11664_v23, %v9831_v20  ;;  %v11672_v23 = vld [vmem:[%s12081_s28 + $0x1284] sm:$0xf]  ;;  %v9863_v20 = vld [vmem:[%s12081_s28 + $0x1288] sm:$0xf0] }
 0x2f5   : > { %7033 = vmatpush.bf16.msra.mxu0 %v9546_v54  ;;  %v6827_v49 = vpop.f32.mrf.mxu0  ;;  %v9887_v54 = vld [vmem:[%s12081_s28 + $0x12b8] sm:$0xf0] }
 0x2f6   : > { %7046 = vmatpush.bf16.msra.mxu1 %v9610_v27  ;;  %v6828_v21 = vadd.f32 %v6827_v49, %v13836_v63  ;;  %v6840_v15 = vpop.f32.mrf.mxu1  ;;  %v9951_v63 = vld [vmem:[%s12081_s28 + $0x1338] sm:$0xf0]  ;;  %v9826_v27 = vor.u32 %v11662_v7, %v9823_v12  ;;  %v9866_v12 = vor.u32 %v11672_v23, %v9863_v20  ;;  %v11776_v20 = vld [vmem:[%s12081_s28 + $0x15c4] sm:$0xf] }
 0x2f7   : > { %7059 = vmatpush.bf16.msra.mxu2 %v9674_v61  ;;  %v9890_v61 = vor.u32 %v11678_v16, %v9887_v54  ;;  %v9954_v46 = vor.u32 %v11694_v17, %v9951_v63  ;;  %v10239_v7 = vld [vmem:[%s12081_s28 + $0x1578] sm:$0xf0]  ;;  %v9930_v16 = vor.u32 %v11688_v56, %v9927_v0  ;;  %v9994_v54 = vor.u32 %v11704_v9, %v9991_v1  ;;  %v10279_v56 = vld [vmem:[%s12081_s28 + $0x15c8] sm:$0xf0] }
 0x2f8   : > { %7072 = vmatpush.bf16.msra.mxu3 %v9738_v38  ;;  %7034 = vmatmul.bf16.vlgmr.msra.gmra.mxu0 %v12820_v50  ;;  %v9842_v50 = vor.u32 %v11666_v31, %v9839_v60  ;;  %v6841_v13 = vadd.f32 %v6840_v15, %v6828_v21  ;;  %v9815_v38 = vld [vmem:[%s12081_s28 + $0x1228] sm:$0xf0]  ;;  %v9946_v31 = vor.u32 %v11692_v22, %v9943_v14  ;;  %v11658_v60 = vld [vmem:[%s12081_s28 + $0x1214] sm:$0xf] }
 0x2f9   : > { %7078 = vmatpush.bf16.msrb.mxu0 %v9858_v40  ;;  %7047 = vmatmul.bf16.vlgmr.msra.gmra.mxu1 %v14282_v57  ;;  %v11676_v40 = vld [vmem:[%s12081_s28 + $0x12a4] sm:$0xf]  ;;  %v9818_v25 = vor.u32 %v11660_v37, %v9815_v38  ;;  %v11706_v57 = vld [vmem:[%s12081_s28 + $0x1394] sm:$0xf]  ;;  %v9810_v53 = vor.u32 %v11658_v60, %v9807_v42  ;;  %v10114_v17 = vor.u32 %v11734_v5, %v10111_v18  ;;  %v10167_v37 = vld [vmem:[%s12081_s28 + $0x14e8] sm:$0xf0] }
 0x2fa   : > { %7091 = vmatpush.bf16.msrb.mxu1 %v9922_v28  ;;  %7060 = vmatmul.bf16.vlgmr.msra.gmra.mxu2 %v14281_v62  ;;  %v10018_v28 = vor.u32 %v11710_v48, %v10015_v29  ;;  %v9935_v62 = vld [vmem:[%s12081_s28 + $0x1318] sm:$0xf0]  ;;  %v11750_v21 = vld [vmem:[%s12081_s28 + $0x14f4] sm:$0xf]  ;;  %v11732_v29 = vld [vmem:[%s12081_s28 + $0x1464] sm:$0xf] }
 0x2fb   : > { %7104 = vmatpush.bf16.msrb.mxu2 %v9986_v33  ;;  %7073 = vmatmul.bf16.vlgmr.msra.gmra.mxu3 %v14283_v45  ;;  %v11656_v45 = vld [vmem:[%s12081_s28 + $0x1204] sm:$0xf]  ;;  %v14286_v60 = vld [vmem:[#allocation8_spill] sm:$0xff]  ;;  %v10079_v18 = vld [vmem:[%s12081_s28 + $0x1438] sm:$0xf0] }
 0x2fc   : > { %7117 = vmatpush.bf16.msrb.mxu3 %v10050_v32  ;;  %v11764_v38 = vld [vmem:[%s12081_s28 + $0x1564] sm:$0xf]  ;;  %v11778_v42 = vld [vmem:[%s12081_s28 + $0x15d4] sm:$0xf] }
 0x2fd   : > { %7079 = vmatpush.bf16.msrb.mxu0 %v9850_v39  ;;  %v6853_v33 = vpop.f32.mrf.mxu2  ;;  %v6829_v34 = vpop.f32.mrf.mxu0  ;;  %v11726_v5 = vld [vmem:[%s12081_s28 + $0x1434] sm:$0xf] }
 0x2fe   : > { %7092 = vmatpush.bf16.msrb.mxu1 %v9914_v4  ;;  %v6854_v32 = vadd.f32 %v6853_v33, %v6841_v13  ;;  %v6866_v41 = vpop.f32.mrf.mxu3  ;;  %v6842_v39 = vpop.f32.mrf.mxu1  ;;  %v10303_v13 = vld [vmem:[%s12081_s28 + $0x15f8] sm:$0xf0]  ;;  %v10295_v33 = vld [vmem:[%s12081_s28 + $0x15e8] sm:$0xf0] }
 0x2ff   : > { %7105 = vmatpush.bf16.msrb.mxu2 %v9978_v11  ;;  %v9882_v11 = vor.u32 %v11676_v40, %v9879_v35  ;;  %v10231_v40 = vld [vmem:[%s12081_s28 + $0x1568] sm:$0xf0]  ;;  %v11762_v39 = vld [vmem:[%s12081_s28 + $0x1554] sm:$0xf] }
 0x300   : > { %7118 = vmatpush.bf16.msrb.mxu3 %v10042_v43  ;;  %v13907_v4 = vadd.f32 %v6866_v41, %v6854_v32  ;;  %v11674_v43 = vld [vmem:[%s12081_s28 + $0x1294] sm:$0xf]  ;;  %v10234_v14 = vor.u32 %v11764_v38, %v10231_v40  ;;  %v10095_v41 = vld [vmem:[%s12081_s28 + $0x1458] sm:$0xf0]  ;;  %v11772_v40 = vld [vmem:[%s12081_s28 + $0x15a4] sm:$0xf] }
 0x301   : > { %7080 = vmatpush.bf16.msrb.mxu0 %v9842_v50  ;;  %v9799_v50 = vld [vmem:[%s12081_s28 + $0x1208] sm:$0xf0]  ;;  %v11730_v32 = vld [vmem:[%s12081_s28 + $0x1454] sm:$0xf] }
 0x302   : > { %7093 = vmatpush.bf16.msrb.mxu1 %v9906_v3  ;;  %v9874_v3 = vor.u32 %v11674_v43, %v9871_v19  ;;  %v9802_v15 = vor.u32 %v11656_v45, %v9799_v50  ;;  %v10287_v43 = vld [vmem:[%s12081_s28 + $0x15d8] sm:$0xf0]  ;;  %v10098_v19 = vor.u32 %v11730_v32, %v10095_v41  ;;  %v10151_v50 = vld [vmem:[%s12081_s28 + $0x14c8] sm:$0xf0] }
 0x303   : > { %7106 = vmatpush.bf16.msrb.mxu2 %v9970_v59  ;;  %v9938_v59 = vor.u32 %v11690_v44, %v9935_v62  ;;  %v10290_v45 = vor.u32 %v11778_v42, %v10287_v43  ;;  %v10255_v42 = vld [vmem:[%s12081_s28 + $0x1598] sm:$0xf0] }
 0x304   : > { %7119 = vmatpush.bf16.msrb.mxu3 %v10034_v8  ;;  %v10002_v8 = vor.u32 %v11706_v57, %v9999_v47  ;;  %v11728_v57 = vld [vmem:[%s12081_s28 + $0x1444] sm:$0xf]  ;;  %v10087_v47 = vld [vmem:[%s12081_s28 + $0x1448] sm:$0xf0] }
 0x305   : > { %7081 = vmatpush.bf16.msrb.mxu0 %v9834_v52  ;;  %v6855_v49 = vpop.f32.mrf.mxu2  ;;  %v10090_v0 = vor.u32 %v11728_v57, %v10087_v47  ;;  %v11736_v57 = vld [vmem:[%s12081_s28 + $0x1484] sm:$0xf]  ;;  %v10119_v47 = vld [vmem:[%s12081_s28 + $0x1488] sm:$0xf0] }
 0x306   : > { %7094 = vmatpush.bf16.msrb.mxu1 %v9898_v6  ;;  %v6868_v52 = vpop.f32.mrf.mxu3  ;;  %v10175_v6 = vld [vmem:[%s12081_s28 + $0x14f8] sm:$0xf0] }
 0x307   : > { %7107 = vmatpush.bf16.msrb.mxu2 %v9962_v30  ;;  %v11766_v30 = vld [vmem:[%s12081_s28 + $0x1574] sm:$0xf]  ;;  %v10178_v63 = vor.u32 %v11750_v21, %v10175_v6  ;;  %v10282_v52 = vor.u32 %v11776_v20, %v10279_v56  ;;  %v10143_v6 = vld [vmem:[%s12081_s28 + $0x14b8] sm:$0xf0] }
 0x308   : > { %7120 = vmatpush.bf16.msrb.mxu3 %v10026_v58  ;;  %v11782_v58 = vld [vmem:[%s12081_s28 + $0x15f4] sm:$0xf]  ;;  %v10242_v48 = vor.u32 %v11766_v30, %v10239_v7  ;;  %v10367_v56 = vld [vmem:[%s12081_s28 + $0x1678] sm:$0xf0] }
 0x309   : > { %7082 = vmatpush.bf16.msrb.mxu0 %v9826_v27  ;;  %v10103_v27 = vld [vmem:[%s12081_s28 + $0x1468] sm:$0xf0]  ;;  %v11742_v21 = vld [vmem:[%s12081_s28 + $0x14b4] sm:$0xf] }
 0x30a   : > { %7095 = vmatpush.bf16.msrb.mxu1 %v9890_v61  ;;  %v11748_v61 = vld [vmem:[%s12081_s28 + $0x14e4] sm:$0xf]  ;;  %v10106_v35 = vor.u32 %v11732_v29, %v10103_v27  ;;  %v11758_v30 = vld [vmem:[%s12081_s28 + $0x1534] sm:$0xf]  ;;  %v10135_v27 = vld [vmem:[%s12081_s28 + $0x14a8] sm:$0xf0] }
 0x30b   : > { %7108 = vmatpush.bf16.msrb.mxu2 %v9954_v46  ;;  %v10306_v46 = vor.u32 %v11782_v58, %v10303_v13  ;;  %v10170_v22 = vor.u32 %v11748_v61, %v10167_v37  ;;  %v11774_v7 = vld [vmem:[%s12081_s28 + $0x15b4] sm:$0xf]  ;;  %v10146_v58 = vor.u32 %v11742_v21, %v10143_v6  ;;  %v11756_v61 = vld [vmem:[%s12081_s28 + $0x1524] sm:$0xf] }
 0x30c   : > { %7121 = vmatpush.bf16.msrb.mxu3 %v10018_v28  ;;  %v11780_v28 = vld [vmem:[%s12081_s28 + $0x15e4] sm:$0xf]  ;;  %v11798_v20 = vld [vmem:[%s12081_s28 + $0x1674] sm:$0xf] }
 0x30d   : > { %7083 = vmatpush.bf16.msrb.mxu0 %v9818_v25  ;;  %v10298_v34 = vor.u32 %v11780_v28, %v10295_v33  ;;  %v10159_v25 = vld [vmem:[%s12081_s28 + $0x14d8] sm:$0xf0]  ;;  %v10263_v28 = vld [vmem:[%s12081_s28 + $0x15a8] sm:$0xf0] }
 0x30e   : > { %7096 = vmatpush.bf16.msrb.mxu1 %v9882_v11  ;;  %v10223_v11 = vld [vmem:[%s12081_s28 + $0x1558] sm:$0xf0]  ;;  %v10162_v44 = vor.u32 %v11746_v2, %v10159_v25  ;;  %v11722_v2 = vld [vmem:[%s12081_s28 + $0x1414] sm:$0xf]  ;;  %v10266_v25 = vor.u32 %v11772_v40, %v10263_v28  ;;  %v14288_v28 = vld [vmem:[#allocation10_spill] sm:$0xff] }
 0x30f   : > { %7109 = vmatpush.bf16.msrb.mxu2 %v9946_v31  ;;  %v14285_v31 = vld [vmem:[#allocation7_spill] sm:$0xff]  ;;  %v10226_v62 = vor.u32 %v11762_v39, %v10223_v11  ;;  %v10127_v39 = vld [vmem:[%s12081_s28 + $0x1498] sm:$0xf0]  ;;  %v11754_v11 = vld [vmem:[%s12081_s28 + $0x1514] sm:$0xf] }
 0x310   : > { %7122 = vmatpush.bf16.msrb.mxu3 %v10010_v24  ;;  %v14287_v24 = vld [vmem:[#allocation9_spill] sm:$0xff]  ;;  %v11810_v40 = vld [vmem:[%s12081_s28 + $0x16d4] sm:$0xf] }
 0x311   : > { %7084 = vmatpush.bf16.msrb.mxu0 %v9810_v53  ;;  %v11744_v53 = vld [vmem:[%s12081_s28 + $0x14c4] sm:$0xf] }
 0x312   : > { %7097 = vmatpush.bf16.msrb.mxu1 %v9874_v3  ;;  %v11760_v3 = vld [vmem:[%s12081_s28 + $0x1544] sm:$0xf]  ;;  %v10154_v1 = vor.u32 %v11744_v53, %v10151_v50  ;;  %v10183_v50 = vld [vmem:[%s12081_s28 + $0x1508] sm:$0xf0] }
 0x313   : > { %7110 = vmatpush.bf16.msrb.mxu2 %v9938_v59  ;;  %v10215_v59 = vld [vmem:[%s12081_s28 + $0x1548] sm:$0xf0]  ;;  %v11752_v53 = vld [vmem:[%s12081_s28 + $0x1504] sm:$0xf] }
 0x314   : > { %7123 = vmatpush.bf16.msrb.mxu3 %v10002_v8  ;;  %v10218_v49 = vor.u32 %v11760_v3, %v10215_v59  ;;  %v11768_v3 = vld [vmem:[%s12081_s28 + $0x1584] sm:$0xf]  ;;  %v10247_v59 = vld [vmem:[%s12081_s28 + $0x1588] sm:$0xf0]  ;;  %v10186_v21 = vor.u32 %v11752_v53, %v10183_v50 }
 0x315   : > { %7085 = vmatpush.bf16.msrb.mxu0 %v9802_v15  ;;  %v6879_v23 = vpop.f32.mrf.mxu0  ;;  %v10250_v6 = vor.u32 %v11768_v3, %v10247_v59  ;;  %v10535_v53 = vld [vmem:[%s12081_s28 + $0x17c8] sm:$0xf0] }
 0x316   : > { %7098 = vmatpush.bf16.msrb.mxu1 %v9866_v12  ;;  %v6880_v8 = vadd.f32 %v6879_v23, %v13907_v4  ;;  %v6892_v9 = vpop.f32.mrf.mxu1  ;;  %v10207_v4 = vld [vmem:[%s12081_s28 + $0x1538] sm:$0xf0] }
 0x317   : > { %7111 = vmatpush.bf16.msrb.mxu2 %v9930_v16  ;;  %v10271_v12 = vld [vmem:[%s12081_s28 + $0x15b8] sm:$0xf0]  ;;  %v10082_v16 = vor.u32 %v11726_v5, %v10079_v18  ;;  %v10210_v13 = vor.u32 %v11758_v30, %v10207_v4  ;;  %v10122_v18 = vor.u32 %v11736_v57, %v10119_v47  ;;  %v10370_v30 = vor.u32 %v11798_v20, %v10367_v56  ;;  %v11840_v47 = vld [vmem:[%s12081_s28 + $0x17c4] sm:$0xf]  ;;  %v11790_v20 = vld [vmem:[%s12081_s28 + $0x1634] sm:$0xf] }
 0x318   : > { %7124 = vmatpush.bf16.msrb.mxu3 %v9994_v54  ;;  %7086 = vmatmul.bf16.vlgmr.msrb.gmra.mxu0 %v14284_v51  ;;  %v6893_v15 = vadd.f32 %v6892_v9, %v6880_v8  ;;  %v11724_v54 = vld [vmem:[%s12081_s28 + $0x1424] sm:$0xf]  ;;  %v10063_v51 = vld [vmem:[%s12081_s28 + $0x1418] sm:$0xf0]  ;;  %v11814_v8 = vld [vmem:[%s12081_s28 + $0x16f4] sm:$0xf] }
 0x319   : > { %7130 = vmatpush.bf16.msra.mxu0 %v10114_v17  ;;  %7099 = vmatmul.bf16.vlgmr.msrb.gmra.mxu1 %v14286_v60  ;;  %v10071_v17 = vld [vmem:[%s12081_s28 + $0x1428] sm:$0xf0]  ;;  %v11770_v60 = vld [vmem:[%s12081_s28 + $0x1594] sm:$0xf]  ;;  %v10066_v43 = vor.u32 %v11722_v2, %v10063_v51  ;;  %v10495_v5 = vld [vmem:[%s12081_s28 + $0x1778] sm:$0xf0] }
 0x31a   : > { %7143 = vmatpush.bf16.msra.mxu1 %v10178_v63  ;;  %7112 = vmatmul.bf16.vlgmr.msrb.gmra.mxu2 %v14285_v31  ;;  %v11740_v63 = vld [vmem:[%s12081_s28 + $0x14a4] sm:$0xf]  ;;  %v10191_v31 = vld [vmem:[%s12081_s28 + $0x1518] sm:$0xf0]  ;;  %v14290_v2 = vld [vmem:[#allocation12_spill] sm:$0xff] }
 0x31b   : > { %7156 = vmatpush.bf16.msra.mxu2 %v10242_v48  ;;  %7125 = vmatmul.bf16.vlgmr.msrb.gmra.mxu3 %v14287_v24  ;;  %v10274_v48 = vor.u32 %v11774_v7, %v10271_v12  ;;  %v10138_v32 = vor.u32 %v11740_v63, %v10135_v27  ;;  %v11720_v24 = vld [vmem:[%s12081_s28 + $0x1404] sm:$0xf]  ;;  %v10487_v63 = vld [vmem:[%s12081_s28 + $0x1768] sm:$0xf0]  ;;  %v11842_v51 = vld [vmem:[%s12081_s28 + $0x17d4] sm:$0xf] }
 0x31c   : > { %7169 = vmatpush.bf16.msra.mxu3 %v10306_v46  ;;  %v10199_v46 = vld [vmem:[%s12081_s28 + $0x1528] sm:$0xf0]  ;;  %v11796_v12 = vld [vmem:[%s12081_s28 + $0x1664] sm:$0xf]  ;;  %v10335_v56 = vld [vmem:[%s12081_s28 + $0x1638] sm:$0xf0] }
 0x31d   : > { %7131 = vmatpush.bf16.msra.mxu0 %v10106_v35  ;;  %v6905_v29 = vpop.f32.mrf.mxu2  ;;  %v6881_v33 = vpop.f32.mrf.mxu0  ;;  %v10074_v35 = vor.u32 %v11724_v54, %v10071_v17  ;;  %v10202_v41 = vor.u32 %v11756_v61, %v10199_v46  ;;  %v10423_v54 = vld [vmem:[%s12081_s28 + $0x16e8] sm:$0xf0]  ;;  %v11828_v17 = vld [vmem:[%s12081_s28 + $0x1764] sm:$0xf] }
 0x31e   : > { %7144 = vmatpush.bf16.msra.mxu1 %v10170_v22  ;;  %v6906_v37 = vadd.f32 %v6905_v29, %v6893_v15  ;;  %v6918_v38 = vpop.f32.mrf.mxu3  ;;  %v6894_v22 = vpop.f32.mrf.mxu1  ;;  %v10559_v15 = vld [vmem:[%s12081_s28 + $0x17f8] sm:$0xf0]  ;;  %v10551_v29 = vld [vmem:[%s12081_s28 + $0x17e8] sm:$0xf0]  ;;  %v10490_v46 = vor.u32 %v11828_v17, %v10487_v63  ;;  %v11836_v63 = vld [vmem:[%s12081_s28 + $0x17a4] sm:$0xf] }
 0x31f   : > { %7157 = vmatpush.bf16.msra.mxu2 %v10234_v14  ;;  %v11826_v22 = vld [vmem:[%s12081_s28 + $0x1754] sm:$0xf] }
 0x320   : > { %7170 = vmatpush.bf16.msra.mxu3 %v10298_v34  ;;  %v13978_v14 = vadd.f32 %v6918_v38, %v6906_v37  ;;  %v11738_v34 = vld [vmem:[%s12081_s28 + $0x1494] sm:$0xf]  ;;  %v10351_v38 = vld [vmem:[%s12081_s28 + $0x1658] sm:$0xf0] }
 0x321   : > { %7132 = vmatpush.bf16.msra.mxu0 %v10098_v19  ;;  %v10055_v19 = vld [vmem:[%s12081_s28 + $0x1408] sm:$0xf0]  ;;  %v11794_v37 = vld [vmem:[%s12081_s28 + $0x1654] sm:$0xf] }
 0x322   : > { %7145 = vmatpush.bf16.msra.mxu1 %v10162_v44  ;;  %v10130_v44 = vor.u32 %v11738_v34, %v10127_v39  ;;  %v10058_v9 = vor.u32 %v11720_v24, %v10055_v19  ;;  %v10543_v34 = vld [vmem:[%s12081_s28 + $0x17d8] sm:$0xf0]  ;;  %v10354_v39 = vor.u32 %v11794_v37, %v10351_v38  ;;  %v10407_v19 = vld [vmem:[%s12081_s28 + $0x16c8] sm:$0xf0] }
 0x323   : > { %7158 = vmatpush.bf16.msra.mxu2 %v10226_v62  ;;  %v10194_v62 = vor.u32 %v11754_v11, %v10191_v31  ;;  %v10546_v24 = vor.u32 %v11842_v51, %v10543_v34  ;;  %v10511_v51 = vld [vmem:[%s12081_s28 + $0x1798] sm:$0xf0] }
 0x324   : > { %7171 = vmatpush.bf16.msra.mxu3 %v10290_v45  ;;  %v10258_v45 = vor.u32 %v11770_v60, %v10255_v42  ;;  %v11792_v60 = vld [vmem:[%s12081_s28 + $0x1644] sm:$0xf]  ;;  %v10343_v42 = vld [vmem:[%s12081_s28 + $0x1648] sm:$0xf0] }
 0x325   : > { %7133 = vmatpush.bf16.msra.mxu0 %v10090_v0  ;;  %v6907_v23 = vpop.f32.mrf.mxu2  ;;  %v10346_v50 = vor.u32 %v11792_v60, %v10343_v42  ;;  %v11800_v60 = vld [vmem:[%s12081_s28 + $0x1684] sm:$0xf]  ;;  %v10375_v42 = vld [vmem:[%s12081_s28 + $0x1688] sm:$0xf0] }
 0x326   : > { %7146 = vmatpush.bf16.msra.mxu1 %v10154_v1  ;;  %v6920_v0 = vpop.f32.mrf.mxu3  ;;  %v10431_v1 = vld [vmem:[%s12081_s28 + $0x16f8] sm:$0xf0] }
 0x327   : > { %7159 = vmatpush.bf16.msra.mxu2 %v10218_v49  ;;  %v11830_v49 = vld [vmem:[%s12081_s28 + $0x1774] sm:$0xf]  ;;  %v10434_v4 = vor.u32 %v11814_v8, %v10431_v1  ;;  %v10538_v0 = vor.u32 %v11840_v47, %v10535_v53  ;;  %v10399_v1 = vld [vmem:[%s12081_s28 + $0x16b8] sm:$0xf0] }
 0x328   : > { %7172 = vmatpush.bf16.msra.mxu3 %v10282_v52  ;;  %v11846_v52 = vld [vmem:[%s12081_s28 + $0x17f4] sm:$0xf]  ;;  %v10498_v7 = vor.u32 %v11830_v49, %v10495_v5  ;;  %v10623_v53 = vld [vmem:[%s12081_s28 + $0x1878] sm:$0xf0] }
 0x329   : > { %7134 = vmatpush.bf16.msra.mxu0 %v10082_v16  ;;  %v10359_v16 = vld [vmem:[%s12081_s28 + $0x1668] sm:$0xf0]  ;;  %v11806_v8 = vld [vmem:[%s12081_s28 + $0x16b4] sm:$0xf] }
 0x32a   : > { %7147 = vmatpush.bf16.msra.mxu1 %v10146_v58  ;;  %v11812_v58 = vld [vmem:[%s12081_s28 + $0x16e4] sm:$0xf]  ;;  %v10362_v27 = vor.u32 %v11796_v12, %v10359_v16  ;;  %v11822_v49 = vld [vmem:[%s12081_s28 + $0x1734] sm:$0xf]  ;;  %v10391_v16 = vld [vmem:[%s12081_s28 + $0x16a8] sm:$0xf0] }
 0x32b   : > { %7160 = vmatpush.bf16.msra.mxu2 %v10210_v13  ;;  %v10562_v13 = vor.u32 %v11846_v52, %v10559_v15  ;;  %v10426_v61 = vor.u32 %v11812_v58, %v10423_v54  ;;  %v11838_v5 = vld [vmem:[%s12081_s28 + $0x17b4] sm:$0xf]  ;;  %v10402_v52 = vor.u32 %v11806_v8, %v10399_v1  ;;  %v11820_v58 = vld [vmem:[%s12081_s28 + $0x1724] sm:$0xf] }
 0x32c   : > { %7173 = vmatpush.bf16.msra.mxu3 %v10274_v48  ;;  %v11844_v48 = vld [vmem:[%s12081_s28 + $0x17e4] sm:$0xf]  ;;  %v11862_v47 = vld [vmem:[%s12081_s28 + $0x1874] sm:$0xf] }
 0x32d   : > { %7135 = vmatpush.bf16.msra.mxu0 %v10074_v35  ;;  %v10554_v33 = vor.u32 %v11844_v48, %v10551_v29  ;;  %v10415_v35 = vld [vmem:[%s12081_s28 + $0x16d8] sm:$0xf0]  ;;  %v10519_v48 = vld [vmem:[%s12081_s28 + $0x17a8] sm:$0xf0] }
 0x32e   : > { %7148 = vmatpush.bf16.msra.mxu1 %v10138_v32  ;;  %v10479_v32 = vld [vmem:[%s12081_s28 + $0x1758] sm:$0xf0]  ;;  %v10418_v11 = vor.u32 %v11810_v40, %v10415_v35  ;;  %v11786_v40 = vld [vmem:[%s12081_s28 + $0x1614] sm:$0xf]  ;;  %v10522_v35 = vor.u32 %v11836_v63, %v10519_v48  ;;  %v14292_v48 = vld [vmem:[#allocation14_spill] sm:$0xff] }
 0x32f   : > { %7161 = vmatpush.bf16.msra.mxu2 %v10202_v41  ;;  %v14289_v41 = vld [vmem:[#allocation11_spill] sm:$0xff]  ;;  %v10482_v31 = vor.u32 %v11826_v22, %v10479_v32  ;;  %v10383_v22 = vld [vmem:[%s12081_s28 + $0x1698] sm:$0xf0]  ;;  %v11818_v32 = vld [vmem:[%s12081_s28 + $0x1714] sm:$0xf] }
 0x330   : > { %7174 = vmatpush.bf16.msra.mxu3 %v10266_v25  ;;  %v14291_v25 = vld [vmem:[#allocation13_spill] sm:$0xff]  ;;  %v11874_v63 = vld [vmem:[%s12081_s28 + $0x18d4] sm:$0xf] }
 0x331   : > { %7136 = vmatpush.bf16.msra.mxu0 %v10066_v43  ;;  %v11808_v43 = vld [vmem:[%s12081_s28 + $0x16c4] sm:$0xf] }
 0x332   : > { %7149 = vmatpush.bf16.msra.mxu1 %v10130_v44  ;;  %v11824_v44 = vld [vmem:[%s12081_s28 + $0x1744] sm:$0xf]  ;;  %v10410_v59 = vor.u32 %v11808_v43, %v10407_v19  ;;  %v10439_v19 = vld [vmem:[%s12081_s28 + $0x1708] sm:$0xf0] }
 0x333   : > { %7162 = vmatpush.bf16.msra.mxu2 %v10194_v62  ;;  %v10471_v62 = vld [vmem:[%s12081_s28 + $0x1748] sm:$0xf0]  ;;  %v11816_v43 = vld [vmem:[%s12081_s28 + $0x1704] sm:$0xf] }
 0x334   : > { %7175 = vmatpush.bf16.msra.mxu3 %v10258_v45  ;;  %v10474_v23 = vor.u32 %v11824_v44, %v10471_v62  ;;  %v11832_v44 = vld [vmem:[%s12081_s28 + $0x1784] sm:$0xf]  ;;  %v10503_v62 = vld [vmem:[%s12081_s28 + $0x1788] sm:$0xf0]  ;;  %v10442_v8 = vor.u32 %v11816_v43, %v10439_v19 }
 0x335   : > { %7137 = vmatpush.bf16.msra.mxu0 %v10058_v9  ;;  %v6931_v57 = vpop.f32.mrf.mxu0  ;;  %v10506_v1 = vor.u32 %v11832_v44, %v10503_v62  ;;  %v10791_v43 = vld [vmem:[%s12081_s28 + $0x19c8] sm:$0xf0] }
 0x336   : > { %7150 = vmatpush.bf16.msra.mxu1 %v10122_v18  ;;  %v6932_v45 = vadd.f32 %v6931_v57, %v13978_v14  ;;  %v6944_v3 = vpop.f32.mrf.mxu1  ;;  %v10463_v14 = vld [vmem:[%s12081_s28 + $0x1738] sm:$0xf0] }
 0x337   : > { %7163 = vmatpush.bf16.msra.mxu2 %v10186_v21  ;;  %v10527_v18 = vld [vmem:[%s12081_s28 + $0x17b8] sm:$0xf0]  ;;  %v10338_v21 = vor.u32 %v11790_v20, %v10335_v56  ;;  %v10466_v15 = vor.u32 %v11822_v49, %v10463_v14  ;;  %v10378_v56 = vor.u32 %v11800_v60, %v10375_v42  ;;  %v10626_v49 = vor.u32 %v11862_v47, %v10623_v53  ;;  %v11904_v42 = vld [vmem:[%s12081_s28 + $0x19c4] sm:$0xf]  ;;  %v11854_v47 = vld [vmem:[%s12081_s28 + $0x1834] sm:$0xf] }
 0x338   : > { %7176 = vmatpush.bf16.msra.mxu3 %v10250_v6  ;;  %7138 = vmatmul.bf16.vlgmr.msra.gmra.mxu0 %v14288_v28  ;;  %v6945_v9 = vadd.f32 %v6944_v3, %v6932_v45  ;;  %v11788_v6 = vld [vmem:[%s12081_s28 + $0x1624] sm:$0xf]  ;;  %v10319_v28 = vld [vmem:[%s12081_s28 + $0x1618] sm:$0xf0]  ;;  %v11878_v45 = vld [vmem:[%s12081_s28 + $0x18f4] sm:$0xf] }
 0x339   : > { %7182 = vmatpush.bf16.msrb.mxu0 %v10370_v30  ;;  %7151 = vmatmul.bf16.vlgmr.msra.gmra.mxu1 %v14290_v2  ;;  %v10327_v30 = vld [vmem:[%s12081_s28 + $0x1628] sm:$0xf0]  ;;  %v11834_v2 = vld [vmem:[%s12081_s28 + $0x1794] sm:$0xf]  ;;  %v10322_v34 = vor.u32 %v11786_v40, %v10319_v28  ;;  %v10751_v20 = vld [vmem:[%s12081_s28 + $0x1978] sm:$0xf0] }
 0x33a   : > { %7195 = vmatpush.bf16.msrb.mxu1 %v10434_v4  ;;  %7164 = vmatmul.bf16.vlgmr.msra.gmra.mxu2 %v14289_v41  ;;  %v11804_v4 = vld [vmem:[%s12081_s28 + $0x16a4] sm:$0xf]  ;;  %v10447_v41 = vld [vmem:[%s12081_s28 + $0x1718] sm:$0xf0]  ;;  %v14294_v40 = vld [vmem:[#allocation16_spill] sm:$0xff] }
 0x33b   : > { %7208 = vmatpush.bf16.msrb.mxu2 %v10498_v7  ;;  %7177 = vmatmul.bf16.vlgmr.msra.gmra.mxu3 %v14291_v25  ;;  %v10530_v7 = vor.u32 %v11838_v5, %v10527_v18  ;;  %v10394_v37 = vor.u32 %v11804_v4, %v10391_v16  ;;  %v11784_v25 = vld [vmem:[%s12081_s28 + $0x1604] sm:$0xf]  ;;  %v10743_v4 = vld [vmem:[%s12081_s28 + $0x1968] sm:$0xf0]  ;;  %v11906_v28 = vld [vmem:[%s12081_s28 + $0x19d4] sm:$0xf] }
 0x33c   : > { %7221 = vmatpush.bf16.msrb.mxu3 %v10562_v13  ;;  %v10455_v13 = vld [vmem:[%s12081_s28 + $0x1728] sm:$0xf0]  ;;  %v11860_v18 = vld [vmem:[%s12081_s28 + $0x1864] sm:$0xf]  ;;  %v10591_v53 = vld [vmem:[%s12081_s28 + $0x1838] sm:$0xf0] }
 0x33d   : > { %7183 = vmatpush.bf16.msrb.mxu0 %v10362_v27  ;;  %v6957_v12 = vpop.f32.mrf.mxu2  ;;  %v6933_v29 = vpop.f32.mrf.mxu0  ;;  %v10330_v27 = vor.u32 %v11788_v6, %v10327_v30  ;;  %v10458_v38 = vor.u32 %v11820_v58, %v10455_v13  ;;  %v10679_v6 = vld [vmem:[%s12081_s28 + $0x18e8] sm:$0xf0]  ;;  %v11892_v30 = vld [vmem:[%s12081_s28 + $0x1964] sm:$0xf] }
 0x33e   : > { %7196 = vmatpush.bf16.msrb.mxu1 %v10426_v61  ;;  %v6958_v54 = vadd.f32 %v6957_v12, %v6945_v9  ;;  %v6970_v17 = vpop.f32.mrf.mxu3  ;;  %v6946_v61 = vpop.f32.mrf.mxu1  ;;  %v10815_v9 = vld [vmem:[%s12081_s28 + $0x19f8] sm:$0xf0]  ;;  %v10807_v12 = vld [vmem:[%s12081_s28 + $0x19e8] sm:$0xf0]  ;;  %v10746_v13 = vor.u32 %v11892_v30, %v10743_v4  ;;  %v11900_v4 = vld [vmem:[%s12081_s28 + $0x19a4] sm:$0xf] }
 0x33f   : > { %7209 = vmatpush.bf16.msrb.mxu2 %v10490_v46  ;;  %v11890_v61 = vld [vmem:[%s12081_s28 + $0x1954] sm:$0xf] }
 0x340   : > { %7222 = vmatpush.bf16.msrb.mxu3 %v10554_v33  ;;  %v14049_v46 = vadd.f32 %v6970_v17, %v6958_v54  ;;  %v11802_v33 = vld [vmem:[%s12081_s28 + $0x1694] sm:$0xf]  ;;  %v10607_v17 = vld [vmem:[%s12081_s28 + $0x1858] sm:$0xf0] }
 0x341   : > { %7184 = vmatpush.bf16.msrb.mxu0 %v10354_v39  ;;  %v10311_v39 = vld [vmem:[%s12081_s28 + $0x1608] sm:$0xf0]  ;;  %v11858_v54 = vld [vmem:[%s12081_s28 + $0x1854] sm:$0xf] }
 0x342   : > { %7197 = vmatpush.bf16.msrb.mxu1 %v10418_v11  ;;  %v10386_v11 = vor.u32 %v11802_v33, %v10383_v22  ;;  %v10314_v3 = vor.u32 %v11784_v25, %v10311_v39  ;;  %v10799_v33 = vld [vmem:[%s12081_s28 + $0x19d8] sm:$0xf0]  ;;  %v10610_v22 = vor.u32 %v11858_v54, %v10607_v17  ;;  %v10663_v39 = vld [vmem:[%s12081_s28 + $0x18c8] sm:$0xf0] }
 0x343   : > { %7210 = vmatpush.bf16.msrb.mxu2 %v10482_v31  ;;  %v10450_v31 = vor.u32 %v11818_v32, %v10447_v41  ;;  %v10802_v25 = vor.u32 %v11906_v28, %v10799_v33  ;;  %v10767_v28 = vld [vmem:[%s12081_s28 + $0x1998] sm:$0xf0] }
 0x344   : > { %7223 = vmatpush.bf16.msrb.mxu3 %v10546_v24  ;;  %v10514_v24 = vor.u32 %v11834_v2, %v10511_v51  ;;  %v11856_v2 = vld [vmem:[%s12081_s28 + $0x1844] sm:$0xf]  ;;  %v10599_v51 = vld [vmem:[%s12081_s28 + $0x1848] sm:$0xf0] }
 0x345   : > { %7185 = vmatpush.bf16.msrb.mxu0 %v10346_v50  ;;  %v6959_v57 = vpop.f32.mrf.mxu2  ;;  %v10602_v19 = vor.u32 %v11856_v2, %v10599_v51  ;;  %v11864_v2 = vld [vmem:[%s12081_s28 + $0x1884] sm:$0xf]  ;;  %v10631_v51 = vld [vmem:[%s12081_s28 + $0x1888] sm:$0xf0] }
 0x346   : > { %7198 = vmatpush.bf16.msrb.mxu1 %v10410_v59  ;;  %v6972_v50 = vpop.f32.mrf.mxu3  ;;  %v10687_v59 = vld [vmem:[%s12081_s28 + $0x18f8] sm:$0xf0] }
 0x347   : > { %7211 = vmatpush.bf16.msrb.mxu2 %v10474_v23  ;;  %v11894_v23 = vld [vmem:[%s12081_s28 + $0x1974] sm:$0xf]  ;;  %v10690_v14 = vor.u32 %v11878_v45, %v10687_v59  ;;  %v10794_v50 = vor.u32 %v11904_v42, %v10791_v43  ;;  %v10655_v59 = vld [vmem:[%s12081_s28 + $0x18b8] sm:$0xf0] }
 0x348   : > { %7224 = vmatpush.bf16.msrb.mxu3 %v10538_v0  ;;  %v11910_v0 = vld [vmem:[%s12081_s28 + $0x19f4] sm:$0xf]  ;;  %v10754_v5 = vor.u32 %v11894_v23, %v10751_v20  ;;  %v10879_v43 = vld [vmem:[%s12081_s28 + $0x1a78] sm:$0xf0] }
 0x349   : > { %7186 = vmatpush.bf16.msrb.mxu0 %v10338_v21  ;;  %v10615_v21 = vld [vmem:[%s12081_s28 + $0x1868] sm:$0xf0]  ;;  %v11870_v45 = vld [vmem:[%s12081_s28 + $0x18b4] sm:$0xf] }
 0x34a   : > { %7199 = vmatpush.bf16.msrb.mxu1 %v10402_v52  ;;  %v11876_v52 = vld [vmem:[%s12081_s28 + $0x18e4] sm:$0xf]  ;;  %v10618_v16 = vor.u32 %v11860_v18, %v10615_v21  ;;  %v11886_v23 = vld [vmem:[%s12081_s28 + $0x1934] sm:$0xf]  ;;  %v10647_v21 = vld [vmem:[%s12081_s28 + $0x18a8] sm:$0xf0] }
 0x34b   : > { %7212 = vmatpush.bf16.msrb.mxu2 %v10466_v15  ;;  %v10818_v15 = vor.u32 %v11910_v0, %v10815_v9  ;;  %v10682_v58 = vor.u32 %v11876_v52, %v10679_v6  ;;  %v11902_v20 = vld [vmem:[%s12081_s28 + $0x19b4] sm:$0xf]  ;;  %v10658_v0 = vor.u32 %v11870_v45, %v10655_v59  ;;  %v11884_v52 = vld [vmem:[%s12081_s28 + $0x1924] sm:$0xf] }
 0x34c   : > { %7225 = vmatpush.bf16.msrb.mxu3 %v10530_v7  ;;  %v11908_v7 = vld [vmem:[%s12081_s28 + $0x19e4] sm:$0xf]  ;;  %v11926_v42 = vld [vmem:[%s12081_s28 + $0x1a74] sm:$0xf] }
 0x34d   : > { %7187 = vmatpush.bf16.msrb.mxu0 %v10330_v27  ;;  %v10810_v29 = vor.u32 %v11908_v7, %v10807_v12  ;;  %v10671_v27 = vld [vmem:[%s12081_s28 + $0x18d8] sm:$0xf0]  ;;  %v10775_v7 = vld [vmem:[%s12081_s28 + $0x19a8] sm:$0xf0] }
 0x34e   : > { %7200 = vmatpush.bf16.msrb.mxu1 %v10394_v37  ;;  %v10735_v37 = vld [vmem:[%s12081_s28 + $0x1958] sm:$0xf0]  ;;  %v10674_v32 = vor.u32 %v11874_v63, %v10671_v27  ;;  %v11850_v63 = vld [vmem:[%s12081_s28 + $0x1814] sm:$0xf]  ;;  %v10778_v27 = vor.u32 %v11900_v4, %v10775_v7  ;;  %v14296_v7 = vld [vmem:[#allocation18_spill] sm:$0xff] }
 0x34f   : > { %7213 = vmatpush.bf16.msrb.mxu2 %v10458_v38  ;;  %v14293_v38 = vld [vmem:[#allocation15_spill] sm:$0xff]  ;;  %v10738_v41 = vor.u32 %v11890_v61, %v10735_v37  ;;  %v10639_v61 = vld [vmem:[%s12081_s28 + $0x1898] sm:$0xf0]  ;;  %v11882_v37 = vld [vmem:[%s12081_s28 + $0x1914] sm:$0xf] }
 0x350   : > { %7226 = vmatpush.bf16.msrb.mxu3 %v10522_v35  ;;  %v14295_v35 = vld [vmem:[#allocation17_spill] sm:$0xff]  ;;  %v11938_v4 = vld [vmem:[%s12081_s28 + $0x1ad4] sm:$0xf] }
 0x351   : > { %7188 = vmatpush.bf16.msrb.mxu0 %v10322_v34  ;;  %v11872_v34 = vld [vmem:[%s12081_s28 + $0x18c4] sm:$0xf] }
 0x352   : > { %7201 = vmatpush.bf16.msrb.mxu1 %v10386_v11  ;;  %v11888_v11 = vld [vmem:[%s12081_s28 + $0x1944] sm:$0xf]  ;;  %v10666_v62 = vor.u32 %v11872_v34, %v10663_v39  ;;  %v10695_v39 = vld [vmem:[%s12081_s28 + $0x1908] sm:$0xf0] }
 0x353   : > { %7214 = vmatpush.bf16.msrb.mxu2 %v10450_v31  ;;  %v10727_v31 = vld [vmem:[%s12081_s28 + $0x1948] sm:$0xf0]  ;;  %v11880_v34 = vld [vmem:[%s12081_s28 + $0x1904] sm:$0xf] }
 0x354   : > { %7227 = vmatpush.bf16.msrb.mxu3 %v10514_v24  ;;  %v10730_v57 = vor.u32 %v11888_v11, %v10727_v31  ;;  %v11896_v11 = vld [vmem:[%s12081_s28 + $0x1984] sm:$0xf]  ;;  %v10759_v31 = vld [vmem:[%s12081_s28 + $0x1988] sm:$0xf0]  ;;  %v10698_v45 = vor.u32 %v11880_v34, %v10695_v39 }
 0x355   : > { %7189 = vmatpush.bf16.msrb.mxu0 %v10314_v3  ;;  %v6983_v60 = vpop.f32.mrf.mxu0  ;;  %v10762_v59 = vor.u32 %v11896_v11, %v10759_v31  ;;  %v11047_v34 = vld [vmem:[%s12081_s28 + $0x1bc8] sm:$0xf0] }
 0x356   : > { %7202 = vmatpush.bf16.msrb.mxu1 %v10378_v56  ;;  %v6984_v24 = vadd.f32 %v6983_v60, %v14049_v46  ;;  %v6996_v44 = vpop.f32.mrf.mxu1  ;;  %v10719_v46 = vld [vmem:[%s12081_s28 + $0x1938] sm:$0xf0] }
 0x357   : > { %7215 = vmatpush.bf16.msrb.mxu2 %v10442_v8  ;;  %v10783_v56 = vld [vmem:[%s12081_s28 + $0x19b8] sm:$0xf0]  ;;  %v10594_v8 = vor.u32 %v11854_v47, %v10591_v53  ;;  %v10722_v9 = vor.u32 %v11886_v23, %v10719_v46  ;;  %v10634_v53 = vor.u32 %v11864_v2, %v10631_v51  ;;  %v10882_v23 = vor.u32 %v11926_v42, %v10879_v43  ;;  %v11968_v51 = vld [vmem:[%s12081_s28 + $0x1bc4] sm:$0xf]  ;;  %v11918_v42 = vld [vmem:[%s12081_s28 + $0x1a34] sm:$0xf] }
 0x358   : > { %7228 = vmatpush.bf16.msrb.mxu3 %v10506_v1  ;;  %7190 = vmatmul.bf16.vlgmr.msrb.gmra.mxu0 %v14292_v48  ;;  %v6997_v3 = vadd.f32 %v6996_v44, %v6984_v24  ;;  %v11852_v1 = vld [vmem:[%s12081_s28 + $0x1824] sm:$0xf]  ;;  %v10575_v48 = vld [vmem:[%s12081_s28 + $0x1818] sm:$0xf0]  ;;  %v11942_v24 = vld [vmem:[%s12081_s28 + $0x1af4] sm:$0xf] }
 0x359   : > { %7234 = vmatpush.bf16.msra.mxu0 %v10626_v49  ;;  %7203 = vmatmul.bf16.vlgmr.msrb.gmra.mxu1 %v14294_v40  ;;  %v10583_v49 = vld [vmem:[%s12081_s28 + $0x1828] sm:$0xf0]  ;;  %v11898_v40 = vld [vmem:[%s12081_s28 + $0x1994] sm:$0xf]  ;;  %v10578_v33 = vor.u32 %v11850_v63, %v10575_v48  ;;  %v11007_v47 = vld [vmem:[%s12081_s28 + $0x1b78] sm:$0xf0] }
 0x35a   : > { %7247 = vmatpush.bf16.msra.mxu1 %v10690_v14  ;;  %7216 = vmatmul.bf16.vlgmr.msrb.gmra.mxu2 %v14293_v38  ;;  %v11868_v14 = vld [vmem:[%s12081_s28 + $0x18a4] sm:$0xf]  ;;  %v10703_v38 = vld [vmem:[%s12081_s28 + $0x1918] sm:$0xf0]  ;;  %v14298_v63 = vld [vmem:[#allocation20_spill] sm:$0xff] }
 0x35b   : > { %7260 = vmatpush.bf16.msra.mxu2 %v10754_v5  ;;  %7229 = vmatmul.bf16.vlgmr.msrb.gmra.mxu3 %v14295_v35  ;;  %v10786_v5 = vor.u32 %v11902_v20, %v10783_v56  ;;  %v10650_v54 = vor.u32 %v11868_v14, %v10647_v21  ;;  %v11848_v35 = vld [vmem:[%s12081_s28 + $0x1804] sm:$0xf]  ;;  %v10999_v14 = vld [vmem:[%s12081_s28 + $0x1b68] sm:$0xf0]  ;;  %v11970_v48 = vld [vmem:[%s12081_s28 + $0x1bd4] sm:$0xf] }
 0x35c   : > { %7273 = vmatpush.bf16.msra.mxu3 %v10818_v15  ;;  %v10711_v15 = vld [vmem:[%s12081_s28 + $0x1928] sm:$0xf0]  ;;  %v11924_v56 = vld [vmem:[%s12081_s28 + $0x1a64] sm:$0xf]  ;;  %v10847_v43 = vld [vmem:[%s12081_s28 + $0x1a38] sm:$0xf0] }
 0x35d   : > { %7235 = vmatpush.bf16.msra.mxu0 %v10618_v16  ;;  %v7009_v18 = vpop.f32.mrf.mxu2  ;;  %v6985_v12 = vpop.f32.mrf.mxu0  ;;  %v10586_v16 = vor.u32 %v11852_v1, %v10583_v49  ;;  %v10714_v17 = vor.u32 %v11884_v52, %v10711_v15  ;;  %v10935_v1 = vld [vmem:[%s12081_s28 + $0x1ae8] sm:$0xf0]  ;;  %v11956_v49 = vld [vmem:[%s12081_s28 + $0x1b64] sm:$0xf] }
 0x35e   : > { %7248 = vmatpush.bf16.msra.mxu1 %v10682_v58  ;;  %v7010_v6 = vadd.f32 %v7009_v18, %v6997_v3  ;;  %v7022_v30 = vpop.f32.mrf.mxu3  ;;  %v6998_v58 = vpop.f32.mrf.mxu1  ;;  %v11071_v3 = vld [vmem:[%s12081_s28 + $0x1bf8] sm:$0xf0]  ;;  %v11063_v18 = vld [vmem:[%s12081_s28 + $0x1be8] sm:$0xf0]  ;;  %v11002_v15 = vor.u32 %v11956_v49, %v10999_v14  ;;  %v11964_v14 = vld [vmem:[%s12081_s28 + $0x1ba4] sm:$0xf] }
 0x35f   : > { %7261 = vmatpush.bf16.msra.mxu2 %v10746_v13  ;;  %v11954_v58 = vld [vmem:[%s12081_s28 + $0x1b54] sm:$0xf] }
 0x360   : > { %7274 = vmatpush.bf16.msra.mxu3 %v10810_v29  ;;  %v14120_v13 = vadd.f32 %v7022_v30, %v7010_v6  ;;  %v11866_v29 = vld [vmem:[%s12081_s28 + $0x1894] sm:$0xf]  ;;  %v10863_v30 = vld [vmem:[%s12081_s28 + $0x1a58] sm:$0xf0] }
 0x361   : > { %7236 = vmatpush.bf16.msra.mxu0 %v10610_v22  ;;  %v10567_v22 = vld [vmem:[%s12081_s28 + $0x1808] sm:$0xf0]  ;;  %v11922_v6 = vld [vmem:[%s12081_s28 + $0x1a54] sm:$0xf] }
 0x362   : > { %7249 = vmatpush.bf16.msra.mxu1 %v10674_v32  ;;  %v10642_v32 = vor.u32 %v11866_v29, %v10639_v61  ;;  %v10570_v44 = vor.u32 %v11848_v35, %v10567_v22  ;;  %v11055_v29 = vld [vmem:[%s12081_s28 + $0x1bd8] sm:$0xf0]  ;;  %v10866_v61 = vor.u32 %v11922_v6, %v10863_v30  ;;  %v10919_v22 = vld [vmem:[%s12081_s28 + $0x1ac8] sm:$0xf0] }
 0x363   : > { %7262 = vmatpush.bf16.msra.mxu2 %v10738_v41  ;;  %v10706_v41 = vor.u32 %v11882_v37, %v10703_v38  ;;  %v11058_v35 = vor.u32 %v11970_v48, %v11055_v29  ;;  %v11023_v48 = vld [vmem:[%s12081_s28 + $0x1b98] sm:$0xf0] }
 0x364   : > { %7275 = vmatpush.bf16.msra.mxu3 %v10802_v25  ;;  %v10770_v25 = vor.u32 %v11898_v40, %v10767_v28  ;;  %v11920_v40 = vld [vmem:[%s12081_s28 + $0x1a44] sm:$0xf]  ;;  %v10855_v28 = vld [vmem:[%s12081_s28 + $0x1a48] sm:$0xf0] }
 0x365   : > { %7237 = vmatpush.bf16.msra.mxu0 %v10602_v19  ;;  %v7011_v60 = vpop.f32.mrf.mxu2  ;;  %v10858_v39 = vor.u32 %v11920_v40, %v10855_v28  ;;  %v11928_v40 = vld [vmem:[%s12081_s28 + $0x1a84] sm:$0xf] }
 0x366   : > { %7250 = vmatpush.bf16.msra.mxu1 %v10666_v62  ;;  %v7024_v19 = vpop.f32.mrf.mxu3  ;;  %v10943_v62 = vld [vmem:[%s12081_s28 + $0x1af8] sm:$0xf0] }
 0x367   : > { %7263 = vmatpush.bf16.msra.mxu2 %v10730_v57  ;;  %v11958_v57 = vld [vmem:[%s12081_s28 + $0x1b74] sm:$0xf]  ;;  %v10946_v46 = vor.u32 %v11942_v24, %v10943_v62  ;;  %v11050_v19 = vor.u32 %v11968_v51, %v11047_v34  ;;  %v10911_v62 = vld [vmem:[%s12081_s28 + $0x1ab8] sm:$0xf0] }
 0x368   : > { %7276 = vmatpush.bf16.msra.mxu3 %v10794_v50  ;;  %v11974_v50 = vld [vmem:[%s12081_s28 + $0x1bf4] sm:$0xf]  ;;  %v11010_v20 = vor.u32 %v11958_v57, %v11007_v47 }
 0x369   : > { %7238 = vmatpush.bf16.msra.mxu0 %v10594_v8  ;;  %v10871_v8 = vld [vmem:[%s12081_s28 + $0x1a68] sm:$0xf0]  ;;  %v11934_v24 = vld [vmem:[%s12081_s28 + $0x1ab4] sm:$0xf] }
 0x36a   : > { %7251 = vmatpush.bf16.msra.mxu1 %v10658_v0  ;;  %v11940_v0 = vld [vmem:[%s12081_s28 + $0x1ae4] sm:$0xf]  ;;  %v10874_v21 = vor.u32 %v11924_v56, %v10871_v8  ;;  %v11950_v57 = vld [vmem:[%s12081_s28 + $0x1b34] sm:$0xf]  ;;  %v10903_v8 = vld [vmem:[%s12081_s28 + $0x1aa8] sm:$0xf0] }
 0x36b   : > { %7264 = vmatpush.bf16.msra.mxu2 %v10722_v9  ;;  %v11074_v9 = vor.u32 %v11974_v50, %v11071_v3  ;;  %v10938_v52 = vor.u32 %v11940_v0, %v10935_v1  ;;  %v11966_v47 = vld [vmem:[%s12081_s28 + $0x1bb4] sm:$0xf]  ;;  %v10914_v50 = vor.u32 %v11934_v24, %v10911_v62  ;;  %v11948_v0 = vld [vmem:[%s12081_s28 + $0x1b24] sm:$0xf] }
 0x36c   : > { %7277 = vmatpush.bf16.msra.mxu3 %v10786_v5  ;;  %v11972_v5 = vld [vmem:[%s12081_s28 + $0x1be4] sm:$0xf] }
 0x36d   : > { %7239 = vmatpush.bf16.msra.mxu0 %v10586_v16  ;;  %v11066_v12 = vor.u32 %v11972_v5, %v11063_v18  ;;  %v10927_v16 = vld [vmem:[%s12081_s28 + $0x1ad8] sm:$0xf0]  ;;  %v11031_v5 = vld [vmem:[%s12081_s28 + $0x1ba8] sm:$0xf0] }
 0x36e   : > { %7252 = vmatpush.bf16.msra.mxu1 %v10650_v54  ;;  %v10991_v54 = vld [vmem:[%s12081_s28 + $0x1b58] sm:$0xf0]  ;;  %v10930_v37 = vor.u32 %v11938_v4, %v10927_v16  ;;  %v11914_v4 = vld [vmem:[%s12081_s28 + $0x1a14] sm:$0xf]  ;;  %v11034_v16 = vor.u32 %v11964_v14, %v11031_v5 }
 0x36f   : > { %7265 = vmatpush.bf16.msra.mxu2 %v10714_v17  ;;  %v14297_v17 = vld [vmem:[#allocation19_spill] sm:$0xff]  ;;  %v10994_v38 = vor.u32 %v11954_v58, %v10991_v54  ;;  %v10895_v58 = vld [vmem:[%s12081_s28 + $0x1a98] sm:$0xf0]  ;;  %v11946_v54 = vld [vmem:[%s12081_s28 + $0x1b14] sm:$0xf] }
 0x370   : > { %7278 = vmatpush.bf16.msra.mxu3 %v10778_v27  ;;  %v14299_v27 = vld [vmem:[#allocation21_spill] sm:$0xff] }
 0x371   : > { %7240 = vmatpush.bf16.msra.mxu0 %v10578_v33  ;;  %v11936_v33 = vld [vmem:[%s12081_s28 + $0x1ac4] sm:$0xf] }
 0x372   : > { %7253 = vmatpush.bf16.msra.mxu1 %v10642_v32  ;;  %v11952_v32 = vld [vmem:[%s12081_s28 + $0x1b44] sm:$0xf]  ;;  %v10922_v31 = vor.u32 %v11936_v33, %v10919_v22  ;;  %v10887_v33 = vld [vmem:[%s12081_s28 + $0x1a88] sm:$0xf0] }
 0x373   : > { %7266 = vmatpush.bf16.msra.mxu2 %v10706_v41  ;;  %v10983_v41 = vld [vmem:[%s12081_s28 + $0x1b48] sm:$0xf0] }
 0x374   : > { %7279 = vmatpush.bf16.msra.mxu3 %v10770_v25  ;;  %v10986_v60 = vor.u32 %v11952_v32, %v10983_v41  ;;  %v10951_v22 = vld [vmem:[%s12081_s28 + $0x1b08] sm:$0xf0]  ;;  %v11960_v41 = vld [vmem:[%s12081_s28 + $0x1b84] sm:$0xf] }
 0x375   : > { %7241 = vmatpush.bf16.msra.mxu0 %v10570_v44  ;;  %v7035_v2 = vpop.f32.mrf.mxu0 }
 0x376   : > { %7254 = vmatpush.bf16.msra.mxu1 %v10634_v53  ;;  %v7036_v25 = vadd.f32 %v7035_v2, %v14120_v13  ;;  %v7048_v11 = vpop.f32.mrf.mxu1  ;;  %v10975_v13 = vld [vmem:[%s12081_s28 + $0x1b38] sm:$0xf0]  ;;  %v11015_v2 = vld [vmem:[%s12081_s28 + $0x1b88] sm:$0xf0] }
 0x377   : > { %7267 = vmatpush.bf16.msra.mxu2 %v10698_v45  ;;  %v11039_v53 = vld [vmem:[%s12081_s28 + $0x1bb8] sm:$0xf0]  ;;  %v10850_v45 = vor.u32 %v11918_v42, %v10847_v43  ;;  %v10978_v3 = vor.u32 %v11950_v57, %v10975_v13 }
 0x378   : > { %7280 = vmatpush.bf16.msra.mxu3 %v10762_v59  ;;  %7242 = vmatmul.bf16.vlgmr.msra.gmra.mxu0 %v14296_v7  ;;  %v7049_v44 = vadd.f32 %v7048_v11, %v7036_v25  ;;  %v11916_v59 = vld [vmem:[%s12081_s28 + $0x1a24] sm:$0xf]  ;;  %v10831_v7 = vld [vmem:[%s12081_s28 + $0x1a18] sm:$0xf0]  ;;  %v10890_v25 = vor.u32 %v11928_v40, %v10887_v33  ;;  %v11018_v11 = vor.u32 %v11960_v41, %v11015_v2 }
 0x379   : > { %7286 = vmatpush.bf16.msrb.mxu0 %v10882_v23  ;;  %7255 = vmatmul.bf16.vlgmr.msra.gmra.mxu1 %v14298_v63  ;;  %v10839_v23 = vld [vmem:[%s12081_s28 + $0x1a28] sm:$0xf0]  ;;  %v11962_v63 = vld [vmem:[%s12081_s28 + $0x1b94] sm:$0xf]  ;;  %v10834_v29 = vor.u32 %v11914_v4, %v10831_v7 }
 0x37a   : > { %7299 = vmatpush.bf16.msrb.mxu1 %v10946_v46  ;;  %7268 = vmatmul.bf16.vlgmr.msra.gmra.mxu2 %v14297_v17  ;;  %v11932_v46 = vld [vmem:[%s12081_s28 + $0x1aa4] sm:$0xf]  ;;  %v10959_v17 = vld [vmem:[%s12081_s28 + $0x1b18] sm:$0xf0]  ;;  %v11026_v28 = vor.u32 %v11962_v63, %v11023_v48 }
 0x37b   : > { %7312 = vmatpush.bf16.msrb.mxu2 %v11010_v20  ;;  %7281 = vmatmul.bf16.vlgmr.msra.gmra.mxu3 %v14299_v27  ;;  %v11042_v20 = vor.u32 %v11966_v47, %v11039_v53  ;;  %v10906_v6 = vor.u32 %v11932_v46, %v10903_v8 }
 0x37c   : > { %7325 = vmatpush.bf16.msrb.mxu3 %v11074_v9  ;;  %v10967_v9 = vld [vmem:[%s12081_s28 + $0x1b28] sm:$0xf0] }
 0x37d   : > { %7287 = vmatpush.bf16.msrb.mxu0 %v10874_v21  ;;  %v7061_v56 = vpop.f32.mrf.mxu2  ;;  %v7037_v18 = vpop.f32.mrf.mxu0  ;;  %v10842_v21 = vor.u32 %v11916_v59, %v10839_v23  ;;  %v10970_v30 = vor.u32 %v11948_v0, %v10967_v9 }
 0x37e   : > { %7300 = vmatpush.bf16.msrb.mxu1 %v10938_v52  ;;  %v7062_v1 = vadd.f32 %v7061_v56, %v7049_v44  ;;  %v7074_v49 = vpop.f32.mrf.mxu3  ;;  %v7050_v52 = vpop.f32.mrf.mxu1 }
 0x37f   : > { %7313 = vmatpush.bf16.msrb.mxu2 %v11002_v15 }
 0x380   : > { %7326 = vmatpush.bf16.msrb.mxu3 %v11066_v12  ;;  %v7075_v15 = vadd.f32 %v7074_v49, %v7062_v1  ;;  %v11930_v12 = vld [vmem:[%s12081_s28 + $0x1a94] sm:$0xf] }
 0x381   : > { %7288 = vmatpush.bf16.msrb.mxu0 %v10866_v61  ;;  %v10898_v27 = vor.u32 %v11930_v12, %v10895_v58  ;;  %v10962_v61 = vor.u32 %v11946_v54, %v10959_v17 }
 0x382   : > { %7301 = vmatpush.bf16.msrb.mxu1 %v10930_v37  ;;  %v11912_v37 = vld [vmem:[%s12081_s28 + $0x1a04] sm:$0xf] }
 0x383   : > { %7314 = vmatpush.bf16.msrb.mxu2 %v10994_v38  ;;  %v10823_v38 = vld [vmem:[%s12081_s28 + $0x1a08] sm:$0xf0] }
 0x384   : > { %7327 = vmatpush.bf16.msrb.mxu3 %v11058_v35  ;;  %v11944_v35 = vld [vmem:[%s12081_s28 + $0x1b04] sm:$0xf]  ;;  %v10826_v34 = vor.u32 %v11912_v37, %v10823_v38 }
 0x385   : > { %7289 = vmatpush.bf16.msrb.mxu0 %v10858_v39  ;;  %v7063_v32 = vpop.f32.mrf.mxu2  ;;  %v10954_v39 = vor.u32 %v11944_v35, %v10951_v22 }
 0x386   : > { %7302 = vmatpush.bf16.msrb.mxu1 %v10922_v31  ;;  %v7076_v51 = vpop.f32.mrf.mxu3  ;;  %v14300_v31 = vld [vmem:[#allocation22_spill] sm:$0xff] }
 0x387   : > { %7315 = vmatpush.bf16.msrb.mxu2 %v10986_v60 }
 0x388   : > { %7328 = vmatpush.bf16.msrb.mxu3 %v11050_v19 }
 0x389   : > { %7290 = vmatpush.bf16.msrb.mxu0 %v10850_v45 }
 0x38a   : > { %7303 = vmatpush.bf16.msrb.mxu1 %v10914_v50 }
 0x38b   : > { %7316 = vmatpush.bf16.msrb.mxu2 %v10978_v3 }
 0x38c   : > { %7329 = vmatpush.bf16.msrb.mxu3 %v11042_v20 }
 0x38d   : > { %7291 = vmatpush.bf16.msrb.mxu0 %v10842_v21 }
 0x38e   : > { %7304 = vmatpush.bf16.msrb.mxu1 %v10906_v6 }
 0x38f   : > { %7317 = vmatpush.bf16.msrb.mxu2 %v10970_v30 }
 0x390   : > { %7330 = vmatpush.bf16.msrb.mxu3 %v11034_v16 }
 0x391   : > { %7292 = vmatpush.bf16.msrb.mxu0 %v10834_v29 }
 0x392   : > { %7305 = vmatpush.bf16.msrb.mxu1 %v10898_v27 }
 0x393   : > { %7318 = vmatpush.bf16.msrb.mxu2 %v10962_v61 }
 0x394   : > { %7331 = vmatpush.bf16.msrb.mxu3 %v11026_v28 }
 0x395   : > { %7293 = vmatpush.bf16.msrb.mxu0 %v10826_v34  ;;  %v7087_v60 = vpop.f32.mrf.mxu0  ;;  %v294_v34 = vld [vmem:[#allocation2] sm:$0xf] }
 0x396   : > { %7306 = vmatpush.bf16.msrb.mxu1 %v10890_v25  ;;  %v7088_v42 = vadd.f32 %v7087_v60, %v7075_v15  ;;  %v7100_v43 = vpop.f32.mrf.mxu1 }
 0x397   : > { %7319 = vmatpush.bf16.msrb.mxu2 %v10954_v39 }
 0x398   : > { %7332 = vmatpush.bf16.msrb.mxu3 %v11018_v11  ;;  %7294 = vmatmul.bf16.vlgmr.msrb.gmra.mxu0 %v13219_v55  ;;  %v7101_v24 = vadd.f32 %v7100_v43, %v7088_v42 }
 0x399   : > { %7307 = vmatmul.bf16.vlgmr.msrb.gmra.mxu1 %v13226_v36 }
 0x39a   : > { %7320 = vmatmul.bf16.vlgmr.msrb.gmra.mxu2 %v13224_v26 }
 0x39b   : > { %7333 = vmatmul.bf16.vlgmr.msrb.gmra.mxu3 %v14300_v31 }
 0x39d   : > { %v7113_v19 = vpop.f32.mrf.mxu2  ;;  %v7089_v57 = vpop.f32.mrf.mxu0 }
 0x39e   : > { %v7114_v44 = vadd.f32 %v7113_v19, %v7101_v24  ;;  %v7126_v62 = vpop.f32.mrf.mxu3  ;;  %v7102_v13 = vpop.f32.mrf.mxu1 }
 0x3a0   : > { %v7127_v47 = vadd.f32 %v7126_v62, %v7114_v44 }
 0x3a5   : > { %v7115_v53 = vpop.f32.mrf.mxu2 }
 0x3a6   : > { %v7128_v45 = vpop.f32.mrf.mxu3 }
 0x3b5   : > { %v7139_v50 = vpop.f32.mrf.mxu0 }
 0x3b6   : > { %v7140_v55 = vadd.f32 %v7139_v50, %v7127_v47  ;;  %v7152_v3 = vpop.f32.mrf.mxu1 }
 0x3b8   : > { %v7153_v36 = vadd.f32 %v7152_v3, %v7140_v55 }
 0x3bd   : > { %v7165_v59 = vpop.f32.mrf.mxu2  ;;  %v7141_v46 = vpop.f32.mrf.mxu0 }
 0x3be   : > { %v7166_v26 = vadd.f32 %v7165_v59, %v7153_v36  ;;  %v7178_v23 = vpop.f32.mrf.mxu3  ;;  %v7154_v20 = vpop.f32.mrf.mxu1 }
 0x3c0   : > { %v7179_v56 = vadd.f32 %v7178_v23, %v7166_v26 }
 0x3c5   : > { %v7167_v8 = vpop.f32.mrf.mxu2 }
 0x3c6   : > { %v7180_v0 = vpop.f32.mrf.mxu3 }
 0x3d5   : > { %v7191_v9 = vpop.f32.mrf.mxu0 }
 0x3d6   : > { %v7204_v1 = vpop.f32.mrf.mxu1  ;;  %v7192_v30 = vadd.f32 %v7191_v9, %v7179_v56 }
 0x3d8   : > { %v7205_v58 = vadd.f32 %v7204_v1, %v7192_v30 }
 0x3dd   : > { %v7217_v49 = vpop.f32.mrf.mxu2  ;;  %v7193_v5 = vpop.f32.mrf.mxu0 }
 0x3de   : > { %v7230_v14 = vpop.f32.mrf.mxu3  ;;  %v7206_v18 = vpop.f32.mrf.mxu1  ;;  %v7218_v54 = vadd.f32 %v7217_v49, %v7205_v58 }
 0x3e0   : > { %v7231_v48 = vadd.f32 %v7230_v14, %v7218_v54 }
 0x3e5   : > { %v7219_v21 = vpop.f32.mrf.mxu2 }
 0x3e6   : > { %v7232_v52 = vpop.f32.mrf.mxu3 }
 0x3f5   : > { %v7243_v15 = vpop.f32.mrf.mxu0 }
 0x3f6   : > { %v7256_v6 = vpop.f32.mrf.mxu1  ;;  %v7244_v29 = vadd.f32 %v7243_v15, %v7231_v48 }
 0x3f8   : > { %v7257_v27 = vadd.f32 %v7256_v6, %v7244_v29 }
 0x3fd   : > { %v7269_v4 = vpop.f32.mrf.mxu2  ;;  %v7245_v12 = vpop.f32.mrf.mxu0 }
 0x3fe   : > { %v7282_v7 = vpop.f32.mrf.mxu3  ;;  %v7258_v16 = vpop.f32.mrf.mxu1  ;;  %v7270_v61 = vadd.f32 %v7269_v4, %v7257_v27 }
 0x400   : > { %v7283_v37 = vadd.f32 %v7282_v7, %v7270_v61 }
 0x405   : > { %v7271_v17 = vpop.f32.mrf.mxu2 }
 0x406   : > { %v7284_v63 = vpop.f32.mrf.mxu3 }
 0x415   : > { %v7295_v38 = vpop.f32.mrf.mxu0 }
 0x416   : > { %v7308_v40 = vpop.f32.mrf.mxu1  ;;  %v7296_v28 = vadd.f32 %v7295_v38, %v7283_v37 }
 0x418   : > { %v7309_v33 = vadd.f32 %v7308_v40, %v7296_v28 }
 0x41d   : > { %v7321_v35 = vpop.f32.mrf.mxu2  ;;  %v7297_v41 = vpop.f32.mrf.mxu0 }
 0x41e   : > { %v7322_v22 = vadd.f32 %v7321_v35, %v7309_v33  ;;  %v7334_v32 = vpop.f32.mrf.mxu3  ;;  %v7310_v2 = vpop.f32.mrf.mxu1 }
 0x420   : > { %v7335_v51 = vadd.f32 %v7334_v32, %v7322_v22 }
 0x422   : > { %v7340_v25 = vrot.slane %v7335_v51, 6 }
 0x423   : > { %7349 = sbr.rel (%p11075_p7) target bundleno = 1205 (0x4b5), region = 44 }
 0x424   : > { %v7342_v39 = vsel %vm7341_vm0, %v13553_v10, %v7340_v25 }
 0x425   : > { %v7344_v11 = vadd.f32 %v7342_v39, %v294_v34  ;;  %v7323_v31 = vpop.f32.mrf.mxu2 }
 0x426   : > { %v7336_v60 = vpop.f32.mrf.mxu3 }
 0x427   : > { %7345 = vst [vmem:[#allocation2] sm:$0xf] %v7344_v11 }
 0x428   : > { %v7351_v42 = vld [vmem:[%s14238_s2] sm:$0x3] }
 0x429   : > { %v7360_v43 = vld [vmem:[%s14239_s3] sm:$0x3]  ;;  %v7353_v24 = vperm.slane %v7351_v42, 0  ;;  %v7354_v19 = vperm.slane %v7351_v42, 1 }
 0x42a   : > { %v7363_v44 = vperm.slane %v7360_v43, 1  ;;  %v7362_v57 = vperm.slane %v7360_v43, 0 }
 0x42b   : > { %v7355_v10 = vrot.slane %v7354_v19, 6 }
 0x42c   : > { %v7364_v13 = vrot.slane %v7363_v44, 6 }
 0x42d   : > { %v7356_v47 = vsel %vm7341_vm0, %v7353_v24, %v7355_v10 }
 0x42e   : > { %v7350_v62 = vld [vmem:[#allocation2] sm:$0xf]  ;;  %v7365_v45 = vsel %vm7341_vm0, %v7362_v57, %v7364_v13 }
 0x42f   : > { %v7358_v53 = vadd.f32 %v7356_v47, %v7350_v62 }
 0x431   : > { %v7359_v50 = vmax.f32 %v7358_v53, 0.0 }
 0x433   : > { %v7367_v55 = vmul.f32 %v7365_v45, %v7359_v50 }
 0x435   : > { %7369 = vst [vmem:[#allocation1] ss:$4 sm:$0xff] %v7367_v55 }
 0x43c   : > { %v7370_v3 = vld.sshfl [vmem:[#allocation1] sm:$0xff pattern:$0x73625140]  ;;  %v7371_v36 = vld.sshfl [vmem:[#allocation1 + $0x8] sm:$0xff pattern:$0x73625140] }
 0x43d   : > { %v7374_v59 = vsel %vm7341_vm0, %v7370_v3, 0.0  ;;  %v7375_v26 = vsel %vm7341_vm0, %v7371_v36, 0.0 }
 0x43e   : > { %v7376_v23 = vadd.f32 %v7375_v26, %v7374_v59 }
 0x440   : > { %7377 = vadd.xlane.f32.xlu0 %v7376_v23 }
 0x4b3   : > { %v7378_v46 = vpop.xlane.xlu0 %7377 }
 0x4b4   : > { %7379 = vst [vmem:[%s14240_s4] sm:$0x3] %v7378_v46 }
 0x4b5 PF: > { %s14_s17 = sadd.s32 1, %s12023_s17   ;;  %s14301_s15 = smov %s12019_s16 }
 0x4b6   : > { %p11_p8 = scmp.ge.s32.totalorder %s14_s17, 6   ;;  %s14302_s16 = smov %s14304_s18 }
 0x4b8   :  { %13 = sbr.rel (!%p11_p8) target bundleno = 2 (0x2), region = 84 }

</bundles_post_ra>
